<compile_context>
chip_gen: v7x
topology: tpu7x:2x2x1
jax: 0.10.0
libtpu: 0.0.40
codegen_flags: <defaults>
</compile_context>

<pallas_src>
import math

import jax
import jax.numpy as jnp
from jax.experimental import pallas as pl
from jax.experimental.pallas import tpu as pltpu  # noqa: F401

# ---------------- config ----------------
INPUT_DIM = 50     # src vocab size
OUTPUT_DIM = 60    # trg vocab size
HID_DIM = 32
N_LAYERS = 2
N_HEADS = 4
HEAD_DIM = HID_DIM // N_HEADS
PF_DIM = 64
MAX_LEN = 16
SRC_PAD_IDX = 0
TRG_PAD_IDX = 0
LN_EPS = 1e-5
MASK_NEG = -1e10
LOGIT_PAD = 128    # lane-dense logits: fc_out zero-padded 60 -> 128, sliced on host


# ---------------- in-kernel helpers (operate on VMEM values / refs) ----------------
def _layer_norm(x, g, b):
    """LayerNorm on x:[N,H], g/b:[1,H] (biased variance, like torch)."""
    mu = jnp.mean(x, axis=-1, keepdims=True)
    var = jnp.mean((x - mu) ** 2, axis=-1, keepdims=True)
    return (x - mu) * jax.lax.rsqrt(var + LN_EPS) * g + b


def _mha(x_q, x_kv, mask_add, w4, b4, head_sel, attn_store=None):
    """Multi-head attention over the whole batch, fully in VMEM.

    x_q: [B*Lq, H], x_kv: [B*Lk, H], mask_add: [B, Lq, Lk] additive (0 / -1e10).
    w4: [4, H, H] stacked (q, k, v, o) weights, b4: [4, 1, H] stacked biases.
    head_sel: [N_HEADS, 1, H] one-hot column selector per head.
    attn_store: optional output ref [B*N_HEADS*Lq, Lk] (last-layer cross-attn).
    """
    B, Lq, Lk = mask_add.shape
    inv_scale = 1.0 / math.sqrt(HEAD_DIM)

    # Fused projections: one [B*L, H] x [H, H] matmul per Q/K/V (scale folded into q).
    q = (jnp.dot(x_q, w4[0], preferred_element_type=jnp.float32) + b4[0]) * inv_scale
    k = jnp.dot(x_kv, w4[1], preferred_element_type=jnp.float32) + b4[1]
    v = jnp.dot(x_kv, w4[2], preferred_element_type=jnp.float32) + b4[2]

    ctx_rows = []
    for b in range(B):
        qb = q[b * Lq:(b + 1) * Lq, :]          # [Lq, H]  (sublane-aligned slice)
        kb = k[b * Lk:(b + 1) * Lk, :]          # [Lk, H]
        vb = v[b * Lk:(b + 1) * Lk, :]          # [Lk, H]
        madd = mask_add[b]                      # [Lq, Lk]
        ctx_b = jnp.zeros((Lq, HID_DIM), dtype=jnp.float32)
        for h in range(N_HEADS):
            sel = head_sel[h]                   # [1, H] one-hot block for head h
            # per-head scores without slicing: (q ⊙ sel) · k^T contracts only
            # head-h columns; contraction is over the full H (MXU-friendly).
            e = jax.lax.dot_general(qb * sel, kb, (((1,), (1,)), ((), ())),
                                    preferred_element_type=jnp.float32)   # [Lq, Lk]
            e = e + madd                         # additive mask (0 / -1e10)
            e = e - jnp.max(e, axis=-1, keepdims=True)
            p = jnp.exp(e)
            p = p * pl.reciprocal(jnp.sum(p, axis=-1, keepdims=True), approx=True)
            if attn_store is not None:
                attn_store[pl.ds((b * N_HEADS + h) * Lq, Lq), :] = p
            # context for all columns, then keep only head-h columns
            ctx_b = ctx_b + jnp.dot(p, vb, preferred_element_type=jnp.float32) * sel
        ctx_rows.append(ctx_b)
    ctx = jnp.concatenate(ctx_rows, axis=0)      # [B*Lq, H]
    # single fused output projection across batch and heads
    return jnp.dot(ctx, w4[3], preferred_element_type=jnp.float32) + b4[3]


# ---------------- ONE fused kernel: encoder + decoder + fc_out ----------------
def _transformer_kernel(
    # activations + masks + head selector
    src_ref, trg_ref, emask_ref, tmask_ref, xmask_ref, hsel_ref,
    # encoder weights (stacked over layers, fully resident in VMEM)
    e_aw_ref, e_ab_ref, e_lng_ref, e_lnb_ref,
    e_w1_ref, e_b1_ref, e_w2_ref, e_b2_ref,
    # decoder weights
    d_saw_ref, d_sab_ref, d_caw_ref, d_cab_ref, d_lng_ref, d_lnb_ref,
    d_w1_ref, d_b1_ref, d_w2_ref, d_b2_ref,
    # final vocab projection (lane-padded to 128)
    fcw_ref, fcb_ref,
    # outputs
    logits_ref, attn_ref,
):
    hsel = hsel_ref[...]
    emask = emask_ref[...]
    tmask = tmask_ref[...]
    xmask = xmask_ref[...]

    # ------------------------------ encoder ------------------------------
    x = src_ref[...]                                          # [B*Ls, H]
    for l in range(N_LAYERS):
        w4, b4 = e_aw_ref[l], e_ab_ref[l]
        lng, lnb = e_lng_ref[l], e_lnb_ref[l]
        sa = _mha(x, x, emask, w4, b4, hsel)
        x = _layer_norm(x + sa, lng[0], lnb[0])
        hmid = jnp.maximum(
            jnp.dot(x, e_w1_ref[l], preferred_element_type=jnp.float32)
            + e_b1_ref[l], 0.0)
        ff = jnp.dot(hmid, e_w2_ref[l], preferred_element_type=jnp.float32) + e_b2_ref[l]
        x = _layer_norm(x + ff, lng[1], lnb[1])
    enc = x                                                   # stays in VMEM

    # ------------------------------ decoder ------------------------------
    y = trg_ref[...]                                          # [B*Lt, H]
    for l in range(N_LAYERS):
        sw4, sb4 = d_saw_ref[l], d_sab_ref[l]
        cw4, cb4 = d_caw_ref[l], d_cab_ref[l]
        lng, lnb = d_lng_ref[l], d_lnb_ref[l]

        # masked self-attention + residual + LN
        sa = _mha(y, y, tmask, sw4, sb4, hsel)
        y = _layer_norm(y + sa, lng[0], lnb[0])

        # cross-attention; only the LAST layer's weights are returned
        store = attn_ref if l == N_LAYERS - 1 else None
        ca = _mha(y, enc, xmask, cw4, cb4, hsel, attn_store=store)
        y = _layer_norm(y + ca, lng[1], lnb[1])

        # position-wise FFN + residual + LN
        hmid = jnp.maximum(
            jnp.dot(y, d_w1_ref[l], preferred_element_type=jnp.float32)
            + d_b1_ref[l], 0.0)
        ff = jnp.dot(hmid, d_w2_ref[l], preferred_element_type=jnp.float32) + d_b2_ref[l]
        y = _layer_norm(y + ff, lng[2], lnb[2])

    # lane-dense (128-wide) logits store; host slices back to OUTPUT_DIM
    logits_ref[...] = (
        jnp.dot(y, fcw_ref[...], preferred_element_type=jnp.float32) + fcb_ref[...])


# ---------------- parameter packing for the fused kernel ----------------
def prepare_fused_params(params):
    enc, dec = params["encoder"], params["decoder"]

    def stack_attn(layers, name):
        w = jnp.stack([
            jnp.stack([l[name]["wq"], l[name]["wk"], l[name]["wv"], l[name]["wo"]],
                      axis=0) for l in layers], axis=0)                 # [NL,4,H,H]
        b = jnp.stack([
            jnp.stack([l[name]["bq"].reshape(1, HID_DIM),
                       l[name]["bk"].reshape(1, HID_DIM),
                       l[name]["bv"].reshape(1, HID_DIM),
                       l[name]["bo"].reshape(1, HID_DIM)],
                      axis=0) for l in layers], axis=0)                 # [NL,4,1,H]
        return w, b

    def stack_ln(layers, keys):
        g = jnp.stack([jnp.stack([l[k + "_g"].reshape(1, HID_DIM) for k in keys], 0)
                       for l in layers], 0)
        b = jnp.stack([jnp.stack([l[k + "_b"].reshape(1, HID_DIM) for k in keys], 0)
                       for l in layers], 0)
        return g, b                                                     # [NL,len,1,H]

    def stack_ffn(layers):
        return (jnp.stack([l["ff"]["w1"] for l in layers], 0),
                jnp.stack([l["ff"]["b1"].reshape(1, PF_DIM) for l in layers], 0),
                jnp.stack([l["ff"]["w2"] for l in layers], 0),
                jnp.stack([l["ff"]["b2"].reshape(1, HID_DIM) for l in layers], 0))

    fp = {}
    fp["e_aw"], fp["e_ab"] = stack_attn(enc["layers"], "self_attn")
    fp["e_lng"], fp["e_lnb"] = stack_ln(enc["layers"], ("ln1", "ln2"))
    fp["e_w1"], fp["e_b1"], fp["e_w2"], fp["e_b2"] = stack_ffn(enc["layers"])

    fp["d_saw"], fp["d_sab"] = stack_attn(dec["layers"], "self_attn")
    fp["d_caw"], fp["d_cab"] = stack_attn(dec["layers"], "enc_attn")
    fp["d_lng"], fp["d_lnb"] = stack_ln(dec["layers"], ("ln1", "ln2", "ln3"))
    fp["d_w1"], fp["d_b1"], fp["d_w2"], fp["d_b2"] = stack_ffn(dec["layers"])

    # lane-pad the vocab projection so the logits store is a full 128-lane vst
    fp["fc_w"] = jnp.zeros((HID_DIM, LOGIT_PAD), jnp.float32).at[:, :OUTPUT_DIM].set(
        dec["fc_out_w"])
    fp["fc_b"] = jnp.zeros((1, LOGIT_PAD), jnp.float32).at[:, :OUTPUT_DIM].set(
        dec["fc_out_b"])

    # one-hot per-head column selector [NH, 1, H]
    fp["head_sel"] = jnp.repeat(
        jnp.eye(N_HEADS, dtype=jnp.float32), HEAD_DIM, axis=1
    ).reshape(N_HEADS, 1, HID_DIM)
    return fp


# ---------------- masks + top-level forward (glue in JAX) ----------------
def build_bool_masks(src, trg):
    B, Ls = src.shape
    Lt = trg.shape[1]
    src_keep = src != SRC_PAD_IDX
    enc_keep = jnp.broadcast_to(src_keep[:, None, :], (B, Ls, Ls))
    cross_keep = jnp.broadcast_to(src_keep[:, None, :], (B, Lt, Ls))
    causal = jnp.tril(jnp.ones((Lt, Lt), dtype=bool))
    trg_keep = (trg != TRG_PAD_IDX)[:, None, :] & causal[None, :, :]
    return enc_keep, trg_keep, cross_keep


def _to_additive(keep):
    # NOTE: for rows that are fully masked this differs from masked_fill
    # semantics only in the degenerate all-pad-query case (never hit here).
    return jnp.where(keep, 0.0, MASK_NEG).astype(jnp.float32)


def transformer_forward(params, src, trg):
    B, Ls = src.shape
    Lt = trg.shape[1]
    enc_keep, trg_keep, cross_keep = build_bool_masks(src, trg)
    emask = _to_additive(enc_keep)
    tmask = _to_additive(trg_keep)
    xmask = _to_additive(cross_keep)

    enc_p, dec_p = params["encoder"], params["decoder"]
    scale = math.sqrt(HID_DIM)
    src_x = (enc_p["tok_emb"][src] * scale
             + enc_p["pos_emb"][:Ls][None, :, :]).reshape(B * Ls, HID_DIM)
    trg_x = (dec_p["tok_emb"][trg] * scale
             + dec_p["pos_emb"][:Lt][None, :, :]).reshape(B * Lt, HID_DIM)

    fp = prepare_fused_params(params)

    out_shape = (
        jax.ShapeDtypeStruct((B * Lt, LOGIT_PAD), jnp.float32),
        jax.ShapeDtypeStruct((B * N_HEADS * Lt, Ls), jnp.float32),
    )
    logits_pad, attn_flat = pl.pallas_call(
        _transformer_kernel,
        out_shape=out_shape,
    )(
        src_x, trg_x, emask, tmask, xmask, fp["head_sel"],
        fp["e_aw"], fp["e_ab"], fp["e_lng"], fp["e_lnb"],
        fp["e_w1"], fp["e_b1"], fp["e_w2"], fp["e_b2"],
        fp["d_saw"], fp["d_sab"], fp["d_caw"], fp["d_cab"], fp["d_lng"], fp["d_lnb"],
        fp["d_w1"], fp["d_b1"], fp["d_w2"], fp["d_b2"],
        fp["fc_w"], fp["fc_b"],
    )

    output = logits_pad[:, :OUTPUT_DIM].reshape(B, Lt, OUTPUT_DIM)
    attention = attn_flat.reshape(B, N_HEADS, Lt, Ls)
    return output, attention


# ---------------- pure-JAX reference (for numerical sanity check) ----------------
def _ref_ln(x, g, b):
    mu = jnp.mean(x, axis=-1, keepdims=True)
    var = jnp.mean((x - mu) ** 2, axis=-1, keepdims=True)
    return (x - mu) * jax.lax.rsqrt(var + LN_EPS) * g + b


def _ref_mha(p, q_in, kv_in, mask_keep):
    B, Lq, H = q_in.shape
    Lk = kv_in.shape[1]

    def split(t, L):
        return t.reshape(B, L, N_HEADS, HEAD_DIM).transpose(0, 2, 1, 3)

    Q = split(q_in @ p["wq"] + p["bq"], Lq)
    K = split(kv_in @ p["wk"] + p["bk"], Lk)
    V = split(kv_in @ p["wv"] + p["bv"], Lk)
    e = jnp.einsum("bhqd,bhkd->bhqk", Q, K) * (1.0 / math.sqrt(HEAD_DIM))
    e = jnp.where(mask_keep[:, None, :, :], e, MASK_NEG)
    a = jax.nn.softmax(e, axis=-1)
    ctx = jnp.einsum("bhqk,bhkd->bhqd", a, V).transpose(0, 2, 1, 3).reshape(B, Lq, H)
    return ctx @ p["wo"] + p["bo"], a


def transformer_forward_ref(params, src, trg):
    B, Ls = src.shape
    Lt = trg.shape[1]
    enc_keep, trg_keep, cross_keep = build_bool_masks(src, trg)
    enc_p, dec_p = params["encoder"], params["decoder"]
    scale = math.sqrt(HID_DIM)

    x = enc_p["tok_emb"][src] * scale + enc_p["pos_emb"][:Ls][None, :, :]
    for lyr in enc_p["layers"]:
        a, _ = _ref_mha(lyr["self_attn"], x, x, enc_keep)
        x = _ref_ln(x + a, lyr["ln1_g"], lyr["ln1_b"])
        f = jnp.maximum(x @ lyr["ff"]["w1"] + lyr["ff"]["b1"], 0.0) @ lyr["ff"]["w2"] \
            + lyr["ff"]["b2"]
        x = _ref_ln(x + f, lyr["ln2_g"], lyr["ln2_b"])
    enc_src = x

    y = dec_p["tok_emb"][trg] * scale + dec_p["pos_emb"][:Lt][None, :, :]
    attention = None
    for lyr in dec_p["layers"]:
        a, _ = _ref_mha(lyr["self_attn"], y, y, trg_keep)
        y = _ref_ln(y + a, lyr["ln1_g"], lyr["ln1_b"])
        a, attention = _ref_mha(lyr["enc_attn"], y, enc_src, cross_keep)
        y = _ref_ln(y + a, lyr["ln2_g"], lyr["ln2_b"])
        f = jnp.maximum(y @ lyr["ff"]["w1"] + lyr["ff"]["b1"], 0.0) @ lyr["ff"]["w2"] \
            + lyr["ff"]["b2"]
        y = _ref_ln(y + f, lyr["ln3_g"], lyr["ln3_b"])
    out = y @ dec_p["fc_out_w"] + dec_p["fc_out_b"]
    return out, attention


# ---------------- deterministic parameter init ----------------
def _init_linear(key, din, dout):
    kw, kb = jax.random.split(key)
    bound = 1.0 / math.sqrt(din)
    w = jax.random.uniform(kw, (din, dout), jnp.float32, -bound, bound)
    b = jax.random.uniform(kb, (dout,), jnp.float32, -bound, bound)
    return w, b


def _init_mha(key):
    ks = jax.random.split(key, 4)
    p = {}
    for name, k in zip(("q", "k", "v", "o"), ks):
        w, b = _init_linear(k, HID_DIM, HID_DIM)
        p["w" + name] = w
        p["b" + name] = b
    return p


def _init_ff(key):
    k1, k2 = jax.random.split(key)
    w1, b1 = _init_linear(k1, HID_DIM, PF_DIM)
    w2, b2 = _init_linear(k2, PF_DIM, HID_DIM)
    return {"w1": w1, "b1": b1, "w2": w2, "b2": b2}


def _init_enc_layer(key):
    k1, k2 = jax.random.split(key)
    return {
        "self_attn": _init_mha(k1),
        "ff": _init_ff(k2),
        "ln1_g": jnp.ones((HID_DIM,), jnp.float32), "ln1_b": jnp.zeros((HID_DIM,), jnp.float32),
        "ln2_g": jnp.ones((HID_DIM,), jnp.float32), "ln2_b": jnp.zeros((HID_DIM,), jnp.float32),
    }


def _init_dec_layer(key):
    k1, k2, k3 = jax.random.split(key, 3)
    return {
        "self_attn": _init_mha(k1),
        "enc_attn": _init_mha(k2),
        "ff": _init_ff(k3),
        "ln1_g": jnp.ones((HID_DIM,), jnp.float32), "ln1_b": jnp.zeros((HID_DIM,), jnp.float32),
        "ln2_g": jnp.ones((HID_DIM,), jnp.float32), "ln2_b": jnp.zeros((HID_DIM,), jnp.float32),
        "ln3_g": jnp.ones((HID_DIM,), jnp.float32), "ln3_b": jnp.zeros((HID_DIM,), jnp.float32),
    }


def init_params(key):
    ke, kd = jax.random.split(key)
    ke_tok, ke_pos, *ke_layers = jax.random.split(ke, 2 + N_LAYERS)
    kd_tok, kd_pos, kd_out, *kd_layers = jax.random.split(kd, 3 + N_LAYERS)
    enc = {
        "tok_emb": jax.random.normal(ke_tok, (INPUT_DIM, HID_DIM), jnp.float32),
        "pos_emb": jax.random.normal(ke_pos, (MAX_LEN, HID_DIM), jnp.float32),
        "layers": [_init_enc_layer(k) for k in ke_layers],
    }
    fc_w, fc_b = _init_linear(kd_out, HID_DIM, OUTPUT_DIM)
    dec = {
        "tok_emb": jax.random.normal(kd_tok, (OUTPUT_DIM, HID_DIM), jnp.float32),
        "pos_emb": jax.random.normal(kd_pos, (MAX_LEN, HID_DIM), jnp.float32),
        "layers": [_init_dec_layer(k) for k in kd_layers],
        "fc_out_w": fc_w,
        "fc_out_b": fc_b,
    }
    return {"encoder": enc, "decoder": dec}


if __name__ == "__main__":
    key = jax.random.PRNGKey(0)
    kp, ks, kt = jax.random.split(key, 3)
    params = init_params(kp)

    B, SRC_LEN, TRG_LEN = 2, 8, 8
    src = jax.random.randint(ks, (B, SRC_LEN), 1, INPUT_DIM, dtype=jnp.int32)
    trg = jax.random.randint(kt, (B, TRG_LEN), 1, OUTPUT_DIM, dtype=jnp.int32)
    # add some padding so the src/trg masks are exercised
    src = src.at[:, -2:].set(SRC_PAD_IDX)
    trg = trg.at[:, -1:].set(TRG_PAD_IDX)

    output, attention = jax.jit(transformer_forward)(params, src, trg)
    jax.block_until_ready((output, attention))

    assert output.shape == (B, TRG_LEN, OUTPUT_DIM)
    assert attention.shape == (B, N_HEADS, TRG_LEN, SRC_LEN)
    assert bool(jnp.all(jnp.isfinite(output))) and bool(jnp.all(jnp.isfinite(attention)))

    # numerical sanity check vs. a plain-JAX reference of the same module
    # (tolerances sized for the approx=True EUP reciprocal in the softmax)
    out_ref, attn_ref = jax.jit(transformer_forward_ref)(params, src, trg)
    jax.block_until_ready((out_ref, attn_ref))
    assert float(jnp.max(jnp.abs(output - out_ref))) < 5e-2
    assert float(jnp.max(jnp.abs(attention - attn_ref))) < 2e-2

    print("KERNEL_OK")
</pallas_src>

<mosaic_0001>
module attributes {stable_mosaic.version = 11 : i64} {
  func.func @_transformer_kernel(%arg0: memref<16x32xf32, #tpu.memory_space<vmem>>, %arg1: memref<16x32xf32, #tpu.memory_space<vmem>>, %arg2: memref<2x8x8xf32, #tpu.memory_space<vmem>>, %arg3: memref<2x8x8xf32, #tpu.memory_space<vmem>>, %arg4: memref<2x8x8xf32, #tpu.memory_space<vmem>>, %arg5: memref<4x1x32xf32, #tpu.memory_space<vmem>>, %arg6: memref<2x4x32x32xf32, #tpu.memory_space<vmem>>, %arg7: memref<2x4x1x32xf32, #tpu.memory_space<vmem>>, %arg8: memref<2x2x1x32xf32, #tpu.memory_space<vmem>>, %arg9: memref<2x2x1x32xf32, #tpu.memory_space<vmem>>, %arg10: memref<2x32x64xf32, #tpu.memory_space<vmem>>, %arg11: memref<2x1x64xf32, #tpu.memory_space<vmem>>, %arg12: memref<2x64x32xf32, #tpu.memory_space<vmem>>, %arg13: memref<2x1x32xf32, #tpu.memory_space<vmem>>, %arg14: memref<2x4x32x32xf32, #tpu.memory_space<vmem>>, %arg15: memref<2x4x1x32xf32, #tpu.memory_space<vmem>>, %arg16: memref<2x4x32x32xf32, #tpu.memory_space<vmem>>, %arg17: memref<2x4x1x32xf32, #tpu.memory_space<vmem>>, %arg18: memref<2x3x1x32xf32, #tpu.memory_space<vmem>>, %arg19: memref<2x3x1x32xf32, #tpu.memory_space<vmem>>, %arg20: memref<2x32x64xf32, #tpu.memory_space<vmem>>, %arg21: memref<2x1x64xf32, #tpu.memory_space<vmem>>, %arg22: memref<2x64x32xf32, #tpu.memory_space<vmem>>, %arg23: memref<2x1x32xf32, #tpu.memory_space<vmem>>, %arg24: memref<32x128xf32, #tpu.memory_space<vmem>>, %arg25: memref<1x128xf32, #tpu.memory_space<vmem>>, %arg26: memref<16x128xf32, #tpu.memory_space<vmem>>, %arg27: memref<64x8xf32, #tpu.memory_space<vmem>>) attributes {dimension_semantics = [], scalar_prefetch = 0 : i64, scratch_operands = 0 : i64, tpu.core_type = #tpu.core_type<tc>} {
    %c0 = arith.constant 0 : index
    %c0_0 = arith.constant 0 : index
    %c0_1 = arith.constant 0 : index
    %0 = vector.load %arg5[%c0, %c0_0, %c0_1] : memref<4x1x32xf32, #tpu.memory_space<vmem>>, vector<4x1x32xf32>
    %c0_2 = arith.constant 0 : index
    %c0_3 = arith.constant 0 : index
    %c0_4 = arith.constant 0 : index
    %1 = vector.load %arg2[%c0_2, %c0_3, %c0_4] : memref<2x8x8xf32, #tpu.memory_space<vmem>>, vector<2x8x8xf32>
    %c0_5 = arith.constant 0 : index
    %c0_6 = arith.constant 0 : index
    %c0_7 = arith.constant 0 : index
    %2 = vector.load %arg3[%c0_5, %c0_6, %c0_7] : memref<2x8x8xf32, #tpu.memory_space<vmem>>, vector<2x8x8xf32>
    %c0_8 = arith.constant 0 : index
    %c0_9 = arith.constant 0 : index
    %c0_10 = arith.constant 0 : index
    %3 = vector.load %arg4[%c0_8, %c0_9, %c0_10] : memref<2x8x8xf32, #tpu.memory_space<vmem>>, vector<2x8x8xf32>
    %c0_11 = arith.constant 0 : index
    %c0_12 = arith.constant 0 : index
    %4 = vector.load %arg0[%c0_11, %c0_12] : memref<16x32xf32, #tpu.memory_space<vmem>>, vector<16x32xf32>
    %c0_13 = arith.constant 0 : index
    %c0_14 = arith.constant 0 : index
    %c0_15 = arith.constant 0 : index
    %c0_16 = arith.constant 0 : index
    %5 = vector.load %arg6[%c0_13, %c0_14, %c0_15, %c0_16] : memref<2x4x32x32xf32, #tpu.memory_space<vmem>>, vector<1x4x32x32xf32>
    %6 = vector.shape_cast %5 : vector<1x4x32x32xf32> to vector<4x32x32xf32>
    %c0_17 = arith.constant 0 : index
    %c0_18 = arith.constant 0 : index
    %c0_19 = arith.constant 0 : index
    %c0_20 = arith.constant 0 : index
    %7 = vector.load %arg7[%c0_17, %c0_18, %c0_19, %c0_20] : memref<2x4x1x32xf32, #tpu.memory_space<vmem>>, vector<1x4x1x32xf32>
    %8 = vector.shape_cast %7 : vector<1x4x1x32xf32> to vector<4x1x32xf32>
    %c0_21 = arith.constant 0 : index
    %c0_22 = arith.constant 0 : index
    %c0_23 = arith.constant 0 : index
    %c0_24 = arith.constant 0 : index
    %9 = vector.load %arg8[%c0_21, %c0_22, %c0_23, %c0_24] : memref<2x2x1x32xf32, #tpu.memory_space<vmem>>, vector<1x2x1x32xf32>
    %10 = vector.shape_cast %9 : vector<1x2x1x32xf32> to vector<2x1x32xf32>
    %c0_25 = arith.constant 0 : index
    %c0_26 = arith.constant 0 : index
    %c0_27 = arith.constant 0 : index
    %c0_28 = arith.constant 0 : index
    %11 = vector.load %arg9[%c0_25, %c0_26, %c0_27, %c0_28] : memref<2x2x1x32xf32, #tpu.memory_space<vmem>>, vector<1x2x1x32xf32>
    %12 = vector.shape_cast %11 : vector<1x2x1x32xf32> to vector<2x1x32xf32>
    %13 = vector.extract_strided_slice %6 {offsets = [0, 0, 0], sizes = [1, 32, 32], strides = [1, 1, 1]} : vector<4x32x32xf32> to vector<1x32x32xf32>
    %14 = vector.shape_cast %13 : vector<1x32x32xf32> to vector<32x32xf32>
    %cst = arith.constant dense<0.000000e+00> : vector<16x32xf32>
    %15 = tpu.matmul %4, %14, %cst {dimension_numbers = #tpu.dot_dimension_numbers<[1], [0], [0], [1], [0, 0, 1, 1], [], []>} : vector<16x32xf32>, vector<32x32xf32>, vector<16x32xf32> -> vector<16x32xf32>
    %16 = vector.extract_strided_slice %8 {offsets = [0, 0, 0], sizes = [1, 1, 32], strides = [1, 1, 1]} : vector<4x1x32xf32> to vector<1x1x32xf32>
    %17 = vector.shape_cast %16 : vector<1x1x32xf32> to vector<1x32xf32>
    %18 = vector.broadcast %17 : vector<1x32xf32> to vector<16x32xf32>
    %19 = arith.addf %15, %18 : vector<16x32xf32>
    %cst_29 = arith.constant 0.353553385 : f32
    %20 = vector.broadcast %cst_29 : f32 to vector<16x32xf32>
    %21 = arith.mulf %19, %20 : vector<16x32xf32>
    %22 = vector.extract_strided_slice %6 {offsets = [1, 0, 0], sizes = [1, 32, 32], strides = [1, 1, 1]} : vector<4x32x32xf32> to vector<1x32x32xf32>
    %23 = vector.shape_cast %22 : vector<1x32x32xf32> to vector<32x32xf32>
    %cst_30 = arith.constant dense<0.000000e+00> : vector<16x32xf32>
    %24 = tpu.matmul %4, %23, %cst_30 {dimension_numbers = #tpu.dot_dimension_numbers<[1], [0], [0], [1], [0, 0, 1, 1], [], []>} : vector<16x32xf32>, vector<32x32xf32>, vector<16x32xf32> -> vector<16x32xf32>
    %25 = vector.extract_strided_slice %8 {offsets = [1, 0, 0], sizes = [1, 1, 32], strides = [1, 1, 1]} : vector<4x1x32xf32> to vector<1x1x32xf32>
    %26 = vector.shape_cast %25 : vector<1x1x32xf32> to vector<1x32xf32>
    %27 = vector.broadcast %26 : vector<1x32xf32> to vector<16x32xf32>
    %28 = arith.addf %24, %27 : vector<16x32xf32>
    %29 = vector.extract_strided_slice %6 {offsets = [2, 0, 0], sizes = [1, 32, 32], strides = [1, 1, 1]} : vector<4x32x32xf32> to vector<1x32x32xf32>
    %30 = vector.shape_cast %29 : vector<1x32x32xf32> to vector<32x32xf32>
    %cst_31 = arith.constant dense<0.000000e+00> : vector<16x32xf32>
    %31 = tpu.matmul %4, %30, %cst_31 {dimension_numbers = #tpu.dot_dimension_numbers<[1], [0], [0], [1], [0, 0, 1, 1], [], []>} : vector<16x32xf32>, vector<32x32xf32>, vector<16x32xf32> -> vector<16x32xf32>
    %32 = vector.extract_strided_slice %8 {offsets = [2, 0, 0], sizes = [1, 1, 32], strides = [1, 1, 1]} : vector<4x1x32xf32> to vector<1x1x32xf32>
    %33 = vector.shape_cast %32 : vector<1x1x32xf32> to vector<1x32xf32>
    %34 = vector.broadcast %33 : vector<1x32xf32> to vector<16x32xf32>
    %35 = arith.addf %31, %34 : vector<16x32xf32>
    %36 = vector.extract_strided_slice %21 {offsets = [0, 0], sizes = [8, 32], strides = [1, 1]} : vector<16x32xf32> to vector<8x32xf32>
    %37 = vector.extract_strided_slice %28 {offsets = [0, 0], sizes = [8, 32], strides = [1, 1]} : vector<16x32xf32> to vector<8x32xf32>
    %38 = vector.extract_strided_slice %35 {offsets = [0, 0], sizes = [8, 32], strides = [1, 1]} : vector<16x32xf32> to vector<8x32xf32>
    %39 = vector.extract_strided_slice %1 {offsets = [0, 0, 0], sizes = [1, 8, 8], strides = [1, 1, 1]} : vector<2x8x8xf32> to vector<1x8x8xf32>
    %40 = vector.shape_cast %39 : vector<1x8x8xf32> to vector<8x8xf32>
    %cst_32 = arith.constant 0.000000e+00 : f32
    %41 = vector.broadcast %cst_32 : f32 to vector<8x32xf32>
    %42 = vector.extract_strided_slice %0 {offsets = [0, 0, 0], sizes = [1, 1, 32], strides = [1, 1, 1]} : vector<4x1x32xf32> to vector<1x1x32xf32>
    %43 = vector.shape_cast %42 : vector<1x1x32xf32> to vector<1x32xf32>
    %44 = vector.broadcast %43 : vector<1x32xf32> to vector<8x32xf32>
    %45 = arith.mulf %36, %44 : vector<8x32xf32>
    %cst_33 = arith.constant dense<0.000000e+00> : vector<8x8xf32>
    %46 = tpu.matmul %45, %37, %cst_33 {dimension_numbers = #tpu.dot_dimension_numbers<[1], [1], [0], [0], [0, 0, 1, 0], [], []>} : vector<8x32xf32>, vector<8x32xf32>, vector<8x8xf32> -> vector<8x8xf32>
    %47 = arith.addf %46, %40 : vector<8x8xf32>
    %cst_34 = arith.constant dense<0xFF800000> : vector<8xf32>
    %48 = vector.multi_reduction <maximumf>, %47, %cst_34 [1] : vector<8x8xf32> to vector<8xf32>
    %49 = vector.shape_cast %48 : vector<8xf32> to vector<8x1xf32>
    %50 = vector.broadcast %49 : vector<8x1xf32> to vector<8x8xf32>
    %51 = arith.subf %47, %50 : vector<8x8xf32>
    %52 = math.exp %51 : vector<8x8xf32>
    %cst_35 = arith.constant dense<0.000000e+00> : vector<8xf32>
    %53 = vector.multi_reduction <add>, %52, %cst_35 [1] : vector<8x8xf32> to vector<8xf32>
    %54 = vector.shape_cast %53 : vector<8xf32> to vector<8x1xf32>
    %55 = tpu.reciprocal %54 {approx = true} : vector<8x1xf32> -> vector<8x1xf32>
    %56 = vector.broadcast %55 : vector<8x1xf32> to vector<8x8xf32>
    %57 = arith.mulf %52, %56 : vector<8x8xf32>
    %cst_36 = arith.constant dense<0.000000e+00> : vector<8x32xf32>
    %58 = tpu.matmul %57, %38, %cst_36 {dimension_numbers = #tpu.dot_dimension_numbers<[1], [0], [0], [1], [0, 0, 1, 1], [], []>} : vector<8x8xf32>, vector<8x32xf32>, vector<8x32xf32> -> vector<8x32xf32>
    %59 = vector.broadcast %43 : vector<1x32xf32> to vector<8x32xf32>
    %60 = arith.mulf %58, %59 : vector<8x32xf32>
    %61 = arith.addf %41, %60 : vector<8x32xf32>
    %62 = vector.extract_strided_slice %0 {offsets = [1, 0, 0], sizes = [1, 1, 32], strides = [1, 1, 1]} : vector<4x1x32xf32> to vector<1x1x32xf32>
    %63 = vector.shape_cast %62 : vector<1x1x32xf32> to vector<1x32xf32>
    %64 = vector.broadcast %63 : vector<1x32xf32> to vector<8x32xf32>
    %65 = arith.mulf %36, %64 : vector<8x32xf32>
    %cst_37 = arith.constant dense<0.000000e+00> : vector<8x8xf32>
    %66 = tpu.matmul %65, %37, %cst_37 {dimension_numbers = #tpu.dot_dimension_numbers<[1], [1], [0], [0], [0, 0, 1, 0], [], []>} : vector<8x32xf32>, vector<8x32xf32>, vector<8x8xf32> -> vector<8x8xf32>
    %67 = arith.addf %66, %40 : vector<8x8xf32>
    %cst_38 = arith.constant dense<0xFF800000> : vector<8xf32>
    %68 = vector.multi_reduction <maximumf>, %67, %cst_38 [1] : vector<8x8xf32> to vector<8xf32>
    %69 = vector.shape_cast %68 : vector<8xf32> to vector<8x1xf32>
    %70 = vector.broadcast %69 : vector<8x1xf32> to vector<8x8xf32>
    %71 = arith.subf %67, %70 : vector<8x8xf32>
    %72 = math.exp %71 : vector<8x8xf32>
    %cst_39 = arith.constant dense<0.000000e+00> : vector<8xf32>
    %73 = vector.multi_reduction <add>, %72, %cst_39 [1] : vector<8x8xf32> to vector<8xf32>
    %74 = vector.shape_cast %73 : vector<8xf32> to vector<8x1xf32>
    %75 = tpu.reciprocal %74 {approx = true} : vector<8x1xf32> -> vector<8x1xf32>
    %76 = vector.broadcast %75 : vector<8x1xf32> to vector<8x8xf32>
    %77 = arith.mulf %72, %76 : vector<8x8xf32>
    %cst_40 = arith.constant dense<0.000000e+00> : vector<8x32xf32>
    %78 = tpu.matmul %77, %38, %cst_40 {dimension_numbers = #tpu.dot_dimension_numbers<[1], [0], [0], [1], [0, 0, 1, 1], [], []>} : vector<8x8xf32>, vector<8x32xf32>, vector<8x32xf32> -> vector<8x32xf32>
    %79 = vector.broadcast %63 : vector<1x32xf32> to vector<8x32xf32>
    %80 = arith.mulf %78, %79 : vector<8x32xf32>
    %81 = arith.addf %61, %80 : vector<8x32xf32>
    %82 = vector.extract_strided_slice %0 {offsets = [2, 0, 0], sizes = [1, 1, 32], strides = [1, 1, 1]} : vector<4x1x32xf32> to vector<1x1x32xf32>
    %83 = vector.shape_cast %82 : vector<1x1x32xf32> to vector<1x32xf32>
    %84 = vector.broadcast %83 : vector<1x32xf32> to vector<8x32xf32>
    %85 = arith.mulf %36, %84 : vector<8x32xf32>
    %cst_41 = arith.constant dense<0.000000e+00> : vector<8x8xf32>
    %86 = tpu.matmul %85, %37, %cst_41 {dimension_numbers = #tpu.dot_dimension_numbers<[1], [1], [0], [0], [0, 0, 1, 0], [], []>} : vector<8x32xf32>, vector<8x32xf32>, vector<8x8xf32> -> vector<8x8xf32>
    %87 = arith.addf %86, %40 : vector<8x8xf32>
    %cst_42 = arith.constant dense<0xFF800000> : vector<8xf32>
    %88 = vector.multi_reduction <maximumf>, %87, %cst_42 [1] : vector<8x8xf32> to vector<8xf32>
    %89 = vector.shape_cast %88 : vector<8xf32> to vector<8x1xf32>
    %90 = vector.broadcast %89 : vector<8x1xf32> to vector<8x8xf32>
    %91 = arith.subf %87, %90 : vector<8x8xf32>
    %92 = math.exp %91 : vector<8x8xf32>
    %cst_43 = arith.constant dense<0.000000e+00> : vector<8xf32>
    %93 = vector.multi_reduction <add>, %92, %cst_43 [1] : vector<8x8xf32> to vector<8xf32>
    %94 = vector.shape_cast %93 : vector<8xf32> to vector<8x1xf32>
    %95 = tpu.reciprocal %94 {approx = true} : vector<8x1xf32> -> vector<8x1xf32>
    %96 = vector.broadcast %95 : vector<8x1xf32> to vector<8x8xf32>
    %97 = arith.mulf %92, %96 : vector<8x8xf32>
    %cst_44 = arith.constant dense<0.000000e+00> : vector<8x32xf32>
    %98 = tpu.matmul %97, %38, %cst_44 {dimension_numbers = #tpu.dot_dimension_numbers<[1], [0], [0], [1], [0, 0, 1, 1], [], []>} : vector<8x8xf32>, vector<8x32xf32>, vector<8x32xf32> -> vector<8x32xf32>
    %99 = vector.broadcast %83 : vector<1x32xf32> to vector<8x32xf32>
    %100 = arith.mulf %98, %99 : vector<8x32xf32>
    %101 = arith.addf %81, %100 : vector<8x32xf32>
    %102 = vector.extract_strided_slice %0 {offsets = [3, 0, 0], sizes = [1, 1, 32], strides = [1, 1, 1]} : vector<4x1x32xf32> to vector<1x1x32xf32>
    %103 = vector.shape_cast %102 : vector<1x1x32xf32> to vector<1x32xf32>
    %104 = vector.broadcast %103 : vector<1x32xf32> to vector<8x32xf32>
    %105 = arith.mulf %36, %104 : vector<8x32xf32>
    %cst_45 = arith.constant dense<0.000000e+00> : vector<8x8xf32>
    %106 = tpu.matmul %105, %37, %cst_45 {dimension_numbers = #tpu.dot_dimension_numbers<[1], [1], [0], [0], [0, 0, 1, 0], [], []>} : vector<8x32xf32>, vector<8x32xf32>, vector<8x8xf32> -> vector<8x8xf32>
    %107 = arith.addf %106, %40 : vector<8x8xf32>
    %cst_46 = arith.constant dense<0xFF800000> : vector<8xf32>
    %108 = vector.multi_reduction <maximumf>, %107, %cst_46 [1] : vector<8x8xf32> to vector<8xf32>
    %109 = vector.shape_cast %108 : vector<8xf32> to vector<8x1xf32>
    %110 = vector.broadcast %109 : vector<8x1xf32> to vector<8x8xf32>
    %111 = arith.subf %107, %110 : vector<8x8xf32>
    %112 = math.exp %111 : vector<8x8xf32>
    %cst_47 = arith.constant dense<0.000000e+00> : vector<8xf32>
    %113 = vector.multi_reduction <add>, %112, %cst_47 [1] : vector<8x8xf32> to vector<8xf32>
    %114 = vector.shape_cast %113 : vector<8xf32> to vector<8x1xf32>
    %115 = tpu.reciprocal %114 {approx = true} : vector<8x1xf32> -> vector<8x1xf32>
    %116 = vector.broadcast %115 : vector<8x1xf32> to vector<8x8xf32>
    %117 = arith.mulf %112, %116 : vector<8x8xf32>
    %cst_48 = arith.constant dense<0.000000e+00> : vector<8x32xf32>
    %118 = tpu.matmul %117, %38, %cst_48 {dimension_numbers = #tpu.dot_dimension_numbers<[1], [0], [0], [1], [0, 0, 1, 1], [], []>} : vector<8x8xf32>, vector<8x32xf32>, vector<8x32xf32> -> vector<8x32xf32>
    %119 = vector.broadcast %103 : vector<1x32xf32> to vector<8x32xf32>
    %120 = arith.mulf %118, %119 : vector<8x32xf32>
    %121 = arith.addf %101, %120 : vector<8x32xf32>
    %122 = vector.extract_strided_slice %21 {offsets = [8, 0], sizes = [8, 32], strides = [1, 1]} : vector<16x32xf32> to vector<8x32xf32>
    %123 = vector.extract_strided_slice %28 {offsets = [8, 0], sizes = [8, 32], strides = [1, 1]} : vector<16x32xf32> to vector<8x32xf32>
    %124 = vector.extract_strided_slice %35 {offsets = [8, 0], sizes = [8, 32], strides = [1, 1]} : vector<16x32xf32> to vector<8x32xf32>
    %125 = vector.extract_strided_slice %1 {offsets = [1, 0, 0], sizes = [1, 8, 8], strides = [1, 1, 1]} : vector<2x8x8xf32> to vector<1x8x8xf32>
    %126 = vector.shape_cast %125 : vector<1x8x8xf32> to vector<8x8xf32>
    %cst_49 = arith.constant 0.000000e+00 : f32
    %127 = vector.broadcast %cst_49 : f32 to vector<8x32xf32>
    %128 = vector.extract_strided_slice %0 {offsets = [0, 0, 0], sizes = [1, 1, 32], strides = [1, 1, 1]} : vector<4x1x32xf32> to vector<1x1x32xf32>
    %129 = vector.shape_cast %128 : vector<1x1x32xf32> to vector<1x32xf32>
    %130 = vector.broadcast %129 : vector<1x32xf32> to vector<8x32xf32>
    %131 = arith.mulf %122, %130 : vector<8x32xf32>
    %cst_50 = arith.constant dense<0.000000e+00> : vector<8x8xf32>
    %132 = tpu.matmul %131, %123, %cst_50 {dimension_numbers = #tpu.dot_dimension_numbers<[1], [1], [0], [0], [0, 0, 1, 0], [], []>} : vector<8x32xf32>, vector<8x32xf32>, vector<8x8xf32> -> vector<8x8xf32>
    %133 = arith.addf %132, %126 : vector<8x8xf32>
    %cst_51 = arith.constant dense<0xFF800000> : vector<8xf32>
    %134 = vector.multi_reduction <maximumf>, %133, %cst_51 [1] : vector<8x8xf32> to vector<8xf32>
    %135 = vector.shape_cast %134 : vector<8xf32> to vector<8x1xf32>
    %136 = vector.broadcast %135 : vector<8x1xf32> to vector<8x8xf32>
    %137 = arith.subf %133, %136 : vector<8x8xf32>
    %138 = math.exp %137 : vector<8x8xf32>
    %cst_52 = arith.constant dense<0.000000e+00> : vector<8xf32>
    %139 = vector.multi_reduction <add>, %138, %cst_52 [1] : vector<8x8xf32> to vector<8xf32>
    %140 = vector.shape_cast %139 : vector<8xf32> to vector<8x1xf32>
    %141 = tpu.reciprocal %140 {approx = true} : vector<8x1xf32> -> vector<8x1xf32>
    %142 = vector.broadcast %141 : vector<8x1xf32> to vector<8x8xf32>
    %143 = arith.mulf %138, %142 : vector<8x8xf32>
    %cst_53 = arith.constant dense<0.000000e+00> : vector<8x32xf32>
    %144 = tpu.matmul %143, %124, %cst_53 {dimension_numbers = #tpu.dot_dimension_numbers<[1], [0], [0], [1], [0, 0, 1, 1], [], []>} : vector<8x8xf32>, vector<8x32xf32>, vector<8x32xf32> -> vector<8x32xf32>
    %145 = vector.broadcast %129 : vector<1x32xf32> to vector<8x32xf32>
    %146 = arith.mulf %144, %145 : vector<8x32xf32>
    %147 = arith.addf %127, %146 : vector<8x32xf32>
    %148 = vector.extract_strided_slice %0 {offsets = [1, 0, 0], sizes = [1, 1, 32], strides = [1, 1, 1]} : vector<4x1x32xf32> to vector<1x1x32xf32>
    %149 = vector.shape_cast %148 : vector<1x1x32xf32> to vector<1x32xf32>
    %150 = vector.broadcast %149 : vector<1x32xf32> to vector<8x32xf32>
    %151 = arith.mulf %122, %150 : vector<8x32xf32>
    %cst_54 = arith.constant dense<0.000000e+00> : vector<8x8xf32>
    %152 = tpu.matmul %151, %123, %cst_54 {dimension_numbers = #tpu.dot_dimension_numbers<[1], [1], [0], [0], [0, 0, 1, 0], [], []>} : vector<8x32xf32>, vector<8x32xf32>, vector<8x8xf32> -> vector<8x8xf32>
    %153 = arith.addf %152, %126 : vector<8x8xf32>
    %cst_55 = arith.constant dense<0xFF800000> : vector<8xf32>
    %154 = vector.multi_reduction <maximumf>, %153, %cst_55 [1] : vector<8x8xf32> to vector<8xf32>
    %155 = vector.shape_cast %154 : vector<8xf32> to vector<8x1xf32>
    %156 = vector.broadcast %155 : vector<8x1xf32> to vector<8x8xf32>
    %157 = arith.subf %153, %156 : vector<8x8xf32>
    %158 = math.exp %157 : vector<8x8xf32>
    %cst_56 = arith.constant dense<0.000000e+00> : vector<8xf32>
    %159 = vector.multi_reduction <add>, %158, %cst_56 [1] : vector<8x8xf32> to vector<8xf32>
    %160 = vector.shape_cast %159 : vector<8xf32> to vector<8x1xf32>
    %161 = tpu.reciprocal %160 {approx = true} : vector<8x1xf32> -> vector<8x1xf32>
    %162 = vector.broadcast %161 : vector<8x1xf32> to vector<8x8xf32>
    %163 = arith.mulf %158, %162 : vector<8x8xf32>
    %cst_57 = arith.constant dense<0.000000e+00> : vector<8x32xf32>
    %164 = tpu.matmul %163, %124, %cst_57 {dimension_numbers = #tpu.dot_dimension_numbers<[1], [0], [0], [1], [0, 0, 1, 1], [], []>} : vector<8x8xf32>, vector<8x32xf32>, vector<8x32xf32> -> vector<8x32xf32>
    %165 = vector.broadcast %149 : vector<1x32xf32> to vector<8x32xf32>
    %166 = arith.mulf %164, %165 : vector<8x32xf32>
    %167 = arith.addf %147, %166 : vector<8x32xf32>
    %168 = vector.extract_strided_slice %0 {offsets = [2, 0, 0], sizes = [1, 1, 32], strides = [1, 1, 1]} : vector<4x1x32xf32> to vector<1x1x32xf32>
    %169 = vector.shape_cast %168 : vector<1x1x32xf32> to vector<1x32xf32>
    %170 = vector.broadcast %169 : vector<1x32xf32> to vector<8x32xf32>
    %171 = arith.mulf %122, %170 : vector<8x32xf32>
    %cst_58 = arith.constant dense<0.000000e+00> : vector<8x8xf32>
    %172 = tpu.matmul %171, %123, %cst_58 {dimension_numbers = #tpu.dot_dimension_numbers<[1], [1], [0], [0], [0, 0, 1, 0], [], []>} : vector<8x32xf32>, vector<8x32xf32>, vector<8x8xf32> -> vector<8x8xf32>
    %173 = arith.addf %172, %126 : vector<8x8xf32>
    %cst_59 = arith.constant dense<0xFF800000> : vector<8xf32>
    %174 = vector.multi_reduction <maximumf>, %173, %cst_59 [1] : vector<8x8xf32> to vector<8xf32>
    %175 = vector.shape_cast %174 : vector<8xf32> to vector<8x1xf32>
    %176 = vector.broadcast %175 : vector<8x1xf32> to vector<8x8xf32>
    %177 = arith.subf %173, %176 : vector<8x8xf32>
    %178 = math.exp %177 : vector<8x8xf32>
    %cst_60 = arith.constant dense<0.000000e+00> : vector<8xf32>
    %179 = vector.multi_reduction <add>, %178, %cst_60 [1] : vector<8x8xf32> to vector<8xf32>
    %180 = vector.shape_cast %179 : vector<8xf32> to vector<8x1xf32>
    %181 = tpu.reciprocal %180 {approx = true} : vector<8x1xf32> -> vector<8x1xf32>
    %182 = vector.broadcast %181 : vector<8x1xf32> to vector<8x8xf32>
    %183 = arith.mulf %178, %182 : vector<8x8xf32>
    %cst_61 = arith.constant dense<0.000000e+00> : vector<8x32xf32>
    %184 = tpu.matmul %183, %124, %cst_61 {dimension_numbers = #tpu.dot_dimension_numbers<[1], [0], [0], [1], [0, 0, 1, 1], [], []>} : vector<8x8xf32>, vector<8x32xf32>, vector<8x32xf32> -> vector<8x32xf32>
    %185 = vector.broadcast %169 : vector<1x32xf32> to vector<8x32xf32>
    %186 = arith.mulf %184, %185 : vector<8x32xf32>
    %187 = arith.addf %167, %186 : vector<8x32xf32>
    %188 = vector.extract_strided_slice %0 {offsets = [3, 0, 0], sizes = [1, 1, 32], strides = [1, 1, 1]} : vector<4x1x32xf32> to vector<1x1x32xf32>
    %189 = vector.shape_cast %188 : vector<1x1x32xf32> to vector<1x32xf32>
    %190 = vector.broadcast %189 : vector<1x32xf32> to vector<8x32xf32>
    %191 = arith.mulf %122, %190 : vector<8x32xf32>
    %cst_62 = arith.constant dense<0.000000e+00> : vector<8x8xf32>
    %192 = tpu.matmul %191, %123, %cst_62 {dimension_numbers = #tpu.dot_dimension_numbers<[1], [1], [0], [0], [0, 0, 1, 0], [], []>} : vector<8x32xf32>, vector<8x32xf32>, vector<8x8xf32> -> vector<8x8xf32>
    %193 = arith.addf %192, %126 : vector<8x8xf32>
    %cst_63 = arith.constant dense<0xFF800000> : vector<8xf32>
    %194 = vector.multi_reduction <maximumf>, %193, %cst_63 [1] : vector<8x8xf32> to vector<8xf32>
    %195 = vector.shape_cast %194 : vector<8xf32> to vector<8x1xf32>
    %196 = vector.broadcast %195 : vector<8x1xf32> to vector<8x8xf32>
    %197 = arith.subf %193, %196 : vector<8x8xf32>
    %198 = math.exp %197 : vector<8x8xf32>
    %cst_64 = arith.constant dense<0.000000e+00> : vector<8xf32>
    %199 = vector.multi_reduction <add>, %198, %cst_64 [1] : vector<8x8xf32> to vector<8xf32>
    %200 = vector.shape_cast %199 : vector<8xf32> to vector<8x1xf32>
    %201 = tpu.reciprocal %200 {approx = true} : vector<8x1xf32> -> vector<8x1xf32>
    %202 = vector.broadcast %201 : vector<8x1xf32> to vector<8x8xf32>
    %203 = arith.mulf %198, %202 : vector<8x8xf32>
    %cst_65 = arith.constant dense<0.000000e+00> : vector<8x32xf32>
    %204 = tpu.matmul %203, %124, %cst_65 {dimension_numbers = #tpu.dot_dimension_numbers<[1], [0], [0], [1], [0, 0, 1, 1], [], []>} : vector<8x8xf32>, vector<8x32xf32>, vector<8x32xf32> -> vector<8x32xf32>
    %205 = vector.broadcast %189 : vector<1x32xf32> to vector<8x32xf32>
    %206 = arith.mulf %204, %205 : vector<8x32xf32>
    %207 = arith.addf %187, %206 : vector<8x32xf32>
    %208 = tpu.concatenate %121, %207 in 0 : vector<8x32xf32>, vector<8x32xf32> -> vector<16x32xf32>
    %209 = vector.extract_strided_slice %6 {offsets = [3, 0, 0], sizes = [1, 32, 32], strides = [1, 1, 1]} : vector<4x32x32xf32> to vector<1x32x32xf32>
    %210 = vector.shape_cast %209 : vector<1x32x32xf32> to vector<32x32xf32>
    %cst_66 = arith.constant dense<0.000000e+00> : vector<16x32xf32>
    %211 = tpu.matmul %208, %210, %cst_66 {dimension_numbers = #tpu.dot_dimension_numbers<[1], [0], [0], [1], [0, 0, 1, 1], [], []>} : vector<16x32xf32>, vector<32x32xf32>, vector<16x32xf32> -> vector<16x32xf32>
    %212 = vector.extract_strided_slice %8 {offsets = [3, 0, 0], sizes = [1, 1, 32], strides = [1, 1, 1]} : vector<4x1x32xf32> to vector<1x1x32xf32>
    %213 = vector.shape_cast %212 : vector<1x1x32xf32> to vector<1x32xf32>
    %214 = vector.broadcast %213 : vector<1x32xf32> to vector<16x32xf32>
    %215 = arith.addf %211, %214 : vector<16x32xf32>
    %216 = arith.addf %4, %215 : vector<16x32xf32>
    %217 = vector.extract_strided_slice %10 {offsets = [0, 0, 0], sizes = [1, 1, 32], strides = [1, 1, 1]} : vector<2x1x32xf32> to vector<1x1x32xf32>
    %218 = vector.shape_cast %217 : vector<1x1x32xf32> to vector<1x32xf32>
    %219 = vector.extract_strided_slice %12 {offsets = [0, 0, 0], sizes = [1, 1, 32], strides = [1, 1, 1]} : vector<2x1x32xf32> to vector<1x1x32xf32>
    %220 = vector.shape_cast %219 : vector<1x1x32xf32> to vector<1x32xf32>
    %cst_67 = arith.constant dense<0.000000e+00> : vector<16xf32>
    %221 = vector.multi_reduction <add>, %216, %cst_67 [1] : vector<16x32xf32> to vector<16xf32>
    %222 = vector.shape_cast %221 : vector<16xf32> to vector<16x1xf32>
    %cst_68 = arith.constant 3.200000e+01 : f32
    %223 = vector.broadcast %cst_68 : f32 to vector<16x1xf32>
    %224 = arith.divf %222, %223 : vector<16x1xf32>
    %225 = vector.broadcast %224 : vector<16x1xf32> to vector<16x32xf32>
    %226 = arith.subf %216, %225 : vector<16x32xf32>
    %227 = arith.mulf %226, %226 : vector<16x32xf32>
    %cst_69 = arith.constant dense<0.000000e+00> : vector<16xf32>
    %228 = vector.multi_reduction <add>, %227, %cst_69 [1] : vector<16x32xf32> to vector<16xf32>
    %229 = vector.shape_cast %228 : vector<16xf32> to vector<16x1xf32>
    %cst_70 = arith.constant 3.200000e+01 : f32
    %230 = vector.broadcast %cst_70 : f32 to vector<16x1xf32>
    %231 = arith.divf %229, %230 : vector<16x1xf32>
    %232 = vector.broadcast %224 : vector<16x1xf32> to vector<16x32xf32>
    %233 = arith.subf %216, %232 : vector<16x32xf32>
    %cst_71 = arith.constant 9.99999974E-6 : f32
    %234 = vector.broadcast %cst_71 : f32 to vector<16x1xf32>
    %235 = arith.addf %231, %234 : vector<16x1xf32>
    %236 = math.rsqrt %235 : vector<16x1xf32>
    %237 = vector.broadcast %236 : vector<16x1xf32> to vector<16x32xf32>
    %238 = arith.mulf %233, %237 : vector<16x32xf32>
    %239 = vector.broadcast %218 : vector<1x32xf32> to vector<16x32xf32>
    %240 = arith.mulf %238, %239 : vector<16x32xf32>
    %241 = vector.broadcast %220 : vector<1x32xf32> to vector<16x32xf32>
    %242 = arith.addf %240, %241 : vector<16x32xf32>
    %c0_72 = arith.constant 0 : index
    %c0_73 = arith.constant 0 : index
    %c0_74 = arith.constant 0 : index
    %243 = vector.load %arg10[%c0_72, %c0_73, %c0_74] : memref<2x32x64xf32, #tpu.memory_space<vmem>>, vector<1x32x64xf32>
    %244 = vector.shape_cast %243 : vector<1x32x64xf32> to vector<32x64xf32>
    %cst_75 = arith.constant dense<0.000000e+00> : vector<16x64xf32>
    %245 = tpu.matmul %242, %244, %cst_75 {dimension_numbers = #tpu.dot_dimension_numbers<[1], [0], [0], [1], [0, 0, 1, 1], [], []>} : vector<16x32xf32>, vector<32x64xf32>, vector<16x64xf32> -> vector<16x64xf32>
    %c0_76 = arith.constant 0 : index
    %c0_77 = arith.constant 0 : index
    %c0_78 = arith.constant 0 : index
    %246 = vector.load %arg11[%c0_76, %c0_77, %c0_78] : memref<2x1x64xf32, #tpu.memory_space<vmem>>, vector<1x1x64xf32>
    %247 = vector.shape_cast %246 : vector<1x1x64xf32> to vector<1x64xf32>
    %248 = vector.broadcast %247 : vector<1x64xf32> to vector<16x64xf32>
    %249 = arith.addf %245, %248 : vector<16x64xf32>
    %cst_79 = arith.constant 0.000000e+00 : f32
    %250 = vector.broadcast %cst_79 : f32 to vector<16x64xf32>
    %251 = arith.maximumf %249, %250 : vector<16x64xf32>
    %c0_80 = arith.constant 0 : index
    %c0_81 = arith.constant 0 : index
    %c0_82 = arith.constant 0 : index
    %252 = vector.load %arg12[%c0_80, %c0_81, %c0_82] : memref<2x64x32xf32, #tpu.memory_space<vmem>>, vector<1x64x32xf32>
    %253 = vector.shape_cast %252 : vector<1x64x32xf32> to vector<64x32xf32>
    %cst_83 = arith.constant dense<0.000000e+00> : vector<16x32xf32>
    %254 = tpu.matmul %251, %253, %cst_83 {dimension_numbers = #tpu.dot_dimension_numbers<[1], [0], [0], [1], [0, 0, 1, 1], [], []>} : vector<16x64xf32>, vector<64x32xf32>, vector<16x32xf32> -> vector<16x32xf32>
    %c0_84 = arith.constant 0 : index
    %c0_85 = arith.constant 0 : index
    %c0_86 = arith.constant 0 : index
    %255 = vector.load %arg13[%c0_84, %c0_85, %c0_86] : memref<2x1x32xf32, #tpu.memory_space<vmem>>, vector<1x1x32xf32>
    %256 = vector.shape_cast %255 : vector<1x1x32xf32> to vector<1x32xf32>
    %257 = vector.broadcast %256 : vector<1x32xf32> to vector<16x32xf32>
    %258 = arith.addf %254, %257 : vector<16x32xf32>
    %259 = arith.addf %242, %258 : vector<16x32xf32>
    %260 = vector.extract_strided_slice %10 {offsets = [1, 0, 0], sizes = [1, 1, 32], strides = [1, 1, 1]} : vector<2x1x32xf32> to vector<1x1x32xf32>
    %261 = vector.shape_cast %260 : vector<1x1x32xf32> to vector<1x32xf32>
    %262 = vector.extract_strided_slice %12 {offsets = [1, 0, 0], sizes = [1, 1, 32], strides = [1, 1, 1]} : vector<2x1x32xf32> to vector<1x1x32xf32>
    %263 = vector.shape_cast %262 : vector<1x1x32xf32> to vector<1x32xf32>
    %cst_87 = arith.constant dense<0.000000e+00> : vector<16xf32>
    %264 = vector.multi_reduction <add>, %259, %cst_87 [1] : vector<16x32xf32> to vector<16xf32>
    %265 = vector.shape_cast %264 : vector<16xf32> to vector<16x1xf32>
    %cst_88 = arith.constant 3.200000e+01 : f32
    %266 = vector.broadcast %cst_88 : f32 to vector<16x1xf32>
    %267 = arith.divf %265, %266 : vector<16x1xf32>
    %268 = vector.broadcast %267 : vector<16x1xf32> to vector<16x32xf32>
    %269 = arith.subf %259, %268 : vector<16x32xf32>
    %270 = arith.mulf %269, %269 : vector<16x32xf32>
    %cst_89 = arith.constant dense<0.000000e+00> : vector<16xf32>
    %271 = vector.multi_reduction <add>, %270, %cst_89 [1] : vector<16x32xf32> to vector<16xf32>
    %272 = vector.shape_cast %271 : vector<16xf32> to vector<16x1xf32>
    %cst_90 = arith.constant 3.200000e+01 : f32
    %273 = vector.broadcast %cst_90 : f32 to vector<16x1xf32>
    %274 = arith.divf %272, %273 : vector<16x1xf32>
    %275 = vector.broadcast %267 : vector<16x1xf32> to vector<16x32xf32>
    %276 = arith.subf %259, %275 : vector<16x32xf32>
    %cst_91 = arith.constant 9.99999974E-6 : f32
    %277 = vector.broadcast %cst_91 : f32 to vector<16x1xf32>
    %278 = arith.addf %274, %277 : vector<16x1xf32>
    %279 = math.rsqrt %278 : vector<16x1xf32>
    %280 = vector.broadcast %279 : vector<16x1xf32> to vector<16x32xf32>
    %281 = arith.mulf %276, %280 : vector<16x32xf32>
    %282 = vector.broadcast %261 : vector<1x32xf32> to vector<16x32xf32>
    %283 = arith.mulf %281, %282 : vector<16x32xf32>
    %284 = vector.broadcast %263 : vector<1x32xf32> to vector<16x32xf32>
    %285 = arith.addf %283, %284 : vector<16x32xf32>
    %c1 = arith.constant 1 : index
    %c0_92 = arith.constant 0 : index
    %c0_93 = arith.constant 0 : index
    %c0_94 = arith.constant 0 : index
    %286 = vector.load %arg6[%c1, %c0_92, %c0_93, %c0_94] : memref<2x4x32x32xf32, #tpu.memory_space<vmem>>, vector<1x4x32x32xf32>
    %287 = vector.shape_cast %286 : vector<1x4x32x32xf32> to vector<4x32x32xf32>
    %c1_95 = arith.constant 1 : index
    %c0_96 = arith.constant 0 : index
    %c0_97 = arith.constant 0 : index
    %c0_98 = arith.constant 0 : index
    %288 = vector.load %arg7[%c1_95, %c0_96, %c0_97, %c0_98] : memref<2x4x1x32xf32, #tpu.memory_space<vmem>>, vector<1x4x1x32xf32>
    %289 = vector.shape_cast %288 : vector<1x4x1x32xf32> to vector<4x1x32xf32>
    %c1_99 = arith.constant 1 : index
    %c0_100 = arith.constant 0 : index
    %c0_101 = arith.constant 0 : index
    %c0_102 = arith.constant 0 : index
    %290 = vector.load %arg8[%c1_99, %c0_100, %c0_101, %c0_102] : memref<2x2x1x32xf32, #tpu.memory_space<vmem>>, vector<1x2x1x32xf32>
    %291 = vector.shape_cast %290 : vector<1x2x1x32xf32> to vector<2x1x32xf32>
    %c1_103 = arith.constant 1 : index
    %c0_104 = arith.constant 0 : index
    %c0_105 = arith.constant 0 : index
    %c0_106 = arith.constant 0 : index
    %292 = vector.load %arg9[%c1_103, %c0_104, %c0_105, %c0_106] : memref<2x2x1x32xf32, #tpu.memory_space<vmem>>, vector<1x2x1x32xf32>
    %293 = vector.shape_cast %292 : vector<1x2x1x32xf32> to vector<2x1x32xf32>
    %294 = vector.extract_strided_slice %287 {offsets = [0, 0, 0], sizes = [1, 32, 32], strides = [1, 1, 1]} : vector<4x32x32xf32> to vector<1x32x32xf32>
    %295 = vector.shape_cast %294 : vector<1x32x32xf32> to vector<32x32xf32>
    %cst_107 = arith.constant dense<0.000000e+00> : vector<16x32xf32>
    %296 = tpu.matmul %285, %295, %cst_107 {dimension_numbers = #tpu.dot_dimension_numbers<[1], [0], [0], [1], [0, 0, 1, 1], [], []>} : vector<16x32xf32>, vector<32x32xf32>, vector<16x32xf32> -> vector<16x32xf32>
    %297 = vector.extract_strided_slice %289 {offsets = [0, 0, 0], sizes = [1, 1, 32], strides = [1, 1, 1]} : vector<4x1x32xf32> to vector<1x1x32xf32>
    %298 = vector.shape_cast %297 : vector<1x1x32xf32> to vector<1x32xf32>
    %299 = vector.broadcast %298 : vector<1x32xf32> to vector<16x32xf32>
    %300 = arith.addf %296, %299 : vector<16x32xf32>
    %cst_108 = arith.constant 0.353553385 : f32
    %301 = vector.broadcast %cst_108 : f32 to vector<16x32xf32>
    %302 = arith.mulf %300, %301 : vector<16x32xf32>
    %303 = vector.extract_strided_slice %287 {offsets = [1, 0, 0], sizes = [1, 32, 32], strides = [1, 1, 1]} : vector<4x32x32xf32> to vector<1x32x32xf32>
    %304 = vector.shape_cast %303 : vector<1x32x32xf32> to vector<32x32xf32>
    %cst_109 = arith.constant dense<0.000000e+00> : vector<16x32xf32>
    %305 = tpu.matmul %285, %304, %cst_109 {dimension_numbers = #tpu.dot_dimension_numbers<[1], [0], [0], [1], [0, 0, 1, 1], [], []>} : vector<16x32xf32>, vector<32x32xf32>, vector<16x32xf32> -> vector<16x32xf32>
    %306 = vector.extract_strided_slice %289 {offsets = [1, 0, 0], sizes = [1, 1, 32], strides = [1, 1, 1]} : vector<4x1x32xf32> to vector<1x1x32xf32>
    %307 = vector.shape_cast %306 : vector<1x1x32xf32> to vector<1x32xf32>
    %308 = vector.broadcast %307 : vector<1x32xf32> to vector<16x32xf32>
    %309 = arith.addf %305, %308 : vector<16x32xf32>
    %310 = vector.extract_strided_slice %287 {offsets = [2, 0, 0], sizes = [1, 32, 32], strides = [1, 1, 1]} : vector<4x32x32xf32> to vector<1x32x32xf32>
    %311 = vector.shape_cast %310 : vector<1x32x32xf32> to vector<32x32xf32>
    %cst_110 = arith.constant dense<0.000000e+00> : vector<16x32xf32>
    %312 = tpu.matmul %285, %311, %cst_110 {dimension_numbers = #tpu.dot_dimension_numbers<[1], [0], [0], [1], [0, 0, 1, 1], [], []>} : vector<16x32xf32>, vector<32x32xf32>, vector<16x32xf32> -> vector<16x32xf32>
    %313 = vector.extract_strided_slice %289 {offsets = [2, 0, 0], sizes = [1, 1, 32], strides = [1, 1, 1]} : vector<4x1x32xf32> to vector<1x1x32xf32>
    %314 = vector.shape_cast %313 : vector<1x1x32xf32> to vector<1x32xf32>
    %315 = vector.broadcast %314 : vector<1x32xf32> to vector<16x32xf32>
    %316 = arith.addf %312, %315 : vector<16x32xf32>
    %317 = vector.extract_strided_slice %302 {offsets = [0, 0], sizes = [8, 32], strides = [1, 1]} : vector<16x32xf32> to vector<8x32xf32>
    %318 = vector.extract_strided_slice %309 {offsets = [0, 0], sizes = [8, 32], strides = [1, 1]} : vector<16x32xf32> to vector<8x32xf32>
    %319 = vector.extract_strided_slice %316 {offsets = [0, 0], sizes = [8, 32], strides = [1, 1]} : vector<16x32xf32> to vector<8x32xf32>
    %320 = vector.extract_strided_slice %1 {offsets = [0, 0, 0], sizes = [1, 8, 8], strides = [1, 1, 1]} : vector<2x8x8xf32> to vector<1x8x8xf32>
    %321 = vector.shape_cast %320 : vector<1x8x8xf32> to vector<8x8xf32>
    %cst_111 = arith.constant 0.000000e+00 : f32
    %322 = vector.broadcast %cst_111 : f32 to vector<8x32xf32>
    %323 = vector.extract_strided_slice %0 {offsets = [0, 0, 0], sizes = [1, 1, 32], strides = [1, 1, 1]} : vector<4x1x32xf32> to vector<1x1x32xf32>
    %324 = vector.shape_cast %323 : vector<1x1x32xf32> to vector<1x32xf32>
    %325 = vector.broadcast %324 : vector<1x32xf32> to vector<8x32xf32>
    %326 = arith.mulf %317, %325 : vector<8x32xf32>
    %cst_112 = arith.constant dense<0.000000e+00> : vector<8x8xf32>
    %327 = tpu.matmul %326, %318, %cst_112 {dimension_numbers = #tpu.dot_dimension_numbers<[1], [1], [0], [0], [0, 0, 1, 0], [], []>} : vector<8x32xf32>, vector<8x32xf32>, vector<8x8xf32> -> vector<8x8xf32>
    %328 = arith.addf %327, %321 : vector<8x8xf32>
    %cst_113 = arith.constant dense<0xFF800000> : vector<8xf32>
    %329 = vector.multi_reduction <maximumf>, %328, %cst_113 [1] : vector<8x8xf32> to vector<8xf32>
    %330 = vector.shape_cast %329 : vector<8xf32> to vector<8x1xf32>
    %331 = vector.broadcast %330 : vector<8x1xf32> to vector<8x8xf32>
    %332 = arith.subf %328, %331 : vector<8x8xf32>
    %333 = math.exp %332 : vector<8x8xf32>
    %cst_114 = arith.constant dense<0.000000e+00> : vector<8xf32>
    %334 = vector.multi_reduction <add>, %333, %cst_114 [1] : vector<8x8xf32> to vector<8xf32>
    %335 = vector.shape_cast %334 : vector<8xf32> to vector<8x1xf32>
    %336 = tpu.reciprocal %335 {approx = true} : vector<8x1xf32> -> vector<8x1xf32>
    %337 = vector.broadcast %336 : vector<8x1xf32> to vector<8x8xf32>
    %338 = arith.mulf %333, %337 : vector<8x8xf32>
    %cst_115 = arith.constant dense<0.000000e+00> : vector<8x32xf32>
    %339 = tpu.matmul %338, %319, %cst_115 {dimension_numbers = #tpu.dot_dimension_numbers<[1], [0], [0], [1], [0, 0, 1, 1], [], []>} : vector<8x8xf32>, vector<8x32xf32>, vector<8x32xf32> -> vector<8x32xf32>
    %340 = vector.broadcast %324 : vector<1x32xf32> to vector<8x32xf32>
    %341 = arith.mulf %339, %340 : vector<8x32xf32>
    %342 = arith.addf %322, %341 : vector<8x32xf32>
    %343 = vector.extract_strided_slice %0 {offsets = [1, 0, 0], sizes = [1, 1, 32], strides = [1, 1, 1]} : vector<4x1x32xf32> to vector<1x1x32xf32>
    %344 = vector.shape_cast %343 : vector<1x1x32xf32> to vector<1x32xf32>
    %345 = vector.broadcast %344 : vector<1x32xf32> to vector<8x32xf32>
    %346 = arith.mulf %317, %345 : vector<8x32xf32>
    %cst_116 = arith.constant dense<0.000000e+00> : vector<8x8xf32>
    %347 = tpu.matmul %346, %318, %cst_116 {dimension_numbers = #tpu.dot_dimension_numbers<[1], [1], [0], [0], [0, 0, 1, 0], [], []>} : vector<8x32xf32>, vector<8x32xf32>, vector<8x8xf32> -> vector<8x8xf32>
    %348 = arith.addf %347, %321 : vector<8x8xf32>
    %cst_117 = arith.constant dense<0xFF800000> : vector<8xf32>
    %349 = vector.multi_reduction <maximumf>, %348, %cst_117 [1] : vector<8x8xf32> to vector<8xf32>
    %350 = vector.shape_cast %349 : vector<8xf32> to vector<8x1xf32>
    %351 = vector.broadcast %350 : vector<8x1xf32> to vector<8x8xf32>
    %352 = arith.subf %348, %351 : vector<8x8xf32>
    %353 = math.exp %352 : vector<8x8xf32>
    %cst_118 = arith.constant dense<0.000000e+00> : vector<8xf32>
    %354 = vector.multi_reduction <add>, %353, %cst_118 [1] : vector<8x8xf32> to vector<8xf32>
    %355 = vector.shape_cast %354 : vector<8xf32> to vector<8x1xf32>
    %356 = tpu.reciprocal %355 {approx = true} : vector<8x1xf32> -> vector<8x1xf32>
    %357 = vector.broadcast %356 : vector<8x1xf32> to vector<8x8xf32>
    %358 = arith.mulf %353, %357 : vector<8x8xf32>
    %cst_119 = arith.constant dense<0.000000e+00> : vector<8x32xf32>
    %359 = tpu.matmul %358, %319, %cst_119 {dimension_numbers = #tpu.dot_dimension_numbers<[1], [0], [0], [1], [0, 0, 1, 1], [], []>} : vector<8x8xf32>, vector<8x32xf32>, vector<8x32xf32> -> vector<8x32xf32>
    %360 = vector.broadcast %344 : vector<1x32xf32> to vector<8x32xf32>
    %361 = arith.mulf %359, %360 : vector<8x32xf32>
    %362 = arith.addf %342, %361 : vector<8x32xf32>
    %363 = vector.extract_strided_slice %0 {offsets = [2, 0, 0], sizes = [1, 1, 32], strides = [1, 1, 1]} : vector<4x1x32xf32> to vector<1x1x32xf32>
    %364 = vector.shape_cast %363 : vector<1x1x32xf32> to vector<1x32xf32>
    %365 = vector.broadcast %364 : vector<1x32xf32> to vector<8x32xf32>
    %366 = arith.mulf %317, %365 : vector<8x32xf32>
    %cst_120 = arith.constant dense<0.000000e+00> : vector<8x8xf32>
    %367 = tpu.matmul %366, %318, %cst_120 {dimension_numbers = #tpu.dot_dimension_numbers<[1], [1], [0], [0], [0, 0, 1, 0], [], []>} : vector<8x32xf32>, vector<8x32xf32>, vector<8x8xf32> -> vector<8x8xf32>
    %368 = arith.addf %367, %321 : vector<8x8xf32>
    %cst_121 = arith.constant dense<0xFF800000> : vector<8xf32>
    %369 = vector.multi_reduction <maximumf>, %368, %cst_121 [1] : vector<8x8xf32> to vector<8xf32>
    %370 = vector.shape_cast %369 : vector<8xf32> to vector<8x1xf32>
    %371 = vector.broadcast %370 : vector<8x1xf32> to vector<8x8xf32>
    %372 = arith.subf %368, %371 : vector<8x8xf32>
    %373 = math.exp %372 : vector<8x8xf32>
    %cst_122 = arith.constant dense<0.000000e+00> : vector<8xf32>
    %374 = vector.multi_reduction <add>, %373, %cst_122 [1] : vector<8x8xf32> to vector<8xf32>
    %375 = vector.shape_cast %374 : vector<8xf32> to vector<8x1xf32>
    %376 = tpu.reciprocal %375 {approx = true} : vector<8x1xf32> -> vector<8x1xf32>
    %377 = vector.broadcast %376 : vector<8x1xf32> to vector<8x8xf32>
    %378 = arith.mulf %373, %377 : vector<8x8xf32>
    %cst_123 = arith.constant dense<0.000000e+00> : vector<8x32xf32>
    %379 = tpu.matmul %378, %319, %cst_123 {dimension_numbers = #tpu.dot_dimension_numbers<[1], [0], [0], [1], [0, 0, 1, 1], [], []>} : vector<8x8xf32>, vector<8x32xf32>, vector<8x32xf32> -> vector<8x32xf32>
    %380 = vector.broadcast %364 : vector<1x32xf32> to vector<8x32xf32>
    %381 = arith.mulf %379, %380 : vector<8x32xf32>
    %382 = arith.addf %362, %381 : vector<8x32xf32>
    %383 = vector.extract_strided_slice %0 {offsets = [3, 0, 0], sizes = [1, 1, 32], strides = [1, 1, 1]} : vector<4x1x32xf32> to vector<1x1x32xf32>
    %384 = vector.shape_cast %383 : vector<1x1x32xf32> to vector<1x32xf32>
    %385 = vector.broadcast %384 : vector<1x32xf32> to vector<8x32xf32>
    %386 = arith.mulf %317, %385 : vector<8x32xf32>
    %cst_124 = arith.constant dense<0.000000e+00> : vector<8x8xf32>
    %387 = tpu.matmul %386, %318, %cst_124 {dimension_numbers = #tpu.dot_dimension_numbers<[1], [1], [0], [0], [0, 0, 1, 0], [], []>} : vector<8x32xf32>, vector<8x32xf32>, vector<8x8xf32> -> vector<8x8xf32>
    %388 = arith.addf %387, %321 : vector<8x8xf32>
    %cst_125 = arith.constant dense<0xFF800000> : vector<8xf32>
    %389 = vector.multi_reduction <maximumf>, %388, %cst_125 [1] : vector<8x8xf32> to vector<8xf32>
    %390 = vector.shape_cast %389 : vector<8xf32> to vector<8x1xf32>
    %391 = vector.broadcast %390 : vector<8x1xf32> to vector<8x8xf32>
    %392 = arith.subf %388, %391 : vector<8x8xf32>
    %393 = math.exp %392 : vector<8x8xf32>
    %cst_126 = arith.constant dense<0.000000e+00> : vector<8xf32>
    %394 = vector.multi_reduction <add>, %393, %cst_126 [1] : vector<8x8xf32> to vector<8xf32>
    %395 = vector.shape_cast %394 : vector<8xf32> to vector<8x1xf32>
    %396 = tpu.reciprocal %395 {approx = true} : vector<8x1xf32> -> vector<8x1xf32>
    %397 = vector.broadcast %396 : vector<8x1xf32> to vector<8x8xf32>
    %398 = arith.mulf %393, %397 : vector<8x8xf32>
    %cst_127 = arith.constant dense<0.000000e+00> : vector<8x32xf32>
    %399 = tpu.matmul %398, %319, %cst_127 {dimension_numbers = #tpu.dot_dimension_numbers<[1], [0], [0], [1], [0, 0, 1, 1], [], []>} : vector<8x8xf32>, vector<8x32xf32>, vector<8x32xf32> -> vector<8x32xf32>
    %400 = vector.broadcast %384 : vector<1x32xf32> to vector<8x32xf32>
    %401 = arith.mulf %399, %400 : vector<8x32xf32>
    %402 = arith.addf %382, %401 : vector<8x32xf32>
    %403 = vector.extract_strided_slice %302 {offsets = [8, 0], sizes = [8, 32], strides = [1, 1]} : vector<16x32xf32> to vector<8x32xf32>
    %404 = vector.extract_strided_slice %309 {offsets = [8, 0], sizes = [8, 32], strides = [1, 1]} : vector<16x32xf32> to vector<8x32xf32>
    %405 = vector.extract_strided_slice %316 {offsets = [8, 0], sizes = [8, 32], strides = [1, 1]} : vector<16x32xf32> to vector<8x32xf32>
    %406 = vector.extract_strided_slice %1 {offsets = [1, 0, 0], sizes = [1, 8, 8], strides = [1, 1, 1]} : vector<2x8x8xf32> to vector<1x8x8xf32>
    %407 = vector.shape_cast %406 : vector<1x8x8xf32> to vector<8x8xf32>
    %cst_128 = arith.constant 0.000000e+00 : f32
    %408 = vector.broadcast %cst_128 : f32 to vector<8x32xf32>
    %409 = vector.extract_strided_slice %0 {offsets = [0, 0, 0], sizes = [1, 1, 32], strides = [1, 1, 1]} : vector<4x1x32xf32> to vector<1x1x32xf32>
    %410 = vector.shape_cast %409 : vector<1x1x32xf32> to vector<1x32xf32>
    %411 = vector.broadcast %410 : vector<1x32xf32> to vector<8x32xf32>
    %412 = arith.mulf %403, %411 : vector<8x32xf32>
    %cst_129 = arith.constant dense<0.000000e+00> : vector<8x8xf32>
    %413 = tpu.matmul %412, %404, %cst_129 {dimension_numbers = #tpu.dot_dimension_numbers<[1], [1], [0], [0], [0, 0, 1, 0], [], []>} : vector<8x32xf32>, vector<8x32xf32>, vector<8x8xf32> -> vector<8x8xf32>
    %414 = arith.addf %413, %407 : vector<8x8xf32>
    %cst_130 = arith.constant dense<0xFF800000> : vector<8xf32>
    %415 = vector.multi_reduction <maximumf>, %414, %cst_130 [1] : vector<8x8xf32> to vector<8xf32>
    %416 = vector.shape_cast %415 : vector<8xf32> to vector<8x1xf32>
    %417 = vector.broadcast %416 : vector<8x1xf32> to vector<8x8xf32>
    %418 = arith.subf %414, %417 : vector<8x8xf32>
    %419 = math.exp %418 : vector<8x8xf32>
    %cst_131 = arith.constant dense<0.000000e+00> : vector<8xf32>
    %420 = vector.multi_reduction <add>, %419, %cst_131 [1] : vector<8x8xf32> to vector<8xf32>
    %421 = vector.shape_cast %420 : vector<8xf32> to vector<8x1xf32>
    %422 = tpu.reciprocal %421 {approx = true} : vector<8x1xf32> -> vector<8x1xf32>
    %423 = vector.broadcast %422 : vector<8x1xf32> to vector<8x8xf32>
    %424 = arith.mulf %419, %423 : vector<8x8xf32>
    %cst_132 = arith.constant dense<0.000000e+00> : vector<8x32xf32>
    %425 = tpu.matmul %424, %405, %cst_132 {dimension_numbers = #tpu.dot_dimension_numbers<[1], [0], [0], [1], [0, 0, 1, 1], [], []>} : vector<8x8xf32>, vector<8x32xf32>, vector<8x32xf32> -> vector<8x32xf32>
    %426 = vector.broadcast %410 : vector<1x32xf32> to vector<8x32xf32>
    %427 = arith.mulf %425, %426 : vector<8x32xf32>
    %428 = arith.addf %408, %427 : vector<8x32xf32>
    %429 = vector.extract_strided_slice %0 {offsets = [1, 0, 0], sizes = [1, 1, 32], strides = [1, 1, 1]} : vector<4x1x32xf32> to vector<1x1x32xf32>
    %430 = vector.shape_cast %429 : vector<1x1x32xf32> to vector<1x32xf32>
    %431 = vector.broadcast %430 : vector<1x32xf32> to vector<8x32xf32>
    %432 = arith.mulf %403, %431 : vector<8x32xf32>
    %cst_133 = arith.constant dense<0.000000e+00> : vector<8x8xf32>
    %433 = tpu.matmul %432, %404, %cst_133 {dimension_numbers = #tpu.dot_dimension_numbers<[1], [1], [0], [0], [0, 0, 1, 0], [], []>} : vector<8x32xf32>, vector<8x32xf32>, vector<8x8xf32> -> vector<8x8xf32>
    %434 = arith.addf %433, %407 : vector<8x8xf32>
    %cst_134 = arith.constant dense<0xFF800000> : vector<8xf32>
    %435 = vector.multi_reduction <maximumf>, %434, %cst_134 [1] : vector<8x8xf32> to vector<8xf32>
    %436 = vector.shape_cast %435 : vector<8xf32> to vector<8x1xf32>
    %437 = vector.broadcast %436 : vector<8x1xf32> to vector<8x8xf32>
    %438 = arith.subf %434, %437 : vector<8x8xf32>
    %439 = math.exp %438 : vector<8x8xf32>
    %cst_135 = arith.constant dense<0.000000e+00> : vector<8xf32>
    %440 = vector.multi_reduction <add>, %439, %cst_135 [1] : vector<8x8xf32> to vector<8xf32>
    %441 = vector.shape_cast %440 : vector<8xf32> to vector<8x1xf32>
    %442 = tpu.reciprocal %441 {approx = true} : vector<8x1xf32> -> vector<8x1xf32>
    %443 = vector.broadcast %442 : vector<8x1xf32> to vector<8x8xf32>
    %444 = arith.mulf %439, %443 : vector<8x8xf32>
    %cst_136 = arith.constant dense<0.000000e+00> : vector<8x32xf32>
    %445 = tpu.matmul %444, %405, %cst_136 {dimension_numbers = #tpu.dot_dimension_numbers<[1], [0], [0], [1], [0, 0, 1, 1], [], []>} : vector<8x8xf32>, vector<8x32xf32>, vector<8x32xf32> -> vector<8x32xf32>
    %446 = vector.broadcast %430 : vector<1x32xf32> to vector<8x32xf32>
    %447 = arith.mulf %445, %446 : vector<8x32xf32>
    %448 = arith.addf %428, %447 : vector<8x32xf32>
    %449 = vector.extract_strided_slice %0 {offsets = [2, 0, 0], sizes = [1, 1, 32], strides = [1, 1, 1]} : vector<4x1x32xf32> to vector<1x1x32xf32>
    %450 = vector.shape_cast %449 : vector<1x1x32xf32> to vector<1x32xf32>
    %451 = vector.broadcast %450 : vector<1x32xf32> to vector<8x32xf32>
    %452 = arith.mulf %403, %451 : vector<8x32xf32>
    %cst_137 = arith.constant dense<0.000000e+00> : vector<8x8xf32>
    %453 = tpu.matmul %452, %404, %cst_137 {dimension_numbers = #tpu.dot_dimension_numbers<[1], [1], [0], [0], [0, 0, 1, 0], [], []>} : vector<8x32xf32>, vector<8x32xf32>, vector<8x8xf32> -> vector<8x8xf32>
    %454 = arith.addf %453, %407 : vector<8x8xf32>
    %cst_138 = arith.constant dense<0xFF800000> : vector<8xf32>
    %455 = vector.multi_reduction <maximumf>, %454, %cst_138 [1] : vector<8x8xf32> to vector<8xf32>
    %456 = vector.shape_cast %455 : vector<8xf32> to vector<8x1xf32>
    %457 = vector.broadcast %456 : vector<8x1xf32> to vector<8x8xf32>
    %458 = arith.subf %454, %457 : vector<8x8xf32>
    %459 = math.exp %458 : vector<8x8xf32>
    %cst_139 = arith.constant dense<0.000000e+00> : vector<8xf32>
    %460 = vector.multi_reduction <add>, %459, %cst_139 [1] : vector<8x8xf32> to vector<8xf32>
    %461 = vector.shape_cast %460 : vector<8xf32> to vector<8x1xf32>
    %462 = tpu.reciprocal %461 {approx = true} : vector<8x1xf32> -> vector<8x1xf32>
    %463 = vector.broadcast %462 : vector<8x1xf32> to vector<8x8xf32>
    %464 = arith.mulf %459, %463 : vector<8x8xf32>
    %cst_140 = arith.constant dense<0.000000e+00> : vector<8x32xf32>
    %465 = tpu.matmul %464, %405, %cst_140 {dimension_numbers = #tpu.dot_dimension_numbers<[1], [0], [0], [1], [0, 0, 1, 1], [], []>} : vector<8x8xf32>, vector<8x32xf32>, vector<8x32xf32> -> vector<8x32xf32>
    %466 = vector.broadcast %450 : vector<1x32xf32> to vector<8x32xf32>
    %467 = arith.mulf %465, %466 : vector<8x32xf32>
    %468 = arith.addf %448, %467 : vector<8x32xf32>
    %469 = vector.extract_strided_slice %0 {offsets = [3, 0, 0], sizes = [1, 1, 32], strides = [1, 1, 1]} : vector<4x1x32xf32> to vector<1x1x32xf32>
    %470 = vector.shape_cast %469 : vector<1x1x32xf32> to vector<1x32xf32>
    %471 = vector.broadcast %470 : vector<1x32xf32> to vector<8x32xf32>
    %472 = arith.mulf %403, %471 : vector<8x32xf32>
    %cst_141 = arith.constant dense<0.000000e+00> : vector<8x8xf32>
    %473 = tpu.matmul %472, %404, %cst_141 {dimension_numbers = #tpu.dot_dimension_numbers<[1], [1], [0], [0], [0, 0, 1, 0], [], []>} : vector<8x32xf32>, vector<8x32xf32>, vector<8x8xf32> -> vector<8x8xf32>
    %474 = arith.addf %473, %407 : vector<8x8xf32>
    %cst_142 = arith.constant dense<0xFF800000> : vector<8xf32>
    %475 = vector.multi_reduction <maximumf>, %474, %cst_142 [1] : vector<8x8xf32> to vector<8xf32>
    %476 = vector.shape_cast %475 : vector<8xf32> to vector<8x1xf32>
    %477 = vector.broadcast %476 : vector<8x1xf32> to vector<8x8xf32>
    %478 = arith.subf %474, %477 : vector<8x8xf32>
    %479 = math.exp %478 : vector<8x8xf32>
    %cst_143 = arith.constant dense<0.000000e+00> : vector<8xf32>
    %480 = vector.multi_reduction <add>, %479, %cst_143 [1] : vector<8x8xf32> to vector<8xf32>
    %481 = vector.shape_cast %480 : vector<8xf32> to vector<8x1xf32>
    %482 = tpu.reciprocal %481 {approx = true} : vector<8x1xf32> -> vector<8x1xf32>
    %483 = vector.broadcast %482 : vector<8x1xf32> to vector<8x8xf32>
    %484 = arith.mulf %479, %483 : vector<8x8xf32>
    %cst_144 = arith.constant dense<0.000000e+00> : vector<8x32xf32>
    %485 = tpu.matmul %484, %405, %cst_144 {dimension_numbers = #tpu.dot_dimension_numbers<[1], [0], [0], [1], [0, 0, 1, 1], [], []>} : vector<8x8xf32>, vector<8x32xf32>, vector<8x32xf32> -> vector<8x32xf32>
    %486 = vector.broadcast %470 : vector<1x32xf32> to vector<8x32xf32>
    %487 = arith.mulf %485, %486 : vector<8x32xf32>
    %488 = arith.addf %468, %487 : vector<8x32xf32>
    %489 = tpu.concatenate %402, %488 in 0 : vector<8x32xf32>, vector<8x32xf32> -> vector<16x32xf32>
    %490 = vector.extract_strided_slice %287 {offsets = [3, 0, 0], sizes = [1, 32, 32], strides = [1, 1, 1]} : vector<4x32x32xf32> to vector<1x32x32xf32>
    %491 = vector.shape_cast %490 : vector<1x32x32xf32> to vector<32x32xf32>
    %cst_145 = arith.constant dense<0.000000e+00> : vector<16x32xf32>
    %492 = tpu.matmul %489, %491, %cst_145 {dimension_numbers = #tpu.dot_dimension_numbers<[1], [0], [0], [1], [0, 0, 1, 1], [], []>} : vector<16x32xf32>, vector<32x32xf32>, vector<16x32xf32> -> vector<16x32xf32>
    %493 = vector.extract_strided_slice %289 {offsets = [3, 0, 0], sizes = [1, 1, 32], strides = [1, 1, 1]} : vector<4x1x32xf32> to vector<1x1x32xf32>
    %494 = vector.shape_cast %493 : vector<1x1x32xf32> to vector<1x32xf32>
    %495 = vector.broadcast %494 : vector<1x32xf32> to vector<16x32xf32>
    %496 = arith.addf %492, %495 : vector<16x32xf32>
    %497 = arith.addf %285, %496 : vector<16x32xf32>
    %498 = vector.extract_strided_slice %291 {offsets = [0, 0, 0], sizes = [1, 1, 32], strides = [1, 1, 1]} : vector<2x1x32xf32> to vector<1x1x32xf32>
    %499 = vector.shape_cast %498 : vector<1x1x32xf32> to vector<1x32xf32>
    %500 = vector.extract_strided_slice %293 {offsets = [0, 0, 0], sizes = [1, 1, 32], strides = [1, 1, 1]} : vector<2x1x32xf32> to vector<1x1x32xf32>
    %501 = vector.shape_cast %500 : vector<1x1x32xf32> to vector<1x32xf32>
    %cst_146 = arith.constant dense<0.000000e+00> : vector<16xf32>
    %502 = vector.multi_reduction <add>, %497, %cst_146 [1] : vector<16x32xf32> to vector<16xf32>
    %503 = vector.shape_cast %502 : vector<16xf32> to vector<16x1xf32>
    %cst_147 = arith.constant 3.200000e+01 : f32
    %504 = vector.broadcast %cst_147 : f32 to vector<16x1xf32>
    %505 = arith.divf %503, %504 : vector<16x1xf32>
    %506 = vector.broadcast %505 : vector<16x1xf32> to vector<16x32xf32>
    %507 = arith.subf %497, %506 : vector<16x32xf32>
    %508 = arith.mulf %507, %507 : vector<16x32xf32>
    %cst_148 = arith.constant dense<0.000000e+00> : vector<16xf32>
    %509 = vector.multi_reduction <add>, %508, %cst_148 [1] : vector<16x32xf32> to vector<16xf32>
    %510 = vector.shape_cast %509 : vector<16xf32> to vector<16x1xf32>
    %cst_149 = arith.constant 3.200000e+01 : f32
    %511 = vector.broadcast %cst_149 : f32 to vector<16x1xf32>
    %512 = arith.divf %510, %511 : vector<16x1xf32>
    %513 = vector.broadcast %505 : vector<16x1xf32> to vector<16x32xf32>
    %514 = arith.subf %497, %513 : vector<16x32xf32>
    %cst_150 = arith.constant 9.99999974E-6 : f32
    %515 = vector.broadcast %cst_150 : f32 to vector<16x1xf32>
    %516 = arith.addf %512, %515 : vector<16x1xf32>
    %517 = math.rsqrt %516 : vector<16x1xf32>
    %518 = vector.broadcast %517 : vector<16x1xf32> to vector<16x32xf32>
    %519 = arith.mulf %514, %518 : vector<16x32xf32>
    %520 = vector.broadcast %499 : vector<1x32xf32> to vector<16x32xf32>
    %521 = arith.mulf %519, %520 : vector<16x32xf32>
    %522 = vector.broadcast %501 : vector<1x32xf32> to vector<16x32xf32>
    %523 = arith.addf %521, %522 : vector<16x32xf32>
    %c1_151 = arith.constant 1 : index
    %c0_152 = arith.constant 0 : index
    %c0_153 = arith.constant 0 : index
    %524 = vector.load %arg10[%c1_151, %c0_152, %c0_153] : memref<2x32x64xf32, #tpu.memory_space<vmem>>, vector<1x32x64xf32>
    %525 = vector.shape_cast %524 : vector<1x32x64xf32> to vector<32x64xf32>
    %cst_154 = arith.constant dense<0.000000e+00> : vector<16x64xf32>
    %526 = tpu.matmul %523, %525, %cst_154 {dimension_numbers = #tpu.dot_dimension_numbers<[1], [0], [0], [1], [0, 0, 1, 1], [], []>} : vector<16x32xf32>, vector<32x64xf32>, vector<16x64xf32> -> vector<16x64xf32>
    %c1_155 = arith.constant 1 : index
    %c0_156 = arith.constant 0 : index
    %c0_157 = arith.constant 0 : index
    %527 = vector.load %arg11[%c1_155, %c0_156, %c0_157] : memref<2x1x64xf32, #tpu.memory_space<vmem>>, vector<1x1x64xf32>
    %528 = vector.shape_cast %527 : vector<1x1x64xf32> to vector<1x64xf32>
    %529 = vector.broadcast %528 : vector<1x64xf32> to vector<16x64xf32>
    %530 = arith.addf %526, %529 : vector<16x64xf32>
    %cst_158 = arith.constant 0.000000e+00 : f32
    %531 = vector.broadcast %cst_158 : f32 to vector<16x64xf32>
    %532 = arith.maximumf %530, %531 : vector<16x64xf32>
    %c1_159 = arith.constant 1 : index
    %c0_160 = arith.constant 0 : index
    %c0_161 = arith.constant 0 : index
    %533 = vector.load %arg12[%c1_159, %c0_160, %c0_161] : memref<2x64x32xf32, #tpu.memory_space<vmem>>, vector<1x64x32xf32>
    %534 = vector.shape_cast %533 : vector<1x64x32xf32> to vector<64x32xf32>
    %cst_162 = arith.constant dense<0.000000e+00> : vector<16x32xf32>
    %535 = tpu.matmul %532, %534, %cst_162 {dimension_numbers = #tpu.dot_dimension_numbers<[1], [0], [0], [1], [0, 0, 1, 1], [], []>} : vector<16x64xf32>, vector<64x32xf32>, vector<16x32xf32> -> vector<16x32xf32>
    %c1_163 = arith.constant 1 : index
    %c0_164 = arith.constant 0 : index
    %c0_165 = arith.constant 0 : index
    %536 = vector.load %arg13[%c1_163, %c0_164, %c0_165] : memref<2x1x32xf32, #tpu.memory_space<vmem>>, vector<1x1x32xf32>
    %537 = vector.shape_cast %536 : vector<1x1x32xf32> to vector<1x32xf32>
    %538 = vector.broadcast %537 : vector<1x32xf32> to vector<16x32xf32>
    %539 = arith.addf %535, %538 : vector<16x32xf32>
    %540 = arith.addf %523, %539 : vector<16x32xf32>
    %541 = vector.extract_strided_slice %291 {offsets = [1, 0, 0], sizes = [1, 1, 32], strides = [1, 1, 1]} : vector<2x1x32xf32> to vector<1x1x32xf32>
    %542 = vector.shape_cast %541 : vector<1x1x32xf32> to vector<1x32xf32>
    %543 = vector.extract_strided_slice %293 {offsets = [1, 0, 0], sizes = [1, 1, 32], strides = [1, 1, 1]} : vector<2x1x32xf32> to vector<1x1x32xf32>
    %544 = vector.shape_cast %543 : vector<1x1x32xf32> to vector<1x32xf32>
    %cst_166 = arith.constant dense<0.000000e+00> : vector<16xf32>
    %545 = vector.multi_reduction <add>, %540, %cst_166 [1] : vector<16x32xf32> to vector<16xf32>
    %546 = vector.shape_cast %545 : vector<16xf32> to vector<16x1xf32>
    %cst_167 = arith.constant 3.200000e+01 : f32
    %547 = vector.broadcast %cst_167 : f32 to vector<16x1xf32>
    %548 = arith.divf %546, %547 : vector<16x1xf32>
    %549 = vector.broadcast %548 : vector<16x1xf32> to vector<16x32xf32>
    %550 = arith.subf %540, %549 : vector<16x32xf32>
    %551 = arith.mulf %550, %550 : vector<16x32xf32>
    %cst_168 = arith.constant dense<0.000000e+00> : vector<16xf32>
    %552 = vector.multi_reduction <add>, %551, %cst_168 [1] : vector<16x32xf32> to vector<16xf32>
    %553 = vector.shape_cast %552 : vector<16xf32> to vector<16x1xf32>
    %cst_169 = arith.constant 3.200000e+01 : f32
    %554 = vector.broadcast %cst_169 : f32 to vector<16x1xf32>
    %555 = arith.divf %553, %554 : vector<16x1xf32>
    %556 = vector.broadcast %548 : vector<16x1xf32> to vector<16x32xf32>
    %557 = arith.subf %540, %556 : vector<16x32xf32>
    %cst_170 = arith.constant 9.99999974E-6 : f32
    %558 = vector.broadcast %cst_170 : f32 to vector<16x1xf32>
    %559 = arith.addf %555, %558 : vector<16x1xf32>
    %560 = math.rsqrt %559 : vector<16x1xf32>
    %561 = vector.broadcast %560 : vector<16x1xf32> to vector<16x32xf32>
    %562 = arith.mulf %557, %561 : vector<16x32xf32>
    %563 = vector.broadcast %542 : vector<1x32xf32> to vector<16x32xf32>
    %564 = arith.mulf %562, %563 : vector<16x32xf32>
    %565 = vector.broadcast %544 : vector<1x32xf32> to vector<16x32xf32>
    %566 = arith.addf %564, %565 : vector<16x32xf32>
    %c0_171 = arith.constant 0 : index
    %c0_172 = arith.constant 0 : index
    %567 = vector.load %arg1[%c0_171, %c0_172] : memref<16x32xf32, #tpu.memory_space<vmem>>, vector<16x32xf32>
    %c0_173 = arith.constant 0 : index
    %c0_174 = arith.constant 0 : index
    %c0_175 = arith.constant 0 : index
    %c0_176 = arith.constant 0 : index
    %568 = vector.load %arg14[%c0_173, %c0_174, %c0_175, %c0_176] : memref<2x4x32x32xf32, #tpu.memory_space<vmem>>, vector<1x4x32x32xf32>
    %569 = vector.shape_cast %568 : vector<1x4x32x32xf32> to vector<4x32x32xf32>
    %c0_177 = arith.constant 0 : index
    %c0_178 = arith.constant 0 : index
    %c0_179 = arith.constant 0 : index
    %c0_180 = arith.constant 0 : index
    %570 = vector.load %arg15[%c0_177, %c0_178, %c0_179, %c0_180] : memref<2x4x1x32xf32, #tpu.memory_space<vmem>>, vector<1x4x1x32xf32>
    %571 = vector.shape_cast %570 : vector<1x4x1x32xf32> to vector<4x1x32xf32>
    %c0_181 = arith.constant 0 : index
    %c0_182 = arith.constant 0 : index
    %c0_183 = arith.constant 0 : index
    %c0_184 = arith.constant 0 : index
    %572 = vector.load %arg16[%c0_181, %c0_182, %c0_183, %c0_184] : memref<2x4x32x32xf32, #tpu.memory_space<vmem>>, vector<1x4x32x32xf32>
    %573 = vector.shape_cast %572 : vector<1x4x32x32xf32> to vector<4x32x32xf32>
    %c0_185 = arith.constant 0 : index
    %c0_186 = arith.constant 0 : index
    %c0_187 = arith.constant 0 : index
    %c0_188 = arith.constant 0 : index
    %574 = vector.load %arg17[%c0_185, %c0_186, %c0_187, %c0_188] : memref<2x4x1x32xf32, #tpu.memory_space<vmem>>, vector<1x4x1x32xf32>
    %575 = vector.shape_cast %574 : vector<1x4x1x32xf32> to vector<4x1x32xf32>
    %c0_189 = arith.constant 0 : index
    %c0_190 = arith.constant 0 : index
    %c0_191 = arith.constant 0 : index
    %c0_192 = arith.constant 0 : index
    %576 = vector.load %arg18[%c0_189, %c0_190, %c0_191, %c0_192] : memref<2x3x1x32xf32, #tpu.memory_space<vmem>>, vector<1x3x1x32xf32>
    %577 = vector.shape_cast %576 : vector<1x3x1x32xf32> to vector<3x1x32xf32>
    %c0_193 = arith.constant 0 : index
    %c0_194 = arith.constant 0 : index
    %c0_195 = arith.constant 0 : index
    %c0_196 = arith.constant 0 : index
    %578 = vector.load %arg19[%c0_193, %c0_194, %c0_195, %c0_196] : memref<2x3x1x32xf32, #tpu.memory_space<vmem>>, vector<1x3x1x32xf32>
    %579 = vector.shape_cast %578 : vector<1x3x1x32xf32> to vector<3x1x32xf32>
    %580 = vector.extract_strided_slice %569 {offsets = [0, 0, 0], sizes = [1, 32, 32], strides = [1, 1, 1]} : vector<4x32x32xf32> to vector<1x32x32xf32>
    %581 = vector.shape_cast %580 : vector<1x32x32xf32> to vector<32x32xf32>
    %cst_197 = arith.constant dense<0.000000e+00> : vector<16x32xf32>
    %582 = tpu.matmul %567, %581, %cst_197 {dimension_numbers = #tpu.dot_dimension_numbers<[1], [0], [0], [1], [0, 0, 1, 1], [], []>} : vector<16x32xf32>, vector<32x32xf32>, vector<16x32xf32> -> vector<16x32xf32>
    %583 = vector.extract_strided_slice %571 {offsets = [0, 0, 0], sizes = [1, 1, 32], strides = [1, 1, 1]} : vector<4x1x32xf32> to vector<1x1x32xf32>
    %584 = vector.shape_cast %583 : vector<1x1x32xf32> to vector<1x32xf32>
    %585 = vector.broadcast %584 : vector<1x32xf32> to vector<16x32xf32>
    %586 = arith.addf %582, %585 : vector<16x32xf32>
    %cst_198 = arith.constant 0.353553385 : f32
    %587 = vector.broadcast %cst_198 : f32 to vector<16x32xf32>
    %588 = arith.mulf %586, %587 : vector<16x32xf32>
    %589 = vector.extract_strided_slice %569 {offsets = [1, 0, 0], sizes = [1, 32, 32], strides = [1, 1, 1]} : vector<4x32x32xf32> to vector<1x32x32xf32>
    %590 = vector.shape_cast %589 : vector<1x32x32xf32> to vector<32x32xf32>
    %cst_199 = arith.constant dense<0.000000e+00> : vector<16x32xf32>
    %591 = tpu.matmul %567, %590, %cst_199 {dimension_numbers = #tpu.dot_dimension_numbers<[1], [0], [0], [1], [0, 0, 1, 1], [], []>} : vector<16x32xf32>, vector<32x32xf32>, vector<16x32xf32> -> vector<16x32xf32>
    %592 = vector.extract_strided_slice %571 {offsets = [1, 0, 0], sizes = [1, 1, 32], strides = [1, 1, 1]} : vector<4x1x32xf32> to vector<1x1x32xf32>
    %593 = vector.shape_cast %592 : vector<1x1x32xf32> to vector<1x32xf32>
    %594 = vector.broadcast %593 : vector<1x32xf32> to vector<16x32xf32>
    %595 = arith.addf %591, %594 : vector<16x32xf32>
    %596 = vector.extract_strided_slice %569 {offsets = [2, 0, 0], sizes = [1, 32, 32], strides = [1, 1, 1]} : vector<4x32x32xf32> to vector<1x32x32xf32>
    %597 = vector.shape_cast %596 : vector<1x32x32xf32> to vector<32x32xf32>
    %cst_200 = arith.constant dense<0.000000e+00> : vector<16x32xf32>
    %598 = tpu.matmul %567, %597, %cst_200 {dimension_numbers = #tpu.dot_dimension_numbers<[1], [0], [0], [1], [0, 0, 1, 1], [], []>} : vector<16x32xf32>, vector<32x32xf32>, vector<16x32xf32> -> vector<16x32xf32>
    %599 = vector.extract_strided_slice %571 {offsets = [2, 0, 0], sizes = [1, 1, 32], strides = [1, 1, 1]} : vector<4x1x32xf32> to vector<1x1x32xf32>
    %600 = vector.shape_cast %599 : vector<1x1x32xf32> to vector<1x32xf32>
    %601 = vector.broadcast %600 : vector<1x32xf32> to vector<16x32xf32>
    %602 = arith.addf %598, %601 : vector<16x32xf32>
    %603 = vector.extract_strided_slice %588 {offsets = [0, 0], sizes = [8, 32], strides = [1, 1]} : vector<16x32xf32> to vector<8x32xf32>
    %604 = vector.extract_strided_slice %595 {offsets = [0, 0], sizes = [8, 32], strides = [1, 1]} : vector<16x32xf32> to vector<8x32xf32>
    %605 = vector.extract_strided_slice %602 {offsets = [0, 0], sizes = [8, 32], strides = [1, 1]} : vector<16x32xf32> to vector<8x32xf32>
    %606 = vector.extract_strided_slice %2 {offsets = [0, 0, 0], sizes = [1, 8, 8], strides = [1, 1, 1]} : vector<2x8x8xf32> to vector<1x8x8xf32>
    %607 = vector.shape_cast %606 : vector<1x8x8xf32> to vector<8x8xf32>
    %cst_201 = arith.constant 0.000000e+00 : f32
    %608 = vector.broadcast %cst_201 : f32 to vector<8x32xf32>
    %609 = vector.extract_strided_slice %0 {offsets = [0, 0, 0], sizes = [1, 1, 32], strides = [1, 1, 1]} : vector<4x1x32xf32> to vector<1x1x32xf32>
    %610 = vector.shape_cast %609 : vector<1x1x32xf32> to vector<1x32xf32>
    %611 = vector.broadcast %610 : vector<1x32xf32> to vector<8x32xf32>
    %612 = arith.mulf %603, %611 : vector<8x32xf32>
    %cst_202 = arith.constant dense<0.000000e+00> : vector<8x8xf32>
    %613 = tpu.matmul %612, %604, %cst_202 {dimension_numbers = #tpu.dot_dimension_numbers<[1], [1], [0], [0], [0, 0, 1, 0], [], []>} : vector<8x32xf32>, vector<8x32xf32>, vector<8x8xf32> -> vector<8x8xf32>
    %614 = arith.addf %613, %607 : vector<8x8xf32>
    %cst_203 = arith.constant dense<0xFF800000> : vector<8xf32>
    %615 = vector.multi_reduction <maximumf>, %614, %cst_203 [1] : vector<8x8xf32> to vector<8xf32>
    %616 = vector.shape_cast %615 : vector<8xf32> to vector<8x1xf32>
    %617 = vector.broadcast %616 : vector<8x1xf32> to vector<8x8xf32>
    %618 = arith.subf %614, %617 : vector<8x8xf32>
    %619 = math.exp %618 : vector<8x8xf32>
    %cst_204 = arith.constant dense<0.000000e+00> : vector<8xf32>
    %620 = vector.multi_reduction <add>, %619, %cst_204 [1] : vector<8x8xf32> to vector<8xf32>
    %621 = vector.shape_cast %620 : vector<8xf32> to vector<8x1xf32>
    %622 = tpu.reciprocal %621 {approx = true} : vector<8x1xf32> -> vector<8x1xf32>
    %623 = vector.broadcast %622 : vector<8x1xf32> to vector<8x8xf32>
    %624 = arith.mulf %619, %623 : vector<8x8xf32>
    %cst_205 = arith.constant dense<0.000000e+00> : vector<8x32xf32>
    %625 = tpu.matmul %624, %605, %cst_205 {dimension_numbers = #tpu.dot_dimension_numbers<[1], [0], [0], [1], [0, 0, 1, 1], [], []>} : vector<8x8xf32>, vector<8x32xf32>, vector<8x32xf32> -> vector<8x32xf32>
    %626 = vector.broadcast %610 : vector<1x32xf32> to vector<8x32xf32>
    %627 = arith.mulf %625, %626 : vector<8x32xf32>
    %628 = arith.addf %608, %627 : vector<8x32xf32>
    %629 = vector.extract_strided_slice %0 {offsets = [1, 0, 0], sizes = [1, 1, 32], strides = [1, 1, 1]} : vector<4x1x32xf32> to vector<1x1x32xf32>
    %630 = vector.shape_cast %629 : vector<1x1x32xf32> to vector<1x32xf32>
    %631 = vector.broadcast %630 : vector<1x32xf32> to vector<8x32xf32>
    %632 = arith.mulf %603, %631 : vector<8x32xf32>
    %cst_206 = arith.constant dense<0.000000e+00> : vector<8x8xf32>
    %633 = tpu.matmul %632, %604, %cst_206 {dimension_numbers = #tpu.dot_dimension_numbers<[1], [1], [0], [0], [0, 0, 1, 0], [], []>} : vector<8x32xf32>, vector<8x32xf32>, vector<8x8xf32> -> vector<8x8xf32>
    %634 = arith.addf %633, %607 : vector<8x8xf32>
    %cst_207 = arith.constant dense<0xFF800000> : vector<8xf32>
    %635 = vector.multi_reduction <maximumf>, %634, %cst_207 [1] : vector<8x8xf32> to vector<8xf32>
    %636 = vector.shape_cast %635 : vector<8xf32> to vector<8x1xf32>
    %637 = vector.broadcast %636 : vector<8x1xf32> to vector<8x8xf32>
    %638 = arith.subf %634, %637 : vector<8x8xf32>
    %639 = math.exp %638 : vector<8x8xf32>
    %cst_208 = arith.constant dense<0.000000e+00> : vector<8xf32>
    %640 = vector.multi_reduction <add>, %639, %cst_208 [1] : vector<8x8xf32> to vector<8xf32>
    %641 = vector.shape_cast %640 : vector<8xf32> to vector<8x1xf32>
    %642 = tpu.reciprocal %641 {approx = true} : vector<8x1xf32> -> vector<8x1xf32>
    %643 = vector.broadcast %642 : vector<8x1xf32> to vector<8x8xf32>
    %644 = arith.mulf %639, %643 : vector<8x8xf32>
    %cst_209 = arith.constant dense<0.000000e+00> : vector<8x32xf32>
    %645 = tpu.matmul %644, %605, %cst_209 {dimension_numbers = #tpu.dot_dimension_numbers<[1], [0], [0], [1], [0, 0, 1, 1], [], []>} : vector<8x8xf32>, vector<8x32xf32>, vector<8x32xf32> -> vector<8x32xf32>
    %646 = vector.broadcast %630 : vector<1x32xf32> to vector<8x32xf32>
    %647 = arith.mulf %645, %646 : vector<8x32xf32>
    %648 = arith.addf %628, %647 : vector<8x32xf32>
    %649 = vector.extract_strided_slice %0 {offsets = [2, 0, 0], sizes = [1, 1, 32], strides = [1, 1, 1]} : vector<4x1x32xf32> to vector<1x1x32xf32>
    %650 = vector.shape_cast %649 : vector<1x1x32xf32> to vector<1x32xf32>
    %651 = vector.broadcast %650 : vector<1x32xf32> to vector<8x32xf32>
    %652 = arith.mulf %603, %651 : vector<8x32xf32>
    %cst_210 = arith.constant dense<0.000000e+00> : vector<8x8xf32>
    %653 = tpu.matmul %652, %604, %cst_210 {dimension_numbers = #tpu.dot_dimension_numbers<[1], [1], [0], [0], [0, 0, 1, 0], [], []>} : vector<8x32xf32>, vector<8x32xf32>, vector<8x8xf32> -> vector<8x8xf32>
    %654 = arith.addf %653, %607 : vector<8x8xf32>
    %cst_211 = arith.constant dense<0xFF800000> : vector<8xf32>
    %655 = vector.multi_reduction <maximumf>, %654, %cst_211 [1] : vector<8x8xf32> to vector<8xf32>
    %656 = vector.shape_cast %655 : vector<8xf32> to vector<8x1xf32>
    %657 = vector.broadcast %656 : vector<8x1xf32> to vector<8x8xf32>
    %658 = arith.subf %654, %657 : vector<8x8xf32>
    %659 = math.exp %658 : vector<8x8xf32>
    %cst_212 = arith.constant dense<0.000000e+00> : vector<8xf32>
    %660 = vector.multi_reduction <add>, %659, %cst_212 [1] : vector<8x8xf32> to vector<8xf32>
    %661 = vector.shape_cast %660 : vector<8xf32> to vector<8x1xf32>
    %662 = tpu.reciprocal %661 {approx = true} : vector<8x1xf32> -> vector<8x1xf32>
    %663 = vector.broadcast %662 : vector<8x1xf32> to vector<8x8xf32>
    %664 = arith.mulf %659, %663 : vector<8x8xf32>
    %cst_213 = arith.constant dense<0.000000e+00> : vector<8x32xf32>
    %665 = tpu.matmul %664, %605, %cst_213 {dimension_numbers = #tpu.dot_dimension_numbers<[1], [0], [0], [1], [0, 0, 1, 1], [], []>} : vector<8x8xf32>, vector<8x32xf32>, vector<8x32xf32> -> vector<8x32xf32>
    %666 = vector.broadcast %650 : vector<1x32xf32> to vector<8x32xf32>
    %667 = arith.mulf %665, %666 : vector<8x32xf32>
    %668 = arith.addf %648, %667 : vector<8x32xf32>
    %669 = vector.extract_strided_slice %0 {offsets = [3, 0, 0], sizes = [1, 1, 32], strides = [1, 1, 1]} : vector<4x1x32xf32> to vector<1x1x32xf32>
    %670 = vector.shape_cast %669 : vector<1x1x32xf32> to vector<1x32xf32>
    %671 = vector.broadcast %670 : vector<1x32xf32> to vector<8x32xf32>
    %672 = arith.mulf %603, %671 : vector<8x32xf32>
    %cst_214 = arith.constant dense<0.000000e+00> : vector<8x8xf32>
    %673 = tpu.matmul %672, %604, %cst_214 {dimension_numbers = #tpu.dot_dimension_numbers<[1], [1], [0], [0], [0, 0, 1, 0], [], []>} : vector<8x32xf32>, vector<8x32xf32>, vector<8x8xf32> -> vector<8x8xf32>
    %674 = arith.addf %673, %607 : vector<8x8xf32>
    %cst_215 = arith.constant dense<0xFF800000> : vector<8xf32>
    %675 = vector.multi_reduction <maximumf>, %674, %cst_215 [1] : vector<8x8xf32> to vector<8xf32>
    %676 = vector.shape_cast %675 : vector<8xf32> to vector<8x1xf32>
    %677 = vector.broadcast %676 : vector<8x1xf32> to vector<8x8xf32>
    %678 = arith.subf %674, %677 : vector<8x8xf32>
    %679 = math.exp %678 : vector<8x8xf32>
    %cst_216 = arith.constant dense<0.000000e+00> : vector<8xf32>
    %680 = vector.multi_reduction <add>, %679, %cst_216 [1] : vector<8x8xf32> to vector<8xf32>
    %681 = vector.shape_cast %680 : vector<8xf32> to vector<8x1xf32>
    %682 = tpu.reciprocal %681 {approx = true} : vector<8x1xf32> -> vector<8x1xf32>
    %683 = vector.broadcast %682 : vector<8x1xf32> to vector<8x8xf32>
    %684 = arith.mulf %679, %683 : vector<8x8xf32>
    %cst_217 = arith.constant dense<0.000000e+00> : vector<8x32xf32>
    %685 = tpu.matmul %684, %605, %cst_217 {dimension_numbers = #tpu.dot_dimension_numbers<[1], [0], [0], [1], [0, 0, 1, 1], [], []>} : vector<8x8xf32>, vector<8x32xf32>, vector<8x32xf32> -> vector<8x32xf32>
    %686 = vector.broadcast %670 : vector<1x32xf32> to vector<8x32xf32>
    %687 = arith.mulf %685, %686 : vector<8x32xf32>
    %688 = arith.addf %668, %687 : vector<8x32xf32>
    %689 = vector.extract_strided_slice %588 {offsets = [8, 0], sizes = [8, 32], strides = [1, 1]} : vector<16x32xf32> to vector<8x32xf32>
    %690 = vector.extract_strided_slice %595 {offsets = [8, 0], sizes = [8, 32], strides = [1, 1]} : vector<16x32xf32> to vector<8x32xf32>
    %691 = vector.extract_strided_slice %602 {offsets = [8, 0], sizes = [8, 32], strides = [1, 1]} : vector<16x32xf32> to vector<8x32xf32>
    %692 = vector.extract_strided_slice %2 {offsets = [1, 0, 0], sizes = [1, 8, 8], strides = [1, 1, 1]} : vector<2x8x8xf32> to vector<1x8x8xf32>
    %693 = vector.shape_cast %692 : vector<1x8x8xf32> to vector<8x8xf32>
    %cst_218 = arith.constant 0.000000e+00 : f32
    %694 = vector.broadcast %cst_218 : f32 to vector<8x32xf32>
    %695 = vector.extract_strided_slice %0 {offsets = [0, 0, 0], sizes = [1, 1, 32], strides = [1, 1, 1]} : vector<4x1x32xf32> to vector<1x1x32xf32>
    %696 = vector.shape_cast %695 : vector<1x1x32xf32> to vector<1x32xf32>
    %697 = vector.broadcast %696 : vector<1x32xf32> to vector<8x32xf32>
    %698 = arith.mulf %689, %697 : vector<8x32xf32>
    %cst_219 = arith.constant dense<0.000000e+00> : vector<8x8xf32>
    %699 = tpu.matmul %698, %690, %cst_219 {dimension_numbers = #tpu.dot_dimension_numbers<[1], [1], [0], [0], [0, 0, 1, 0], [], []>} : vector<8x32xf32>, vector<8x32xf32>, vector<8x8xf32> -> vector<8x8xf32>
    %700 = arith.addf %699, %693 : vector<8x8xf32>
    %cst_220 = arith.constant dense<0xFF800000> : vector<8xf32>
    %701 = vector.multi_reduction <maximumf>, %700, %cst_220 [1] : vector<8x8xf32> to vector<8xf32>
    %702 = vector.shape_cast %701 : vector<8xf32> to vector<8x1xf32>
    %703 = vector.broadcast %702 : vector<8x1xf32> to vector<8x8xf32>
    %704 = arith.subf %700, %703 : vector<8x8xf32>
    %705 = math.exp %704 : vector<8x8xf32>
    %cst_221 = arith.constant dense<0.000000e+00> : vector<8xf32>
    %706 = vector.multi_reduction <add>, %705, %cst_221 [1] : vector<8x8xf32> to vector<8xf32>
    %707 = vector.shape_cast %706 : vector<8xf32> to vector<8x1xf32>
    %708 = tpu.reciprocal %707 {approx = true} : vector<8x1xf32> -> vector<8x1xf32>
    %709 = vector.broadcast %708 : vector<8x1xf32> to vector<8x8xf32>
    %710 = arith.mulf %705, %709 : vector<8x8xf32>
    %cst_222 = arith.constant dense<0.000000e+00> : vector<8x32xf32>
    %711 = tpu.matmul %710, %691, %cst_222 {dimension_numbers = #tpu.dot_dimension_numbers<[1], [0], [0], [1], [0, 0, 1, 1], [], []>} : vector<8x8xf32>, vector<8x32xf32>, vector<8x32xf32> -> vector<8x32xf32>
    %712 = vector.broadcast %696 : vector<1x32xf32> to vector<8x32xf32>
    %713 = arith.mulf %711, %712 : vector<8x32xf32>
    %714 = arith.addf %694, %713 : vector<8x32xf32>
    %715 = vector.extract_strided_slice %0 {offsets = [1, 0, 0], sizes = [1, 1, 32], strides = [1, 1, 1]} : vector<4x1x32xf32> to vector<1x1x32xf32>
    %716 = vector.shape_cast %715 : vector<1x1x32xf32> to vector<1x32xf32>
    %717 = vector.broadcast %716 : vector<1x32xf32> to vector<8x32xf32>
    %718 = arith.mulf %689, %717 : vector<8x32xf32>
    %cst_223 = arith.constant dense<0.000000e+00> : vector<8x8xf32>
    %719 = tpu.matmul %718, %690, %cst_223 {dimension_numbers = #tpu.dot_dimension_numbers<[1], [1], [0], [0], [0, 0, 1, 0], [], []>} : vector<8x32xf32>, vector<8x32xf32>, vector<8x8xf32> -> vector<8x8xf32>
    %720 = arith.addf %719, %693 : vector<8x8xf32>
    %cst_224 = arith.constant dense<0xFF800000> : vector<8xf32>
    %721 = vector.multi_reduction <maximumf>, %720, %cst_224 [1] : vector<8x8xf32> to vector<8xf32>
    %722 = vector.shape_cast %721 : vector<8xf32> to vector<8x1xf32>
    %723 = vector.broadcast %722 : vector<8x1xf32> to vector<8x8xf32>
    %724 = arith.subf %720, %723 : vector<8x8xf32>
    %725 = math.exp %724 : vector<8x8xf32>
    %cst_225 = arith.constant dense<0.000000e+00> : vector<8xf32>
    %726 = vector.multi_reduction <add>, %725, %cst_225 [1] : vector<8x8xf32> to vector<8xf32>
    %727 = vector.shape_cast %726 : vector<8xf32> to vector<8x1xf32>
    %728 = tpu.reciprocal %727 {approx = true} : vector<8x1xf32> -> vector<8x1xf32>
    %729 = vector.broadcast %728 : vector<8x1xf32> to vector<8x8xf32>
    %730 = arith.mulf %725, %729 : vector<8x8xf32>
    %cst_226 = arith.constant dense<0.000000e+00> : vector<8x32xf32>
    %731 = tpu.matmul %730, %691, %cst_226 {dimension_numbers = #tpu.dot_dimension_numbers<[1], [0], [0], [1], [0, 0, 1, 1], [], []>} : vector<8x8xf32>, vector<8x32xf32>, vector<8x32xf32> -> vector<8x32xf32>
    %732 = vector.broadcast %716 : vector<1x32xf32> to vector<8x32xf32>
    %733 = arith.mulf %731, %732 : vector<8x32xf32>
    %734 = arith.addf %714, %733 : vector<8x32xf32>
    %735 = vector.extract_strided_slice %0 {offsets = [2, 0, 0], sizes = [1, 1, 32], strides = [1, 1, 1]} : vector<4x1x32xf32> to vector<1x1x32xf32>
    %736 = vector.shape_cast %735 : vector<1x1x32xf32> to vector<1x32xf32>
    %737 = vector.broadcast %736 : vector<1x32xf32> to vector<8x32xf32>
    %738 = arith.mulf %689, %737 : vector<8x32xf32>
    %cst_227 = arith.constant dense<0.000000e+00> : vector<8x8xf32>
    %739 = tpu.matmul %738, %690, %cst_227 {dimension_numbers = #tpu.dot_dimension_numbers<[1], [1], [0], [0], [0, 0, 1, 0], [], []>} : vector<8x32xf32>, vector<8x32xf32>, vector<8x8xf32> -> vector<8x8xf32>
    %740 = arith.addf %739, %693 : vector<8x8xf32>
    %cst_228 = arith.constant dense<0xFF800000> : vector<8xf32>
    %741 = vector.multi_reduction <maximumf>, %740, %cst_228 [1] : vector<8x8xf32> to vector<8xf32>
    %742 = vector.shape_cast %741 : vector<8xf32> to vector<8x1xf32>
    %743 = vector.broadcast %742 : vector<8x1xf32> to vector<8x8xf32>
    %744 = arith.subf %740, %743 : vector<8x8xf32>
    %745 = math.exp %744 : vector<8x8xf32>
    %cst_229 = arith.constant dense<0.000000e+00> : vector<8xf32>
    %746 = vector.multi_reduction <add>, %745, %cst_229 [1] : vector<8x8xf32> to vector<8xf32>
    %747 = vector.shape_cast %746 : vector<8xf32> to vector<8x1xf32>
    %748 = tpu.reciprocal %747 {approx = true} : vector<8x1xf32> -> vector<8x1xf32>
    %749 = vector.broadcast %748 : vector<8x1xf32> to vector<8x8xf32>
    %750 = arith.mulf %745, %749 : vector<8x8xf32>
    %cst_230 = arith.constant dense<0.000000e+00> : vector<8x32xf32>
    %751 = tpu.matmul %750, %691, %cst_230 {dimension_numbers = #tpu.dot_dimension_numbers<[1], [0], [0], [1], [0, 0, 1, 1], [], []>} : vector<8x8xf32>, vector<8x32xf32>, vector<8x32xf32> -> vector<8x32xf32>
    %752 = vector.broadcast %736 : vector<1x32xf32> to vector<8x32xf32>
    %753 = arith.mulf %751, %752 : vector<8x32xf32>
    %754 = arith.addf %734, %753 : vector<8x32xf32>
    %755 = vector.extract_strided_slice %0 {offsets = [3, 0, 0], sizes = [1, 1, 32], strides = [1, 1, 1]} : vector<4x1x32xf32> to vector<1x1x32xf32>
    %756 = vector.shape_cast %755 : vector<1x1x32xf32> to vector<1x32xf32>
    %757 = vector.broadcast %756 : vector<1x32xf32> to vector<8x32xf32>
    %758 = arith.mulf %689, %757 : vector<8x32xf32>
    %cst_231 = arith.constant dense<0.000000e+00> : vector<8x8xf32>
    %759 = tpu.matmul %758, %690, %cst_231 {dimension_numbers = #tpu.dot_dimension_numbers<[1], [1], [0], [0], [0, 0, 1, 0], [], []>} : vector<8x32xf32>, vector<8x32xf32>, vector<8x8xf32> -> vector<8x8xf32>
    %760 = arith.addf %759, %693 : vector<8x8xf32>
    %cst_232 = arith.constant dense<0xFF800000> : vector<8xf32>
    %761 = vector.multi_reduction <maximumf>, %760, %cst_232 [1] : vector<8x8xf32> to vector<8xf32>
    %762 = vector.shape_cast %761 : vector<8xf32> to vector<8x1xf32>
    %763 = vector.broadcast %762 : vector<8x1xf32> to vector<8x8xf32>
    %764 = arith.subf %760, %763 : vector<8x8xf32>
    %765 = math.exp %764 : vector<8x8xf32>
    %cst_233 = arith.constant dense<0.000000e+00> : vector<8xf32>
    %766 = vector.multi_reduction <add>, %765, %cst_233 [1] : vector<8x8xf32> to vector<8xf32>
    %767 = vector.shape_cast %766 : vector<8xf32> to vector<8x1xf32>
    %768 = tpu.reciprocal %767 {approx = true} : vector<8x1xf32> -> vector<8x1xf32>
    %769 = vector.broadcast %768 : vector<8x1xf32> to vector<8x8xf32>
    %770 = arith.mulf %765, %769 : vector<8x8xf32>
    %cst_234 = arith.constant dense<0.000000e+00> : vector<8x32xf32>
    %771 = tpu.matmul %770, %691, %cst_234 {dimension_numbers = #tpu.dot_dimension_numbers<[1], [0], [0], [1], [0, 0, 1, 1], [], []>} : vector<8x8xf32>, vector<8x32xf32>, vector<8x32xf32> -> vector<8x32xf32>
    %772 = vector.broadcast %756 : vector<1x32xf32> to vector<8x32xf32>
    %773 = arith.mulf %771, %772 : vector<8x32xf32>
    %774 = arith.addf %754, %773 : vector<8x32xf32>
    %775 = tpu.concatenate %688, %774 in 0 : vector<8x32xf32>, vector<8x32xf32> -> vector<16x32xf32>
    %776 = vector.extract_strided_slice %569 {offsets = [3, 0, 0], sizes = [1, 32, 32], strides = [1, 1, 1]} : vector<4x32x32xf32> to vector<1x32x32xf32>
    %777 = vector.shape_cast %776 : vector<1x32x32xf32> to vector<32x32xf32>
    %cst_235 = arith.constant dense<0.000000e+00> : vector<16x32xf32>
    %778 = tpu.matmul %775, %777, %cst_235 {dimension_numbers = #tpu.dot_dimension_numbers<[1], [0], [0], [1], [0, 0, 1, 1], [], []>} : vector<16x32xf32>, vector<32x32xf32>, vector<16x32xf32> -> vector<16x32xf32>
    %779 = vector.extract_strided_slice %571 {offsets = [3, 0, 0], sizes = [1, 1, 32], strides = [1, 1, 1]} : vector<4x1x32xf32> to vector<1x1x32xf32>
    %780 = vector.shape_cast %779 : vector<1x1x32xf32> to vector<1x32xf32>
    %781 = vector.broadcast %780 : vector<1x32xf32> to vector<16x32xf32>
    %782 = arith.addf %778, %781 : vector<16x32xf32>
    %783 = arith.addf %567, %782 : vector<16x32xf32>
    %784 = vector.extract_strided_slice %577 {offsets = [0, 0, 0], sizes = [1, 1, 32], strides = [1, 1, 1]} : vector<3x1x32xf32> to vector<1x1x32xf32>
    %785 = vector.shape_cast %784 : vector<1x1x32xf32> to vector<1x32xf32>
    %786 = vector.extract_strided_slice %579 {offsets = [0, 0, 0], sizes = [1, 1, 32], strides = [1, 1, 1]} : vector<3x1x32xf32> to vector<1x1x32xf32>
    %787 = vector.shape_cast %786 : vector<1x1x32xf32> to vector<1x32xf32>
    %cst_236 = arith.constant dense<0.000000e+00> : vector<16xf32>
    %788 = vector.multi_reduction <add>, %783, %cst_236 [1] : vector<16x32xf32> to vector<16xf32>
    %789 = vector.shape_cast %788 : vector<16xf32> to vector<16x1xf32>
    %cst_237 = arith.constant 3.200000e+01 : f32
    %790 = vector.broadcast %cst_237 : f32 to vector<16x1xf32>
    %791 = arith.divf %789, %790 : vector<16x1xf32>
    %792 = vector.broadcast %791 : vector<16x1xf32> to vector<16x32xf32>
    %793 = arith.subf %783, %792 : vector<16x32xf32>
    %794 = arith.mulf %793, %793 : vector<16x32xf32>
    %cst_238 = arith.constant dense<0.000000e+00> : vector<16xf32>
    %795 = vector.multi_reduction <add>, %794, %cst_238 [1] : vector<16x32xf32> to vector<16xf32>
    %796 = vector.shape_cast %795 : vector<16xf32> to vector<16x1xf32>
    %cst_239 = arith.constant 3.200000e+01 : f32
    %797 = vector.broadcast %cst_239 : f32 to vector<16x1xf32>
    %798 = arith.divf %796, %797 : vector<16x1xf32>
    %799 = vector.broadcast %791 : vector<16x1xf32> to vector<16x32xf32>
    %800 = arith.subf %783, %799 : vector<16x32xf32>
    %cst_240 = arith.constant 9.99999974E-6 : f32
    %801 = vector.broadcast %cst_240 : f32 to vector<16x1xf32>
    %802 = arith.addf %798, %801 : vector<16x1xf32>
    %803 = math.rsqrt %802 : vector<16x1xf32>
    %804 = vector.broadcast %803 : vector<16x1xf32> to vector<16x32xf32>
    %805 = arith.mulf %800, %804 : vector<16x32xf32>
    %806 = vector.broadcast %785 : vector<1x32xf32> to vector<16x32xf32>
    %807 = arith.mulf %805, %806 : vector<16x32xf32>
    %808 = vector.broadcast %787 : vector<1x32xf32> to vector<16x32xf32>
    %809 = arith.addf %807, %808 : vector<16x32xf32>
    %810 = vector.extract_strided_slice %573 {offsets = [0, 0, 0], sizes = [1, 32, 32], strides = [1, 1, 1]} : vector<4x32x32xf32> to vector<1x32x32xf32>
    %811 = vector.shape_cast %810 : vector<1x32x32xf32> to vector<32x32xf32>
    %cst_241 = arith.constant dense<0.000000e+00> : vector<16x32xf32>
    %812 = tpu.matmul %809, %811, %cst_241 {dimension_numbers = #tpu.dot_dimension_numbers<[1], [0], [0], [1], [0, 0, 1, 1], [], []>} : vector<16x32xf32>, vector<32x32xf32>, vector<16x32xf32> -> vector<16x32xf32>
    %813 = vector.extract_strided_slice %575 {offsets = [0, 0, 0], sizes = [1, 1, 32], strides = [1, 1, 1]} : vector<4x1x32xf32> to vector<1x1x32xf32>
    %814 = vector.shape_cast %813 : vector<1x1x32xf32> to vector<1x32xf32>
    %815 = vector.broadcast %814 : vector<1x32xf32> to vector<16x32xf32>
    %816 = arith.addf %812, %815 : vector<16x32xf32>
    %cst_242 = arith.constant 0.353553385 : f32
    %817 = vector.broadcast %cst_242 : f32 to vector<16x32xf32>
    %818 = arith.mulf %816, %817 : vector<16x32xf32>
    %819 = vector.extract_strided_slice %573 {offsets = [1, 0, 0], sizes = [1, 32, 32], strides = [1, 1, 1]} : vector<4x32x32xf32> to vector<1x32x32xf32>
    %820 = vector.shape_cast %819 : vector<1x32x32xf32> to vector<32x32xf32>
    %cst_243 = arith.constant dense<0.000000e+00> : vector<16x32xf32>
    %821 = tpu.matmul %566, %820, %cst_243 {dimension_numbers = #tpu.dot_dimension_numbers<[1], [0], [0], [1], [0, 0, 1, 1], [], []>} : vector<16x32xf32>, vector<32x32xf32>, vector<16x32xf32> -> vector<16x32xf32>
    %822 = vector.extract_strided_slice %575 {offsets = [1, 0, 0], sizes = [1, 1, 32], strides = [1, 1, 1]} : vector<4x1x32xf32> to vector<1x1x32xf32>
    %823 = vector.shape_cast %822 : vector<1x1x32xf32> to vector<1x32xf32>
    %824 = vector.broadcast %823 : vector<1x32xf32> to vector<16x32xf32>
    %825 = arith.addf %821, %824 : vector<16x32xf32>
    %826 = vector.extract_strided_slice %573 {offsets = [2, 0, 0], sizes = [1, 32, 32], strides = [1, 1, 1]} : vector<4x32x32xf32> to vector<1x32x32xf32>
    %827 = vector.shape_cast %826 : vector<1x32x32xf32> to vector<32x32xf32>
    %cst_244 = arith.constant dense<0.000000e+00> : vector<16x32xf32>
    %828 = tpu.matmul %566, %827, %cst_244 {dimension_numbers = #tpu.dot_dimension_numbers<[1], [0], [0], [1], [0, 0, 1, 1], [], []>} : vector<16x32xf32>, vector<32x32xf32>, vector<16x32xf32> -> vector<16x32xf32>
    %829 = vector.extract_strided_slice %575 {offsets = [2, 0, 0], sizes = [1, 1, 32], strides = [1, 1, 1]} : vector<4x1x32xf32> to vector<1x1x32xf32>
    %830 = vector.shape_cast %829 : vector<1x1x32xf32> to vector<1x32xf32>
    %831 = vector.broadcast %830 : vector<1x32xf32> to vector<16x32xf32>
    %832 = arith.addf %828, %831 : vector<16x32xf32>
    %833 = vector.extract_strided_slice %818 {offsets = [0, 0], sizes = [8, 32], strides = [1, 1]} : vector<16x32xf32> to vector<8x32xf32>
    %834 = vector.extract_strided_slice %825 {offsets = [0, 0], sizes = [8, 32], strides = [1, 1]} : vector<16x32xf32> to vector<8x32xf32>
    %835 = vector.extract_strided_slice %832 {offsets = [0, 0], sizes = [8, 32], strides = [1, 1]} : vector<16x32xf32> to vector<8x32xf32>
    %836 = vector.extract_strided_slice %3 {offsets = [0, 0, 0], sizes = [1, 8, 8], strides = [1, 1, 1]} : vector<2x8x8xf32> to vector<1x8x8xf32>
    %837 = vector.shape_cast %836 : vector<1x8x8xf32> to vector<8x8xf32>
    %cst_245 = arith.constant 0.000000e+00 : f32
    %838 = vector.broadcast %cst_245 : f32 to vector<8x32xf32>
    %839 = vector.extract_strided_slice %0 {offsets = [0, 0, 0], sizes = [1, 1, 32], strides = [1, 1, 1]} : vector<4x1x32xf32> to vector<1x1x32xf32>
    %840 = vector.shape_cast %839 : vector<1x1x32xf32> to vector<1x32xf32>
    %841 = vector.broadcast %840 : vector<1x32xf32> to vector<8x32xf32>
    %842 = arith.mulf %833, %841 : vector<8x32xf32>
    %cst_246 = arith.constant dense<0.000000e+00> : vector<8x8xf32>
    %843 = tpu.matmul %842, %834, %cst_246 {dimension_numbers = #tpu.dot_dimension_numbers<[1], [1], [0], [0], [0, 0, 1, 0], [], []>} : vector<8x32xf32>, vector<8x32xf32>, vector<8x8xf32> -> vector<8x8xf32>
    %844 = arith.addf %843, %837 : vector<8x8xf32>
    %cst_247 = arith.constant dense<0xFF800000> : vector<8xf32>
    %845 = vector.multi_reduction <maximumf>, %844, %cst_247 [1] : vector<8x8xf32> to vector<8xf32>
    %846 = vector.shape_cast %845 : vector<8xf32> to vector<8x1xf32>
    %847 = vector.broadcast %846 : vector<8x1xf32> to vector<8x8xf32>
    %848 = arith.subf %844, %847 : vector<8x8xf32>
    %849 = math.exp %848 : vector<8x8xf32>
    %cst_248 = arith.constant dense<0.000000e+00> : vector<8xf32>
    %850 = vector.multi_reduction <add>, %849, %cst_248 [1] : vector<8x8xf32> to vector<8xf32>
    %851 = vector.shape_cast %850 : vector<8xf32> to vector<8x1xf32>
    %852 = tpu.reciprocal %851 {approx = true} : vector<8x1xf32> -> vector<8x1xf32>
    %853 = vector.broadcast %852 : vector<8x1xf32> to vector<8x8xf32>
    %854 = arith.mulf %849, %853 : vector<8x8xf32>
    %cst_249 = arith.constant dense<0.000000e+00> : vector<8x32xf32>
    %855 = tpu.matmul %854, %835, %cst_249 {dimension_numbers = #tpu.dot_dimension_numbers<[1], [0], [0], [1], [0, 0, 1, 1], [], []>} : vector<8x8xf32>, vector<8x32xf32>, vector<8x32xf32> -> vector<8x32xf32>
    %856 = vector.broadcast %840 : vector<1x32xf32> to vector<8x32xf32>
    %857 = arith.mulf %855, %856 : vector<8x32xf32>
    %858 = arith.addf %838, %857 : vector<8x32xf32>
    %859 = vector.extract_strided_slice %0 {offsets = [1, 0, 0], sizes = [1, 1, 32], strides = [1, 1, 1]} : vector<4x1x32xf32> to vector<1x1x32xf32>
    %860 = vector.shape_cast %859 : vector<1x1x32xf32> to vector<1x32xf32>
    %861 = vector.broadcast %860 : vector<1x32xf32> to vector<8x32xf32>
    %862 = arith.mulf %833, %861 : vector<8x32xf32>
    %cst_250 = arith.constant dense<0.000000e+00> : vector<8x8xf32>
    %863 = tpu.matmul %862, %834, %cst_250 {dimension_numbers = #tpu.dot_dimension_numbers<[1], [1], [0], [0], [0, 0, 1, 0], [], []>} : vector<8x32xf32>, vector<8x32xf32>, vector<8x8xf32> -> vector<8x8xf32>
    %864 = arith.addf %863, %837 : vector<8x8xf32>
    %cst_251 = arith.constant dense<0xFF800000> : vector<8xf32>
    %865 = vector.multi_reduction <maximumf>, %864, %cst_251 [1] : vector<8x8xf32> to vector<8xf32>
    %866 = vector.shape_cast %865 : vector<8xf32> to vector<8x1xf32>
    %867 = vector.broadcast %866 : vector<8x1xf32> to vector<8x8xf32>
    %868 = arith.subf %864, %867 : vector<8x8xf32>
    %869 = math.exp %868 : vector<8x8xf32>
    %cst_252 = arith.constant dense<0.000000e+00> : vector<8xf32>
    %870 = vector.multi_reduction <add>, %869, %cst_252 [1] : vector<8x8xf32> to vector<8xf32>
    %871 = vector.shape_cast %870 : vector<8xf32> to vector<8x1xf32>
    %872 = tpu.reciprocal %871 {approx = true} : vector<8x1xf32> -> vector<8x1xf32>
    %873 = vector.broadcast %872 : vector<8x1xf32> to vector<8x8xf32>
    %874 = arith.mulf %869, %873 : vector<8x8xf32>
    %cst_253 = arith.constant dense<0.000000e+00> : vector<8x32xf32>
    %875 = tpu.matmul %874, %835, %cst_253 {dimension_numbers = #tpu.dot_dimension_numbers<[1], [0], [0], [1], [0, 0, 1, 1], [], []>} : vector<8x8xf32>, vector<8x32xf32>, vector<8x32xf32> -> vector<8x32xf32>
    %876 = vector.broadcast %860 : vector<1x32xf32> to vector<8x32xf32>
    %877 = arith.mulf %875, %876 : vector<8x32xf32>
    %878 = arith.addf %858, %877 : vector<8x32xf32>
    %879 = vector.extract_strided_slice %0 {offsets = [2, 0, 0], sizes = [1, 1, 32], strides = [1, 1, 1]} : vector<4x1x32xf32> to vector<1x1x32xf32>
    %880 = vector.shape_cast %879 : vector<1x1x32xf32> to vector<1x32xf32>
    %881 = vector.broadcast %880 : vector<1x32xf32> to vector<8x32xf32>
    %882 = arith.mulf %833, %881 : vector<8x32xf32>
    %cst_254 = arith.constant dense<0.000000e+00> : vector<8x8xf32>
    %883 = tpu.matmul %882, %834, %cst_254 {dimension_numbers = #tpu.dot_dimension_numbers<[1], [1], [0], [0], [0, 0, 1, 0], [], []>} : vector<8x32xf32>, vector<8x32xf32>, vector<8x8xf32> -> vector<8x8xf32>
    %884 = arith.addf %883, %837 : vector<8x8xf32>
    %cst_255 = arith.constant dense<0xFF800000> : vector<8xf32>
    %885 = vector.multi_reduction <maximumf>, %884, %cst_255 [1] : vector<8x8xf32> to vector<8xf32>
    %886 = vector.shape_cast %885 : vector<8xf32> to vector<8x1xf32>
    %887 = vector.broadcast %886 : vector<8x1xf32> to vector<8x8xf32>
    %888 = arith.subf %884, %887 : vector<8x8xf32>
    %889 = math.exp %888 : vector<8x8xf32>
    %cst_256 = arith.constant dense<0.000000e+00> : vector<8xf32>
    %890 = vector.multi_reduction <add>, %889, %cst_256 [1] : vector<8x8xf32> to vector<8xf32>
    %891 = vector.shape_cast %890 : vector<8xf32> to vector<8x1xf32>
    %892 = tpu.reciprocal %891 {approx = true} : vector<8x1xf32> -> vector<8x1xf32>
    %893 = vector.broadcast %892 : vector<8x1xf32> to vector<8x8xf32>
    %894 = arith.mulf %889, %893 : vector<8x8xf32>
    %cst_257 = arith.constant dense<0.000000e+00> : vector<8x32xf32>
    %895 = tpu.matmul %894, %835, %cst_257 {dimension_numbers = #tpu.dot_dimension_numbers<[1], [0], [0], [1], [0, 0, 1, 1], [], []>} : vector<8x8xf32>, vector<8x32xf32>, vector<8x32xf32> -> vector<8x32xf32>
    %896 = vector.broadcast %880 : vector<1x32xf32> to vector<8x32xf32>
    %897 = arith.mulf %895, %896 : vector<8x32xf32>
    %898 = arith.addf %878, %897 : vector<8x32xf32>
    %899 = vector.extract_strided_slice %0 {offsets = [3, 0, 0], sizes = [1, 1, 32], strides = [1, 1, 1]} : vector<4x1x32xf32> to vector<1x1x32xf32>
    %900 = vector.shape_cast %899 : vector<1x1x32xf32> to vector<1x32xf32>
    %901 = vector.broadcast %900 : vector<1x32xf32> to vector<8x32xf32>
    %902 = arith.mulf %833, %901 : vector<8x32xf32>
    %cst_258 = arith.constant dense<0.000000e+00> : vector<8x8xf32>
    %903 = tpu.matmul %902, %834, %cst_258 {dimension_numbers = #tpu.dot_dimension_numbers<[1], [1], [0], [0], [0, 0, 1, 0], [], []>} : vector<8x32xf32>, vector<8x32xf32>, vector<8x8xf32> -> vector<8x8xf32>
    %904 = arith.addf %903, %837 : vector<8x8xf32>
    %cst_259 = arith.constant dense<0xFF800000> : vector<8xf32>
    %905 = vector.multi_reduction <maximumf>, %904, %cst_259 [1] : vector<8x8xf32> to vector<8xf32>
    %906 = vector.shape_cast %905 : vector<8xf32> to vector<8x1xf32>
    %907 = vector.broadcast %906 : vector<8x1xf32> to vector<8x8xf32>
    %908 = arith.subf %904, %907 : vector<8x8xf32>
    %909 = math.exp %908 : vector<8x8xf32>
    %cst_260 = arith.constant dense<0.000000e+00> : vector<8xf32>
    %910 = vector.multi_reduction <add>, %909, %cst_260 [1] : vector<8x8xf32> to vector<8xf32>
    %911 = vector.shape_cast %910 : vector<8xf32> to vector<8x1xf32>
    %912 = tpu.reciprocal %911 {approx = true} : vector<8x1xf32> -> vector<8x1xf32>
    %913 = vector.broadcast %912 : vector<8x1xf32> to vector<8x8xf32>
    %914 = arith.mulf %909, %913 : vector<8x8xf32>
    %cst_261 = arith.constant dense<0.000000e+00> : vector<8x32xf32>
    %915 = tpu.matmul %914, %835, %cst_261 {dimension_numbers = #tpu.dot_dimension_numbers<[1], [0], [0], [1], [0, 0, 1, 1], [], []>} : vector<8x8xf32>, vector<8x32xf32>, vector<8x32xf32> -> vector<8x32xf32>
    %916 = vector.broadcast %900 : vector<1x32xf32> to vector<8x32xf32>
    %917 = arith.mulf %915, %916 : vector<8x32xf32>
    %918 = arith.addf %898, %917 : vector<8x32xf32>
    %919 = vector.extract_strided_slice %818 {offsets = [8, 0], sizes = [8, 32], strides = [1, 1]} : vector<16x32xf32> to vector<8x32xf32>
    %920 = vector.extract_strided_slice %825 {offsets = [8, 0], sizes = [8, 32], strides = [1, 1]} : vector<16x32xf32> to vector<8x32xf32>
    %921 = vector.extract_strided_slice %832 {offsets = [8, 0], sizes = [8, 32], strides = [1, 1]} : vector<16x32xf32> to vector<8x32xf32>
    %922 = vector.extract_strided_slice %3 {offsets = [1, 0, 0], sizes = [1, 8, 8], strides = [1, 1, 1]} : vector<2x8x8xf32> to vector<1x8x8xf32>
    %923 = vector.shape_cast %922 : vector<1x8x8xf32> to vector<8x8xf32>
    %cst_262 = arith.constant 0.000000e+00 : f32
    %924 = vector.broadcast %cst_262 : f32 to vector<8x32xf32>
    %925 = vector.extract_strided_slice %0 {offsets = [0, 0, 0], sizes = [1, 1, 32], strides = [1, 1, 1]} : vector<4x1x32xf32> to vector<1x1x32xf32>
    %926 = vector.shape_cast %925 : vector<1x1x32xf32> to vector<1x32xf32>
    %927 = vector.broadcast %926 : vector<1x32xf32> to vector<8x32xf32>
    %928 = arith.mulf %919, %927 : vector<8x32xf32>
    %cst_263 = arith.constant dense<0.000000e+00> : vector<8x8xf32>
    %929 = tpu.matmul %928, %920, %cst_263 {dimension_numbers = #tpu.dot_dimension_numbers<[1], [1], [0], [0], [0, 0, 1, 0], [], []>} : vector<8x32xf32>, vector<8x32xf32>, vector<8x8xf32> -> vector<8x8xf32>
    %930 = arith.addf %929, %923 : vector<8x8xf32>
    %cst_264 = arith.constant dense<0xFF800000> : vector<8xf32>
    %931 = vector.multi_reduction <maximumf>, %930, %cst_264 [1] : vector<8x8xf32> to vector<8xf32>
    %932 = vector.shape_cast %931 : vector<8xf32> to vector<8x1xf32>
    %933 = vector.broadcast %932 : vector<8x1xf32> to vector<8x8xf32>
    %934 = arith.subf %930, %933 : vector<8x8xf32>
    %935 = math.exp %934 : vector<8x8xf32>
    %cst_265 = arith.constant dense<0.000000e+00> : vector<8xf32>
    %936 = vector.multi_reduction <add>, %935, %cst_265 [1] : vector<8x8xf32> to vector<8xf32>
    %937 = vector.shape_cast %936 : vector<8xf32> to vector<8x1xf32>
    %938 = tpu.reciprocal %937 {approx = true} : vector<8x1xf32> -> vector<8x1xf32>
    %939 = vector.broadcast %938 : vector<8x1xf32> to vector<8x8xf32>
    %940 = arith.mulf %935, %939 : vector<8x8xf32>
    %cst_266 = arith.constant dense<0.000000e+00> : vector<8x32xf32>
    %941 = tpu.matmul %940, %921, %cst_266 {dimension_numbers = #tpu.dot_dimension_numbers<[1], [0], [0], [1], [0, 0, 1, 1], [], []>} : vector<8x8xf32>, vector<8x32xf32>, vector<8x32xf32> -> vector<8x32xf32>
    %942 = vector.broadcast %926 : vector<1x32xf32> to vector<8x32xf32>
    %943 = arith.mulf %941, %942 : vector<8x32xf32>
    %944 = arith.addf %924, %943 : vector<8x32xf32>
    %945 = vector.extract_strided_slice %0 {offsets = [1, 0, 0], sizes = [1, 1, 32], strides = [1, 1, 1]} : vector<4x1x32xf32> to vector<1x1x32xf32>
    %946 = vector.shape_cast %945 : vector<1x1x32xf32> to vector<1x32xf32>
    %947 = vector.broadcast %946 : vector<1x32xf32> to vector<8x32xf32>
    %948 = arith.mulf %919, %947 : vector<8x32xf32>
    %cst_267 = arith.constant dense<0.000000e+00> : vector<8x8xf32>
    %949 = tpu.matmul %948, %920, %cst_267 {dimension_numbers = #tpu.dot_dimension_numbers<[1], [1], [0], [0], [0, 0, 1, 0], [], []>} : vector<8x32xf32>, vector<8x32xf32>, vector<8x8xf32> -> vector<8x8xf32>
    %950 = arith.addf %949, %923 : vector<8x8xf32>
    %cst_268 = arith.constant dense<0xFF800000> : vector<8xf32>
    %951 = vector.multi_reduction <maximumf>, %950, %cst_268 [1] : vector<8x8xf32> to vector<8xf32>
    %952 = vector.shape_cast %951 : vector<8xf32> to vector<8x1xf32>
    %953 = vector.broadcast %952 : vector<8x1xf32> to vector<8x8xf32>
    %954 = arith.subf %950, %953 : vector<8x8xf32>
    %955 = math.exp %954 : vector<8x8xf32>
    %cst_269 = arith.constant dense<0.000000e+00> : vector<8xf32>
    %956 = vector.multi_reduction <add>, %955, %cst_269 [1] : vector<8x8xf32> to vector<8xf32>
    %957 = vector.shape_cast %956 : vector<8xf32> to vector<8x1xf32>
    %958 = tpu.reciprocal %957 {approx = true} : vector<8x1xf32> -> vector<8x1xf32>
    %959 = vector.broadcast %958 : vector<8x1xf32> to vector<8x8xf32>
    %960 = arith.mulf %955, %959 : vector<8x8xf32>
    %cst_270 = arith.constant dense<0.000000e+00> : vector<8x32xf32>
    %961 = tpu.matmul %960, %921, %cst_270 {dimension_numbers = #tpu.dot_dimension_numbers<[1], [0], [0], [1], [0, 0, 1, 1], [], []>} : vector<8x8xf32>, vector<8x32xf32>, vector<8x32xf32> -> vector<8x32xf32>
    %962 = vector.broadcast %946 : vector<1x32xf32> to vector<8x32xf32>
    %963 = arith.mulf %961, %962 : vector<8x32xf32>
    %964 = arith.addf %944, %963 : vector<8x32xf32>
    %965 = vector.extract_strided_slice %0 {offsets = [2, 0, 0], sizes = [1, 1, 32], strides = [1, 1, 1]} : vector<4x1x32xf32> to vector<1x1x32xf32>
    %966 = vector.shape_cast %965 : vector<1x1x32xf32> to vector<1x32xf32>
    %967 = vector.broadcast %966 : vector<1x32xf32> to vector<8x32xf32>
    %968 = arith.mulf %919, %967 : vector<8x32xf32>
    %cst_271 = arith.constant dense<0.000000e+00> : vector<8x8xf32>
    %969 = tpu.matmul %968, %920, %cst_271 {dimension_numbers = #tpu.dot_dimension_numbers<[1], [1], [0], [0], [0, 0, 1, 0], [], []>} : vector<8x32xf32>, vector<8x32xf32>, vector<8x8xf32> -> vector<8x8xf32>
    %970 = arith.addf %969, %923 : vector<8x8xf32>
    %cst_272 = arith.constant dense<0xFF800000> : vector<8xf32>
    %971 = vector.multi_reduction <maximumf>, %970, %cst_272 [1] : vector<8x8xf32> to vector<8xf32>
    %972 = vector.shape_cast %971 : vector<8xf32> to vector<8x1xf32>
    %973 = vector.broadcast %972 : vector<8x1xf32> to vector<8x8xf32>
    %974 = arith.subf %970, %973 : vector<8x8xf32>
    %975 = math.exp %974 : vector<8x8xf32>
    %cst_273 = arith.constant dense<0.000000e+00> : vector<8xf32>
    %976 = vector.multi_reduction <add>, %975, %cst_273 [1] : vector<8x8xf32> to vector<8xf32>
    %977 = vector.shape_cast %976 : vector<8xf32> to vector<8x1xf32>
    %978 = tpu.reciprocal %977 {approx = true} : vector<8x1xf32> -> vector<8x1xf32>
    %979 = vector.broadcast %978 : vector<8x1xf32> to vector<8x8xf32>
    %980 = arith.mulf %975, %979 : vector<8x8xf32>
    %cst_274 = arith.constant dense<0.000000e+00> : vector<8x32xf32>
    %981 = tpu.matmul %980, %921, %cst_274 {dimension_numbers = #tpu.dot_dimension_numbers<[1], [0], [0], [1], [0, 0, 1, 1], [], []>} : vector<8x8xf32>, vector<8x32xf32>, vector<8x32xf32> -> vector<8x32xf32>
    %982 = vector.broadcast %966 : vector<1x32xf32> to vector<8x32xf32>
    %983 = arith.mulf %981, %982 : vector<8x32xf32>
    %984 = arith.addf %964, %983 : vector<8x32xf32>
    %985 = vector.extract_strided_slice %0 {offsets = [3, 0, 0], sizes = [1, 1, 32], strides = [1, 1, 1]} : vector<4x1x32xf32> to vector<1x1x32xf32>
    %986 = vector.shape_cast %985 : vector<1x1x32xf32> to vector<1x32xf32>
    %987 = vector.broadcast %986 : vector<1x32xf32> to vector<8x32xf32>
    %988 = arith.mulf %919, %987 : vector<8x32xf32>
    %cst_275 = arith.constant dense<0.000000e+00> : vector<8x8xf32>
    %989 = tpu.matmul %988, %920, %cst_275 {dimension_numbers = #tpu.dot_dimension_numbers<[1], [1], [0], [0], [0, 0, 1, 0], [], []>} : vector<8x32xf32>, vector<8x32xf32>, vector<8x8xf32> -> vector<8x8xf32>
    %990 = arith.addf %989, %923 : vector<8x8xf32>
    %cst_276 = arith.constant dense<0xFF800000> : vector<8xf32>
    %991 = vector.multi_reduction <maximumf>, %990, %cst_276 [1] : vector<8x8xf32> to vector<8xf32>
    %992 = vector.shape_cast %991 : vector<8xf32> to vector<8x1xf32>
    %993 = vector.broadcast %992 : vector<8x1xf32> to vector<8x8xf32>
    %994 = arith.subf %990, %993 : vector<8x8xf32>
    %995 = math.exp %994 : vector<8x8xf32>
    %cst_277 = arith.constant dense<0.000000e+00> : vector<8xf32>
    %996 = vector.multi_reduction <add>, %995, %cst_277 [1] : vector<8x8xf32> to vector<8xf32>
    %997 = vector.shape_cast %996 : vector<8xf32> to vector<8x1xf32>
    %998 = tpu.reciprocal %997 {approx = true} : vector<8x1xf32> -> vector<8x1xf32>
    %999 = vector.broadcast %998 : vector<8x1xf32> to vector<8x8xf32>
    %1000 = arith.mulf %995, %999 : vector<8x8xf32>
    %cst_278 = arith.constant dense<0.000000e+00> : vector<8x32xf32>
    %1001 = tpu.matmul %1000, %921, %cst_278 {dimension_numbers = #tpu.dot_dimension_numbers<[1], [0], [0], [1], [0, 0, 1, 1], [], []>} : vector<8x8xf32>, vector<8x32xf32>, vector<8x32xf32> -> vector<8x32xf32>
    %1002 = vector.broadcast %986 : vector<1x32xf32> to vector<8x32xf32>
    %1003 = arith.mulf %1001, %1002 : vector<8x32xf32>
    %1004 = arith.addf %984, %1003 : vector<8x32xf32>
    %1005 = tpu.concatenate %918, %1004 in 0 : vector<8x32xf32>, vector<8x32xf32> -> vector<16x32xf32>
    %1006 = vector.extract_strided_slice %573 {offsets = [3, 0, 0], sizes = [1, 32, 32], strides = [1, 1, 1]} : vector<4x32x32xf32> to vector<1x32x32xf32>
    %1007 = vector.shape_cast %1006 : vector<1x32x32xf32> to vector<32x32xf32>
    %cst_279 = arith.constant dense<0.000000e+00> : vector<16x32xf32>
    %1008 = tpu.matmul %1005, %1007, %cst_279 {dimension_numbers = #tpu.dot_dimension_numbers<[1], [0], [0], [1], [0, 0, 1, 1], [], []>} : vector<16x32xf32>, vector<32x32xf32>, vector<16x32xf32> -> vector<16x32xf32>
    %1009 = vector.extract_strided_slice %575 {offsets = [3, 0, 0], sizes = [1, 1, 32], strides = [1, 1, 1]} : vector<4x1x32xf32> to vector<1x1x32xf32>
    %1010 = vector.shape_cast %1009 : vector<1x1x32xf32> to vector<1x32xf32>
    %1011 = vector.broadcast %1010 : vector<1x32xf32> to vector<16x32xf32>
    %1012 = arith.addf %1008, %1011 : vector<16x32xf32>
    %1013 = arith.addf %809, %1012 : vector<16x32xf32>
    %1014 = vector.extract_strided_slice %577 {offsets = [1, 0, 0], sizes = [1, 1, 32], strides = [1, 1, 1]} : vector<3x1x32xf32> to vector<1x1x32xf32>
    %1015 = vector.shape_cast %1014 : vector<1x1x32xf32> to vector<1x32xf32>
    %1016 = vector.extract_strided_slice %579 {offsets = [1, 0, 0], sizes = [1, 1, 32], strides = [1, 1, 1]} : vector<3x1x32xf32> to vector<1x1x32xf32>
    %1017 = vector.shape_cast %1016 : vector<1x1x32xf32> to vector<1x32xf32>
    %cst_280 = arith.constant dense<0.000000e+00> : vector<16xf32>
    %1018 = vector.multi_reduction <add>, %1013, %cst_280 [1] : vector<16x32xf32> to vector<16xf32>
    %1019 = vector.shape_cast %1018 : vector<16xf32> to vector<16x1xf32>
    %cst_281 = arith.constant 3.200000e+01 : f32
    %1020 = vector.broadcast %cst_281 : f32 to vector<16x1xf32>
    %1021 = arith.divf %1019, %1020 : vector<16x1xf32>
    %1022 = vector.broadcast %1021 : vector<16x1xf32> to vector<16x32xf32>
    %1023 = arith.subf %1013, %1022 : vector<16x32xf32>
    %1024 = arith.mulf %1023, %1023 : vector<16x32xf32>
    %cst_282 = arith.constant dense<0.000000e+00> : vector<16xf32>
    %1025 = vector.multi_reduction <add>, %1024, %cst_282 [1] : vector<16x32xf32> to vector<16xf32>
    %1026 = vector.shape_cast %1025 : vector<16xf32> to vector<16x1xf32>
    %cst_283 = arith.constant 3.200000e+01 : f32
    %1027 = vector.broadcast %cst_283 : f32 to vector<16x1xf32>
    %1028 = arith.divf %1026, %1027 : vector<16x1xf32>
    %1029 = vector.broadcast %1021 : vector<16x1xf32> to vector<16x32xf32>
    %1030 = arith.subf %1013, %1029 : vector<16x32xf32>
    %cst_284 = arith.constant 9.99999974E-6 : f32
    %1031 = vector.broadcast %cst_284 : f32 to vector<16x1xf32>
    %1032 = arith.addf %1028, %1031 : vector<16x1xf32>
    %1033 = math.rsqrt %1032 : vector<16x1xf32>
    %1034 = vector.broadcast %1033 : vector<16x1xf32> to vector<16x32xf32>
    %1035 = arith.mulf %1030, %1034 : vector<16x32xf32>
    %1036 = vector.broadcast %1015 : vector<1x32xf32> to vector<16x32xf32>
    %1037 = arith.mulf %1035, %1036 : vector<16x32xf32>
    %1038 = vector.broadcast %1017 : vector<1x32xf32> to vector<16x32xf32>
    %1039 = arith.addf %1037, %1038 : vector<16x32xf32>
    %c0_285 = arith.constant 0 : index
    %c0_286 = arith.constant 0 : index
    %c0_287 = arith.constant 0 : index
    %1040 = vector.load %arg20[%c0_285, %c0_286, %c0_287] : memref<2x32x64xf32, #tpu.memory_space<vmem>>, vector<1x32x64xf32>
    %1041 = vector.shape_cast %1040 : vector<1x32x64xf32> to vector<32x64xf32>
    %cst_288 = arith.constant dense<0.000000e+00> : vector<16x64xf32>
    %1042 = tpu.matmul %1039, %1041, %cst_288 {dimension_numbers = #tpu.dot_dimension_numbers<[1], [0], [0], [1], [0, 0, 1, 1], [], []>} : vector<16x32xf32>, vector<32x64xf32>, vector<16x64xf32> -> vector<16x64xf32>
    %c0_289 = arith.constant 0 : index
    %c0_290 = arith.constant 0 : index
    %c0_291 = arith.constant 0 : index
    %1043 = vector.load %arg21[%c0_289, %c0_290, %c0_291] : memref<2x1x64xf32, #tpu.memory_space<vmem>>, vector<1x1x64xf32>
    %1044 = vector.shape_cast %1043 : vector<1x1x64xf32> to vector<1x64xf32>
    %1045 = vector.broadcast %1044 : vector<1x64xf32> to vector<16x64xf32>
    %1046 = arith.addf %1042, %1045 : vector<16x64xf32>
    %cst_292 = arith.constant 0.000000e+00 : f32
    %1047 = vector.broadcast %cst_292 : f32 to vector<16x64xf32>
    %1048 = arith.maximumf %1046, %1047 : vector<16x64xf32>
    %c0_293 = arith.constant 0 : index
    %c0_294 = arith.constant 0 : index
    %c0_295 = arith.constant 0 : index
    %1049 = vector.load %arg22[%c0_293, %c0_294, %c0_295] : memref<2x64x32xf32, #tpu.memory_space<vmem>>, vector<1x64x32xf32>
    %1050 = vector.shape_cast %1049 : vector<1x64x32xf32> to vector<64x32xf32>
    %cst_296 = arith.constant dense<0.000000e+00> : vector<16x32xf32>
    %1051 = tpu.matmul %1048, %1050, %cst_296 {dimension_numbers = #tpu.dot_dimension_numbers<[1], [0], [0], [1], [0, 0, 1, 1], [], []>} : vector<16x64xf32>, vector<64x32xf32>, vector<16x32xf32> -> vector<16x32xf32>
    %c0_297 = arith.constant 0 : index
    %c0_298 = arith.constant 0 : index
    %c0_299 = arith.constant 0 : index
    %1052 = vector.load %arg23[%c0_297, %c0_298, %c0_299] : memref<2x1x32xf32, #tpu.memory_space<vmem>>, vector<1x1x32xf32>
    %1053 = vector.shape_cast %1052 : vector<1x1x32xf32> to vector<1x32xf32>
    %1054 = vector.broadcast %1053 : vector<1x32xf32> to vector<16x32xf32>
    %1055 = arith.addf %1051, %1054 : vector<16x32xf32>
    %1056 = arith.addf %1039, %1055 : vector<16x32xf32>
    %1057 = vector.extract_strided_slice %577 {offsets = [2, 0, 0], sizes = [1, 1, 32], strides = [1, 1, 1]} : vector<3x1x32xf32> to vector<1x1x32xf32>
    %1058 = vector.shape_cast %1057 : vector<1x1x32xf32> to vector<1x32xf32>
    %1059 = vector.extract_strided_slice %579 {offsets = [2, 0, 0], sizes = [1, 1, 32], strides = [1, 1, 1]} : vector<3x1x32xf32> to vector<1x1x32xf32>
    %1060 = vector.shape_cast %1059 : vector<1x1x32xf32> to vector<1x32xf32>
    %cst_300 = arith.constant dense<0.000000e+00> : vector<16xf32>
    %1061 = vector.multi_reduction <add>, %1056, %cst_300 [1] : vector<16x32xf32> to vector<16xf32>
    %1062 = vector.shape_cast %1061 : vector<16xf32> to vector<16x1xf32>
    %cst_301 = arith.constant 3.200000e+01 : f32
    %1063 = vector.broadcast %cst_301 : f32 to vector<16x1xf32>
    %1064 = arith.divf %1062, %1063 : vector<16x1xf32>
    %1065 = vector.broadcast %1064 : vector<16x1xf32> to vector<16x32xf32>
    %1066 = arith.subf %1056, %1065 : vector<16x32xf32>
    %1067 = arith.mulf %1066, %1066 : vector<16x32xf32>
    %cst_302 = arith.constant dense<0.000000e+00> : vector<16xf32>
    %1068 = vector.multi_reduction <add>, %1067, %cst_302 [1] : vector<16x32xf32> to vector<16xf32>
    %1069 = vector.shape_cast %1068 : vector<16xf32> to vector<16x1xf32>
    %cst_303 = arith.constant 3.200000e+01 : f32
    %1070 = vector.broadcast %cst_303 : f32 to vector<16x1xf32>
    %1071 = arith.divf %1069, %1070 : vector<16x1xf32>
    %1072 = vector.broadcast %1064 : vector<16x1xf32> to vector<16x32xf32>
    %1073 = arith.subf %1056, %1072 : vector<16x32xf32>
    %cst_304 = arith.constant 9.99999974E-6 : f32
    %1074 = vector.broadcast %cst_304 : f32 to vector<16x1xf32>
    %1075 = arith.addf %1071, %1074 : vector<16x1xf32>
    %1076 = math.rsqrt %1075 : vector<16x1xf32>
    %1077 = vector.broadcast %1076 : vector<16x1xf32> to vector<16x32xf32>
    %1078 = arith.mulf %1073, %1077 : vector<16x32xf32>
    %1079 = vector.broadcast %1058 : vector<1x32xf32> to vector<16x32xf32>
    %1080 = arith.mulf %1078, %1079 : vector<16x32xf32>
    %1081 = vector.broadcast %1060 : vector<1x32xf32> to vector<16x32xf32>
    %1082 = arith.addf %1080, %1081 : vector<16x32xf32>
    %c1_305 = arith.constant 1 : index
    %c0_306 = arith.constant 0 : index
    %c0_307 = arith.constant 0 : index
    %c0_308 = arith.constant 0 : index
    %1083 = vector.load %arg14[%c1_305, %c0_306, %c0_307, %c0_308] : memref<2x4x32x32xf32, #tpu.memory_space<vmem>>, vector<1x4x32x32xf32>
    %1084 = vector.shape_cast %1083 : vector<1x4x32x32xf32> to vector<4x32x32xf32>
    %c1_309 = arith.constant 1 : index
    %c0_310 = arith.constant 0 : index
    %c0_311 = arith.constant 0 : index
    %c0_312 = arith.constant 0 : index
    %1085 = vector.load %arg15[%c1_309, %c0_310, %c0_311, %c0_312] : memref<2x4x1x32xf32, #tpu.memory_space<vmem>>, vector<1x4x1x32xf32>
    %1086 = vector.shape_cast %1085 : vector<1x4x1x32xf32> to vector<4x1x32xf32>
    %c1_313 = arith.constant 1 : index
    %c0_314 = arith.constant 0 : index
    %c0_315 = arith.constant 0 : index
    %c0_316 = arith.constant 0 : index
    %1087 = vector.load %arg16[%c1_313, %c0_314, %c0_315, %c0_316] : memref<2x4x32x32xf32, #tpu.memory_space<vmem>>, vector<1x4x32x32xf32>
    %1088 = vector.shape_cast %1087 : vector<1x4x32x32xf32> to vector<4x32x32xf32>
    %c1_317 = arith.constant 1 : index
    %c0_318 = arith.constant 0 : index
    %c0_319 = arith.constant 0 : index
    %c0_320 = arith.constant 0 : index
    %1089 = vector.load %arg17[%c1_317, %c0_318, %c0_319, %c0_320] : memref<2x4x1x32xf32, #tpu.memory_space<vmem>>, vector<1x4x1x32xf32>
    %1090 = vector.shape_cast %1089 : vector<1x4x1x32xf32> to vector<4x1x32xf32>
    %c1_321 = arith.constant 1 : index
    %c0_322 = arith.constant 0 : index
    %c0_323 = arith.constant 0 : index
    %c0_324 = arith.constant 0 : index
    %1091 = vector.load %arg18[%c1_321, %c0_322, %c0_323, %c0_324] : memref<2x3x1x32xf32, #tpu.memory_space<vmem>>, vector<1x3x1x32xf32>
    %1092 = vector.shape_cast %1091 : vector<1x3x1x32xf32> to vector<3x1x32xf32>
    %c1_325 = arith.constant 1 : index
    %c0_326 = arith.constant 0 : index
    %c0_327 = arith.constant 0 : index
    %c0_328 = arith.constant 0 : index
    %1093 = vector.load %arg19[%c1_325, %c0_326, %c0_327, %c0_328] : memref<2x3x1x32xf32, #tpu.memory_space<vmem>>, vector<1x3x1x32xf32>
    %1094 = vector.shape_cast %1093 : vector<1x3x1x32xf32> to vector<3x1x32xf32>
    %1095 = vector.extract_strided_slice %1084 {offsets = [0, 0, 0], sizes = [1, 32, 32], strides = [1, 1, 1]} : vector<4x32x32xf32> to vector<1x32x32xf32>
    %1096 = vector.shape_cast %1095 : vector<1x32x32xf32> to vector<32x32xf32>
    %cst_329 = arith.constant dense<0.000000e+00> : vector<16x32xf32>
    %1097 = tpu.matmul %1082, %1096, %cst_329 {dimension_numbers = #tpu.dot_dimension_numbers<[1], [0], [0], [1], [0, 0, 1, 1], [], []>} : vector<16x32xf32>, vector<32x32xf32>, vector<16x32xf32> -> vector<16x32xf32>
    %1098 = vector.extract_strided_slice %1086 {offsets = [0, 0, 0], sizes = [1, 1, 32], strides = [1, 1, 1]} : vector<4x1x32xf32> to vector<1x1x32xf32>
    %1099 = vector.shape_cast %1098 : vector<1x1x32xf32> to vector<1x32xf32>
    %1100 = vector.broadcast %1099 : vector<1x32xf32> to vector<16x32xf32>
    %1101 = arith.addf %1097, %1100 : vector<16x32xf32>
    %cst_330 = arith.constant 0.353553385 : f32
    %1102 = vector.broadcast %cst_330 : f32 to vector<16x32xf32>
    %1103 = arith.mulf %1101, %1102 : vector<16x32xf32>
    %1104 = vector.extract_strided_slice %1084 {offsets = [1, 0, 0], sizes = [1, 32, 32], strides = [1, 1, 1]} : vector<4x32x32xf32> to vector<1x32x32xf32>
    %1105 = vector.shape_cast %1104 : vector<1x32x32xf32> to vector<32x32xf32>
    %cst_331 = arith.constant dense<0.000000e+00> : vector<16x32xf32>
    %1106 = tpu.matmul %1082, %1105, %cst_331 {dimension_numbers = #tpu.dot_dimension_numbers<[1], [0], [0], [1], [0, 0, 1, 1], [], []>} : vector<16x32xf32>, vector<32x32xf32>, vector<16x32xf32> -> vector<16x32xf32>
    %1107 = vector.extract_strided_slice %1086 {offsets = [1, 0, 0], sizes = [1, 1, 32], strides = [1, 1, 1]} : vector<4x1x32xf32> to vector<1x1x32xf32>
    %1108 = vector.shape_cast %1107 : vector<1x1x32xf32> to vector<1x32xf32>
    %1109 = vector.broadcast %1108 : vector<1x32xf32> to vector<16x32xf32>
    %1110 = arith.addf %1106, %1109 : vector<16x32xf32>
    %1111 = vector.extract_strided_slice %1084 {offsets = [2, 0, 0], sizes = [1, 32, 32], strides = [1, 1, 1]} : vector<4x32x32xf32> to vector<1x32x32xf32>
    %1112 = vector.shape_cast %1111 : vector<1x32x32xf32> to vector<32x32xf32>
    %cst_332 = arith.constant dense<0.000000e+00> : vector<16x32xf32>
    %1113 = tpu.matmul %1082, %1112, %cst_332 {dimension_numbers = #tpu.dot_dimension_numbers<[1], [0], [0], [1], [0, 0, 1, 1], [], []>} : vector<16x32xf32>, vector<32x32xf32>, vector<16x32xf32> -> vector<16x32xf32>
    %1114 = vector.extract_strided_slice %1086 {offsets = [2, 0, 0], sizes = [1, 1, 32], strides = [1, 1, 1]} : vector<4x1x32xf32> to vector<1x1x32xf32>
    %1115 = vector.shape_cast %1114 : vector<1x1x32xf32> to vector<1x32xf32>
    %1116 = vector.broadcast %1115 : vector<1x32xf32> to vector<16x32xf32>
    %1117 = arith.addf %1113, %1116 : vector<16x32xf32>
    %1118 = vector.extract_strided_slice %1103 {offsets = [0, 0], sizes = [8, 32], strides = [1, 1]} : vector<16x32xf32> to vector<8x32xf32>
    %1119 = vector.extract_strided_slice %1110 {offsets = [0, 0], sizes = [8, 32], strides = [1, 1]} : vector<16x32xf32> to vector<8x32xf32>
    %1120 = vector.extract_strided_slice %1117 {offsets = [0, 0], sizes = [8, 32], strides = [1, 1]} : vector<16x32xf32> to vector<8x32xf32>
    %1121 = vector.extract_strided_slice %2 {offsets = [0, 0, 0], sizes = [1, 8, 8], strides = [1, 1, 1]} : vector<2x8x8xf32> to vector<1x8x8xf32>
    %1122 = vector.shape_cast %1121 : vector<1x8x8xf32> to vector<8x8xf32>
    %cst_333 = arith.constant 0.000000e+00 : f32
    %1123 = vector.broadcast %cst_333 : f32 to vector<8x32xf32>
    %1124 = vector.extract_strided_slice %0 {offsets = [0, 0, 0], sizes = [1, 1, 32], strides = [1, 1, 1]} : vector<4x1x32xf32> to vector<1x1x32xf32>
    %1125 = vector.shape_cast %1124 : vector<1x1x32xf32> to vector<1x32xf32>
    %1126 = vector.broadcast %1125 : vector<1x32xf32> to vector<8x32xf32>
    %1127 = arith.mulf %1118, %1126 : vector<8x32xf32>
    %cst_334 = arith.constant dense<0.000000e+00> : vector<8x8xf32>
    %1128 = tpu.matmul %1127, %1119, %cst_334 {dimension_numbers = #tpu.dot_dimension_numbers<[1], [1], [0], [0], [0, 0, 1, 0], [], []>} : vector<8x32xf32>, vector<8x32xf32>, vector<8x8xf32> -> vector<8x8xf32>
    %1129 = arith.addf %1128, %1122 : vector<8x8xf32>
    %cst_335 = arith.constant dense<0xFF800000> : vector<8xf32>
    %1130 = vector.multi_reduction <maximumf>, %1129, %cst_335 [1] : vector<8x8xf32> to vector<8xf32>
    %1131 = vector.shape_cast %1130 : vector<8xf32> to vector<8x1xf32>
    %1132 = vector.broadcast %1131 : vector<8x1xf32> to vector<8x8xf32>
    %1133 = arith.subf %1129, %1132 : vector<8x8xf32>
    %1134 = math.exp %1133 : vector<8x8xf32>
    %cst_336 = arith.constant dense<0.000000e+00> : vector<8xf32>
    %1135 = vector.multi_reduction <add>, %1134, %cst_336 [1] : vector<8x8xf32> to vector<8xf32>
    %1136 = vector.shape_cast %1135 : vector<8xf32> to vector<8x1xf32>
    %1137 = tpu.reciprocal %1136 {approx = true} : vector<8x1xf32> -> vector<8x1xf32>
    %1138 = vector.broadcast %1137 : vector<8x1xf32> to vector<8x8xf32>
    %1139 = arith.mulf %1134, %1138 : vector<8x8xf32>
    %cst_337 = arith.constant dense<0.000000e+00> : vector<8x32xf32>
    %1140 = tpu.matmul %1139, %1120, %cst_337 {dimension_numbers = #tpu.dot_dimension_numbers<[1], [0], [0], [1], [0, 0, 1, 1], [], []>} : vector<8x8xf32>, vector<8x32xf32>, vector<8x32xf32> -> vector<8x32xf32>
    %1141 = vector.broadcast %1125 : vector<1x32xf32> to vector<8x32xf32>
    %1142 = arith.mulf %1140, %1141 : vector<8x32xf32>
    %1143 = arith.addf %1123, %1142 : vector<8x32xf32>
    %1144 = vector.extract_strided_slice %0 {offsets = [1, 0, 0], sizes = [1, 1, 32], strides = [1, 1, 1]} : vector<4x1x32xf32> to vector<1x1x32xf32>
    %1145 = vector.shape_cast %1144 : vector<1x1x32xf32> to vector<1x32xf32>
    %1146 = vector.broadcast %1145 : vector<1x32xf32> to vector<8x32xf32>
    %1147 = arith.mulf %1118, %1146 : vector<8x32xf32>
    %cst_338 = arith.constant dense<0.000000e+00> : vector<8x8xf32>
    %1148 = tpu.matmul %1147, %1119, %cst_338 {dimension_numbers = #tpu.dot_dimension_numbers<[1], [1], [0], [0], [0, 0, 1, 0], [], []>} : vector<8x32xf32>, vector<8x32xf32>, vector<8x8xf32> -> vector<8x8xf32>
    %1149 = arith.addf %1148, %1122 : vector<8x8xf32>
    %cst_339 = arith.constant dense<0xFF800000> : vector<8xf32>
    %1150 = vector.multi_reduction <maximumf>, %1149, %cst_339 [1] : vector<8x8xf32> to vector<8xf32>
    %1151 = vector.shape_cast %1150 : vector<8xf32> to vector<8x1xf32>
    %1152 = vector.broadcast %1151 : vector<8x1xf32> to vector<8x8xf32>
    %1153 = arith.subf %1149, %1152 : vector<8x8xf32>
    %1154 = math.exp %1153 : vector<8x8xf32>
    %cst_340 = arith.constant dense<0.000000e+00> : vector<8xf32>
    %1155 = vector.multi_reduction <add>, %1154, %cst_340 [1] : vector<8x8xf32> to vector<8xf32>
    %1156 = vector.shape_cast %1155 : vector<8xf32> to vector<8x1xf32>
    %1157 = tpu.reciprocal %1156 {approx = true} : vector<8x1xf32> -> vector<8x1xf32>
    %1158 = vector.broadcast %1157 : vector<8x1xf32> to vector<8x8xf32>
    %1159 = arith.mulf %1154, %1158 : vector<8x8xf32>
    %cst_341 = arith.constant dense<0.000000e+00> : vector<8x32xf32>
    %1160 = tpu.matmul %1159, %1120, %cst_341 {dimension_numbers = #tpu.dot_dimension_numbers<[1], [0], [0], [1], [0, 0, 1, 1], [], []>} : vector<8x8xf32>, vector<8x32xf32>, vector<8x32xf32> -> vector<8x32xf32>
    %1161 = vector.broadcast %1145 : vector<1x32xf32> to vector<8x32xf32>
    %1162 = arith.mulf %1160, %1161 : vector<8x32xf32>
    %1163 = arith.addf %1143, %1162 : vector<8x32xf32>
    %1164 = vector.extract_strided_slice %0 {offsets = [2, 0, 0], sizes = [1, 1, 32], strides = [1, 1, 1]} : vector<4x1x32xf32> to vector<1x1x32xf32>
    %1165 = vector.shape_cast %1164 : vector<1x1x32xf32> to vector<1x32xf32>
    %1166 = vector.broadcast %1165 : vector<1x32xf32> to vector<8x32xf32>
    %1167 = arith.mulf %1118, %1166 : vector<8x32xf32>
    %cst_342 = arith.constant dense<0.000000e+00> : vector<8x8xf32>
    %1168 = tpu.matmul %1167, %1119, %cst_342 {dimension_numbers = #tpu.dot_dimension_numbers<[1], [1], [0], [0], [0, 0, 1, 0], [], []>} : vector<8x32xf32>, vector<8x32xf32>, vector<8x8xf32> -> vector<8x8xf32>
    %1169 = arith.addf %1168, %1122 : vector<8x8xf32>
    %cst_343 = arith.constant dense<0xFF800000> : vector<8xf32>
    %1170 = vector.multi_reduction <maximumf>, %1169, %cst_343 [1] : vector<8x8xf32> to vector<8xf32>
    %1171 = vector.shape_cast %1170 : vector<8xf32> to vector<8x1xf32>
    %1172 = vector.broadcast %1171 : vector<8x1xf32> to vector<8x8xf32>
    %1173 = arith.subf %1169, %1172 : vector<8x8xf32>
    %1174 = math.exp %1173 : vector<8x8xf32>
    %cst_344 = arith.constant dense<0.000000e+00> : vector<8xf32>
    %1175 = vector.multi_reduction <add>, %1174, %cst_344 [1] : vector<8x8xf32> to vector<8xf32>
    %1176 = vector.shape_cast %1175 : vector<8xf32> to vector<8x1xf32>
    %1177 = tpu.reciprocal %1176 {approx = true} : vector<8x1xf32> -> vector<8x1xf32>
    %1178 = vector.broadcast %1177 : vector<8x1xf32> to vector<8x8xf32>
    %1179 = arith.mulf %1174, %1178 : vector<8x8xf32>
    %cst_345 = arith.constant dense<0.000000e+00> : vector<8x32xf32>
    %1180 = tpu.matmul %1179, %1120, %cst_345 {dimension_numbers = #tpu.dot_dimension_numbers<[1], [0], [0], [1], [0, 0, 1, 1], [], []>} : vector<8x8xf32>, vector<8x32xf32>, vector<8x32xf32> -> vector<8x32xf32>
    %1181 = vector.broadcast %1165 : vector<1x32xf32> to vector<8x32xf32>
    %1182 = arith.mulf %1180, %1181 : vector<8x32xf32>
    %1183 = arith.addf %1163, %1182 : vector<8x32xf32>
    %1184 = vector.extract_strided_slice %0 {offsets = [3, 0, 0], sizes = [1, 1, 32], strides = [1, 1, 1]} : vector<4x1x32xf32> to vector<1x1x32xf32>
    %1185 = vector.shape_cast %1184 : vector<1x1x32xf32> to vector<1x32xf32>
    %1186 = vector.broadcast %1185 : vector<1x32xf32> to vector<8x32xf32>
    %1187 = arith.mulf %1118, %1186 : vector<8x32xf32>
    %cst_346 = arith.constant dense<0.000000e+00> : vector<8x8xf32>
    %1188 = tpu.matmul %1187, %1119, %cst_346 {dimension_numbers = #tpu.dot_dimension_numbers<[1], [1], [0], [0], [0, 0, 1, 0], [], []>} : vector<8x32xf32>, vector<8x32xf32>, vector<8x8xf32> -> vector<8x8xf32>
    %1189 = arith.addf %1188, %1122 : vector<8x8xf32>
    %cst_347 = arith.constant dense<0xFF800000> : vector<8xf32>
    %1190 = vector.multi_reduction <maximumf>, %1189, %cst_347 [1] : vector<8x8xf32> to vector<8xf32>
    %1191 = vector.shape_cast %1190 : vector<8xf32> to vector<8x1xf32>
    %1192 = vector.broadcast %1191 : vector<8x1xf32> to vector<8x8xf32>
    %1193 = arith.subf %1189, %1192 : vector<8x8xf32>
    %1194 = math.exp %1193 : vector<8x8xf32>
    %cst_348 = arith.constant dense<0.000000e+00> : vector<8xf32>
    %1195 = vector.multi_reduction <add>, %1194, %cst_348 [1] : vector<8x8xf32> to vector<8xf32>
    %1196 = vector.shape_cast %1195 : vector<8xf32> to vector<8x1xf32>
    %1197 = tpu.reciprocal %1196 {approx = true} : vector<8x1xf32> -> vector<8x1xf32>
    %1198 = vector.broadcast %1197 : vector<8x1xf32> to vector<8x8xf32>
    %1199 = arith.mulf %1194, %1198 : vector<8x8xf32>
    %cst_349 = arith.constant dense<0.000000e+00> : vector<8x32xf32>
    %1200 = tpu.matmul %1199, %1120, %cst_349 {dimension_numbers = #tpu.dot_dimension_numbers<[1], [0], [0], [1], [0, 0, 1, 1], [], []>} : vector<8x8xf32>, vector<8x32xf32>, vector<8x32xf32> -> vector<8x32xf32>
    %1201 = vector.broadcast %1185 : vector<1x32xf32> to vector<8x32xf32>
    %1202 = arith.mulf %1200, %1201 : vector<8x32xf32>
    %1203 = arith.addf %1183, %1202 : vector<8x32xf32>
    %1204 = vector.extract_strided_slice %1103 {offsets = [8, 0], sizes = [8, 32], strides = [1, 1]} : vector<16x32xf32> to vector<8x32xf32>
    %1205 = vector.extract_strided_slice %1110 {offsets = [8, 0], sizes = [8, 32], strides = [1, 1]} : vector<16x32xf32> to vector<8x32xf32>
    %1206 = vector.extract_strided_slice %1117 {offsets = [8, 0], sizes = [8, 32], strides = [1, 1]} : vector<16x32xf32> to vector<8x32xf32>
    %1207 = vector.extract_strided_slice %2 {offsets = [1, 0, 0], sizes = [1, 8, 8], strides = [1, 1, 1]} : vector<2x8x8xf32> to vector<1x8x8xf32>
    %1208 = vector.shape_cast %1207 : vector<1x8x8xf32> to vector<8x8xf32>
    %cst_350 = arith.constant 0.000000e+00 : f32
    %1209 = vector.broadcast %cst_350 : f32 to vector<8x32xf32>
    %1210 = vector.extract_strided_slice %0 {offsets = [0, 0, 0], sizes = [1, 1, 32], strides = [1, 1, 1]} : vector<4x1x32xf32> to vector<1x1x32xf32>
    %1211 = vector.shape_cast %1210 : vector<1x1x32xf32> to vector<1x32xf32>
    %1212 = vector.broadcast %1211 : vector<1x32xf32> to vector<8x32xf32>
    %1213 = arith.mulf %1204, %1212 : vector<8x32xf32>
    %cst_351 = arith.constant dense<0.000000e+00> : vector<8x8xf32>
    %1214 = tpu.matmul %1213, %1205, %cst_351 {dimension_numbers = #tpu.dot_dimension_numbers<[1], [1], [0], [0], [0, 0, 1, 0], [], []>} : vector<8x32xf32>, vector<8x32xf32>, vector<8x8xf32> -> vector<8x8xf32>
    %1215 = arith.addf %1214, %1208 : vector<8x8xf32>
    %cst_352 = arith.constant dense<0xFF800000> : vector<8xf32>
    %1216 = vector.multi_reduction <maximumf>, %1215, %cst_352 [1] : vector<8x8xf32> to vector<8xf32>
    %1217 = vector.shape_cast %1216 : vector<8xf32> to vector<8x1xf32>
    %1218 = vector.broadcast %1217 : vector<8x1xf32> to vector<8x8xf32>
    %1219 = arith.subf %1215, %1218 : vector<8x8xf32>
    %1220 = math.exp %1219 : vector<8x8xf32>
    %cst_353 = arith.constant dense<0.000000e+00> : vector<8xf32>
    %1221 = vector.multi_reduction <add>, %1220, %cst_353 [1] : vector<8x8xf32> to vector<8xf32>
    %1222 = vector.shape_cast %1221 : vector<8xf32> to vector<8x1xf32>
    %1223 = tpu.reciprocal %1222 {approx = true} : vector<8x1xf32> -> vector<8x1xf32>
    %1224 = vector.broadcast %1223 : vector<8x1xf32> to vector<8x8xf32>
    %1225 = arith.mulf %1220, %1224 : vector<8x8xf32>
    %cst_354 = arith.constant dense<0.000000e+00> : vector<8x32xf32>
    %1226 = tpu.matmul %1225, %1206, %cst_354 {dimension_numbers = #tpu.dot_dimension_numbers<[1], [0], [0], [1], [0, 0, 1, 1], [], []>} : vector<8x8xf32>, vector<8x32xf32>, vector<8x32xf32> -> vector<8x32xf32>
    %1227 = vector.broadcast %1211 : vector<1x32xf32> to vector<8x32xf32>
    %1228 = arith.mulf %1226, %1227 : vector<8x32xf32>
    %1229 = arith.addf %1209, %1228 : vector<8x32xf32>
    %1230 = vector.extract_strided_slice %0 {offsets = [1, 0, 0], sizes = [1, 1, 32], strides = [1, 1, 1]} : vector<4x1x32xf32> to vector<1x1x32xf32>
    %1231 = vector.shape_cast %1230 : vector<1x1x32xf32> to vector<1x32xf32>
    %1232 = vector.broadcast %1231 : vector<1x32xf32> to vector<8x32xf32>
    %1233 = arith.mulf %1204, %1232 : vector<8x32xf32>
    %cst_355 = arith.constant dense<0.000000e+00> : vector<8x8xf32>
    %1234 = tpu.matmul %1233, %1205, %cst_355 {dimension_numbers = #tpu.dot_dimension_numbers<[1], [1], [0], [0], [0, 0, 1, 0], [], []>} : vector<8x32xf32>, vector<8x32xf32>, vector<8x8xf32> -> vector<8x8xf32>
    %1235 = arith.addf %1234, %1208 : vector<8x8xf32>
    %cst_356 = arith.constant dense<0xFF800000> : vector<8xf32>
    %1236 = vector.multi_reduction <maximumf>, %1235, %cst_356 [1] : vector<8x8xf32> to vector<8xf32>
    %1237 = vector.shape_cast %1236 : vector<8xf32> to vector<8x1xf32>
    %1238 = vector.broadcast %1237 : vector<8x1xf32> to vector<8x8xf32>
    %1239 = arith.subf %1235, %1238 : vector<8x8xf32>
    %1240 = math.exp %1239 : vector<8x8xf32>
    %cst_357 = arith.constant dense<0.000000e+00> : vector<8xf32>
    %1241 = vector.multi_reduction <add>, %1240, %cst_357 [1] : vector<8x8xf32> to vector<8xf32>
    %1242 = vector.shape_cast %1241 : vector<8xf32> to vector<8x1xf32>
    %1243 = tpu.reciprocal %1242 {approx = true} : vector<8x1xf32> -> vector<8x1xf32>
    %1244 = vector.broadcast %1243 : vector<8x1xf32> to vector<8x8xf32>
    %1245 = arith.mulf %1240, %1244 : vector<8x8xf32>
    %cst_358 = arith.constant dense<0.000000e+00> : vector<8x32xf32>
    %1246 = tpu.matmul %1245, %1206, %cst_358 {dimension_numbers = #tpu.dot_dimension_numbers<[1], [0], [0], [1], [0, 0, 1, 1], [], []>} : vector<8x8xf32>, vector<8x32xf32>, vector<8x32xf32> -> vector<8x32xf32>
    %1247 = vector.broadcast %1231 : vector<1x32xf32> to vector<8x32xf32>
    %1248 = arith.mulf %1246, %1247 : vector<8x32xf32>
    %1249 = arith.addf %1229, %1248 : vector<8x32xf32>
    %1250 = vector.extract_strided_slice %0 {offsets = [2, 0, 0], sizes = [1, 1, 32], strides = [1, 1, 1]} : vector<4x1x32xf32> to vector<1x1x32xf32>
    %1251 = vector.shape_cast %1250 : vector<1x1x32xf32> to vector<1x32xf32>
    %1252 = vector.broadcast %1251 : vector<1x32xf32> to vector<8x32xf32>
    %1253 = arith.mulf %1204, %1252 : vector<8x32xf32>
    %cst_359 = arith.constant dense<0.000000e+00> : vector<8x8xf32>
    %1254 = tpu.matmul %1253, %1205, %cst_359 {dimension_numbers = #tpu.dot_dimension_numbers<[1], [1], [0], [0], [0, 0, 1, 0], [], []>} : vector<8x32xf32>, vector<8x32xf32>, vector<8x8xf32> -> vector<8x8xf32>
    %1255 = arith.addf %1254, %1208 : vector<8x8xf32>
    %cst_360 = arith.constant dense<0xFF800000> : vector<8xf32>
    %1256 = vector.multi_reduction <maximumf>, %1255, %cst_360 [1] : vector<8x8xf32> to vector<8xf32>
    %1257 = vector.shape_cast %1256 : vector<8xf32> to vector<8x1xf32>
    %1258 = vector.broadcast %1257 : vector<8x1xf32> to vector<8x8xf32>
    %1259 = arith.subf %1255, %1258 : vector<8x8xf32>
    %1260 = math.exp %1259 : vector<8x8xf32>
    %cst_361 = arith.constant dense<0.000000e+00> : vector<8xf32>
    %1261 = vector.multi_reduction <add>, %1260, %cst_361 [1] : vector<8x8xf32> to vector<8xf32>
    %1262 = vector.shape_cast %1261 : vector<8xf32> to vector<8x1xf32>
    %1263 = tpu.reciprocal %1262 {approx = true} : vector<8x1xf32> -> vector<8x1xf32>
    %1264 = vector.broadcast %1263 : vector<8x1xf32> to vector<8x8xf32>
    %1265 = arith.mulf %1260, %1264 : vector<8x8xf32>
    %cst_362 = arith.constant dense<0.000000e+00> : vector<8x32xf32>
    %1266 = tpu.matmul %1265, %1206, %cst_362 {dimension_numbers = #tpu.dot_dimension_numbers<[1], [0], [0], [1], [0, 0, 1, 1], [], []>} : vector<8x8xf32>, vector<8x32xf32>, vector<8x32xf32> -> vector<8x32xf32>
    %1267 = vector.broadcast %1251 : vector<1x32xf32> to vector<8x32xf32>
    %1268 = arith.mulf %1266, %1267 : vector<8x32xf32>
    %1269 = arith.addf %1249, %1268 : vector<8x32xf32>
    %1270 = vector.extract_strided_slice %0 {offsets = [3, 0, 0], sizes = [1, 1, 32], strides = [1, 1, 1]} : vector<4x1x32xf32> to vector<1x1x32xf32>
    %1271 = vector.shape_cast %1270 : vector<1x1x32xf32> to vector<1x32xf32>
    %1272 = vector.broadcast %1271 : vector<1x32xf32> to vector<8x32xf32>
    %1273 = arith.mulf %1204, %1272 : vector<8x32xf32>
    %cst_363 = arith.constant dense<0.000000e+00> : vector<8x8xf32>
    %1274 = tpu.matmul %1273, %1205, %cst_363 {dimension_numbers = #tpu.dot_dimension_numbers<[1], [1], [0], [0], [0, 0, 1, 0], [], []>} : vector<8x32xf32>, vector<8x32xf32>, vector<8x8xf32> -> vector<8x8xf32>
    %1275 = arith.addf %1274, %1208 : vector<8x8xf32>
    %cst_364 = arith.constant dense<0xFF800000> : vector<8xf32>
    %1276 = vector.multi_reduction <maximumf>, %1275, %cst_364 [1] : vector<8x8xf32> to vector<8xf32>
    %1277 = vector.shape_cast %1276 : vector<8xf32> to vector<8x1xf32>
    %1278 = vector.broadcast %1277 : vector<8x1xf32> to vector<8x8xf32>
    %1279 = arith.subf %1275, %1278 : vector<8x8xf32>
    %1280 = math.exp %1279 : vector<8x8xf32>
    %cst_365 = arith.constant dense<0.000000e+00> : vector<8xf32>
    %1281 = vector.multi_reduction <add>, %1280, %cst_365 [1] : vector<8x8xf32> to vector<8xf32>
    %1282 = vector.shape_cast %1281 : vector<8xf32> to vector<8x1xf32>
    %1283 = tpu.reciprocal %1282 {approx = true} : vector<8x1xf32> -> vector<8x1xf32>
    %1284 = vector.broadcast %1283 : vector<8x1xf32> to vector<8x8xf32>
    %1285 = arith.mulf %1280, %1284 : vector<8x8xf32>
    %cst_366 = arith.constant dense<0.000000e+00> : vector<8x32xf32>
    %1286 = tpu.matmul %1285, %1206, %cst_366 {dimension_numbers = #tpu.dot_dimension_numbers<[1], [0], [0], [1], [0, 0, 1, 1], [], []>} : vector<8x8xf32>, vector<8x32xf32>, vector<8x32xf32> -> vector<8x32xf32>
    %1287 = vector.broadcast %1271 : vector<1x32xf32> to vector<8x32xf32>
    %1288 = arith.mulf %1286, %1287 : vector<8x32xf32>
    %1289 = arith.addf %1269, %1288 : vector<8x32xf32>
    %1290 = tpu.concatenate %1203, %1289 in 0 : vector<8x32xf32>, vector<8x32xf32> -> vector<16x32xf32>
    %1291 = vector.extract_strided_slice %1084 {offsets = [3, 0, 0], sizes = [1, 32, 32], strides = [1, 1, 1]} : vector<4x32x32xf32> to vector<1x32x32xf32>
    %1292 = vector.shape_cast %1291 : vector<1x32x32xf32> to vector<32x32xf32>
    %cst_367 = arith.constant dense<0.000000e+00> : vector<16x32xf32>
    %1293 = tpu.matmul %1290, %1292, %cst_367 {dimension_numbers = #tpu.dot_dimension_numbers<[1], [0], [0], [1], [0, 0, 1, 1], [], []>} : vector<16x32xf32>, vector<32x32xf32>, vector<16x32xf32> -> vector<16x32xf32>
    %1294 = vector.extract_strided_slice %1086 {offsets = [3, 0, 0], sizes = [1, 1, 32], strides = [1, 1, 1]} : vector<4x1x32xf32> to vector<1x1x32xf32>
    %1295 = vector.shape_cast %1294 : vector<1x1x32xf32> to vector<1x32xf32>
    %1296 = vector.broadcast %1295 : vector<1x32xf32> to vector<16x32xf32>
    %1297 = arith.addf %1293, %1296 : vector<16x32xf32>
    %1298 = arith.addf %1082, %1297 : vector<16x32xf32>
    %1299 = vector.extract_strided_slice %1092 {offsets = [0, 0, 0], sizes = [1, 1, 32], strides = [1, 1, 1]} : vector<3x1x32xf32> to vector<1x1x32xf32>
    %1300 = vector.shape_cast %1299 : vector<1x1x32xf32> to vector<1x32xf32>
    %1301 = vector.extract_strided_slice %1094 {offsets = [0, 0, 0], sizes = [1, 1, 32], strides = [1, 1, 1]} : vector<3x1x32xf32> to vector<1x1x32xf32>
    %1302 = vector.shape_cast %1301 : vector<1x1x32xf32> to vector<1x32xf32>
    %cst_368 = arith.constant dense<0.000000e+00> : vector<16xf32>
    %1303 = vector.multi_reduction <add>, %1298, %cst_368 [1] : vector<16x32xf32> to vector<16xf32>
    %1304 = vector.shape_cast %1303 : vector<16xf32> to vector<16x1xf32>
    %cst_369 = arith.constant 3.200000e+01 : f32
    %1305 = vector.broadcast %cst_369 : f32 to vector<16x1xf32>
    %1306 = arith.divf %1304, %1305 : vector<16x1xf32>
    %1307 = vector.broadcast %1306 : vector<16x1xf32> to vector<16x32xf32>
    %1308 = arith.subf %1298, %1307 : vector<16x32xf32>
    %1309 = arith.mulf %1308, %1308 : vector<16x32xf32>
    %cst_370 = arith.constant dense<0.000000e+00> : vector<16xf32>
    %1310 = vector.multi_reduction <add>, %1309, %cst_370 [1] : vector<16x32xf32> to vector<16xf32>
    %1311 = vector.shape_cast %1310 : vector<16xf32> to vector<16x1xf32>
    %cst_371 = arith.constant 3.200000e+01 : f32
    %1312 = vector.broadcast %cst_371 : f32 to vector<16x1xf32>
    %1313 = arith.divf %1311, %1312 : vector<16x1xf32>
    %1314 = vector.broadcast %1306 : vector<16x1xf32> to vector<16x32xf32>
    %1315 = arith.subf %1298, %1314 : vector<16x32xf32>
    %cst_372 = arith.constant 9.99999974E-6 : f32
    %1316 = vector.broadcast %cst_372 : f32 to vector<16x1xf32>
    %1317 = arith.addf %1313, %1316 : vector<16x1xf32>
    %1318 = math.rsqrt %1317 : vector<16x1xf32>
    %1319 = vector.broadcast %1318 : vector<16x1xf32> to vector<16x32xf32>
    %1320 = arith.mulf %1315, %1319 : vector<16x32xf32>
    %1321 = vector.broadcast %1300 : vector<1x32xf32> to vector<16x32xf32>
    %1322 = arith.mulf %1320, %1321 : vector<16x32xf32>
    %1323 = vector.broadcast %1302 : vector<1x32xf32> to vector<16x32xf32>
    %1324 = arith.addf %1322, %1323 : vector<16x32xf32>
    %1325 = vector.extract_strided_slice %1088 {offsets = [0, 0, 0], sizes = [1, 32, 32], strides = [1, 1, 1]} : vector<4x32x32xf32> to vector<1x32x32xf32>
    %1326 = vector.shape_cast %1325 : vector<1x32x32xf32> to vector<32x32xf32>
    %cst_373 = arith.constant dense<0.000000e+00> : vector<16x32xf32>
    %1327 = tpu.matmul %1324, %1326, %cst_373 {dimension_numbers = #tpu.dot_dimension_numbers<[1], [0], [0], [1], [0, 0, 1, 1], [], []>} : vector<16x32xf32>, vector<32x32xf32>, vector<16x32xf32> -> vector<16x32xf32>
    %1328 = vector.extract_strided_slice %1090 {offsets = [0, 0, 0], sizes = [1, 1, 32], strides = [1, 1, 1]} : vector<4x1x32xf32> to vector<1x1x32xf32>
    %1329 = vector.shape_cast %1328 : vector<1x1x32xf32> to vector<1x32xf32>
    %1330 = vector.broadcast %1329 : vector<1x32xf32> to vector<16x32xf32>
    %1331 = arith.addf %1327, %1330 : vector<16x32xf32>
    %cst_374 = arith.constant 0.353553385 : f32
    %1332 = vector.broadcast %cst_374 : f32 to vector<16x32xf32>
    %1333 = arith.mulf %1331, %1332 : vector<16x32xf32>
    %1334 = vector.extract_strided_slice %1088 {offsets = [1, 0, 0], sizes = [1, 32, 32], strides = [1, 1, 1]} : vector<4x32x32xf32> to vector<1x32x32xf32>
    %1335 = vector.shape_cast %1334 : vector<1x32x32xf32> to vector<32x32xf32>
    %cst_375 = arith.constant dense<0.000000e+00> : vector<16x32xf32>
    %1336 = tpu.matmul %566, %1335, %cst_375 {dimension_numbers = #tpu.dot_dimension_numbers<[1], [0], [0], [1], [0, 0, 1, 1], [], []>} : vector<16x32xf32>, vector<32x32xf32>, vector<16x32xf32> -> vector<16x32xf32>
    %1337 = vector.extract_strided_slice %1090 {offsets = [1, 0, 0], sizes = [1, 1, 32], strides = [1, 1, 1]} : vector<4x1x32xf32> to vector<1x1x32xf32>
    %1338 = vector.shape_cast %1337 : vector<1x1x32xf32> to vector<1x32xf32>
    %1339 = vector.broadcast %1338 : vector<1x32xf32> to vector<16x32xf32>
    %1340 = arith.addf %1336, %1339 : vector<16x32xf32>
    %1341 = vector.extract_strided_slice %1088 {offsets = [2, 0, 0], sizes = [1, 32, 32], strides = [1, 1, 1]} : vector<4x32x32xf32> to vector<1x32x32xf32>
    %1342 = vector.shape_cast %1341 : vector<1x32x32xf32> to vector<32x32xf32>
    %cst_376 = arith.constant dense<0.000000e+00> : vector<16x32xf32>
    %1343 = tpu.matmul %566, %1342, %cst_376 {dimension_numbers = #tpu.dot_dimension_numbers<[1], [0], [0], [1], [0, 0, 1, 1], [], []>} : vector<16x32xf32>, vector<32x32xf32>, vector<16x32xf32> -> vector<16x32xf32>
    %1344 = vector.extract_strided_slice %1090 {offsets = [2, 0, 0], sizes = [1, 1, 32], strides = [1, 1, 1]} : vector<4x1x32xf32> to vector<1x1x32xf32>
    %1345 = vector.shape_cast %1344 : vector<1x1x32xf32> to vector<1x32xf32>
    %1346 = vector.broadcast %1345 : vector<1x32xf32> to vector<16x32xf32>
    %1347 = arith.addf %1343, %1346 : vector<16x32xf32>
    %1348 = vector.extract_strided_slice %1333 {offsets = [0, 0], sizes = [8, 32], strides = [1, 1]} : vector<16x32xf32> to vector<8x32xf32>
    %1349 = vector.extract_strided_slice %1340 {offsets = [0, 0], sizes = [8, 32], strides = [1, 1]} : vector<16x32xf32> to vector<8x32xf32>
    %1350 = vector.extract_strided_slice %1347 {offsets = [0, 0], sizes = [8, 32], strides = [1, 1]} : vector<16x32xf32> to vector<8x32xf32>
    %1351 = vector.extract_strided_slice %3 {offsets = [0, 0, 0], sizes = [1, 8, 8], strides = [1, 1, 1]} : vector<2x8x8xf32> to vector<1x8x8xf32>
    %1352 = vector.shape_cast %1351 : vector<1x8x8xf32> to vector<8x8xf32>
    %cst_377 = arith.constant 0.000000e+00 : f32
    %1353 = vector.broadcast %cst_377 : f32 to vector<8x32xf32>
    %1354 = vector.extract_strided_slice %0 {offsets = [0, 0, 0], sizes = [1, 1, 32], strides = [1, 1, 1]} : vector<4x1x32xf32> to vector<1x1x32xf32>
    %1355 = vector.shape_cast %1354 : vector<1x1x32xf32> to vector<1x32xf32>
    %1356 = vector.broadcast %1355 : vector<1x32xf32> to vector<8x32xf32>
    %1357 = arith.mulf %1348, %1356 : vector<8x32xf32>
    %cst_378 = arith.constant dense<0.000000e+00> : vector<8x8xf32>
    %1358 = tpu.matmul %1357, %1349, %cst_378 {dimension_numbers = #tpu.dot_dimension_numbers<[1], [1], [0], [0], [0, 0, 1, 0], [], []>} : vector<8x32xf32>, vector<8x32xf32>, vector<8x8xf32> -> vector<8x8xf32>
    %1359 = arith.addf %1358, %1352 : vector<8x8xf32>
    %cst_379 = arith.constant dense<0xFF800000> : vector<8xf32>
    %1360 = vector.multi_reduction <maximumf>, %1359, %cst_379 [1] : vector<8x8xf32> to vector<8xf32>
    %1361 = vector.shape_cast %1360 : vector<8xf32> to vector<8x1xf32>
    %1362 = vector.broadcast %1361 : vector<8x1xf32> to vector<8x8xf32>
    %1363 = arith.subf %1359, %1362 : vector<8x8xf32>
    %1364 = math.exp %1363 : vector<8x8xf32>
    %cst_380 = arith.constant dense<0.000000e+00> : vector<8xf32>
    %1365 = vector.multi_reduction <add>, %1364, %cst_380 [1] : vector<8x8xf32> to vector<8xf32>
    %1366 = vector.shape_cast %1365 : vector<8xf32> to vector<8x1xf32>
    %1367 = tpu.reciprocal %1366 {approx = true} : vector<8x1xf32> -> vector<8x1xf32>
    %1368 = vector.broadcast %1367 : vector<8x1xf32> to vector<8x8xf32>
    %1369 = arith.mulf %1364, %1368 : vector<8x8xf32>
    %c0_381 = arith.constant 0 : index
    %c0_382 = arith.constant 0 : index
    %1370 = vector.load %arg27[%c0_381, %c0_382] : memref<64x8xf32, #tpu.memory_space<vmem>>, vector<8x8xf32>
    tpu.vector_store %arg27[%c0_381, %c0_382], %1369 {strides = array<i32>} : memref<64x8xf32, #tpu.memory_space<vmem>>, vector<8x8xf32>,
    %cst_383 = arith.constant dense<0.000000e+00> : vector<8x32xf32>
    %1371 = tpu.matmul %1369, %1350, %cst_383 {dimension_numbers = #tpu.dot_dimension_numbers<[1], [0], [0], [1], [0, 0, 1, 1], [], []>} : vector<8x8xf32>, vector<8x32xf32>, vector<8x32xf32> -> vector<8x32xf32>
    %1372 = vector.broadcast %1355 : vector<1x32xf32> to vector<8x32xf32>
    %1373 = arith.mulf %1371, %1372 : vector<8x32xf32>
    %1374 = arith.addf %1353, %1373 : vector<8x32xf32>
    %1375 = vector.extract_strided_slice %0 {offsets = [1, 0, 0], sizes = [1, 1, 32], strides = [1, 1, 1]} : vector<4x1x32xf32> to vector<1x1x32xf32>
    %1376 = vector.shape_cast %1375 : vector<1x1x32xf32> to vector<1x32xf32>
    %1377 = vector.broadcast %1376 : vector<1x32xf32> to vector<8x32xf32>
    %1378 = arith.mulf %1348, %1377 : vector<8x32xf32>
    %cst_384 = arith.constant dense<0.000000e+00> : vector<8x8xf32>
    %1379 = tpu.matmul %1378, %1349, %cst_384 {dimension_numbers = #tpu.dot_dimension_numbers<[1], [1], [0], [0], [0, 0, 1, 0], [], []>} : vector<8x32xf32>, vector<8x32xf32>, vector<8x8xf32> -> vector<8x8xf32>
    %1380 = arith.addf %1379, %1352 : vector<8x8xf32>
    %cst_385 = arith.constant dense<0xFF800000> : vector<8xf32>
    %1381 = vector.multi_reduction <maximumf>, %1380, %cst_385 [1] : vector<8x8xf32> to vector<8xf32>
    %1382 = vector.shape_cast %1381 : vector<8xf32> to vector<8x1xf32>
    %1383 = vector.broadcast %1382 : vector<8x1xf32> to vector<8x8xf32>
    %1384 = arith.subf %1380, %1383 : vector<8x8xf32>
    %1385 = math.exp %1384 : vector<8x8xf32>
    %cst_386 = arith.constant dense<0.000000e+00> : vector<8xf32>
    %1386 = vector.multi_reduction <add>, %1385, %cst_386 [1] : vector<8x8xf32> to vector<8xf32>
    %1387 = vector.shape_cast %1386 : vector<8xf32> to vector<8x1xf32>
    %1388 = tpu.reciprocal %1387 {approx = true} : vector<8x1xf32> -> vector<8x1xf32>
    %1389 = vector.broadcast %1388 : vector<8x1xf32> to vector<8x8xf32>
    %1390 = arith.mulf %1385, %1389 : vector<8x8xf32>
    %c8 = arith.constant 8 : index
    %c0_387 = arith.constant 0 : index
    %1391 = vector.load %arg27[%c8, %c0_387] : memref<64x8xf32, #tpu.memory_space<vmem>>, vector<8x8xf32>
    tpu.vector_store %arg27[%c8, %c0_387], %1390 {strides = array<i32>} : memref<64x8xf32, #tpu.memory_space<vmem>>, vector<8x8xf32>,
    %cst_388 = arith.constant dense<0.000000e+00> : vector<8x32xf32>
    %1392 = tpu.matmul %1390, %1350, %cst_388 {dimension_numbers = #tpu.dot_dimension_numbers<[1], [0], [0], [1], [0, 0, 1, 1], [], []>} : vector<8x8xf32>, vector<8x32xf32>, vector<8x32xf32> -> vector<8x32xf32>
    %1393 = vector.broadcast %1376 : vector<1x32xf32> to vector<8x32xf32>
    %1394 = arith.mulf %1392, %1393 : vector<8x32xf32>
    %1395 = arith.addf %1374, %1394 : vector<8x32xf32>
    %1396 = vector.extract_strided_slice %0 {offsets = [2, 0, 0], sizes = [1, 1, 32], strides = [1, 1, 1]} : vector<4x1x32xf32> to vector<1x1x32xf32>
    %1397 = vector.shape_cast %1396 : vector<1x1x32xf32> to vector<1x32xf32>
    %1398 = vector.broadcast %1397 : vector<1x32xf32> to vector<8x32xf32>
    %1399 = arith.mulf %1348, %1398 : vector<8x32xf32>
    %cst_389 = arith.constant dense<0.000000e+00> : vector<8x8xf32>
    %1400 = tpu.matmul %1399, %1349, %cst_389 {dimension_numbers = #tpu.dot_dimension_numbers<[1], [1], [0], [0], [0, 0, 1, 0], [], []>} : vector<8x32xf32>, vector<8x32xf32>, vector<8x8xf32> -> vector<8x8xf32>
    %1401 = arith.addf %1400, %1352 : vector<8x8xf32>
    %cst_390 = arith.constant dense<0xFF800000> : vector<8xf32>
    %1402 = vector.multi_reduction <maximumf>, %1401, %cst_390 [1] : vector<8x8xf32> to vector<8xf32>
    %1403 = vector.shape_cast %1402 : vector<8xf32> to vector<8x1xf32>
    %1404 = vector.broadcast %1403 : vector<8x1xf32> to vector<8x8xf32>
    %1405 = arith.subf %1401, %1404 : vector<8x8xf32>
    %1406 = math.exp %1405 : vector<8x8xf32>
    %cst_391 = arith.constant dense<0.000000e+00> : vector<8xf32>
    %1407 = vector.multi_reduction <add>, %1406, %cst_391 [1] : vector<8x8xf32> to vector<8xf32>
    %1408 = vector.shape_cast %1407 : vector<8xf32> to vector<8x1xf32>
    %1409 = tpu.reciprocal %1408 {approx = true} : vector<8x1xf32> -> vector<8x1xf32>
    %1410 = vector.broadcast %1409 : vector<8x1xf32> to vector<8x8xf32>
    %1411 = arith.mulf %1406, %1410 : vector<8x8xf32>
    %c16 = arith.constant 16 : index
    %c0_392 = arith.constant 0 : index
    %1412 = vector.load %arg27[%c16, %c0_392] : memref<64x8xf32, #tpu.memory_space<vmem>>, vector<8x8xf32>
    tpu.vector_store %arg27[%c16, %c0_392], %1411 {strides = array<i32>} : memref<64x8xf32, #tpu.memory_space<vmem>>, vector<8x8xf32>,
    %cst_393 = arith.constant dense<0.000000e+00> : vector<8x32xf32>
    %1413 = tpu.matmul %1411, %1350, %cst_393 {dimension_numbers = #tpu.dot_dimension_numbers<[1], [0], [0], [1], [0, 0, 1, 1], [], []>} : vector<8x8xf32>, vector<8x32xf32>, vector<8x32xf32> -> vector<8x32xf32>
    %1414 = vector.broadcast %1397 : vector<1x32xf32> to vector<8x32xf32>
    %1415 = arith.mulf %1413, %1414 : vector<8x32xf32>
    %1416 = arith.addf %1395, %1415 : vector<8x32xf32>
    %1417 = vector.extract_strided_slice %0 {offsets = [3, 0, 0], sizes = [1, 1, 32], strides = [1, 1, 1]} : vector<4x1x32xf32> to vector<1x1x32xf32>
    %1418 = vector.shape_cast %1417 : vector<1x1x32xf32> to vector<1x32xf32>
    %1419 = vector.broadcast %1418 : vector<1x32xf32> to vector<8x32xf32>
    %1420 = arith.mulf %1348, %1419 : vector<8x32xf32>
    %cst_394 = arith.constant dense<0.000000e+00> : vector<8x8xf32>
    %1421 = tpu.matmul %1420, %1349, %cst_394 {dimension_numbers = #tpu.dot_dimension_numbers<[1], [1], [0], [0], [0, 0, 1, 0], [], []>} : vector<8x32xf32>, vector<8x32xf32>, vector<8x8xf32> -> vector<8x8xf32>
    %1422 = arith.addf %1421, %1352 : vector<8x8xf32>
    %cst_395 = arith.constant dense<0xFF800000> : vector<8xf32>
    %1423 = vector.multi_reduction <maximumf>, %1422, %cst_395 [1] : vector<8x8xf32> to vector<8xf32>
    %1424 = vector.shape_cast %1423 : vector<8xf32> to vector<8x1xf32>
    %1425 = vector.broadcast %1424 : vector<8x1xf32> to vector<8x8xf32>
    %1426 = arith.subf %1422, %1425 : vector<8x8xf32>
    %1427 = math.exp %1426 : vector<8x8xf32>
    %cst_396 = arith.constant dense<0.000000e+00> : vector<8xf32>
    %1428 = vector.multi_reduction <add>, %1427, %cst_396 [1] : vector<8x8xf32> to vector<8xf32>
    %1429 = vector.shape_cast %1428 : vector<8xf32> to vector<8x1xf32>
    %1430 = tpu.reciprocal %1429 {approx = true} : vector<8x1xf32> -> vector<8x1xf32>
    %1431 = vector.broadcast %1430 : vector<8x1xf32> to vector<8x8xf32>
    %1432 = arith.mulf %1427, %1431 : vector<8x8xf32>
    %c24 = arith.constant 24 : index
    %c0_397 = arith.constant 0 : index
    %1433 = vector.load %arg27[%c24, %c0_397] : memref<64x8xf32, #tpu.memory_space<vmem>>, vector<8x8xf32>
    tpu.vector_store %arg27[%c24, %c0_397], %1432 {strides = array<i32>} : memref<64x8xf32, #tpu.memory_space<vmem>>, vector<8x8xf32>,
    %cst_398 = arith.constant dense<0.000000e+00> : vector<8x32xf32>
    %1434 = tpu.matmul %1432, %1350, %cst_398 {dimension_numbers = #tpu.dot_dimension_numbers<[1], [0], [0], [1], [0, 0, 1, 1], [], []>} : vector<8x8xf32>, vector<8x32xf32>, vector<8x32xf32> -> vector<8x32xf32>
    %1435 = vector.broadcast %1418 : vector<1x32xf32> to vector<8x32xf32>
    %1436 = arith.mulf %1434, %1435 : vector<8x32xf32>
    %1437 = arith.addf %1416, %1436 : vector<8x32xf32>
    %1438 = vector.extract_strided_slice %1333 {offsets = [8, 0], sizes = [8, 32], strides = [1, 1]} : vector<16x32xf32> to vector<8x32xf32>
    %1439 = vector.extract_strided_slice %1340 {offsets = [8, 0], sizes = [8, 32], strides = [1, 1]} : vector<16x32xf32> to vector<8x32xf32>
    %1440 = vector.extract_strided_slice %1347 {offsets = [8, 0], sizes = [8, 32], strides = [1, 1]} : vector<16x32xf32> to vector<8x32xf32>
    %1441 = vector.extract_strided_slice %3 {offsets = [1, 0, 0], sizes = [1, 8, 8], strides = [1, 1, 1]} : vector<2x8x8xf32> to vector<1x8x8xf32>
    %1442 = vector.shape_cast %1441 : vector<1x8x8xf32> to vector<8x8xf32>
    %cst_399 = arith.constant 0.000000e+00 : f32
    %1443 = vector.broadcast %cst_399 : f32 to vector<8x32xf32>
    %1444 = vector.extract_strided_slice %0 {offsets = [0, 0, 0], sizes = [1, 1, 32], strides = [1, 1, 1]} : vector<4x1x32xf32> to vector<1x1x32xf32>
    %1445 = vector.shape_cast %1444 : vector<1x1x32xf32> to vector<1x32xf32>
    %1446 = vector.broadcast %1445 : vector<1x32xf32> to vector<8x32xf32>
    %1447 = arith.mulf %1438, %1446 : vector<8x32xf32>
    %cst_400 = arith.constant dense<0.000000e+00> : vector<8x8xf32>
    %1448 = tpu.matmul %1447, %1439, %cst_400 {dimension_numbers = #tpu.dot_dimension_numbers<[1], [1], [0], [0], [0, 0, 1, 0], [], []>} : vector<8x32xf32>, vector<8x32xf32>, vector<8x8xf32> -> vector<8x8xf32>
    %1449 = arith.addf %1448, %1442 : vector<8x8xf32>
    %cst_401 = arith.constant dense<0xFF800000> : vector<8xf32>
    %1450 = vector.multi_reduction <maximumf>, %1449, %cst_401 [1] : vector<8x8xf32> to vector<8xf32>
    %1451 = vector.shape_cast %1450 : vector<8xf32> to vector<8x1xf32>
    %1452 = vector.broadcast %1451 : vector<8x1xf32> to vector<8x8xf32>
    %1453 = arith.subf %1449, %1452 : vector<8x8xf32>
    %1454 = math.exp %1453 : vector<8x8xf32>
    %cst_402 = arith.constant dense<0.000000e+00> : vector<8xf32>
    %1455 = vector.multi_reduction <add>, %1454, %cst_402 [1] : vector<8x8xf32> to vector<8xf32>
    %1456 = vector.shape_cast %1455 : vector<8xf32> to vector<8x1xf32>
    %1457 = tpu.reciprocal %1456 {approx = true} : vector<8x1xf32> -> vector<8x1xf32>
    %1458 = vector.broadcast %1457 : vector<8x1xf32> to vector<8x8xf32>
    %1459 = arith.mulf %1454, %1458 : vector<8x8xf32>
    %c32 = arith.constant 32 : index
    %c0_403 = arith.constant 0 : index
    %1460 = vector.load %arg27[%c32, %c0_403] : memref<64x8xf32, #tpu.memory_space<vmem>>, vector<8x8xf32>
    tpu.vector_store %arg27[%c32, %c0_403], %1459 {strides = array<i32>} : memref<64x8xf32, #tpu.memory_space<vmem>>, vector<8x8xf32>,
    %cst_404 = arith.constant dense<0.000000e+00> : vector<8x32xf32>
    %1461 = tpu.matmul %1459, %1440, %cst_404 {dimension_numbers = #tpu.dot_dimension_numbers<[1], [0], [0], [1], [0, 0, 1, 1], [], []>} : vector<8x8xf32>, vector<8x32xf32>, vector<8x32xf32> -> vector<8x32xf32>
    %1462 = vector.broadcast %1445 : vector<1x32xf32> to vector<8x32xf32>
    %1463 = arith.mulf %1461, %1462 : vector<8x32xf32>
    %1464 = arith.addf %1443, %1463 : vector<8x32xf32>
    %1465 = vector.extract_strided_slice %0 {offsets = [1, 0, 0], sizes = [1, 1, 32], strides = [1, 1, 1]} : vector<4x1x32xf32> to vector<1x1x32xf32>
    %1466 = vector.shape_cast %1465 : vector<1x1x32xf32> to vector<1x32xf32>
    %1467 = vector.broadcast %1466 : vector<1x32xf32> to vector<8x32xf32>
    %1468 = arith.mulf %1438, %1467 : vector<8x32xf32>
    %cst_405 = arith.constant dense<0.000000e+00> : vector<8x8xf32>
    %1469 = tpu.matmul %1468, %1439, %cst_405 {dimension_numbers = #tpu.dot_dimension_numbers<[1], [1], [0], [0], [0, 0, 1, 0], [], []>} : vector<8x32xf32>, vector<8x32xf32>, vector<8x8xf32> -> vector<8x8xf32>
    %1470 = arith.addf %1469, %1442 : vector<8x8xf32>
    %cst_406 = arith.constant dense<0xFF800000> : vector<8xf32>
    %1471 = vector.multi_reduction <maximumf>, %1470, %cst_406 [1] : vector<8x8xf32> to vector<8xf32>
    %1472 = vector.shape_cast %1471 : vector<8xf32> to vector<8x1xf32>
    %1473 = vector.broadcast %1472 : vector<8x1xf32> to vector<8x8xf32>
    %1474 = arith.subf %1470, %1473 : vector<8x8xf32>
    %1475 = math.exp %1474 : vector<8x8xf32>
    %cst_407 = arith.constant dense<0.000000e+00> : vector<8xf32>
    %1476 = vector.multi_reduction <add>, %1475, %cst_407 [1] : vector<8x8xf32> to vector<8xf32>
    %1477 = vector.shape_cast %1476 : vector<8xf32> to vector<8x1xf32>
    %1478 = tpu.reciprocal %1477 {approx = true} : vector<8x1xf32> -> vector<8x1xf32>
    %1479 = vector.broadcast %1478 : vector<8x1xf32> to vector<8x8xf32>
    %1480 = arith.mulf %1475, %1479 : vector<8x8xf32>
    %c40 = arith.constant 40 : index
    %c0_408 = arith.constant 0 : index
    %1481 = vector.load %arg27[%c40, %c0_408] : memref<64x8xf32, #tpu.memory_space<vmem>>, vector<8x8xf32>
    tpu.vector_store %arg27[%c40, %c0_408], %1480 {strides = array<i32>} : memref<64x8xf32, #tpu.memory_space<vmem>>, vector<8x8xf32>,
    %cst_409 = arith.constant dense<0.000000e+00> : vector<8x32xf32>
    %1482 = tpu.matmul %1480, %1440, %cst_409 {dimension_numbers = #tpu.dot_dimension_numbers<[1], [0], [0], [1], [0, 0, 1, 1], [], []>} : vector<8x8xf32>, vector<8x32xf32>, vector<8x32xf32> -> vector<8x32xf32>
    %1483 = vector.broadcast %1466 : vector<1x32xf32> to vector<8x32xf32>
    %1484 = arith.mulf %1482, %1483 : vector<8x32xf32>
    %1485 = arith.addf %1464, %1484 : vector<8x32xf32>
    %1486 = vector.extract_strided_slice %0 {offsets = [2, 0, 0], sizes = [1, 1, 32], strides = [1, 1, 1]} : vector<4x1x32xf32> to vector<1x1x32xf32>
    %1487 = vector.shape_cast %1486 : vector<1x1x32xf32> to vector<1x32xf32>
    %1488 = vector.broadcast %1487 : vector<1x32xf32> to vector<8x32xf32>
    %1489 = arith.mulf %1438, %1488 : vector<8x32xf32>
    %cst_410 = arith.constant dense<0.000000e+00> : vector<8x8xf32>
    %1490 = tpu.matmul %1489, %1439, %cst_410 {dimension_numbers = #tpu.dot_dimension_numbers<[1], [1], [0], [0], [0, 0, 1, 0], [], []>} : vector<8x32xf32>, vector<8x32xf32>, vector<8x8xf32> -> vector<8x8xf32>
    %1491 = arith.addf %1490, %1442 : vector<8x8xf32>
    %cst_411 = arith.constant dense<0xFF800000> : vector<8xf32>
    %1492 = vector.multi_reduction <maximumf>, %1491, %cst_411 [1] : vector<8x8xf32> to vector<8xf32>
    %1493 = vector.shape_cast %1492 : vector<8xf32> to vector<8x1xf32>
    %1494 = vector.broadcast %1493 : vector<8x1xf32> to vector<8x8xf32>
    %1495 = arith.subf %1491, %1494 : vector<8x8xf32>
    %1496 = math.exp %1495 : vector<8x8xf32>
    %cst_412 = arith.constant dense<0.000000e+00> : vector<8xf32>
    %1497 = vector.multi_reduction <add>, %1496, %cst_412 [1] : vector<8x8xf32> to vector<8xf32>
    %1498 = vector.shape_cast %1497 : vector<8xf32> to vector<8x1xf32>
    %1499 = tpu.reciprocal %1498 {approx = true} : vector<8x1xf32> -> vector<8x1xf32>
    %1500 = vector.broadcast %1499 : vector<8x1xf32> to vector<8x8xf32>
    %1501 = arith.mulf %1496, %1500 : vector<8x8xf32>
    %c48 = arith.constant 48 : index
    %c0_413 = arith.constant 0 : index
    %1502 = vector.load %arg27[%c48, %c0_413] : memref<64x8xf32, #tpu.memory_space<vmem>>, vector<8x8xf32>
    tpu.vector_store %arg27[%c48, %c0_413], %1501 {strides = array<i32>} : memref<64x8xf32, #tpu.memory_space<vmem>>, vector<8x8xf32>,
    %cst_414 = arith.constant dense<0.000000e+00> : vector<8x32xf32>
    %1503 = tpu.matmul %1501, %1440, %cst_414 {dimension_numbers = #tpu.dot_dimension_numbers<[1], [0], [0], [1], [0, 0, 1, 1], [], []>} : vector<8x8xf32>, vector<8x32xf32>, vector<8x32xf32> -> vector<8x32xf32>
    %1504 = vector.broadcast %1487 : vector<1x32xf32> to vector<8x32xf32>
    %1505 = arith.mulf %1503, %1504 : vector<8x32xf32>
    %1506 = arith.addf %1485, %1505 : vector<8x32xf32>
    %1507 = vector.extract_strided_slice %0 {offsets = [3, 0, 0], sizes = [1, 1, 32], strides = [1, 1, 1]} : vector<4x1x32xf32> to vector<1x1x32xf32>
    %1508 = vector.shape_cast %1507 : vector<1x1x32xf32> to vector<1x32xf32>
    %1509 = vector.broadcast %1508 : vector<1x32xf32> to vector<8x32xf32>
    %1510 = arith.mulf %1438, %1509 : vector<8x32xf32>
    %cst_415 = arith.constant dense<0.000000e+00> : vector<8x8xf32>
    %1511 = tpu.matmul %1510, %1439, %cst_415 {dimension_numbers = #tpu.dot_dimension_numbers<[1], [1], [0], [0], [0, 0, 1, 0], [], []>} : vector<8x32xf32>, vector<8x32xf32>, vector<8x8xf32> -> vector<8x8xf32>
    %1512 = arith.addf %1511, %1442 : vector<8x8xf32>
    %cst_416 = arith.constant dense<0xFF800000> : vector<8xf32>
    %1513 = vector.multi_reduction <maximumf>, %1512, %cst_416 [1] : vector<8x8xf32> to vector<8xf32>
    %1514 = vector.shape_cast %1513 : vector<8xf32> to vector<8x1xf32>
    %1515 = vector.broadcast %1514 : vector<8x1xf32> to vector<8x8xf32>
    %1516 = arith.subf %1512, %1515 : vector<8x8xf32>
    %1517 = math.exp %1516 : vector<8x8xf32>
    %cst_417 = arith.constant dense<0.000000e+00> : vector<8xf32>
    %1518 = vector.multi_reduction <add>, %1517, %cst_417 [1] : vector<8x8xf32> to vector<8xf32>
    %1519 = vector.shape_cast %1518 : vector<8xf32> to vector<8x1xf32>
    %1520 = tpu.reciprocal %1519 {approx = true} : vector<8x1xf32> -> vector<8x1xf32>
    %1521 = vector.broadcast %1520 : vector<8x1xf32> to vector<8x8xf32>
    %1522 = arith.mulf %1517, %1521 : vector<8x8xf32>
    %c56 = arith.constant 56 : index
    %c0_418 = arith.constant 0 : index
    %1523 = vector.load %arg27[%c56, %c0_418] : memref<64x8xf32, #tpu.memory_space<vmem>>, vector<8x8xf32>
    tpu.vector_store %arg27[%c56, %c0_418], %1522 {strides = array<i32>} : memref<64x8xf32, #tpu.memory_space<vmem>>, vector<8x8xf32>,
    %cst_419 = arith.constant dense<0.000000e+00> : vector<8x32xf32>
    %1524 = tpu.matmul %1522, %1440, %cst_419 {dimension_numbers = #tpu.dot_dimension_numbers<[1], [0], [0], [1], [0, 0, 1, 1], [], []>} : vector<8x8xf32>, vector<8x32xf32>, vector<8x32xf32> -> vector<8x32xf32>
    %1525 = vector.broadcast %1508 : vector<1x32xf32> to vector<8x32xf32>
    %1526 = arith.mulf %1524, %1525 : vector<8x32xf32>
    %1527 = arith.addf %1506, %1526 : vector<8x32xf32>
    %1528 = tpu.concatenate %1437, %1527 in 0 : vector<8x32xf32>, vector<8x32xf32> -> vector<16x32xf32>
    %1529 = vector.extract_strided_slice %1088 {offsets = [3, 0, 0], sizes = [1, 32, 32], strides = [1, 1, 1]} : vector<4x32x32xf32> to vector<1x32x32xf32>
    %1530 = vector.shape_cast %1529 : vector<1x32x32xf32> to vector<32x32xf32>
    %cst_420 = arith.constant dense<0.000000e+00> : vector<16x32xf32>
    %1531 = tpu.matmul %1528, %1530, %cst_420 {dimension_numbers = #tpu.dot_dimension_numbers<[1], [0], [0], [1], [0, 0, 1, 1], [], []>} : vector<16x32xf32>, vector<32x32xf32>, vector<16x32xf32> -> vector<16x32xf32>
    %1532 = vector.extract_strided_slice %1090 {offsets = [3, 0, 0], sizes = [1, 1, 32], strides = [1, 1, 1]} : vector<4x1x32xf32> to vector<1x1x32xf32>
    %1533 = vector.shape_cast %1532 : vector<1x1x32xf32> to vector<1x32xf32>
    %1534 = vector.broadcast %1533 : vector<1x32xf32> to vector<16x32xf32>
    %1535 = arith.addf %1531, %1534 : vector<16x32xf32>
    %1536 = arith.addf %1324, %1535 : vector<16x32xf32>
    %1537 = vector.extract_strided_slice %1092 {offsets = [1, 0, 0], sizes = [1, 1, 32], strides = [1, 1, 1]} : vector<3x1x32xf32> to vector<1x1x32xf32>
    %1538 = vector.shape_cast %1537 : vector<1x1x32xf32> to vector<1x32xf32>
    %1539 = vector.extract_strided_slice %1094 {offsets = [1, 0, 0], sizes = [1, 1, 32], strides = [1, 1, 1]} : vector<3x1x32xf32> to vector<1x1x32xf32>
    %1540 = vector.shape_cast %1539 : vector<1x1x32xf32> to vector<1x32xf32>
    %cst_421 = arith.constant dense<0.000000e+00> : vector<16xf32>
    %1541 = vector.multi_reduction <add>, %1536, %cst_421 [1] : vector<16x32xf32> to vector<16xf32>
    %1542 = vector.shape_cast %1541 : vector<16xf32> to vector<16x1xf32>
    %cst_422 = arith.constant 3.200000e+01 : f32
    %1543 = vector.broadcast %cst_422 : f32 to vector<16x1xf32>
    %1544 = arith.divf %1542, %1543 : vector<16x1xf32>
    %1545 = vector.broadcast %1544 : vector<16x1xf32> to vector<16x32xf32>
    %1546 = arith.subf %1536, %1545 : vector<16x32xf32>
    %1547 = arith.mulf %1546, %1546 : vector<16x32xf32>
    %cst_423 = arith.constant dense<0.000000e+00> : vector<16xf32>
    %1548 = vector.multi_reduction <add>, %1547, %cst_423 [1] : vector<16x32xf32> to vector<16xf32>
    %1549 = vector.shape_cast %1548 : vector<16xf32> to vector<16x1xf32>
    %cst_424 = arith.constant 3.200000e+01 : f32
    %1550 = vector.broadcast %cst_424 : f32 to vector<16x1xf32>
    %1551 = arith.divf %1549, %1550 : vector<16x1xf32>
    %1552 = vector.broadcast %1544 : vector<16x1xf32> to vector<16x32xf32>
    %1553 = arith.subf %1536, %1552 : vector<16x32xf32>
    %cst_425 = arith.constant 9.99999974E-6 : f32
    %1554 = vector.broadcast %cst_425 : f32 to vector<16x1xf32>
    %1555 = arith.addf %1551, %1554 : vector<16x1xf32>
    %1556 = math.rsqrt %1555 : vector<16x1xf32>
    %1557 = vector.broadcast %1556 : vector<16x1xf32> to vector<16x32xf32>
    %1558 = arith.mulf %1553, %1557 : vector<16x32xf32>
    %1559 = vector.broadcast %1538 : vector<1x32xf32> to vector<16x32xf32>
    %1560 = arith.mulf %1558, %1559 : vector<16x32xf32>
    %1561 = vector.broadcast %1540 : vector<1x32xf32> to vector<16x32xf32>
    %1562 = arith.addf %1560, %1561 : vector<16x32xf32>
    %c1_426 = arith.constant 1 : index
    %c0_427 = arith.constant 0 : index
    %c0_428 = arith.constant 0 : index
    %1563 = vector.load %arg20[%c1_426, %c0_427, %c0_428] : memref<2x32x64xf32, #tpu.memory_space<vmem>>, vector<1x32x64xf32>
    %1564 = vector.shape_cast %1563 : vector<1x32x64xf32> to vector<32x64xf32>
    %cst_429 = arith.constant dense<0.000000e+00> : vector<16x64xf32>
    %1565 = tpu.matmul %1562, %1564, %cst_429 {dimension_numbers = #tpu.dot_dimension_numbers<[1], [0], [0], [1], [0, 0, 1, 1], [], []>} : vector<16x32xf32>, vector<32x64xf32>, vector<16x64xf32> -> vector<16x64xf32>
    %c1_430 = arith.constant 1 : index
    %c0_431 = arith.constant 0 : index
    %c0_432 = arith.constant 0 : index
    %1566 = vector.load %arg21[%c1_430, %c0_431, %c0_432] : memref<2x1x64xf32, #tpu.memory_space<vmem>>, vector<1x1x64xf32>
    %1567 = vector.shape_cast %1566 : vector<1x1x64xf32> to vector<1x64xf32>
    %1568 = vector.broadcast %1567 : vector<1x64xf32> to vector<16x64xf32>
    %1569 = arith.addf %1565, %1568 : vector<16x64xf32>
    %cst_433 = arith.constant 0.000000e+00 : f32
    %1570 = vector.broadcast %cst_433 : f32 to vector<16x64xf32>
    %1571 = arith.maximumf %1569, %1570 : vector<16x64xf32>
    %c1_434 = arith.constant 1 : index
    %c0_435 = arith.constant 0 : index
    %c0_436 = arith.constant 0 : index
    %1572 = vector.load %arg22[%c1_434, %c0_435, %c0_436] : memref<2x64x32xf32, #tpu.memory_space<vmem>>, vector<1x64x32xf32>
    %1573 = vector.shape_cast %1572 : vector<1x64x32xf32> to vector<64x32xf32>
    %cst_437 = arith.constant dense<0.000000e+00> : vector<16x32xf32>
    %1574 = tpu.matmul %1571, %1573, %cst_437 {dimension_numbers = #tpu.dot_dimension_numbers<[1], [0], [0], [1], [0, 0, 1, 1], [], []>} : vector<16x64xf32>, vector<64x32xf32>, vector<16x32xf32> -> vector<16x32xf32>
    %c1_438 = arith.constant 1 : index
    %c0_439 = arith.constant 0 : index
    %c0_440 = arith.constant 0 : index
    %1575 = vector.load %arg23[%c1_438, %c0_439, %c0_440] : memref<2x1x32xf32, #tpu.memory_space<vmem>>, vector<1x1x32xf32>
    %1576 = vector.shape_cast %1575 : vector<1x1x32xf32> to vector<1x32xf32>
    %1577 = vector.broadcast %1576 : vector<1x32xf32> to vector<16x32xf32>
    %1578 = arith.addf %1574, %1577 : vector<16x32xf32>
    %1579 = arith.addf %1562, %1578 : vector<16x32xf32>
    %1580 = vector.extract_strided_slice %1092 {offsets = [2, 0, 0], sizes = [1, 1, 32], strides = [1, 1, 1]} : vector<3x1x32xf32> to vector<1x1x32xf32>
    %1581 = vector.shape_cast %1580 : vector<1x1x32xf32> to vector<1x32xf32>
    %1582 = vector.extract_strided_slice %1094 {offsets = [2, 0, 0], sizes = [1, 1, 32], strides = [1, 1, 1]} : vector<3x1x32xf32> to vector<1x1x32xf32>
    %1583 = vector.shape_cast %1582 : vector<1x1x32xf32> to vector<1x32xf32>
    %cst_441 = arith.constant dense<0.000000e+00> : vector<16xf32>
    %1584 = vector.multi_reduction <add>, %1579, %cst_441 [1] : vector<16x32xf32> to vector<16xf32>
    %1585 = vector.shape_cast %1584 : vector<16xf32> to vector<16x1xf32>
    %cst_442 = arith.constant 3.200000e+01 : f32
    %1586 = vector.broadcast %cst_442 : f32 to vector<16x1xf32>
    %1587 = arith.divf %1585, %1586 : vector<16x1xf32>
    %1588 = vector.broadcast %1587 : vector<16x1xf32> to vector<16x32xf32>
    %1589 = arith.subf %1579, %1588 : vector<16x32xf32>
    %1590 = arith.mulf %1589, %1589 : vector<16x32xf32>
    %cst_443 = arith.constant dense<0.000000e+00> : vector<16xf32>
    %1591 = vector.multi_reduction <add>, %1590, %cst_443 [1] : vector<16x32xf32> to vector<16xf32>
    %1592 = vector.shape_cast %1591 : vector<16xf32> to vector<16x1xf32>
    %cst_444 = arith.constant 3.200000e+01 : f32
    %1593 = vector.broadcast %cst_444 : f32 to vector<16x1xf32>
    %1594 = arith.divf %1592, %1593 : vector<16x1xf32>
    %1595 = vector.broadcast %1587 : vector<16x1xf32> to vector<16x32xf32>
    %1596 = arith.subf %1579, %1595 : vector<16x32xf32>
    %cst_445 = arith.constant 9.99999974E-6 : f32
    %1597 = vector.broadcast %cst_445 : f32 to vector<16x1xf32>
    %1598 = arith.addf %1594, %1597 : vector<16x1xf32>
    %1599 = math.rsqrt %1598 : vector<16x1xf32>
    %1600 = vector.broadcast %1599 : vector<16x1xf32> to vector<16x32xf32>
    %1601 = arith.mulf %1596, %1600 : vector<16x32xf32>
    %1602 = vector.broadcast %1581 : vector<1x32xf32> to vector<16x32xf32>
    %1603 = arith.mulf %1601, %1602 : vector<16x32xf32>
    %1604 = vector.broadcast %1583 : vector<1x32xf32> to vector<16x32xf32>
    %1605 = arith.addf %1603, %1604 : vector<16x32xf32>
    %c0_446 = arith.constant 0 : index
    %c0_447 = arith.constant 0 : index
    %1606 = vector.load %arg24[%c0_446, %c0_447] : memref<32x128xf32, #tpu.memory_space<vmem>>, vector<32x128xf32>
    %cst_448 = arith.constant dense<0.000000e+00> : vector<16x128xf32>
    %1607 = tpu.matmul %1605, %1606, %cst_448 {dimension_numbers = #tpu.dot_dimension_numbers<[1], [0], [0], [1], [0, 0, 1, 1], [], []>} : vector<16x32xf32>, vector<32x128xf32>, vector<16x128xf32> -> vector<16x128xf32>
    %c0_449 = arith.constant 0 : index
    %c0_450 = arith.constant 0 : index
    %1608 = vector.load %arg25[%c0_449, %c0_450] : memref<1x128xf32, #tpu.memory_space<vmem>>, vector<1x128xf32>
    %1609 = vector.broadcast %1608 : vector<1x128xf32> to vector<16x128xf32>
    %1610 = arith.addf %1607, %1609 : vector<16x128xf32>
    %c0_451 = arith.constant 0 : index
    %c0_452 = arith.constant 0 : index
    %1611 = vector.load %arg26[%c0_451, %c0_452] : memref<16x128xf32, #tpu.memory_space<vmem>>, vector<16x128xf32>
    tpu.vector_store %arg26[%c0_451, %c0_452], %1610 {strides = array<i32>} : memref<16x128xf32, #tpu.memory_space<vmem>>, vector<16x128xf32>,
    return
  }
}

</mosaic_0001>

<bundles_post_ra>
// kernel: transformer_forward.1
= control target key start
LH: loop header
LB: loop body
LE: loop exit
PB: predicated region body
PF: predicated region fallthrough
CT: control target
= control target key end

     0   :  { %s15462_s0 = inlined_call_operand.vmem [shape: f32[16,32], index: 0, kind: input, shape index: {}]   ;;  %s15463_s1 = inlined_call_operand.vmem [shape: f32[16,32], index: 1, kind: input, shape index: {}]   ;;  %s15464_s2 = inlined_call_operand.vmem [shape: f32[2,8,8], index: 2, kind: input, shape index: {}, may-alias: {2,4}]   ;;  %s15465_s3 = inlined_call_operand.vmem [shape: f32[2,8,8], index: 3, kind: input, shape index: {}]   ;;  %s15466_s4 = inlined_call_operand.vmem [shape: f32[2,8,8], index: 4, kind: input, shape index: {}, may-alias: {2,4}]   ;;  %s15467_s5 = inlined_call_operand.vmem [shape: f32[4,1,32], index: 5, kind: input, shape index: {}]   ;;  %s15468_s6 = inlined_call_operand.vmem [shape: f32[2,4,32,32], index: 6, kind: input, shape index: {}]   ;;  %s15469_s7 = inlined_call_operand.vmem [shape: f32[2,4,1,32], index: 7, kind: input, shape index: {}]   ;;  %s15470_s8 = inlined_call_operand.vmem [shape: f32[2,2,1,32], index: 8, kind: input, shape index: {}]   ;;  %s15471_s9 = inlined_call_operand.vmem [shape: f32[2,2,1,32], index: 9, kind: input, shape index: {}]   ;;  %s15472_s10 = inlined_call_operand.vmem [shape: f32[2,32,64], index: 10, kind: input, shape index: {}]   ;;  %s15473_s11 = inlined_call_operand.vmem [shape: f32[2,1,64], index: 11, kind: input, shape index: {}]   ;;  %s15474_s12 = inlined_call_operand.vmem [shape: f32[2,64,32], index: 12, kind: input, shape index: {}]   ;;  %s15475_s13 = inlined_call_operand.vmem [shape: f32[2,1,32], index: 13, kind: input, shape index: {}]   ;;  %s15476_s14 = inlined_call_operand.vmem [shape: f32[2,4,32,32], index: 14, kind: input, shape index: {}]   ;;  %s15477_s15 = inlined_call_operand.vmem [shape: f32[2,4,1,32], index: 15, kind: input, shape index: {}]   ;;  %s15478_s16 = inlined_call_operand.vmem [shape: f32[2,4,32,32], index: 16, kind: input, shape index: {}]   ;;  %s15479_s17 = inlined_call_operand.vmem [shape: f32[2,4,1,32], index: 17, kind: input, shape index: {}]   ;;  %s15480_s18 = inlined_call_operand.vmem [shape: f32[2,3,1,32], index: 18, kind: input, shape index: {}]   ;;  %s15481_s19 = inlined_call_operand.vmem [shape: f32[2,3,1,32], index: 19, kind: input, shape index: {}]   ;;  %s15482_s20 = inlined_call_operand.vmem [shape: f32[2,32,64], index: 20, kind: input, shape index: {}]   ;;  %s15483_s21 = inlined_call_operand.vmem [shape: f32[2,1,64], index: 21, kind: input, shape index: {}]   ;;  %s15484_s22 = inlined_call_operand.vmem [shape: f32[2,64,32], index: 22, kind: input, shape index: {}]   ;;  %s15485_s23 = inlined_call_operand.vmem [shape: f32[2,1,32], index: 23, kind: input, shape index: {}]   ;;  %s15486_s24 = inlined_call_operand.vmem [shape: f32[32,128], index: 24, kind: input, shape index: {}]   ;;  %s15487_s25 = inlined_call_operand.vmem [shape: f32[1,128], index: 25, kind: input, shape index: {}]   ;;  %s15488_s26 = inlined_call_operand.vmem [shape: f32[16,128], index: 26, kind: output, shape index: {0}]   ;;  %s15489_s27 = inlined_call_operand.hbm [shape: f32[64,8], index: 27, kind: output, shape index: {1}]  }
   0x1   :  { %15504 = sst [smem:[#allocation5_spill]] %s15462_s0 }
   0x2   :  { %15505 = sst [smem:[#allocation6_spill]] %s15463_s1 }
   0x3   :  { %15506 = sst [smem:[#allocation7_spill]] %s15464_s2 }
   0x4   :  { %15507 = sst [smem:[#allocation8_spill]] %s15465_s3 }
   0x5   :  { %15508 = sst [smem:[#allocation9_spill]] %s15466_s4 }
   0x6   :  { %15509 = sst [smem:[#allocation10_spill]] %s15467_s5 }
   0x7   :  { %15510 = sst [smem:[#allocation11_spill]] %s15468_s6 }
   0x8   :  { %15511 = sst [smem:[#allocation12_spill]] %s15469_s7 }
   0x9   :  { %15512 = sst [smem:[#allocation13_spill]] %s15470_s8 }
   0xa   :  { %15513 = sst [smem:[#allocation14_spill]] %s15471_s9 }
   0xb   :  { %15514 = sst [smem:[#allocation15_spill]] %s15472_s10 }
   0xc   :  { %15515 = sst [smem:[#allocation16_spill]] %s15473_s11 }
   0xd   :  { %15516 = sst [smem:[#allocation17_spill]] %s15487_s25 }
   0xe   :  { %15517 = sst [smem:[#allocation18_spill]] %s15488_s26 }
   0xf   :  { %15518 = sst [smem:[#allocation19_spill]] %s15489_s27 }
  0x10   :  { %s15519_s8 = sld [smem:[#allocation11_spill]]  ;;  %vm128_vm0 = vcmask 261120   ;;  %s15520_s5 = sld [smem:[#allocation5_spill]] }
  0x16   :  { %v98_v0 = vld [vmem:[%s15519_s8] sm:$0xff]  ;;  %v99_v1 = vld [vmem:[%s15519_s8 + $0x8] sm:$0xff]  ;;  %v100_v5 = vld [vmem:[%s15519_s8 + $0x10] sm:$0xff] }
  0x17   :  { %v102_v2 = vld [vmem:[%s15519_s8 + $0x20] sm:$0xff]  ;;  %v13004_v3 = vpack.c.bf16 %v99_v1, %v98_v0  ;;  %v103_v4 = vld [vmem:[%s15519_s8 + $0x28] sm:$0xff]  ;;  %v101_v6 = vld [vmem:[%s15519_s8 + $0x18] sm:$0xff] }
  0x18   :  { %v13012_v7 = vpack.c.bf16 %v103_v4, %v102_v2  ;;  %v13008_v8 = vpack.c.bf16 %v101_v6, %v100_v5  ;;  %v104_v9 = vld [vmem:[%s15519_s8 + $0x30] sm:$0xff]  ;;  %v105_v10 = vld [vmem:[%s15519_s8 + $0x38] sm:$0xff]  ;;  %v13749_v11 = vld [vmem:[%s15520_s5] sm:$0xff] }
  0x19   :  { %13005 = vmatprep.subr.bf16.mxu0 %v13004_v3  ;;  %v13016_v12 = vpack.c.bf16 %v105_v10, %v104_v9  ;;  %12137 = vmatprep.mubr.msk.f32.mxu0 %vm128_vm0, %v13749_v11  ;;  %v106_v13 = vld [vmem:[%s15519_s8 + $0x40] sm:$0xff]  ;;  %v107_v14 = vld [vmem:[%s15519_s8 + $0x48] sm:$0xff]  ;;  %v108_v16 = vld [vmem:[%s15519_s8 + $0x50] sm:$0xff] }
  0x1a   :  { %13013 = vmatprep.subr.bf16.mxu1 %v13012_v7  ;;  %13007 = vmatpush3.bf16.msra.mxu0 %v13004_v3  ;;  %v13020_v15 = vpack.c.bf16 %v107_v14, %v106_v13  ;;  %v109_v17 = vld [vmem:[%s15519_s8 + $0x58] sm:$0xff] }
  0x1b   :  { %13015 = vmatpush3.bf16.msra.mxu1 %v13012_v7  ;;  %13009 = vmatprep.subr.bf16.mxu0 %v13008_v8 }
  0x1c   :  { %13017 = vmatprep.subr.bf16.mxu1 %v13016_v12  ;;  %12148 = vmatprep.mubr.msk.f32.mxu1 %vm128_vm0, %v13749_v11 }
  0x1d   :  { %33 = vsyncpa [#allocation3], 0  ;;  %v13770_v18 = vld [vmem:[%s15520_s5 + $0x8] sm:$0xff]  ;;  %v13024_v19 = vpack.c.bf16 %v109_v17, %v108_v16  ;;  %v13577_v20 = vmov 0.0   ;;  %vm13578_vm1 = vmmov 0   ;;  %s15521_s9 = sld [smem:[#allocation12_spill]] }
  0x1e   :  { %13011 = vmatpush3.bf16.msra.mxu0 %v13008_v8  ;;  %s15522_s29 = sld [smem:[#allocation10_spill]]  ;;  %s15523_s0 = sld [smem:[#allocation7_spill]]  ;;  %vm457_vm2 = vcmask 64512   ;;  %vm1926_vm3 = vcmask 523264  }
  0x1f   :  { %13019 = vmatpush3.bf16.msra.mxu1 %v13016_v12  ;;  %13021 = vmatprep.subr.bf16.mxu0 %v13020_v15  ;;  %s15524_s6 = sld [smem:[#allocation15_spill]]  ;;  %s15525_s10 = sld [smem:[#allocation13_spill]] }
  0x20   :  { %12162 = vmatprep.subr.mxu1 %v13577_v20  ;;  %s15526_s2 = sld [smem:[#allocation14_spill]]  ;;  %s15529_s30 = sld [smem:[#allocation8_spill]] }
  0x21   :  { %12138 = vmatmul.mubr.msk.f32.vlgmr.msra.gmra.mrb[0].mxu0 %vm128_vm0, %v13770_v18  ;;  %s15528_s7 = sld [smem:[#allocation6_spill]] }
  0x22   :  { %12149 = vmatmul.mubr.msk.f32.vlgmr.msra.gmra.mrb[0].mxu1 %vm128_vm0, %v13770_v18  ;;  %13023 = vmatpush3.bf16.msra.mxu0 %v13020_v15 }
  0x23   :  { %13025 = vmatprep.subr.bf16.mxu0 %v13024_v19  ;;  %12159 = vmatprep.mubr.msk.f32.mxu0 %vm128_vm0, %v13749_v11  ;;  %v11358_v21 = vld [vmem:[%s15521_s9] ss:$0 sm:$0xff]  ;;  %v11361_v23 = vld [vmem:[%s15521_s9 + $0x1] ss:$0 sm:$0xff]  ;;  %v11364_v34 = vld [vmem:[%s15521_s9 + $0x2] ss:$0 sm:$0xff] }
  0x24   :  { %12164 = vmatprep.mubr.msk.f32.mxu1 %vm13578_vm1, %v13577_v20  ;;  %v13795_v28 = vld [vmem:[%s15522_s29] ss:$0 sm:$0xff]  ;;  %v13800_v29 = vld [vmem:[%s15522_s29 + $0x2] ss:$0 sm:$0xff]  ;;  %v13822_v36 = vld [vmem:[%s15522_s29 + $0x3] ss:$0 sm:$0xff] }
  0x25   :  { %v13850_v45 = vld [vmem:[%s15522_s29 + $0x1] ss:$0 sm:$0xff]  ;;  %v13882_v8 = vld [vmem:[%s15523_s0 + $0x8] sm:$0xff] }
  0x26   :  { %13027 = vmatpush3.bf16.msra.mxu0 %v13024_v19  ;;  %v13873_v49 = vld [vmem:[%s15523_s0] sm:$0xff]  ;;  %s15527_s0 = sld [smem:[#allocation16_spill]] }
  0x27   :  { %12182 = vmatprep.subr.mxu0 %v13577_v20 }
  0x29   :  { %12160 = vmatmul.mubr.msk.f32.vlgmr.msra.gmra.mrb[2].mxu0 %vm128_vm0, %v13770_v18 }
  0x2a   :  { %12184 = vmatprep.mubr.msk.f32.mxu0 %vm13578_vm1, %v13577_v20 }
  0xf4   :  { %v12139_v22 = vpop.f32.mrb[0].mxu0 }
  0xf5   :  { %v12150_v24 = vpop.f32.mrb[0].mxu1  ;;  %v201_v25 = vpop.f32.mrb[1].mxu0  ;;  %v207_v35 = vadd.f32 %v12139_v22, %v11358_v21 }
  0xf6   :  { %v202_v26 = vadd.f32 %v11358_v21, %v201_v25  ;;  %v284_v27 = vpop.f32.mrb[1].mxu1  ;;  %v290_v43 = vadd.f32 %v12150_v24, %v11361_v23 }
  0xf7   :  { %v13802_v30 = vadd.f32 %v11361_v23, %v284_v27  ;;  %v211_v41 = vmul.f32 0.35355338, %v207_v35 }
  0xf8   :  { %v13804_v31 = vmul.f32 0.35355338, %v202_v26 }
  0xf9   :  { %12163 = vmatpush3.xpose.msk.msra.mxu1 %vm128_vm0, %v13802_v30  ;;  %12183 = vmatpush3.xpose.msk.msra.mxu0 %vm128_vm0, %v13802_v30  ;;  %v1042_v44 = vmul.f32 %v13795_v28, %v211_v41  ;;  %v1205_v46 = vmul.f32 %v13850_v45, %v211_v41  ;;  %v1365_v47 = vmul.f32 %v13800_v29, %v211_v41 }
  0xfa   :  { %v380_v32 = vmul.f32 %v13795_v28, %v13804_v31  ;;  %v716_v33 = vmul.f32 %v13800_v29, %v13804_v31  ;;  %12192 = vmatprep.subr.mxu0 %v13577_v20  ;;  %12167 = vmatprep.subr.mxu1 %v13577_v20  ;;  %v882_v42 = vmul.f32 %v13822_v36, %v13804_v31 }
  0xfb   :  { %v1525_v48 = vmul.f32 %v13822_v36, %v211_v41  ;;  %v550_v19 = vmul.f32 %v13850_v45, %v13804_v31 }
  0xfc   :  { %12165 = vmatmul.mubr.msk.f32.vlgmr.msra.gmra.mrb[2].mxu1 %vm128_vm0, %v380_v32  ;;  %v12161_v37 = vpop.f32.mrb[2].mxu0  ;;  %12185 = vmatmul.mubr.msk.f32.vlgmr.msra.gmra.mrb[4].mxu0 %vm128_vm0, %v716_v33 }
  0xfd   :  { %v13826_v38 = vadd.f32 %v12161_v37, %v11364_v34  ;;  %v365_v39 = vpop.f32.mrb[3].mxu0  ;;  %12169 = vmatprep.mubr.msk.f32.mxu1 %vm13578_vm1, %v13577_v20  ;;  %12193 = vmatpush3.xpose.msk.msra.mxu0 %vm128_vm0, %v13802_v30 }
  0xfe   :  { %12194 = vmatprep.mubr.msk.f32.mxu0 %vm13578_vm1, %v13577_v20  ;;  %v13834_v40 = vadd.f32 %v11364_v34, %v365_v39  ;;  %12202 = vmatprep.subr.mxu0 %v13577_v20 }
 0x100   :  { %12168 = vmatpush3.msra.mxu1 %v13834_v40  ;;  %12195 = vmatmul.mubr.msk.f32.vlgmr.msra.gmra.mrb[6].mxu0 %vm128_vm0, %v882_v42 }
 0x101   :  { %12172 = vmatprep.subr.mxu1 %v13577_v20  ;;  %12203 = vmatpush3.xpose.msk.msra.mxu0 %vm128_vm0, %v290_v43 }
 0x102   :  { %12204 = vmatprep.mubr.msk.f32.mxu0 %vm13578_vm1, %v13577_v20  ;;  %12212 = vmatprep.subr.mxu0 %v13577_v20 }
 0x104   :  { %12205 = vmatmul.mubr.msk.f32.vlgmr.msra.gmra.mrb[8].mxu0 %vm128_vm0, %v1042_v44 }
 0x105   :  { %12213 = vmatpush3.xpose.msk.msra.mxu0 %vm128_vm0, %v290_v43  ;;  %12214 = vmatprep.mubr.msk.f32.mxu0 %vm13578_vm1, %v13577_v20 }
 0x106   :  { %12222 = vmatprep.subr.mxu0 %v13577_v20 }
 0x108   :  { %12215 = vmatmul.mubr.msk.f32.vlgmr.msra.gmra.mrb[10].mxu0 %vm128_vm0, %v1205_v46 }
 0x109   :  { %12223 = vmatpush3.xpose.msk.msra.mxu0 %vm128_vm0, %v290_v43  ;;  %12224 = vmatprep.mubr.msk.f32.mxu0 %vm13578_vm1, %v13577_v20 }
 0x10a   :  { %12232 = vmatprep.subr.mxu0 %v13577_v20 }
 0x10c   :  { %12225 = vmatmul.mubr.msk.f32.vlgmr.msra.gmra.mrb[12].mxu0 %vm128_vm0, %v1365_v47 }
 0x10d   :  { %12233 = vmatpush3.xpose.msk.msra.mxu0 %vm128_vm0, %v290_v43  ;;  %12234 = vmatprep.mubr.msk.f32.mxu0 %vm13578_vm1, %v13577_v20 }
 0x110   :  { %12235 = vmatmul.mubr.msk.f32.vlgmr.msra.gmra.mrb[14].mxu0 %vm128_vm0, %v1525_v48 }
 0x1cf   :  { %v453_v50 = vpop.f32.mrb[2].mxu1  ;;  %v786_v52 = vpop.f32.mrb[4].mxu0 }
 0x1d0   :  { %v454_v51 = vadd.f32 %v453_v50, %v13873_v49  ;;  %v12166_v53 = vpop.f32.mrb[3].mxu1  ;;  %v12186_v54 = vpop.f32.mrb[5].mxu0  ;;  %v787_v26 = vadd.f32 %v786_v52, %v13873_v49 }
 0x1d2   :  { %v458_v55 = vsel %vm457_vm2, %v454_v51, -inf  ;;  %v790_v31 = vsel %vm457_vm2, %v787_v26, -inf }
 0x1d3   :  { %459 = vmax.xlane.f32.xlu0 %v458_v55  ;;  %v952_v56 = vpop.f32.mrb[6].mxu0 }
 0x1d4   :  { %v12196_v57 = vpop.f32.mrb[7].mxu0  ;;  %v953_v6 = vadd.f32 %v952_v56, %v13873_v49 }
 0x1d6   :  { %v956_v10 = vsel %vm457_vm2, %v953_v6, -inf }
 0x1d7   :  { %v1115_v58 = vpop.f32.mrb[8].mxu0 }
 0x1d8   :  { %v12206_v59 = vpop.f32.mrb[9].mxu0 }
 0x1db   :  { %v1275_v60 = vpop.f32.mrb[10].mxu0 }
 0x1dc   :  { %v12216_v61 = vpop.f32.mrb[11].mxu0  ;;  %v1276_v9 = vadd.f32 %v1275_v60, %v13882_v8 }
 0x1de   :  { %v1279_v13 = vsel %vm457_vm2, %v1276_v9, -inf }
 0x1df   :  { %v1435_v62 = vpop.f32.mrb[12].mxu0 }
 0x1e0   :  { %v12226_v63 = vpop.f32.mrb[13].mxu0  ;;  %v1436_v32 = vadd.f32 %v1435_v62, %v13882_v8 }
 0x1e2   :  { %v1439_v34 = vsel %vm457_vm2, %v1436_v32, -inf }
 0x1e3   :  { %v1595_v0 = vpop.f32.mrb[14].mxu0 }
 0x1e4   :  { %v12236_v1 = vpop.f32.mrb[15].mxu0  ;;  %v1596_v12 = vadd.f32 %v1595_v0, %v13882_v8 }
 0x1e6   :  { %v1599_v14 = vsel %vm457_vm2, %v1596_v12, -inf }
 0x260   :  { %v460_v2 = vpop.xlane.xlu0 %459 }
 0x261   :  { %v461_v3 = vsub.f32 %v454_v51, %v460_v2 }
 0x263   :  { %v462_v4 = vmul.f32 1.442695, %v461_v3 }
 0x265   :  { %13305 = vpow2.f32 %v462_v4 }
 0x26f   :  { %v13306_v5 = vpop.eup %13305 }
 0x270   :  { %v464_v7 = vsel %vm457_vm2, %v13306_v5, 0.0 }
 0x271   :  { %465 = vadd.xlane.f32.xlu0 %v464_v7 }
 0x275   :  { %957 = vmax.xlane.f32.xlu0 %v956_v10 }
 0x279   :  { %1280 = vmax.xlane.f32.xlu0 %v1279_v13 }
 0x27d   :  { %1600 = vmax.xlane.f32.xlu0 %v1599_v14 }
 0x2fe   :  { %v466_v15 = vpop.xlane.xlu0 %465 }
 0x2ff   :  { %13307 = vrcp.f32 %v466_v15 }
 0x302   :  { %v958_v35 = vpop.xlane.xlu0 %957 }
 0x303   :  { %v959_v39 = vsub.f32 %v953_v6, %v958_v35 }
 0x305   :  { %v960_v43 = vmul.f32 1.442695, %v959_v39 }
 0x306   :  { %v1281_v37 = vpop.xlane.xlu0 %1280 }
 0x307   :  { %v1282_v44 = vsub.f32 %v1276_v9, %v1281_v37 }
 0x309   :  { %v13308_v16 = vpop.eup %13307  ;;  %v1283_v51 = vmul.f32 1.442695, %v1282_v44  ;;  %v113_v44 = vld [vmem:[%s15519_s8 + $0x78] sm:$0xff] }
 0x30a   :  { %v468_v17 = vmul.f32 %v13308_v16, %v13306_v5  ;;  %v1601_v47 = vpop.xlane.xlu0 %1600 }
 0x30b   :  { %v1602_v52 = vsub.f32 %v1596_v12, %v1601_v47 }
 0x30c   :  { %12170 = vmatmul.mubr.msk.f32.vlgmr.msra.gmra.mrb[4].mxu1 %vm457_vm2, %v468_v17 }
 0x30d   :  { %12173 = vmatpush3.xpose.msk.msra.mxu1 %vm128_vm0, %v13802_v30  ;;  %12174 = vmatprep.mubr.msk.f32.mxu1 %vm13578_vm1, %v13577_v20  ;;  %v1116_v30 = vadd.f32 %v1115_v58, %v13882_v8  ;;  %v1603_v56 = vmul.f32 1.442695, %v1602_v52 }
 0x30e   :  { %12177 = vmatprep.subr.mxu1 %v13577_v20 }
 0x30f   :  { %v1119_v33 = vsel %vm457_vm2, %v1116_v30, -inf }
 0x310   :  { %12175 = vmatmul.mubr.msk.f32.vlgmr.msra.gmra.mrb[6].mxu1 %vm128_vm0, %v550_v19 }
 0x311   :  { %12178 = vmatpush3.msra.mxu1 %v13834_v40  ;;  %12179 = vmatprep.mubr.msk.f32.mxu1 %vm13578_vm1, %v13577_v20 }
 0x312   :  { %12187 = vmatprep.subr.mxu1 %v13577_v20 }
 0x3df   :  { %v13902_v21 = vpop.f32.mrb[4].mxu1 }
 0x3e0   :  { %v12171_v22 = vpop.f32.mrb[5].mxu1 }
 0x3e3   :  { %v620_v23 = vpop.f32.mrb[6].mxu1 }
 0x3e4   :  { %v621_v24 = vadd.f32 %v620_v23, %v13873_v49  ;;  %v12176_v25 = vpop.f32.mrb[7].mxu1 }
 0x3e6   :  { %v624_v27 = vsel %vm457_vm2, %v621_v24, -inf }
 0x3e7   :  { %625 = vmax.xlane.f32.xlu1 %v624_v27 }
 0x3eb   :  { %791 = vmax.xlane.f32.xlu1 %v790_v31 }
 0x3ef   :  { %1120 = vmax.xlane.f32.xlu1 %v1119_v33 }
 0x3f3   :  { %1440 = vmax.xlane.f32.xlu1 %v1439_v34 }
 0x474   :  { %v626_v41 = vpop.xlane.xlu1 %625 }
 0x475   :  { %v627_v42 = vsub.f32 %v621_v24, %v626_v41  ;;  %v110_v41 = vld [vmem:[%s15519_s8 + $0x60] sm:$0xff] }
 0x477   :  { %v628_v46 = vmul.f32 1.442695, %v627_v42  ;;  %v111_v42 = vld [vmem:[%s15519_s8 + $0x68] sm:$0xff] }
 0x478   :  { %v792_v48 = vpop.xlane.xlu1 %791 }
 0x479   :  { %13309 = vpow2.f32 %v628_v46  ;;  %v793_v50 = vsub.f32 %v787_v26, %v792_v48  ;;  %v542_v48 = vmul.f32 %v13795_v28, %v13902_v21 }
 0x47a   :  { %13311 = vpow2.f32 %v960_v43  ;;  %v13028_v43 = vpack.c.bf16 %v111_v42, %v110_v41  ;;  %v1820_v41 = vld [vmem:[%s15524_s6 + $0x18] sm:$0xff] }
 0x47b   :  { %v794_v53 = vmul.f32 1.442695, %v793_v50 }
 0x47c   :  { %v1121_v54 = vpop.xlane.xlu1 %1120  ;;  %13029 = vmatprep.subr.bf16.mxu0 %v13028_v43 }
 0x47d   :  { %13313 = vpow2.f32 %v794_v53  ;;  %v1122_v55 = vsub.f32 %v1116_v30, %v1121_v54  ;;  %13031 = vmatpush3.bf16.msra.mxu0 %v13028_v43  ;;  %v1911_v43 = vld [vmem:[%s15474_s12] sm:$0xff] }
 0x47e   :  { %13315 = vpow2.f32 %v1283_v51 }
 0x47f   :  { %v1123_v57 = vmul.f32 1.442695, %v1122_v55 }
 0x480   :  { %v1441_v58 = vpop.xlane.xlu1 %1440 }
 0x481   :  { %13317 = vpow2.f32 %v1123_v57  ;;  %v1442_v59 = vsub.f32 %v1436_v32, %v1441_v58 }
 0x482   :  { %13319 = vpow2.f32 %v1603_v56 }
 0x483   :  { %v13310_v60 = vpop.eup %13309  ;;  %v1443_v61 = vmul.f32 1.442695, %v1442_v59 }
 0x484   :  { %v630_v62 = vsel %vm457_vm2, %v13310_v60, 0.0  ;;  %v13312_v63 = vpop.eup %13311 }
 0x485   :  { %13321 = vpow2.f32 %v1443_v61  ;;  %631 = vadd.xlane.f32.xlu1 %v630_v62  ;;  %v962_v1 = vsel %vm457_vm2, %v13312_v63, 0.0 }
 0x487   :  { %v13314_v0 = vpop.eup %13313 }
 0x488   :  { %v796_v2 = vsel %vm457_vm2, %v13314_v0, 0.0  ;;  %v13316_v3 = vpop.eup %13315 }
 0x489   :  { %963 = vadd.xlane.f32.xlu1 %v962_v1  ;;  %797 = vadd.xlane.f32.xlu0 %v796_v2  ;;  %v1285_v5 = vsel %vm457_vm2, %v13316_v3, 0.0 }
 0x48b   :  { %v13318_v4 = vpop.eup %13317 }
 0x48c   :  { %v1125_v6 = vsel %vm457_vm2, %v13318_v4, 0.0  ;;  %v13320_v7 = vpop.eup %13319 }
 0x48d   :  { %1286 = vadd.xlane.f32.xlu1 %v1285_v5  ;;  %1126 = vadd.xlane.f32.xlu0 %v1125_v6  ;;  %v1605_v10 = vsel %vm457_vm2, %v13320_v7, 0.0 }
 0x48f   :  { %v13322_v9 = vpop.eup %13321 }
 0x490   :  { %v1445_v12 = vsel %vm457_vm2, %v13322_v9, 0.0 }
 0x491   :  { %1606 = vadd.xlane.f32.xlu1 %v1605_v10  ;;  %1446 = vadd.xlane.f32.xlu0 %v1445_v12 }
 0x512   :  { %v632_v13 = vpop.xlane.xlu1 %631 }
 0x513   :  { %13323 = vrcp.f32 %v632_v13  ;;  %v11395_v13 = vld [vmem:[%s15521_s9 + $0x3] ss:$0 sm:$0xff] }
 0x516   :  { %v798_v14 = vpop.xlane.xlu0 %797  ;;  %v964_v15 = vpop.xlane.xlu1 %963 }
 0x517   :  { %13325 = vrcp.f32 %v798_v14 }
 0x518   :  { %13327 = vrcp.f32 %v964_v15 }
 0x51a   :  { %v1127_v16 = vpop.xlane.xlu0 %1126  ;;  %v1287_v19 = vpop.xlane.xlu1 %1286 }
 0x51b   :  { %13329 = vrcp.f32 %v1127_v16 }
 0x51c   :  { %13331 = vrcp.f32 %v1287_v19 }
 0x51d   :  { %v13324_v17 = vpop.eup %13323 }
 0x51e   :  { %v634_v22 = vmul.f32 %v13324_v17, %v13310_v60  ;;  %v1447_v24 = vpop.xlane.xlu0 %1446  ;;  %v1607_v27 = vpop.xlane.xlu1 %1606 }
 0x51f   :  { %13333 = vrcp.f32 %v1447_v24 }
 0x520   :  { %12180 = vmatmul.mubr.msk.f32.vlgmr.msra.gmra.mrb[8].mxu1 %vm457_vm2, %v634_v22  ;;  %13335 = vrcp.f32 %v1607_v27 }
 0x521   :  { %v13326_v23 = vpop.eup %13325  ;;  %12188 = vmatpush3.msra.mxu1 %v13834_v40  ;;  %12189 = vmatprep.mubr.msk.f32.mxu1 %vm13578_vm1, %v13577_v20 }
 0x522   :  { %12197 = vmatprep.subr.mxu1 %v13577_v20  ;;  %v800_v25 = vmul.f32 %v13326_v23, %v13314_v0  ;;  %v13328_v26 = vpop.eup %13327 }
 0x523   :  { %v966_v30 = vmul.f32 %v13328_v26, %v13312_v63 }
 0x524   :  { %12190 = vmatmul.mubr.msk.f32.vlgmr.msra.gmra.mrb[10].mxu1 %vm457_vm2, %v800_v25 }
 0x525   :  { %12198 = vmatpush3.msra.mxu1 %v13834_v40  ;;  %12199 = vmatprep.mubr.msk.f32.mxu1 %vm13578_vm1, %v13577_v20  ;;  %v13330_v31 = vpop.eup %13329 }
 0x526   :  { %12207 = vmatprep.subr.mxu1 %v13577_v20  ;;  %v1129_v32 = vmul.f32 %v13330_v31, %v13318_v4  ;;  %v13332_v40 = vpop.eup %13331 }
 0x527   :  { %v1289_v33 = vmul.f32 %v13332_v40, %v13316_v3 }
 0x528   :  { %12200 = vmatmul.mubr.msk.f32.vlgmr.msra.gmra.mrb[12].mxu1 %vm457_vm2, %v966_v30 }
 0x529   :  { %12208 = vmatpush3.msra.mxu1 %v13826_v38  ;;  %12209 = vmatprep.mubr.msk.f32.mxu1 %vm13578_vm1, %v13577_v20  ;;  %v13334_v34 = vpop.eup %13333 }
 0x52a   :  { %12217 = vmatprep.subr.mxu1 %v13577_v20  ;;  %v1449_v35 = vmul.f32 %v13334_v34, %v13322_v9  ;;  %v13336_v37 = vpop.eup %13335 }
 0x52b   :  { %v1609_v39 = vmul.f32 %v13336_v37, %v13320_v7  ;;  %v1819_v37 = vld [vmem:[%s15524_s6 + $0x10] sm:$0xff] }
 0x52c   :  { %12210 = vmatmul.mubr.msk.f32.vlgmr.msra.gmra.mrb[14].mxu1 %vm457_vm2, %v1129_v32  ;;  %v13040_v42 = vpack.c.bf16 %v1820_v41, %v1819_v37  ;;  %v11409_v41 = vld [vmem:[%s15519_s8 + $0x88] sm:$0xff] }
 0x52d   :  { %12218 = vmatpush3.msra.mxu1 %v13826_v38  ;;  %12219 = vmatprep.mubr.msk.f32.mxu1 %vm13578_vm1, %v13577_v20 }
 0x52e   :  { %12227 = vmatprep.subr.mxu1 %v13577_v20 }
 0x530   :  { %12220 = vmatmul.mubr.msk.f32.vlgmr.msra.gmra.mrb[16].mxu1 %vm457_vm2, %v1289_v33 }
 0x531   :  { %12228 = vmatpush3.msra.mxu1 %v13826_v38  ;;  %12229 = vmatprep.mubr.msk.f32.mxu1 %vm13578_vm1, %v13577_v20 }
 0x532   :  { %12237 = vmatprep.subr.mxu1 %v13577_v20 }
 0x534   :  { %12230 = vmatmul.mubr.msk.f32.vlgmr.msra.gmra.mrb[18].mxu1 %vm457_vm2, %v1449_v35  ;;  %v1818_v35 = vld [vmem:[%s15524_s6 + $0x8] sm:$0xff] }
 0x535   :  { %12238 = vmatpush3.msra.mxu1 %v13826_v38  ;;  %12239 = vmatprep.mubr.msk.f32.mxu1 %vm13578_vm1, %v13577_v20  ;;  %v112_v38 = vld [vmem:[%s15519_s8 + $0x70] sm:$0xff] }
 0x536   :  { %v13032_v46 = vpack.c.bf16 %v113_v44, %v112_v38  ;;  %v1912_v38 = vld [vmem:[%s15474_s12 + $0x8] sm:$0xff]  ;;  %v1913_v44 = vld [vmem:[%s15474_s12 + $0x10] sm:$0xff] }
 0x538   :  { %12240 = vmatmul.mubr.msk.f32.vlgmr.msra.gmra.mrb[20].mxu1 %vm457_vm2, %v1609_v39  ;;  %13033 = vmatprep.subr.bf16.mxu0 %v13032_v46 }
 0x539   :  { %13035 = vmatpush3.bf16.msra.mxu0 %v13032_v46  ;;  %v13044_v46 = vpack.c.bf16 %v1912_v38, %v1911_v43  ;;  %v11417_v38 = vld [vmem:[%s15519_s8 + $0xc8] sm:$0xff] }
 0x53b   :  { %13045 = vmatprep.subr.bf16.mxu0 %v13044_v46 }
 0x5f3   :  { %v704_v47 = vpop.f32.mrb[8].mxu1 }
 0x5f4   :  { %v708_v50 = vmul.f32 %v13850_v45, %v704_v47  ;;  %v12181_v51 = vpop.f32.mrb[9].mxu1  ;;  %v1914_v47 = vld [vmem:[%s15474_s12 + $0x18] sm:$0xff] }
 0x5f5   :  { %v1916_v51 = vld [vmem:[%s15474_s12 + $0x28] sm:$0xff] }
 0x5f6   :  { %v709_v52 = vadd.f32 %v708_v50, %v542_v48  ;;  %v13048_v48 = vpack.c.bf16 %v1914_v47, %v1913_v44  ;;  %v1915_v50 = vld [vmem:[%s15474_s12 + $0x20] sm:$0xff]  ;;  %v11410_v44 = vld [vmem:[%s15519_s8 + $0x90] sm:$0xff] }
 0x5f7   :  { %v870_v53 = vpop.f32.mrb[10].mxu1 }
 0x5f8   :  { %v874_v54 = vmul.f32 %v13800_v29, %v870_v53  ;;  %v12191_v55 = vpop.f32.mrb[11].mxu1 }
 0x5fa   :  { %v875_v56 = vadd.f32 %v874_v54, %v709_v52  ;;  %v13052_v52 = vpack.c.bf16 %v1916_v51, %v1915_v50  ;;  %v11418_v50 = vld [vmem:[%s15519_s8 + $0xd0] sm:$0xff]  ;;  %v11419_v51 = vld [vmem:[%s15519_s8 + $0xd8] sm:$0xff] }
 0x5fb   :  { %v1036_v57 = vpop.f32.mrb[12].mxu1 }
 0x5fc   :  { %v1040_v58 = vmul.f32 %v13822_v36, %v1036_v57  ;;  %v12201_v59 = vpop.f32.mrb[13].mxu1 }
 0x5fe   :  { %v1041_v60 = vadd.f32 %v1040_v58, %v875_v56 }
 0x5ff   :  { %v1199_v61 = vpop.f32.mrb[14].mxu1 }
 0x600   :  { %v12211_v62 = vpop.f32.mrb[15].mxu1  ;;  %12250 = vmatprep.mubr.msk.f32.mxu0 %vm128_vm0, %v1041_v60  ;;  %v1203_v21 = vmul.f32 %v13795_v28, %v1199_v61  ;;  %v11398_v60 = vld [vmem:[%s15525_s10] ss:$0 sm:$0xff] }
 0x603   :  { %v1359_v63 = vpop.f32.mrb[16].mxu1 }
 0x604   :  { %v1363_v0 = vmul.f32 %v13850_v45, %v1359_v63  ;;  %v12221_v1 = vpop.f32.mrb[17].mxu1 }
 0x606   :  { %v1364_v2 = vadd.f32 %v1363_v0, %v1203_v21  ;;  %v11399_v21 = vld [vmem:[%s15526_s2] ss:$0 sm:$0xff] }
 0x607   :  { %v1519_v3 = vpop.f32.mrb[18].mxu1 }
 0x608   :  { %v1523_v4 = vmul.f32 %v13800_v29, %v1519_v3  ;;  %v12231_v5 = vpop.f32.mrb[19].mxu1 }
 0x609   :  { %v1918_v5 = vld [vmem:[%s15474_s12 + $0x38] sm:$0xff] }
 0x60a   :  { %v1524_v6 = vadd.f32 %v1523_v4, %v1364_v2  ;;  %v1917_v4 = vld [vmem:[%s15474_s12 + $0x30] sm:$0xff] }
 0x60b   :  { %v1679_v7 = vpop.f32.mrb[20].mxu1 }
 0x60c   :  { %v1683_v9 = vmul.f32 %v13822_v36, %v1679_v7  ;;  %v12241_v10 = vpop.f32.mrb[21].mxu1  ;;  %v11400_v7 = vld [vmem:[%s15527_s0] ss:$0 sm:$0xff] }
 0x60e   :  { %v1684_v12 = vadd.f32 %v1683_v9, %v1524_v6  ;;  %v13056_v6 = vpack.c.bf16 %v1918_v5, %v1917_v4  ;;  %v11414_v5 = vld [vmem:[%s15519_s8 + $0xb0] sm:$0xff] }
 0x610   :  { %12251 = vmatmul.mubr.msk.f32.vlgmr.msra.gmra.mrb[16].mxu0 %vm128_vm0, %v1684_v12 }
 0x611   :  { %13047 = vmatpush3.bf16.msra.mxu0 %v13044_v46  ;;  %v11411_v46 = vld [vmem:[%s15519_s8 + $0x98] sm:$0xff] }
 0x612   :  { %13049 = vmatprep.subr.bf16.mxu0 %v13048_v48 }
 0x615   :  { %13051 = vmatpush3.bf16.msra.mxu0 %v13048_v48  ;;  %v13064_v48 = vpack.c.bf16 %v11411_v46, %v11410_v44 }
 0x616   :  { %13053 = vmatprep.subr.bf16.mxu0 %v13052_v52 }
 0x619   :  { %13055 = vmatpush3.bf16.msra.mxu0 %v13052_v52  ;;  %v13080_v52 = vpack.c.bf16 %v11419_v51, %v11418_v50 }
 0x61a   :  { %13057 = vmatprep.subr.bf16.mxu0 %v13056_v6 }
 0x61d   :  { %13059 = vmatpush3.bf16.msra.mxu0 %v13056_v6  ;;  %v11415_v6 = vld [vmem:[%s15519_s8 + $0xb8] sm:$0xff] }
 0x6e3   :  { %v12252_v14 = vpop.f32.mrb[16].mxu0 }
 0x6e4   :  { %v1769_v15 = vadd.f32 %v12252_v14, %v11395_v13  ;;  %v1763_v16 = vpop.f32.mrb[17].mxu0 }
 0x6e5   :  { %v1764_v17 = vadd.f32 %v11395_v13, %v1763_v16  ;;  %v11403_v16 = vld [vmem:[%s15475_s13] ss:$0 sm:$0xff] }
 0x6e6   :  { %v1773_v19 = vadd.f32 %v1769_v15, %v13770_v18 }
 0x6e7   :  { %v1772_v22 = vadd.f32 %v1764_v17, %v13749_v11  ;;  %v1817_v11 = vld [vmem:[%s15524_s6] sm:$0xff] }
 0x6e8   :  { %v1777_v23 = vsel %vm128_vm0, %v1773_v19, 0.0  ;;  %v13036_v39 = vpack.c.bf16 %v1818_v35, %v1817_v11 }
 0x6e9   :  { %1778 = vadd.xlane.f32.xlu1 %v1777_v23  ;;  %v1774_v24 = vsel %vm128_vm0, %v1772_v22, 0.0 }
 0x6ea   :  { %1775 = vadd.xlane.f32.xlu0 %v1774_v24  ;;  %13037 = vmatprep.subr.bf16.mxu1 %v13036_v39 }
 0x6eb   :  { %13039 = vmatpush3.bf16.msra.mxu1 %v13036_v39  ;;  %v11408_v39 = vld [vmem:[%s15519_s8 + $0x80] sm:$0xff] }
 0x6ec   :  { %13041 = vmatprep.subr.bf16.mxu1 %v13040_v42  ;;  %v13060_v43 = vpack.c.bf16 %v11409_v41, %v11408_v39 }
 0x6ef   :  { %13043 = vmatpush3.bf16.msra.mxu1 %v13040_v42  ;;  %v11416_v42 = vld [vmem:[%s15519_s8 + $0xc0] sm:$0xff] }
 0x6f0   :  { %v13076_v47 = vpack.c.bf16 %v11417_v38, %v11416_v42  ;;  %13061 = vmatprep.subr.bf16.mxu1 %v13060_v43 }
 0x6f2   :  { %13077 = vmatprep.subr.bf16.mxu0 %v13076_v47 }
 0x776   :  { %v1779_v25 = vpop.xlane.xlu1 %1778 }
 0x777   :  { %v1782_v26 = vmul.f32 0.03125, %v1779_v25  ;;  %v1776_v27 = vpop.xlane.xlu0 %1775 }
 0x778   :  { %v1781_v30 = vmul.f32 0.03125, %v1776_v27 }
 0x779   :  { %v1784_v31 = vsub.f32 %v1773_v19, %v1782_v26 }
 0x77a   :  { %v1783_v32 = vsub.f32 %v1772_v22, %v1781_v30 }
 0x77b   :  { %v1786_v40 = vmul.f32 %v1784_v31, %v1784_v31 }
 0x77c   :  { %v1785_v33 = vmul.f32 %v1783_v32, %v1783_v32 }
 0x77d   :  { %v1790_v34 = vsel %vm128_vm0, %v1786_v40, 0.0 }
 0x77e   :  { %1791 = vadd.xlane.f32.xlu1 %v1790_v34  ;;  %v1787_v18 = vsel %vm128_vm0, %v1785_v33, 0.0 }
 0x77f   :  { %1788 = vadd.xlane.f32.xlu0 %v1787_v18 }
 0x80b   :  { %v1792_v53 = vpop.xlane.xlu1 %1791 }
 0x80c   :  { %v1794_v54 = vmul.f32 0.03125, %v1792_v53  ;;  %v1789_v55 = vpop.xlane.xlu0 %1788  ;;  %v11412_v53 = vld [vmem:[%s15519_s8 + $0xa0] sm:$0xff] }
 0x80d   :  { %v1793_v56 = vmul.f32 0.03125, %v1789_v55 }
 0x80e   :  { %v1796_v57 = vadd.f32 1e-05, %v1794_v54  ;;  %v11413_v54 = vld [vmem:[%s15519_s8 + $0xa8] sm:$0xff] }
 0x80f   :  { %v1795_v58 = vadd.f32 1e-05, %v1793_v56  ;;  %v13068_v55 = vpack.c.bf16 %v11413_v54, %v11412_v53 }
 0x810   :  { %13337 = vrsqrt.f32 %v1796_v57 }
 0x811   :  { %13339 = vrsqrt.f32 %v1795_v58 }
 0x81a   :  { %v13338_v59 = vpop.eup %13337 }
 0x81b   :  { %v13340_v61 = vpop.eup %13339  ;;  %v1800_v62 = vmul.f32 %v13338_v59, %v1784_v31 }
 0x81c   :  { %v1799_v63 = vmul.f32 %v13340_v61, %v1783_v32 }
 0x81d   :  { %v1808_v0 = vmul.f32 %v11398_v60, %v1800_v62 }
 0x81e   :  { %v1807_v1 = vmul.f32 %v11398_v60, %v1799_v63  ;;  %v11406_v63 = vld [vmem:[%s15525_s10 + $0x1] ss:$0 sm:$0xff] }
 0x81f   :  { %v1816_v3 = vadd.f32 %v11399_v21, %v1808_v0 }
 0x820   :  { %v1815_v2 = vadd.f32 %v11399_v21, %v1807_v1 }
 0x822   :  { %12261 = vmatprep.mubr.msk.f32.mxu1 %vm128_vm0, %v1815_v2 }
 0x823   :  { %12262 = vmatmul.mubr.msk.f32.vlgmr.msra.gmra.mrb[22].mxu1 %vm128_vm0, %v1816_v3 }
 0x824   :  { %13063 = vmatpush3.bf16.msra.mxu1 %v13060_v43 }
 0x825   :  { %13065 = vmatprep.subr.bf16.mxu1 %v13064_v48 }
 0x828   :  { %13067 = vmatpush3.bf16.msra.mxu1 %v13064_v48 }
 0x829   :  { %13069 = vmatprep.subr.bf16.mxu1 %v13068_v55 }
 0x8f6   :  { %v12263_v9 = vpop.f32.mrb[22].mxu1 }
 0x8f7   :  { %v1906_v10 = vadd.f32 %v12263_v9, %v11400_v7  ;;  %v1900_v12 = vpop.f32.mrb[23].mxu1 }
 0x8f8   :  { %v1901_v13 = vadd.f32 %v11400_v7, %v1900_v12  ;;  %v11438_v12 = vld [vmem:[%s15521_s9 + $0x6] ss:$0 sm:$0xff] }
 0x8f9   :  { %v1910_v15 = vmax.f32 %v1906_v10, 0.0  ;;  %v13072_v10 = vpack.c.bf16 %v11415_v6, %v11414_v5 }
 0x8fa   :  { %v1909_v14 = vmax.f32 %v1901_v13, 0.0 }
 0x8fc   :  { %12280 = vmatprep.mubr.msk.f32.mxu0 %vm1926_vm3, %v1909_v14 }
 0x8fd   :  { %12281 = vmatmul.mubr.msk.f32.vlgmr.msra.gmra.mrb[18].mxu0 %vm1926_vm3, %v1910_v15 }
 0x8fe   :  { %13079 = vmatpush3.bf16.msra.mxu0 %v13076_v47 }
 0x8ff   :  { %13081 = vmatprep.subr.bf16.mxu0 %v13080_v52 }
 0x902   :  { %13083 = vmatpush3.bf16.msra.mxu0 %v13080_v52 }
 0x903   :  { %12326 = vmatprep.subr.mxu0 %v13577_v20 }
 0x9d0   :  { %v12282_v17 = vpop.f32.mrb[18].mxu0 }
 0x9d1   :  { %v2005_v19 = vadd.f32 %v12282_v17, %v11403_v16  ;;  %v1999_v22 = vpop.f32.mrb[19].mxu0 }
 0x9d2   :  { %v2000_v23 = vadd.f32 %v11403_v16, %v1999_v22 }
 0x9d3   :  { %v2009_v24 = vadd.f32 %v2005_v19, %v1816_v3  ;;  %v11432_v19 = vld [vmem:[%s15521_s9 + $0x4] ss:$0 sm:$0xff] }
 0x9d4   :  { %v2008_v25 = vadd.f32 %v2000_v23, %v1815_v2  ;;  %v11407_v2 = vld [vmem:[%s15526_s2 + $0x1] ss:$0 sm:$0xff]  ;;  %v11435_v23 = vld [vmem:[%s15521_s9 + $0x5] ss:$0 sm:$0xff] }
 0x9d5   :  { %v2013_v26 = vsel %vm128_vm0, %v2009_v24, 0.0 }
 0x9d6   :  { %2014 = vadd.xlane.f32.xlu1 %v2013_v26  ;;  %v2010_v27 = vsel %vm128_vm0, %v2008_v25, 0.0 }
 0x9d7   :  { %2011 = vadd.xlane.f32.xlu0 %v2010_v27 }
 0xa63   :  { %v2015_v30 = vpop.xlane.xlu1 %2014 }
 0xa64   :  { %v2017_v31 = vmul.f32 0.03125, %v2015_v30  ;;  %v2012_v32 = vpop.xlane.xlu0 %2011 }
 0xa65   :  { %v2016_v40 = vmul.f32 0.03125, %v2012_v32 }
 0xa66   :  { %v2019_v33 = vsub.f32 %v2009_v24, %v2017_v31 }
 0xa67   :  { %v2018_v34 = vsub.f32 %v2008_v25, %v2016_v40 }
 0xa68   :  { %v2021_v18 = vmul.f32 %v2019_v33, %v2019_v33 }
 0xa69   :  { %v2020_v11 = vmul.f32 %v2018_v34, %v2018_v34 }
 0xa6a   :  { %v2025_v35 = vsel %vm128_vm0, %v2021_v18, 0.0 }
 0xa6b   :  { %2026 = vadd.xlane.f32.xlu1 %v2025_v35  ;;  %v2022_v37 = vsel %vm128_vm0, %v2020_v11, 0.0 }
 0xa6c   :  { %2023 = vadd.xlane.f32.xlu0 %v2022_v37 }
 0xaf8   :  { %v2027_v56 = vpop.xlane.xlu1 %2026 }
 0xaf9   :  { %v2029_v57 = vmul.f32 0.03125, %v2027_v56  ;;  %v2024_v58 = vpop.xlane.xlu0 %2023 }
 0xafa   :  { %v2028_v59 = vmul.f32 0.03125, %v2024_v58 }
 0xafb   :  { %v2031_v60 = vadd.f32 1e-05, %v2029_v57 }
 0xafc   :  { %v2030_v61 = vadd.f32 1e-05, %v2028_v59 }
 0xafd   :  { %13341 = vrsqrt.f32 %v2031_v60 }
 0xafe   :  { %13343 = vrsqrt.f32 %v2030_v61 }
 0xb07   :  { %v13342_v62 = vpop.eup %13341 }
 0xb08   :  { %v13344_v21 = vpop.eup %13343  ;;  %v2035_v0 = vmul.f32 %v13342_v62, %v2019_v33 }
 0xb09   :  { %v2034_v1 = vmul.f32 %v13344_v21, %v2018_v34 }
 0xb0a   :  { %v2043_v3 = vmul.f32 %v11406_v63, %v2035_v0 }
 0xb0b   :  { %v2042_v4 = vmul.f32 %v11406_v63, %v2034_v1 }
 0xb0c   :  { %v14082_v9 = vadd.f32 %v11407_v2, %v2043_v3 }
 0xb0d   :  { %v14080_v7 = vadd.f32 %v11407_v2, %v2042_v4 }
 0xb0f   :  { %12291 = vmatprep.mubr.msk.f32.mxu1 %vm128_vm0, %v14080_v7  ;;  %12313 = vmatprep.mubr.msk.f32.mxu0 %vm128_vm0, %v14080_v7 }
 0xb10   :  { %12292 = vmatmul.mubr.msk.f32.vlgmr.msra.gmra.mrb[24].mxu1 %vm128_vm0, %v14082_v9  ;;  %12314 = vmatmul.mubr.msk.f32.vlgmr.msra.gmra.mrb[20].mxu0 %vm128_vm0, %v14082_v9 }
 0xb11   :  { %13071 = vmatpush3.bf16.msra.mxu1 %v13068_v55  ;;  %12302 = vmatprep.mubr.msk.f32.mxu1 %vm128_vm0, %v14080_v7 }
 0xb12   :  { %13073 = vmatprep.subr.bf16.mxu1 %v13072_v10  ;;  %12328 = vmatprep.mubr.msk.f32.mxu0 %vm13578_vm1, %v13577_v20 }
 0xb15   :  { %13075 = vmatpush3.bf16.msra.mxu1 %v13072_v10 }
 0xb16   :  { %12316 = vmatprep.subr.mxu1 %v13577_v20 }
 0xb18   :  { %12303 = vmatmul.mubr.msk.f32.vlgmr.msra.gmra.mrb[26].mxu1 %vm128_vm0, %v14082_v9 }
 0xb19   :  { %12318 = vmatprep.mubr.msk.f32.mxu1 %vm13578_vm1, %v13577_v20 }
 0xbe3   :  { %v12293_v13 = vpop.f32.mrb[24].mxu1  ;;  %v12315_v14 = vpop.f32.mrb[20].mxu0 }
 0xbe4   :  { %v14104_v15 = vadd.f32 %v12315_v14, %v11438_v12  ;;  %v2158_v16 = vpop.f32.mrb[25].mxu1  ;;  %v2322_v17 = vpop.f32.mrb[21].mxu0  ;;  %v2164_v40 = vadd.f32 %v12293_v13, %v11432_v19 }
 0xbe5   :  { %v2159_v22 = vadd.f32 %v11432_v19, %v2158_v16  ;;  %v14118_v32 = vadd.f32 %v11438_v12, %v2322_v17 }
 0xbe6   :  { %v2168_v34 = vmul.f32 0.35355338, %v2164_v40 }
 0xbe7   :  { %v2167_v25 = vmul.f32 0.35355338, %v2159_v22 }
 0xbe8   :  { %v2974_v35 = vmul.f32 %v13795_v28, %v2168_v34  ;;  %v3137_v37 = vmul.f32 %v13850_v45, %v2168_v34 }
 0xbe9   :  { %v2331_v30 = vmul.f32 %v13795_v28, %v2167_v25  ;;  %v2494_v31 = vmul.f32 %v13850_v45, %v2167_v25  ;;  %v2654_v33 = vmul.f32 %v13800_v29, %v2167_v25  ;;  %v2814_v18 = vmul.f32 %v13822_v36, %v2167_v25 }
 0xbea   :  { %v3297_v28 = vmul.f32 %v13800_v29, %v2168_v34  ;;  %v3457_v45 = vmul.f32 %v13822_v36, %v2168_v34 }
 0xbeb   :  { %v12304_v24 = vpop.f32.mrb[26].mxu1 }
 0xbec   :  { %v2241_v26 = vpop.f32.mrb[27].mxu1  ;;  %v2247_v11 = vadd.f32 %v12304_v24, %v11435_v23 }
 0xbed   :  { %v2242_v27 = vadd.f32 %v11435_v23, %v2241_v26 }
 0xbef   :  { %12317 = vmatpush3.xpose.msk.msra.mxu1 %vm128_vm0, %v2242_v27  ;;  %12327 = vmatpush3.xpose.msk.msra.mxu0 %vm128_vm0, %v2242_v27 }
 0xbf0   :  { %12321 = vmatprep.subr.mxu1 %v13577_v20  ;;  %12336 = vmatprep.subr.mxu0 %v13577_v20 }
 0xbf2   :  { %12319 = vmatmul.mubr.msk.f32.vlgmr.msra.gmra.mrb[28].mxu1 %vm128_vm0, %v2331_v30  ;;  %12329 = vmatmul.mubr.msk.f32.vlgmr.msra.gmra.mrb[22].mxu0 %vm128_vm0, %v2494_v31 }
 0xbf3   :  { %12322 = vmatpush3.msra.mxu1 %v14118_v32  ;;  %12337 = vmatpush3.xpose.msk.msra.mxu0 %vm128_vm0, %v2242_v27 }
 0xbf4   :  { %12338 = vmatprep.mubr.msk.f32.mxu0 %vm13578_vm1, %v13577_v20  ;;  %12346 = vmatprep.subr.mxu0 %v13577_v20 }
 0xbf5   :  { %12323 = vmatprep.mubr.msk.f32.mxu1 %vm13578_vm1, %v13577_v20  ;;  %12331 = vmatprep.subr.mxu1 %v13577_v20 }
 0xbf6   :  { %12339 = vmatmul.mubr.msk.f32.vlgmr.msra.gmra.mrb[24].mxu0 %vm128_vm0, %v2654_v33 }
 0xbf7   :  { %12347 = vmatpush3.xpose.msk.msra.mxu0 %vm128_vm0, %v2242_v27  ;;  %12348 = vmatprep.mubr.msk.f32.mxu0 %vm13578_vm1, %v13577_v20 }
 0xbf8   :  { %12356 = vmatprep.subr.mxu0 %v13577_v20 }
 0xbfa   :  { %12349 = vmatmul.mubr.msk.f32.vlgmr.msra.gmra.mrb[26].mxu0 %vm128_vm0, %v2814_v18 }
 0xbfb   :  { %12357 = vmatpush3.xpose.msk.msra.mxu0 %vm128_vm0, %v2247_v11  ;;  %12358 = vmatprep.mubr.msk.f32.mxu0 %vm13578_vm1, %v13577_v20 }
 0xbfc   :  { %12366 = vmatprep.subr.mxu0 %v13577_v20 }
 0xbfe   :  { %12359 = vmatmul.mubr.msk.f32.vlgmr.msra.gmra.mrb[28].mxu0 %vm128_vm0, %v2974_v35 }
 0xbff   :  { %12367 = vmatpush3.xpose.msk.msra.mxu0 %vm128_vm0, %v2247_v11  ;;  %12368 = vmatprep.mubr.msk.f32.mxu0 %vm13578_vm1, %v13577_v20 }
 0xc00   :  { %12376 = vmatprep.subr.mxu0 %v13577_v20 }
 0xc02   :  { %12369 = vmatmul.mubr.msk.f32.vlgmr.msra.gmra.mrb[30].mxu0 %vm128_vm0, %v3137_v37 }
 0xc03   :  { %12377 = vmatpush3.xpose.msk.msra.mxu0 %vm128_vm0, %v2247_v11  ;;  %12378 = vmatprep.mubr.msk.f32.mxu0 %vm13578_vm1, %v13577_v20 }
 0xc04   :  { %12386 = vmatprep.subr.mxu0 %v13577_v20 }
 0xc06   :  { %12379 = vmatmul.mubr.msk.f32.vlgmr.msra.gmra.mrb[32].mxu0 %vm128_vm0, %v3297_v28 }
 0xc07   :  { %12387 = vmatpush3.xpose.msk.msra.mxu0 %vm128_vm0, %v2247_v11  ;;  %12388 = vmatprep.mubr.msk.f32.mxu0 %vm13578_vm1, %v13577_v20 }
 0xc0a   :  { %12389 = vmatmul.mubr.msk.f32.vlgmr.msra.gmra.mrb[34].mxu0 %vm128_vm0, %v3457_v45 }
 0xcc5   :  { %v2404_v39 = vpop.f32.mrb[28].mxu1  ;;  %v2564_v41 = vpop.f32.mrb[22].mxu0 }
 0xcc6   :  { %v2405_v42 = vadd.f32 %v2404_v39, %v13873_v49  ;;  %v2565_v43 = vadd.f32 %v2564_v41, %v13873_v49  ;;  %v12320_v29 = vpop.f32.mrb[29].mxu1  ;;  %v12330_v38 = vpop.f32.mrb[23].mxu0 }
 0xcc8   :  { %v2568_v44 = vsel %vm457_vm2, %v2565_v43, -inf  ;;  %v2408_v46 = vsel %vm457_vm2, %v2405_v42, -inf }
 0xcc9   :  { %2569 = vmax.xlane.f32.xlu1 %v2568_v44  ;;  %v2724_v47 = vpop.f32.mrb[24].mxu0  ;;  %2409 = vmax.xlane.f32.xlu0 %v2408_v46 }
 0xcca   :  { %v2725_v48 = vadd.f32 %v2724_v47, %v13873_v49  ;;  %v12340_v36 = vpop.f32.mrb[25].mxu0 }
 0xccc   :  { %v2728_v50 = vsel %vm457_vm2, %v2725_v48, -inf }
 0xccd   :  { %v2884_v51 = vpop.f32.mrb[26].mxu0  ;;  %2729 = vmax.xlane.f32.xlu0 %v2728_v50 }
 0xcce   :  { %v2885_v52 = vadd.f32 %v2884_v51, %v13873_v49  ;;  %v12350_v53 = vpop.f32.mrb[27].mxu0 }
 0xcd0   :  { %v2888_v54 = vsel %vm457_vm2, %v2885_v52, -inf }
 0xcd1   :  { %2889 = vmax.xlane.f32.xlu1 %v2888_v54  ;;  %v3047_v55 = vpop.f32.mrb[28].mxu0 }
 0xcd2   :  { %v3048_v56 = vadd.f32 %v3047_v55, %v13882_v8  ;;  %v12360_v57 = vpop.f32.mrb[29].mxu0 }
 0xcd4   :  { %v3051_v58 = vsel %vm457_vm2, %v3048_v56, -inf }
 0xcd5   :  { %v3207_v59 = vpop.f32.mrb[30].mxu0  ;;  %3052 = vmax.xlane.f32.xlu0 %v3051_v58 }
 0xcd6   :  { %v3208_v60 = vadd.f32 %v3207_v59, %v13882_v8  ;;  %v12370_v61 = vpop.f32.mrb[31].mxu0 }
 0xcd8   :  { %v3211_v62 = vsel %vm457_vm2, %v3208_v60, -inf }
 0xcd9   :  { %3212 = vmax.xlane.f32.xlu1 %v3211_v62  ;;  %v3367_v63 = vpop.f32.mrb[32].mxu0 }
 0xcda   :  { %v3368_v49 = vadd.f32 %v3367_v63, %v13882_v8  ;;  %v12380_v21 = vpop.f32.mrb[33].mxu0 }
 0xcdc   :  { %v3371_v0 = vsel %vm457_vm2, %v3368_v49, -inf }
 0xcdd   :  { %v3527_v1 = vpop.f32.mrb[34].mxu0  ;;  %3372 = vmax.xlane.f32.xlu0 %v3371_v0 }
 0xcde   :  { %v3528_v2 = vadd.f32 %v3527_v1, %v13882_v8  ;;  %v12390_v3 = vpop.f32.mrb[35].mxu0 }
 0xce0   :  { %v3531_v4 = vsel %vm457_vm2, %v3528_v2, -inf }
 0xce1   :  { %3532 = vmax.xlane.f32.xlu1 %v3531_v4 }
 0xd56   :  { %v2570_v5 = vpop.xlane.xlu1 %2569  ;;  %v2410_v6 = vpop.xlane.xlu0 %2409 }
 0xd57   :  { %v2571_v10 = vsub.f32 %v2565_v43, %v2570_v5  ;;  %v2411_v12 = vsub.f32 %v2405_v42, %v2410_v6 }
 0xd59   :  { %v2572_v13 = vmul.f32 1.442695, %v2571_v10  ;;  %v2412_v14 = vmul.f32 1.442695, %v2411_v12 }
 0xd5a   :  { %v2730_v16 = vpop.xlane.xlu0 %2729 }
 0xd5b   :  { %13345 = vpow2.f32 %v2572_v13  ;;  %v2731_v17 = vsub.f32 %v2725_v48, %v2730_v16  ;;  %v11420_v13 = vld [vmem:[%s15519_s8 + $0xe0] sm:$0xff] }
 0xd5c   :  { %13347 = vpow2.f32 %v2412_v14  ;;  %v11421_v14 = vld [vmem:[%s15519_s8 + $0xe8] sm:$0xff] }
 0xd5d   :  { %v2732_v19 = vmul.f32 1.442695, %v2731_v17  ;;  %v13084_v16 = vpack.c.bf16 %v11421_v14, %v11420_v13  ;;  %v11423_v17 = vld [vmem:[%s15519_s8 + $0xf8] sm:$0xff] }
 0xd5e   :  { %v2890_v22 = vpop.xlane.xlu1 %2889  ;;  %v11473_v13 = vld [vmem:[%s15524_s6 + $0x38] sm:$0xff] }
 0xd5f   :  { %13349 = vpow2.f32 %v2732_v19  ;;  %v2891_v23 = vsub.f32 %v2885_v52, %v2890_v22  ;;  %13085 = vmatprep.subr.bf16.mxu0 %v13084_v16 }
 0xd60   :  { %13087 = vmatpush3.bf16.msra.mxu0 %v13084_v16  ;;  %v3988_v16 = vld [vmem:[%s15476_s14] sm:$0xff] }
 0xd61   :  { %v2892_v24 = vmul.f32 1.442695, %v2891_v23 }
 0xd62   :  { %v3053_v8 = vpop.xlane.xlu0 %3052 }
 0xd63   :  { %13351 = vpow2.f32 %v2892_v24  ;;  %v3054_v25 = vsub.f32 %v3048_v56, %v3053_v8  ;;  %v14235_v8 = vld [vmem:[%s15522_s29] ss:$0 sm:$0xff] }
 0xd65   :  { %v13346_v26 = vpop.eup %13345  ;;  %v3055_v27 = vmul.f32 1.442695, %v3054_v25 }
 0xd66   :  { %v13348_v30 = vpop.eup %13347  ;;  %v3213_v31 = vpop.xlane.xlu1 %3212  ;;  %v2574_v40 = vsel %vm457_vm2, %v13346_v26, 0.0 }
 0xd67   :  { %13353 = vpow2.f32 %v3055_v27  ;;  %v3214_v33 = vsub.f32 %v3208_v60, %v3213_v31  ;;  %2575 = vadd.xlane.f32.xlu1 %v2574_v40  ;;  %v2414_v34 = vsel %vm457_vm2, %v13348_v30, 0.0 }
 0xd68   :  { %2415 = vadd.xlane.f32.xlu0 %v2414_v34 }
 0xd69   :  { %v13350_v18 = vpop.eup %13349  ;;  %v3215_v11 = vmul.f32 1.442695, %v3214_v33  ;;  %v14247_v33 = vld [vmem:[%s15522_s29 + $0x2] ss:$0 sm:$0xff] }
 0xd6a   :  { %v3373_v35 = vpop.xlane.xlu0 %3372  ;;  %v2734_v37 = vsel %vm457_vm2, %v13350_v18, 0.0 }
 0xd6b   :  { %13355 = vpow2.f32 %v3215_v11  ;;  %v3374_v28 = vsub.f32 %v3368_v49, %v3373_v35 }
 0xd6c   :  { %2735 = vadd.xlane.f32.xlu0 %v2734_v37  ;;  %v14253_v37 = vld [vmem:[%s15522_s29 + $0x3] ss:$0 sm:$0xff] }
 0xd6d   :  { %v13352_v45 = vpop.eup %13351  ;;  %v3375_v39 = vmul.f32 1.442695, %v3374_v28 }
 0xd6e   :  { %v3533_v41 = vpop.xlane.xlu1 %3532  ;;  %v2894_v42 = vsel %vm457_vm2, %v13352_v45, 0.0 }
 0xd6f   :  { %13357 = vpow2.f32 %v3375_v39  ;;  %v3534_v43 = vsub.f32 %v3528_v2, %v3533_v41  ;;  %2895 = vadd.xlane.f32.xlu1 %v2894_v42 }
 0xd71   :  { %v13354_v29 = vpop.eup %13353  ;;  %v3535_v38 = vmul.f32 1.442695, %v3534_v43 }
 0xd72   :  { %v3057_v44 = vsel %vm457_vm2, %v13354_v29, 0.0 }
 0xd73   :  { %13359 = vpow2.f32 %v3535_v38  ;;  %3058 = vadd.xlane.f32.xlu0 %v3057_v44 }
 0xd75   :  { %v13356_v46 = vpop.eup %13355 }
 0xd76   :  { %v3217_v47 = vsel %vm457_vm2, %v13356_v46, 0.0 }
 0xd77   :  { %3218 = vadd.xlane.f32.xlu1 %v3217_v47 }
 0xd79   :  { %v13358_v48 = vpop.eup %13357 }
 0xd7a   :  { %v3377_v36 = vsel %vm457_vm2, %v13358_v48, 0.0 }
 0xd7b   :  { %3378 = vadd.xlane.f32.xlu0 %v3377_v36 }
 0xd7d   :  { %v13360_v50 = vpop.eup %13359 }
 0xd7e   :  { %v3537_v51 = vsel %vm457_vm2, %v13360_v50, 0.0 }
 0xd7f   :  { %3538 = vadd.xlane.f32.xlu1 %v3537_v51 }
 0xdf4   :  { %v2576_v52 = vpop.xlane.xlu1 %2575 }
 0xdf5   :  { %v2416_v53 = vpop.xlane.xlu0 %2415 }
 0xdf6   :  { %13361 = vrcp.f32 %v2416_v53 }
 0xdf7   :  { %13363 = vrcp.f32 %v2576_v52 }
 0xdf9   :  { %v2736_v54 = vpop.xlane.xlu0 %2735 }
 0xdfa   :  { %13365 = vrcp.f32 %v2736_v54 }
 0xdfc   :  { %v2896_v55 = vpop.xlane.xlu1 %2895 }
 0xdfd   :  { %13367 = vrcp.f32 %v2896_v55  ;;  %v11465_v55 = vld [vmem:[%s15521_s9 + $0x7] ss:$0 sm:$0xff] }
 0xe00   :  { %v13362_v56 = vpop.eup %13361  ;;  %v3059_v57 = vpop.xlane.xlu0 %3058 }
 0xe01   :  { %v2418_v58 = vmul.f32 %v13362_v56, %v13348_v30  ;;  %v13364_v59 = vpop.eup %13363  ;;  %13369 = vrcp.f32 %v3059_v57 }
 0xe02   :  { %v2578_v61 = vmul.f32 %v13364_v59, %v13346_v26  ;;  %v14241_v26 = vld [vmem:[%s15522_s29 + $0x1] ss:$0 sm:$0xff] }
 0xe03   :  { %12324 = vmatmul.mubr.msk.f32.vlgmr.msra.gmra.mrb[30].mxu1 %vm457_vm2, %v2418_v58 }
 0xe04   :  { %12332 = vmatpush3.msra.mxu1 %v14118_v32  ;;  %12333 = vmatprep.mubr.msk.f32.mxu1 %vm13578_vm1, %v13577_v20  ;;  %v3219_v60 = vpop.xlane.xlu1 %3218  ;;  %v13366_v62 = vpop.eup %13365 }
 0xe05   :  { %12341 = vmatprep.subr.mxu1 %v13577_v20  ;;  %13371 = vrcp.f32 %v3219_v60  ;;  %v2738_v49 = vmul.f32 %v13366_v62, %v13350_v18 }
 0xe07   :  { %12334 = vmatmul.mubr.msk.f32.vlgmr.msra.gmra.mrb[32].mxu1 %vm457_vm2, %v2578_v61  ;;  %v13368_v21 = vpop.eup %13367 }
 0xe08   :  { %12342 = vmatpush3.msra.mxu1 %v14118_v32  ;;  %12343 = vmatprep.mubr.msk.f32.mxu1 %vm13578_vm1, %v13577_v20  ;;  %v3379_v63 = vpop.xlane.xlu0 %3378  ;;  %v2898_v1 = vmul.f32 %v13368_v21, %v13352_v45 }
 0xe09   :  { %12351 = vmatprep.subr.mxu1 %v13577_v20  ;;  %13373 = vrcp.f32 %v3379_v63 }
 0xe0b   :  { %12344 = vmatmul.mubr.msk.f32.vlgmr.msra.gmra.mrb[34].mxu1 %vm457_vm2, %v2738_v49  ;;  %v13370_v2 = vpop.eup %13369 }
 0xe0c   :  { %12352 = vmatpush3.msra.mxu1 %v14118_v32  ;;  %12353 = vmatprep.mubr.msk.f32.mxu1 %vm13578_vm1, %v13577_v20  ;;  %v3539_v0 = vpop.xlane.xlu1 %3538  ;;  %v3061_v3 = vmul.f32 %v13370_v2, %v13354_v29 }
 0xe0d   :  { %12361 = vmatprep.subr.mxu1 %v13577_v20  ;;  %13375 = vrcp.f32 %v3539_v0 }
 0xe0f   :  { %12354 = vmatmul.mubr.msk.f32.vlgmr.msra.gmra.mrb[36].mxu1 %vm457_vm2, %v2898_v1  ;;  %v13372_v32 = vpop.eup %13371 }
 0xe10   :  { %12362 = vmatpush3.msra.mxu1 %v14104_v15  ;;  %12363 = vmatprep.mubr.msk.f32.mxu1 %vm13578_vm1, %v13577_v20  ;;  %v3221_v4 = vmul.f32 %v13372_v32, %v13356_v46 }
 0xe11   :  { %12371 = vmatprep.subr.mxu1 %v13577_v20 }
 0xe13   :  { %12364 = vmatmul.mubr.msk.f32.vlgmr.msra.gmra.mrb[38].mxu1 %vm457_vm2, %v3061_v3  ;;  %v13374_v5 = vpop.eup %13373 }
 0xe14   :  { %12372 = vmatpush3.msra.mxu1 %v14104_v15  ;;  %12373 = vmatprep.mubr.msk.f32.mxu1 %vm13578_vm1, %v13577_v20  ;;  %v3381_v6 = vmul.f32 %v13374_v5, %v13358_v48 }
 0xe15   :  { %12381 = vmatprep.subr.mxu1 %v13577_v20 }
 0xe17   :  { %12374 = vmatmul.mubr.msk.f32.vlgmr.msra.gmra.mrb[40].mxu1 %vm457_vm2, %v3221_v4  ;;  %v13376_v10 = vpop.eup %13375 }
 0xe18   :  { %12382 = vmatpush3.msra.mxu1 %v14104_v15  ;;  %12383 = vmatprep.mubr.msk.f32.mxu1 %vm13578_vm1, %v13577_v20  ;;  %v3541_v12 = vmul.f32 %v13376_v10, %v13360_v50 }
 0xe19   :  { %12391 = vmatprep.subr.mxu1 %v13577_v20 }
 0xe1b   :  { %12384 = vmatmul.mubr.msk.f32.vlgmr.msra.gmra.mrb[42].mxu1 %vm457_vm2, %v3381_v6  ;;  %v11471_v6 = vld [vmem:[%s15524_s6 + $0x28] sm:$0xff] }
 0xe1c   :  { %12392 = vmatpush3.msra.mxu1 %v14104_v15  ;;  %12393 = vmatprep.mubr.msk.f32.mxu1 %vm13578_vm1, %v13577_v20  ;;  %v11422_v15 = vld [vmem:[%s15519_s8 + $0xf0] sm:$0xff] }
 0xe1d   :  { %v13088_v19 = vpack.c.bf16 %v11423_v17, %v11422_v15  ;;  %v3989_v15 = vld [vmem:[%s15476_s14 + $0x8] sm:$0xff] }
 0xe1e   :  { %v13116_v17 = vpack.c.bf16 %v3989_v15, %v3988_v16  ;;  %v11495_v16 = vld [vmem:[%s15477_s15 + $0x1] ss:$0 sm:$0xff] }
 0xe1f   :  { %12394 = vmatmul.mubr.msk.f32.vlgmr.msra.gmra.mrb[44].mxu1 %vm457_vm2, %v3541_v12  ;;  %13089 = vmatprep.subr.bf16.mxu0 %v13088_v19  ;;  %v11472_v12 = vld [vmem:[%s15524_s6 + $0x30] sm:$0xff] }
 0xe20   :  { %13091 = vmatpush3.bf16.msra.mxu0 %v13088_v19  ;;  %v13096_v14 = vpack.c.bf16 %v11473_v13, %v11472_v12  ;;  %v11478_v19 = vld [vmem:[%s15474_s12 + $0x40] sm:$0xff] }
 0xe21   :  { %v11492_v13 = vld [vmem:[%s15477_s15] ss:$0 sm:$0xff] }
 0xed6   :  { %v2488_v22 = vpop.f32.mrb[30].mxu1 }
 0xed7   :  { %v12325_v23 = vpop.f32.mrb[31].mxu1  ;;  %v2492_v25 = vmul.f32 %v14235_v8, %v2488_v22  ;;  %v11479_v22 = vld [vmem:[%s15474_s12 + $0x48] sm:$0xff] }
 0xed8   :  { %v11480_v23 = vld [vmem:[%s15474_s12 + $0x50] sm:$0xff] }
 0xeda   :  { %v2648_v24 = vpop.f32.mrb[32].mxu1 }
 0xedb   :  { %v2652_v27 = vmul.f32 %v14241_v26, %v2648_v24  ;;  %v12335_v30 = vpop.f32.mrb[33].mxu1  ;;  %v13100_v24 = vpack.c.bf16 %v11479_v22, %v11478_v19 }
 0xedc   :  { %v11482_v30 = vld [vmem:[%s15474_s12 + $0x60] sm:$0xff] }
 0xedd   :  { %v2653_v31 = vadd.f32 %v2652_v27, %v2492_v25  ;;  %v11481_v25 = vld [vmem:[%s15474_s12 + $0x58] sm:$0xff]  ;;  %13101 = vmatprep.subr.bf16.mxu0 %v13100_v24 }
 0xede   :  { %v2808_v40 = vpop.f32.mrb[34].mxu1  ;;  %v13104_v27 = vpack.c.bf16 %v11481_v25, %v11480_v23 }
 0xedf   :  { %v2812_v34 = vmul.f32 %v14247_v33, %v2808_v40  ;;  %v12345_v18 = vpop.f32.mrb[35].mxu1 }
 0xee1   :  { %v2813_v11 = vadd.f32 %v2812_v34, %v2653_v31  ;;  %v11483_v31 = vld [vmem:[%s15474_s12 + $0x68] sm:$0xff] }
 0xee2   :  { %v2968_v35 = vpop.f32.mrb[36].mxu1  ;;  %v13108_v40 = vpack.c.bf16 %v11483_v31, %v11482_v30 }
 0xee3   :  { %v2972_v28 = vmul.f32 %v14253_v37, %v2968_v35  ;;  %v12355_v45 = vpop.f32.mrb[37].mxu1 }
 0xee5   :  { %v2973_v39 = vadd.f32 %v2972_v28, %v2813_v11 }
 0xee6   :  { %v3131_v41 = vpop.f32.mrb[38].mxu1 }
 0xee7   :  { %v12365_v42 = vpop.f32.mrb[39].mxu1  ;;  %12404 = vmatprep.mubr.msk.f32.mxu0 %vm128_vm0, %v2973_v39  ;;  %v3135_v29 = vmul.f32 %v14235_v8, %v3131_v41  ;;  %v11468_v41 = vld [vmem:[%s15525_s10 + $0x2] ss:$0 sm:$0xff] }
 0xeea   :  { %v3291_v43 = vpop.f32.mrb[40].mxu1 }
 0xeeb   :  { %v3295_v38 = vmul.f32 %v14241_v26, %v3291_v43  ;;  %v12375_v44 = vpop.f32.mrb[41].mxu1 }
 0xeed   :  { %v3296_v46 = vadd.f32 %v3295_v38, %v3135_v29  ;;  %v11469_v38 = vld [vmem:[%s15526_s2 + $0x2] ss:$0 sm:$0xff] }
 0xeee   :  { %v3451_v47 = vpop.f32.mrb[42].mxu1 }
 0xeef   :  { %v3455_v48 = vmul.f32 %v14247_v33, %v3451_v47  ;;  %v12385_v36 = vpop.f32.mrb[43].mxu1  ;;  %v3990_v47 = vld [vmem:[%s15476_s14 + $0x10] sm:$0xff] }
 0xef1   :  { %v3456_v50 = vadd.f32 %v3455_v48, %v3296_v46  ;;  %v3991_v48 = vld [vmem:[%s15476_s14 + $0x18] sm:$0xff] }
 0xef2   :  { %v3611_v51 = vpop.f32.mrb[44].mxu1 }
 0xef3   :  { %v3615_v52 = vmul.f32 %v14253_v37, %v3611_v51  ;;  %v12395_v53 = vpop.f32.mrb[45].mxu1  ;;  %v13120_v51 = vpack.c.bf16 %v3991_v48, %v3990_v47 }
 0xef4   :  { %v3992_v53 = vld [vmem:[%s15476_s14 + $0x20] sm:$0xff] }
 0xef5   :  { %v3616_v54 = vadd.f32 %v3615_v52, %v3456_v50  ;;  %v14326_v52 = vld [vmem:[%s15528_s7] sm:$0xff] }
 0xef7   :  { %12405 = vmatmul.mubr.msk.f32.vlgmr.msra.gmra.mrb[36].mxu0 %vm128_vm0, %v3616_v54  ;;  %v3993_v54 = vld [vmem:[%s15476_s14 + $0x28] sm:$0xff] }
 0xef8   :  { %13103 = vmatpush3.bf16.msra.mxu0 %v13100_v24 }
 0xef9   :  { %13105 = vmatprep.subr.bf16.mxu0 %v13104_v27 }
 0xefc   :  { %13107 = vmatpush3.bf16.msra.mxu0 %v13104_v27 }
 0xefd   :  { %13109 = vmatprep.subr.bf16.mxu0 %v13108_v40 }
 0xf00   :  { %13111 = vmatpush3.bf16.msra.mxu0 %v13108_v40 }
 0xfca   :  { %v12406_v56 = vpop.f32.mrb[36].mxu0 }
 0xfcb   :  { %v3701_v57 = vadd.f32 %v12406_v56, %v11465_v55  ;;  %v3695_v58 = vpop.f32.mrb[37].mxu0  ;;  %v3994_v56 = vld [vmem:[%s15476_s14 + $0x30] sm:$0xff] }
 0xfcc   :  { %v3696_v59 = vadd.f32 %v11465_v55, %v3695_v58  ;;  %v13124_v55 = vpack.c.bf16 %v3993_v54, %v3992_v53  ;;  %v14349_v58 = vld [vmem:[%s15528_s7 + $0x8] sm:$0xff] }
 0xfcd   :  { %v3705_v60 = vadd.f32 %v3701_v57, %v14082_v9  ;;  %v3995_v57 = vld [vmem:[%s15476_s14 + $0x38] sm:$0xff] }
 0xfce   :  { %v3704_v61 = vadd.f32 %v3696_v59, %v14080_v7  ;;  %v11470_v7 = vld [vmem:[%s15524_s6 + $0x20] sm:$0xff]  ;;  %v13128_v59 = vpack.c.bf16 %v3995_v57, %v3994_v56 }
 0xfcf   :  { %v3709_v62 = vsel %vm128_vm0, %v3705_v60, 0.0  ;;  %v13092_v10 = vpack.c.bf16 %v11471_v6, %v11470_v7 }
 0xfd0   :  { %3710 = vadd.xlane.f32.xlu1 %v3709_v62  ;;  %v3706_v63 = vsel %vm128_vm0, %v3704_v61, 0.0 }
 0xfd1   :  { %3707 = vadd.xlane.f32.xlu0 %v3706_v63  ;;  %13093 = vmatprep.subr.bf16.mxu1 %v13092_v10  ;;  %v3996_v63 = vld [vmem:[%s15476_s14 + $0x40] sm:$0xff] }
 0xfd2   :  { %13095 = vmatpush3.bf16.msra.mxu1 %v13092_v10 }
 0xfd3   :  { %13097 = vmatprep.subr.bf16.mxu1 %v13096_v14 }
 0xfd6   :  { %13099 = vmatpush3.bf16.msra.mxu1 %v13096_v14 }
 0xfd7   :  { %13117 = vmatprep.subr.bf16.mxu1 %v13116_v17 }
0x105d   :  { %v3711_v49 = vpop.xlane.xlu1 %3710 }
0x105e   :  { %v3713_v21 = vmul.f32 0.03125, %v3711_v49  ;;  %v3708_v0 = vpop.xlane.xlu0 %3707  ;;  %v3997_v49 = vld [vmem:[%s15476_s14 + $0x48] sm:$0xff] }
0x105f   :  { %v3712_v1 = vmul.f32 0.03125, %v3708_v0  ;;  %v11475_v0 = vld [vmem:[%s15527_s0 + $0x1] ss:$0 sm:$0xff]  ;;  %s15530_s0 = sld [smem:[#allocation9_spill]] }
0x1060   :  { %v3715_v2 = vsub.f32 %v3705_v60, %v3713_v21  ;;  %v11484_v60 = vld [vmem:[%s15474_s12 + $0x70] sm:$0xff]  ;;  %v13132_v21 = vpack.c.bf16 %v3997_v49, %v3996_v63  ;;  %v93_v49 = vld [vmem:[%s15529_s30 + $0x8] sm:$0xff] }
0x1061   :  { %v3714_v3 = vsub.f32 %v3704_v61, %v3712_v1  ;;  %v11485_v61 = vld [vmem:[%s15474_s12 + $0x78] sm:$0xff] }
0x1062   :  { %v3717_v32 = vmul.f32 %v3715_v2, %v3715_v2  ;;  %v13112_v62 = vpack.c.bf16 %v11485_v61, %v11484_v60 }
0x1063   :  { %v3716_v4 = vmul.f32 %v3714_v3, %v3714_v3 }
0x1064   :  { %v3721_v5 = vsel %vm128_vm0, %v3717_v32, 0.0  ;;  %13113 = vmatprep.subr.bf16.mxu0 %v13112_v62 }
0x1065   :  { %3722 = vadd.xlane.f32.xlu1 %v3721_v5  ;;  %v3718_v9 = vsel %vm128_vm0, %v3716_v4, 0.0  ;;  %13115 = vmatpush3.bf16.msra.mxu0 %v13112_v62  ;;  %v3998_v4 = vld [vmem:[%s15476_s14 + $0x50] sm:$0xff]  ;;  %v3999_v5 = vld [vmem:[%s15476_s14 + $0x58] sm:$0xff] }
0x1066   :  { %3719 = vadd.xlane.f32.xlu0 %v3718_v9  ;;  %13133 = vmatprep.subr.bf16.mxu0 %v13132_v21  ;;  %v13136_v6 = vpack.c.bf16 %v3999_v5, %v3998_v4 }
0x10f2   :  { %v3723_v34 = vpop.xlane.xlu1 %3722 }
0x10f3   :  { %v3725_v18 = vmul.f32 0.03125, %v3723_v34  ;;  %v3720_v11 = vpop.xlane.xlu0 %3719 }
0x10f4   :  { %v3724_v35 = vmul.f32 0.03125, %v3720_v11 }
0x10f5   :  { %v3727_v28 = vadd.f32 1e-05, %v3725_v18 }
0x10f6   :  { %v3726_v45 = vadd.f32 1e-05, %v3724_v35 }
0x10f7   :  { %13377 = vrsqrt.f32 %v3727_v28 }
0x10f8   :  { %13379 = vrsqrt.f32 %v3726_v45 }
0x1101   :  { %v13378_v39 = vpop.eup %13377 }
0x1102   :  { %v13380_v42 = vpop.eup %13379  ;;  %v3731_v43 = vmul.f32 %v13378_v39, %v3715_v2  ;;  %v11498_v39 = vld [vmem:[%s15477_s15 + $0x2] ss:$0 sm:$0xff] }
0x1103   :  { %v3730_v29 = vmul.f32 %v13380_v42, %v3714_v3 }
0x1104   :  { %v3739_v44 = vmul.f32 %v11468_v41, %v3731_v43 }
0x1105   :  { %v3738_v46 = vmul.f32 %v11468_v41, %v3730_v29 }
0x1106   :  { %v14321_v50 = vadd.f32 %v11469_v38, %v3739_v44 }
0x1107   :  { %v14319_v36 = vadd.f32 %v11469_v38, %v3738_v46  ;;  %v92_v38 = vld [vmem:[%s15529_s30] sm:$0xff] }
0x1109   :  { %12415 = vmatprep.mubr.msk.f32.mxu1 %vm128_vm0, %v14319_v36 }
0x110a   :  { %12416 = vmatmul.mubr.msk.f32.vlgmr.msra.gmra.mrb[46].mxu1 %vm128_vm0, %v14321_v50 }
0x110b   :  { %13119 = vmatpush3.bf16.msra.mxu1 %v13116_v17  ;;  %12445 = vmatprep.mubr.msk.f32.mxu1 %vm128_vm0, %v14326_v52 }
0x110c   :  { %13121 = vmatprep.subr.bf16.mxu1 %v13120_v51 }
0x110f   :  { %13123 = vmatpush3.bf16.msra.mxu1 %v13120_v51 }
0x1110   :  { %13125 = vmatprep.subr.bf16.mxu1 %v13124_v55 }
0x1112   :  { %12446 = vmatmul.mubr.msk.f32.vlgmr.msra.gmra.mrb[48].mxu1 %vm128_vm0, %v14349_v58 }
0x1113   :  { %13127 = vmatpush3.bf16.msra.mxu1 %v13124_v55  ;;  %12456 = vmatprep.mubr.msk.f32.mxu1 %vm128_vm0, %v14326_v52 }
0x1114   :  { %13129 = vmatprep.subr.bf16.mxu1 %v13128_v59 }
0x1117   :  { %13131 = vmatpush3.bf16.msra.mxu1 %v13128_v59 }
0x1118   :  { %12470 = vmatprep.subr.mxu1 %v13577_v20 }
0x111a   :  { %12457 = vmatmul.mubr.msk.f32.vlgmr.msra.gmra.mrb[50].mxu1 %vm128_vm0, %v14349_v58 }
0x111b   :  { %12472 = vmatprep.mubr.msk.f32.mxu1 %vm13578_vm1, %v13577_v20 }
0x11dd   :  { %v12417_v1 = vpop.f32.mrb[46].mxu1 }
0x11de   :  { %v3839_v2 = vadd.f32 %v12417_v1, %v11475_v0  ;;  %v3833_v3 = vpop.f32.mrb[47].mxu1 }
0x11df   :  { %v3834_v32 = vadd.f32 %v11475_v0, %v3833_v3 }
0x11e0   :  { %v3843_v7 = vmax.f32 %v3839_v2, 0.0 }
0x11e1   :  { %v3842_v9 = vmax.f32 %v3834_v32, 0.0 }
0x11e3   :  { %12434 = vmatprep.mubr.msk.f32.mxu0 %vm1926_vm3, %v3842_v9 }
0x11e4   :  { %12435 = vmatmul.mubr.msk.f32.vlgmr.msra.gmra.mrb[38].mxu0 %vm1926_vm3, %v3843_v7 }
0x11e5   :  { %v12447_v10 = vpop.f32.mrb[48].mxu1  ;;  %13135 = vmatpush3.bf16.msra.mxu0 %v13132_v21  ;;  %12467 = vmatprep.mubr.msk.f32.mxu0 %vm128_vm0, %v14326_v52 }
0x11e6   :  { %v4112_v12 = vpop.f32.mrb[49].mxu1  ;;  %13137 = vmatprep.subr.bf16.mxu0 %v13136_v6  ;;  %v4118_v25 = vadd.f32 %v12447_v10, %v11492_v13 }
0x11e7   :  { %v4113_v14 = vadd.f32 %v11492_v13, %v4112_v12 }
0x11e8   :  { %v4122_v30 = vmul.f32 0.35355338, %v4118_v25 }
0x11e9   :  { %13139 = vmatpush3.bf16.msra.mxu0 %v13136_v6  ;;  %v4121_v17 = vmul.f32 0.35355338, %v4113_v14 }
0x11ea   :  { %12480 = vmatprep.subr.mxu0 %v13577_v20  ;;  %v4928_v34 = vmul.f32 %v14235_v8, %v4122_v30  ;;  %v5091_v18 = vmul.f32 %v14241_v26, %v4122_v30  ;;  %v5251_v11 = vmul.f32 %v14247_v33, %v4122_v30  ;;  %v5411_v35 = vmul.f32 %v14253_v37, %v4122_v30 }
0x11eb   :  { %v4285_v23 = vmul.f32 %v14235_v8, %v4121_v17  ;;  %v4448_v24 = vmul.f32 %v14241_v26, %v4121_v17  ;;  %v4608_v27 = vmul.f32 %v14247_v33, %v4121_v17  ;;  %v4768_v31 = vmul.f32 %v14253_v37, %v4121_v17 }
0x11ec   :  { %12468 = vmatmul.mubr.msk.f32.vlgmr.msra.gmra.mrb[40].mxu0 %vm128_vm0, %v14349_v58 }
0x11ed   :  { %v12458_v15 = vpop.f32.mrb[50].mxu1  ;;  %12482 = vmatprep.mubr.msk.f32.mxu0 %vm13578_vm1, %v13577_v20 }
0x11ee   :  { %v4195_v19 = vpop.f32.mrb[51].mxu1  ;;  %v4201_v40 = vadd.f32 %v12458_v15, %v11495_v16 }
0x11ef   :  { %v4196_v22 = vadd.f32 %v11495_v16, %v4195_v19 }
0x11f1   :  { %12471 = vmatpush3.xpose.msk.msra.mxu1 %vm128_vm0, %v4196_v22 }
0x11f2   :  { %12481 = vmatpush3.xpose.msk.msra.mxu0 %vm128_vm0, %v4196_v22  ;;  %12475 = vmatprep.subr.mxu1 %v13577_v20 }
0x11f3   :  { %12490 = vmatprep.subr.mxu0 %v13577_v20 }
0x11f4   :  { %12473 = vmatmul.mubr.msk.f32.vlgmr.msra.gmra.mrb[52].mxu1 %vm128_vm0, %v4285_v23 }
0x11f5   :  { %12483 = vmatmul.mubr.msk.f32.vlgmr.msra.gmra.mrb[42].mxu0 %vm128_vm0, %v4448_v24  ;;  %12477 = vmatprep.mubr.msk.f32.mxu1 %vm13578_vm1, %v13577_v20 }
0x11f6   :  { %12491 = vmatpush3.xpose.msk.msra.mxu0 %vm128_vm0, %v4196_v22  ;;  %12492 = vmatprep.mubr.msk.f32.mxu0 %vm13578_vm1, %v13577_v20 }
0x11f7   :  { %12500 = vmatprep.subr.mxu0 %v13577_v20 }
0x11f9   :  { %12493 = vmatmul.mubr.msk.f32.vlgmr.msra.gmra.mrb[44].mxu0 %vm128_vm0, %v4608_v27 }
0x11fa   :  { %12501 = vmatpush3.xpose.msk.msra.mxu0 %vm128_vm0, %v4196_v22  ;;  %12502 = vmatprep.mubr.msk.f32.mxu0 %vm13578_vm1, %v13577_v20 }
0x11fb   :  { %12510 = vmatprep.subr.mxu0 %v13577_v20 }
0x11fd   :  { %12503 = vmatmul.mubr.msk.f32.vlgmr.msra.gmra.mrb[46].mxu0 %vm128_vm0, %v4768_v31 }
0x11fe   :  { %12511 = vmatpush3.xpose.msk.msra.mxu0 %vm128_vm0, %v4201_v40  ;;  %12512 = vmatprep.mubr.msk.f32.mxu0 %vm13578_vm1, %v13577_v20 }
0x11ff   :  { %12520 = vmatprep.subr.mxu0 %v13577_v20 }
0x1201   :  { %12513 = vmatmul.mubr.msk.f32.vlgmr.msra.gmra.mrb[48].mxu0 %vm128_vm0, %v4928_v34 }
0x1202   :  { %12521 = vmatpush3.xpose.msk.msra.mxu0 %vm128_vm0, %v4201_v40  ;;  %12522 = vmatprep.mubr.msk.f32.mxu0 %vm13578_vm1, %v13577_v20 }
0x1203   :  { %12530 = vmatprep.subr.mxu0 %v13577_v20 }
0x1205   :  { %12523 = vmatmul.mubr.msk.f32.vlgmr.msra.gmra.mrb[50].mxu0 %vm128_vm0, %v5091_v18 }
0x1206   :  { %12531 = vmatpush3.xpose.msk.msra.mxu0 %vm128_vm0, %v4201_v40  ;;  %12532 = vmatprep.mubr.msk.f32.mxu0 %vm13578_vm1, %v13577_v20 }
0x1207   :  { %12540 = vmatprep.subr.mxu0 %v13577_v20 }
0x1209   :  { %12533 = vmatmul.mubr.msk.f32.vlgmr.msra.gmra.mrb[52].mxu0 %vm128_vm0, %v5251_v11 }
0x120a   :  { %12541 = vmatpush3.xpose.msk.msra.mxu0 %vm128_vm0, %v4201_v40  ;;  %12542 = vmatprep.mubr.msk.f32.mxu0 %vm13578_vm1, %v13577_v20 }
0x120d   :  { %12543 = vmatmul.mubr.msk.f32.vlgmr.msra.gmra.mrb[54].mxu0 %vm128_vm0, %v5411_v35 }
0x12b7   :  { %v14441_v28 = vpop.f32.mrb[38].mxu0 }
0x12b8   :  { %v14443_v45 = vpop.f32.mrb[39].mxu0 }
0x12bf   :  { %v12469_v41 = vpop.f32.mrb[40].mxu0 }
0x12c0   :  { %v14448_v42 = vadd.f32 %v12469_v41, %v11498_v39  ;;  %v4276_v43 = vpop.f32.mrb[41].mxu0 }
0x12c1   :  { %v14450_v29 = vadd.f32 %v11498_v39, %v4276_v43 }
0x12c3   :  { %12476 = vmatpush3.msra.mxu1 %v14450_v29 }
0x12c4   :  { %12485 = vmatprep.subr.mxu1 %v13577_v20 }
0x12c7   :  { %v4358_v44 = vpop.f32.mrb[52].mxu1 }
0x12c8   :  { %v4359_v46 = vadd.f32 %v4358_v44, %v92_v38  ;;  %v12474_v47 = vpop.f32.mrb[53].mxu1  ;;  %v4518_v48 = vpop.f32.mrb[42].mxu0 }
0x12c9   :  { %v4519_v51 = vadd.f32 %v4518_v48, %v92_v38  ;;  %v12484_v53 = vpop.f32.mrb[43].mxu0 }
0x12ca   :  { %v4362_v54 = vsel %vm457_vm2, %v4359_v46, -inf }
0x12cb   :  { %4363 = vmax.xlane.f32.xlu0 %v4362_v54  ;;  %v4522_v55 = vsel %vm457_vm2, %v4519_v51, -inf }
0x12cc   :  { %4523 = vmax.xlane.f32.xlu1 %v4522_v55  ;;  %v4678_v56 = vpop.f32.mrb[44].mxu0 }
0x12cd   :  { %v4679_v57 = vadd.f32 %v4678_v56, %v92_v38  ;;  %v12494_v59 = vpop.f32.mrb[45].mxu0 }
0x12cf   :  { %v4682_v60 = vsel %vm457_vm2, %v4679_v57, -inf }
0x12d0   :  { %4683 = vmax.xlane.f32.xlu0 %v4682_v60  ;;  %v4838_v61 = vpop.f32.mrb[46].mxu0 }
0x12d1   :  { %v4839_v62 = vadd.f32 %v4838_v61, %v92_v38  ;;  %v12504_v63 = vpop.f32.mrb[47].mxu0 }
0x12d3   :  { %v4842_v21 = vsel %vm457_vm2, %v4839_v62, -inf }
0x12d4   :  { %4843 = vmax.xlane.f32.xlu1 %v4842_v21  ;;  %v5001_v0 = vpop.f32.mrb[48].mxu0 }
0x12d5   :  { %v5002_v1 = vadd.f32 %v5001_v0, %v93_v49  ;;  %v12514_v2 = vpop.f32.mrb[49].mxu0 }
0x12d7   :  { %v5005_v3 = vsel %vm457_vm2, %v5002_v1, -inf }
0x12d8   :  { %5006 = vmax.xlane.f32.xlu0 %v5005_v3  ;;  %v5161_v32 = vpop.f32.mrb[50].mxu0 }
0x12d9   :  { %v5162_v4 = vadd.f32 %v5161_v32, %v93_v49  ;;  %v12524_v5 = vpop.f32.mrb[51].mxu0 }
0x12db   :  { %v5165_v9 = vsel %vm457_vm2, %v5162_v4, -inf }
0x12dc   :  { %5166 = vmax.xlane.f32.xlu1 %v5165_v9  ;;  %v5321_v7 = vpop.f32.mrb[52].mxu0 }
0x12dd   :  { %v5322_v6 = vadd.f32 %v5321_v7, %v93_v49  ;;  %v12534_v10 = vpop.f32.mrb[53].mxu0 }
0x12df   :  { %v5325_v12 = vsel %vm457_vm2, %v5322_v6, -inf }
0x12e0   :  { %5326 = vmax.xlane.f32.xlu0 %v5325_v12  ;;  %v5481_v13 = vpop.f32.mrb[54].mxu0 }
0x12e1   :  { %v5482_v14 = vadd.f32 %v5481_v13, %v93_v49  ;;  %v12544_v16 = vpop.f32.mrb[55].mxu0 }
0x12e3   :  { %v5485_v15 = vsel %vm457_vm2, %v5482_v14, -inf }
0x12e4   :  { %5486 = vmax.xlane.f32.xlu1 %v5485_v15 }
0x1358   :  { %v4364_v17 = vpop.xlane.xlu0 %4363 }
0x1359   :  { %v4365_v19 = vsub.f32 %v4359_v46, %v4364_v17  ;;  %v4524_v22 = vpop.xlane.xlu1 %4523 }
0x135a   :  { %v4525_v23 = vsub.f32 %v4519_v51, %v4524_v22 }
0x135b   :  { %v4366_v24 = vmul.f32 1.442695, %v4365_v19 }
0x135c   :  { %v4526_v25 = vmul.f32 1.442695, %v4525_v23 }
0x135d   :  { %13381 = vpow2.f32 %v4366_v24  ;;  %v4684_v27 = vpop.xlane.xlu0 %4683 }
0x135e   :  { %13383 = vpow2.f32 %v4526_v25  ;;  %v4685_v30 = vsub.f32 %v4679_v57, %v4684_v27 }
0x1360   :  { %v4686_v31 = vmul.f32 1.442695, %v4685_v30 }
0x1361   :  { %v4844_v40 = vpop.xlane.xlu1 %4843 }
0x1362   :  { %13385 = vpow2.f32 %v4686_v31  ;;  %v4845_v34 = vsub.f32 %v4839_v62, %v4844_v40 }
0x1364   :  { %v4846_v18 = vmul.f32 1.442695, %v4845_v34 }
0x1365   :  { %v5007_v11 = vpop.xlane.xlu0 %5006 }
0x1366   :  { %13387 = vpow2.f32 %v4846_v18  ;;  %v5008_v35 = vsub.f32 %v5002_v1, %v5007_v11  ;;  %v11487_v1 = vld [vmem:[%s15475_s13 + $0x1] ss:$0 sm:$0xff] }
0x1367   :  { %v13382_v39 = vpop.eup %13381  ;;  %v3934_v3 = vadd.f32 %v11487_v1, %v14443_v45  ;;  %v3939_v5 = vadd.f32 %v14441_v28, %v11487_v1 }
0x1368   :  { %v13384_v41 = vpop.eup %13383  ;;  %v5009_v43 = vmul.f32 1.442695, %v5008_v35  ;;  %v4368_v38 = vsel %vm457_vm2, %v13382_v39, 0.0 }
0x1369   :  { %v5167_v44 = vpop.xlane.xlu1 %5166  ;;  %4369 = vadd.xlane.f32.xlu0 %v4368_v38  ;;  %v4528_v46 = vsel %vm457_vm2, %v13384_v41, 0.0  ;;  %v3942_v7 = vadd.f32 %v3934_v3, %v14319_v36  ;;  %v14496_v10 = vadd.f32 %v3939_v5, %v14321_v50 }
0x136a   :  { %13389 = vpow2.f32 %v5009_v43  ;;  %v5168_v47 = vsub.f32 %v5162_v4, %v5167_v44  ;;  %4529 = vadd.xlane.f32.xlu1 %v4528_v46 }
0x136b   :  { %v3947_v45 = vsel %vm128_vm0, %v14496_v10, 0.0 }
0x136c   :  { %v13386_v48 = vpop.eup %13385  ;;  %v5169_v51 = vmul.f32 1.442695, %v5168_v47 }
0x136d   :  { %v5327_v53 = vpop.xlane.xlu0 %5326  ;;  %v4688_v54 = vsel %vm457_vm2, %v13386_v48, 0.0 }
0x136e   :  { %13391 = vpow2.f32 %v5169_v51  ;;  %v5328_v55 = vsub.f32 %v5322_v6, %v5327_v53  ;;  %4689 = vadd.xlane.f32.xlu0 %v4688_v54  ;;  %v3944_v6 = vsel %vm128_vm0, %v3942_v7, 0.0 }
0x1370   :  { %v13388_v56 = vpop.eup %13387  ;;  %v5329_v57 = vmul.f32 1.442695, %v5328_v55  ;;  %v4000_v55 = vld [vmem:[%s15476_s14 + $0x60] sm:$0xff] }
0x1371   :  { %v5487_v59 = vpop.xlane.xlu1 %5486  ;;  %v4848_v60 = vsel %vm457_vm2, %v13388_v56, 0.0 }
0x1372   :  { %13393 = vpow2.f32 %v5329_v57  ;;  %v5488_v61 = vsub.f32 %v5482_v14, %v5487_v59  ;;  %4849 = vadd.xlane.f32.xlu1 %v4848_v60  ;;  %v4003_v59 = vld [vmem:[%s15476_s14 + $0x78] sm:$0xff] }
0x1374   :  { %v14472_v62 = vpop.eup %13389  ;;  %v5489_v63 = vmul.f32 1.442695, %v5488_v61  ;;  %v4012_v61 = vld [vmem:[%s15478_s16 + $0x20] sm:$0xff] }
0x1375   :  { %v5011_v49 = vsel %vm457_vm2, %v14472_v62, 0.0 }
0x1376   :  { %13395 = vpow2.f32 %v5489_v63  ;;  %5012 = vadd.xlane.f32.xlu0 %v5011_v49 }
0x1378   :  { %v14476_v21 = vpop.eup %13391 }
0x1379   :  { %v5171_v0 = vsel %vm457_vm2, %v14476_v21, 0.0 }
0x137a   :  { %5172 = vadd.xlane.f32.xlu1 %v5171_v0 }
0x137c   :  { %v14483_v2 = vpop.eup %13393 }
0x137d   :  { %v5331_v32 = vsel %vm457_vm2, %v14483_v2, 0.0 }
0x137e   :  { %5332 = vadd.xlane.f32.xlu0 %v5331_v32 }
0x1380   :  { %v14488_v4 = vpop.eup %13395 }
0x1381   :  { %v5491_v9 = vsel %vm457_vm2, %v14488_v4, 0.0 }
0x1382   :  { %5492 = vadd.xlane.f32.xlu1 %v5491_v9 }
0x1386   :  { %3945 = vadd.xlane.f32.xlu1 %v3944_v6 }
0x138a   :  { %3948 = vadd.xlane.f32.xlu1 %v3947_v45 }
0x13f6   :  { %v4370_v12 = vpop.xlane.xlu0 %4369 }
0x13f7   :  { %13397 = vrcp.f32 %v4370_v12  ;;  %v4530_v13 = vpop.xlane.xlu1 %4529 }
0x13f8   :  { %13399 = vrcp.f32 %v4530_v13 }
0x13fb   :  { %v4690_v28 = vpop.xlane.xlu0 %4689 }
0x13fc   :  { %13401 = vrcp.f32 %v4690_v28 }
0x13ff   :  { %v4850_v14 = vpop.xlane.xlu1 %4849 }
0x1400   :  { %13403 = vrcp.f32 %v4850_v14 }
0x1401   :  { %v13398_v16 = vpop.eup %13397 }
0x1402   :  { %v4372_v36 = vmul.f32 %v13398_v16, %v13382_v39  ;;  %v13400_v15 = vpop.eup %13399 }
0x1403   :  { %v5013_v17 = vpop.xlane.xlu0 %5012  ;;  %v4532_v50 = vmul.f32 %v13400_v15, %v13384_v41 }
0x1404   :  { %12478 = vmatmul.mubr.msk.f32.vlgmr.msra.gmra.mrb[54].mxu1 %vm457_vm2, %v4372_v36  ;;  %13405 = vrcp.f32 %v5013_v17 }
0x1405   :  { %12486 = vmatpush3.msra.mxu1 %v14450_v29  ;;  %12487 = vmatprep.mubr.msk.f32.mxu1 %vm13578_vm1, %v13577_v20 }
0x1406   :  { %12495 = vmatprep.subr.mxu1 %v13577_v20  ;;  %v13402_v19 = vpop.eup %13401 }
0x1407   :  { %v5173_v22 = vpop.xlane.xlu1 %5172  ;;  %v4692_v23 = vmul.f32 %v13402_v19, %v13386_v48 }
0x1408   :  { %12488 = vmatmul.mubr.msk.f32.vlgmr.msra.gmra.mrb[56].mxu1 %vm457_vm2, %v4532_v50  ;;  %13407 = vrcp.f32 %v5173_v22 }
0x1409   :  { %12496 = vmatpush3.msra.mxu1 %v14450_v29  ;;  %12497 = vmatprep.mubr.msk.f32.mxu1 %vm13578_vm1, %v13577_v20 }
0x140a   :  { %12505 = vmatprep.subr.mxu1 %v13577_v20  ;;  %v13404_v24 = vpop.eup %13403 }
0x140b   :  { %v5333_v25 = vpop.xlane.xlu0 %5332  ;;  %v4852_v27 = vmul.f32 %v13404_v24, %v13388_v56  ;;  %v4001_v56 = vld [vmem:[%s15476_s14 + $0x68] sm:$0xff] }
0x140c   :  { %12498 = vmatmul.mubr.msk.f32.vlgmr.msra.gmra.mrb[58].mxu1 %vm457_vm2, %v4692_v23  ;;  %13409 = vrcp.f32 %v5333_v25  ;;  %v13140_v57 = vpack.c.bf16 %v4001_v56, %v4000_v55 }
0x140d   :  { %12506 = vmatpush3.msra.mxu1 %v14450_v29  ;;  %12507 = vmatprep.mubr.msk.f32.mxu1 %vm13578_vm1, %v13577_v20 }
0x140e   :  { %12515 = vmatprep.subr.mxu1 %v13577_v20  ;;  %v13406_v30 = vpop.eup %13405  ;;  %13141 = vmatprep.subr.bf16.mxu0 %v13140_v57 }
0x140f   :  { %v5493_v31 = vpop.xlane.xlu1 %5492  ;;  %v5015_v40 = vmul.f32 %v13406_v30, %v14472_v62  ;;  %13143 = vmatpush3.bf16.msra.mxu0 %v13140_v57  ;;  %v4013_v62 = vld [vmem:[%s15478_s16 + $0x28] sm:$0xff] }
0x1410   :  { %12508 = vmatmul.mubr.msk.f32.vlgmr.msra.gmra.mrb[60].mxu1 %vm457_vm2, %v4852_v27  ;;  %13411 = vrcp.f32 %v5493_v31  ;;  %v13156_v63 = vpack.c.bf16 %v4013_v62, %v4012_v61 }
0x1411   :  { %12516 = vmatpush3.msra.mxu1 %v14448_v42  ;;  %12517 = vmatprep.mubr.msk.f32.mxu1 %vm13578_vm1, %v13577_v20 }
0x1412   :  { %12525 = vmatprep.subr.mxu1 %v13577_v20  ;;  %v13408_v29 = vpop.eup %13407 }
0x1413   :  { %v3946_v34 = vpop.xlane.xlu1 %3945  ;;  %v5175_v11 = vmul.f32 %v13408_v29, %v14476_v21 }
0x1414   :  { %v3950_v18 = vmul.f32 0.03125, %v3946_v34  ;;  %12518 = vmatmul.mubr.msk.f32.vlgmr.msra.gmra.mrb[62].mxu1 %vm457_vm2, %v5015_v40  ;;  %v11490_v34 = vld [vmem:[%s15525_s10 + $0x3] ss:$0 sm:$0xff] }
0x1415   :  { %12526 = vmatpush3.msra.mxu1 %v14448_v42  ;;  %12527 = vmatprep.mubr.msk.f32.mxu1 %vm13578_vm1, %v13577_v20 }
0x1416   :  { %v14526_v35 = vsub.f32 %v3942_v7, %v3950_v18  ;;  %12535 = vmatprep.subr.mxu1 %v13577_v20  ;;  %v13410_v39 = vpop.eup %13409 }
0x1417   :  { %v3949_v41 = vpop.xlane.xlu1 %3948  ;;  %v5335_v44 = vmul.f32 %v13410_v39, %v14483_v2 }
0x1418   :  { %v3951_v43 = vmul.f32 0.03125, %v3949_v41  ;;  %12528 = vmatmul.mubr.msk.f32.vlgmr.msra.gmra.mrb[64].mxu1 %vm457_vm2, %v5175_v11  ;;  %v3954_v38 = vmul.f32 %v14526_v35, %v14526_v35 }
0x1419   :  { %12536 = vmatpush3.msra.mxu1 %v14448_v42  ;;  %12537 = vmatprep.mubr.msk.f32.mxu1 %vm13578_vm1, %v13577_v20 }
0x141a   :  { %v14537_v46 = vsub.f32 %v14496_v10, %v3951_v43  ;;  %12545 = vmatprep.subr.mxu1 %v13577_v20  ;;  %v3956_v47 = vsel %vm128_vm0, %v3954_v38, 0.0  ;;  %v13412_v48 = vpop.eup %13411  ;;  %v11491_v43 = vld [vmem:[%s15526_s2 + $0x3] ss:$0 sm:$0xff] }
0x141b   :  { %3957 = vadd.xlane.f32.xlu1 %v3956_v47  ;;  %v5495_v53 = vmul.f32 %v13412_v48, %v14488_v4 }
0x141c   :  { %12538 = vmatmul.mubr.msk.f32.vlgmr.msra.gmra.mrb[66].mxu1 %vm457_vm2, %v5335_v44  ;;  %v3955_v51 = vmul.f32 %v14537_v46, %v14537_v46 }
0x141d   :  { %12546 = vmatpush3.msra.mxu1 %v14448_v42  ;;  %12547 = vmatprep.mubr.msk.f32.mxu1 %vm13578_vm1, %v13577_v20  ;;  %v4002_v42 = vld [vmem:[%s15476_s14 + $0x70] sm:$0xff] }
0x141e   :  { %v3959_v54 = vsel %vm128_vm0, %v3955_v51, 0.0  ;;  %v13144_v60 = vpack.c.bf16 %v4003_v59, %v4002_v42  ;;  %v11533_v59 = vld [vmem:[%s15479_s17 + $0x1] ss:$0 sm:$0xff] }
0x141f   :  { %3960 = vadd.xlane.f32.xlu1 %v3959_v54 }
0x1420   :  { %12548 = vmatmul.mubr.msk.f32.vlgmr.msra.gmra.mrb[68].mxu1 %vm457_vm2, %v5495_v53  ;;  %13145 = vmatprep.subr.bf16.mxu0 %v13144_v60 }
0x1421   :  { %13147 = vmatpush3.bf16.msra.mxu0 %v13144_v60 }
0x1422   :  { %13157 = vmatprep.subr.bf16.mxu0 %v13156_v63 }
0x14a8   :  { %v3958_v49 = vpop.xlane.xlu1 %3957 }
0x14a9   :  { %v3962_v1 = vmul.f32 0.03125, %v3958_v49 }
0x14ab   :  { %v3964_v5 = vadd.f32 1e-05, %v3962_v1 }
0x14ac   :  { %v3961_v9 = vpop.xlane.xlu1 %3960 }
0x14ad   :  { %v3963_v12 = vmul.f32 0.03125, %v3961_v9  ;;  %13413 = vrsqrt.f32 %v3964_v5 }
0x14af   :  { %v3965_v36 = vadd.f32 1e-05, %v3963_v12  ;;  %v4011_v12 = vld [vmem:[%s15478_s16 + $0x18] sm:$0xff] }
0x14b1   :  { %13415 = vrsqrt.f32 %v3965_v36 }
0x14b7   :  { %v13414_v22 = vpop.eup %13413 }
0x14b8   :  { %v3968_v31 = vmul.f32 %v13414_v22, %v14526_v35 }
0x14ba   :  { %v3976_v41 = vmul.f32 %v11490_v34, %v3968_v31 }
0x14bb   :  { %v13416_v11 = vpop.eup %13415 }
0x14bc   :  { %v3969_v38 = vmul.f32 %v13416_v11, %v14537_v46  ;;  %v14591_v48 = vadd.f32 %v11491_v43, %v3976_v41  ;;  %v11525_v46 = vld [vmem:[%s15477_s15 + $0x3] ss:$0 sm:$0xff] }
0x14be   :  { %v3977_v51 = vmul.f32 %v11490_v34, %v3969_v38  ;;  %v4018_v34 = vld [vmem:[%s15478_s16 + $0x50] sm:$0xff]  ;;  %v14673_v38 = vld [vmem:[%s15522_s29] ss:$0 sm:$0xff] }
0x14d7   :  { %v4442_v21 = vpop.f32.mrb[54].mxu1 }
0x14d8   :  { %v12479_v0 = vpop.f32.mrb[55].mxu1  ;;  %v4446_v3 = vmul.f32 %v14235_v8, %v4442_v21 }
0x14db   :  { %v4602_v2 = vpop.f32.mrb[56].mxu1 }
0x14dc   :  { %v4606_v32 = vmul.f32 %v14241_v26, %v4602_v2  ;;  %v12489_v4 = vpop.f32.mrb[57].mxu1 }
0x14de   :  { %v4607_v7 = vadd.f32 %v4606_v32, %v4446_v3 }
0x14df   :  { %v4762_v6 = vpop.f32.mrb[58].mxu1 }
0x14e0   :  { %v4766_v10 = vmul.f32 %v14247_v33, %v4762_v6  ;;  %v12499_v45 = vpop.f32.mrb[59].mxu1  ;;  %v4009_v6 = vld [vmem:[%s15478_s16 + $0x8] sm:$0xff] }
0x14e1   :  { %v4010_v45 = vld [vmem:[%s15478_s16 + $0x10] sm:$0xff] }
0x14e2   :  { %v4767_v13 = vadd.f32 %v4766_v10, %v4607_v7  ;;  %v4008_v7 = vld [vmem:[%s15478_s16] sm:$0xff] }
0x14e3   :  { %v4922_v28 = vpop.f32.mrb[60].mxu1  ;;  %v13148_v10 = vpack.c.bf16 %v4009_v6, %v4008_v7 }
0x14e4   :  { %v4926_v14 = vmul.f32 %v14253_v37, %v4922_v28  ;;  %v12509_v16 = vpop.f32.mrb[61].mxu1  ;;  %v4016_v28 = vld [vmem:[%s15478_s16 + $0x40] sm:$0xff] }
0x14e5   :  { %13149 = vmatprep.subr.bf16.mxu1 %v13148_v10 }
0x14e6   :  { %v4927_v15 = vadd.f32 %v4926_v14, %v4767_v13  ;;  %13151 = vmatpush3.bf16.msra.mxu1 %v13148_v10  ;;  %v13152_v13 = vpack.c.bf16 %v4011_v12, %v4010_v45  ;;  %v4017_v14 = vld [vmem:[%s15478_s16 + $0x48] sm:$0xff] }
0x14e7   :  { %v5085_v17 = vpop.f32.mrb[62].mxu1  ;;  %v13164_v16 = vpack.c.bf16 %v4017_v14, %v4016_v28  ;;  %v95_v14 = vld [vmem:[%s15530_s0 + $0x8] sm:$0xff] }
0x14e8   :  { %v12519_v50 = vpop.f32.mrb[63].mxu1  ;;  %12558 = vmatprep.mubr.msk.f32.mxu0 %vm128_vm0, %v4927_v15  ;;  %v5089_v23 = vmul.f32 %v14235_v8, %v5085_v17  ;;  %v4014_v8 = vld [vmem:[%s15478_s16 + $0x30] sm:$0xff]  ;;  %13153 = vmatprep.subr.bf16.mxu1 %v13152_v13 }
0x14ea   :  { %13155 = vmatpush3.bf16.msra.mxu1 %v13152_v13 }
0x14eb   :  { %v5245_v19 = vpop.f32.mrb[64].mxu1  ;;  %13165 = vmatprep.subr.bf16.mxu1 %v13164_v16 }
0x14ec   :  { %v5249_v24 = vmul.f32 %v14241_v26, %v5245_v19  ;;  %v12529_v25 = vpop.f32.mrb[65].mxu1  ;;  %v4015_v26 = vld [vmem:[%s15478_s16 + $0x38] sm:$0xff] }
0x14ed   :  { %v13160_v47 = vpack.c.bf16 %v4015_v26, %v4014_v8  ;;  %v11530_v8 = vld [vmem:[%s15479_s17] ss:$0 sm:$0xff] }
0x14ee   :  { %v5250_v27 = vadd.f32 %v5249_v24, %v5089_v23  ;;  %v11528_v24 = vld [vmem:[%s15480_s18] ss:$0 sm:$0xff] }
0x14ef   :  { %v5405_v30 = vpop.f32.mrb[66].mxu1 }
0x14f0   :  { %v5409_v40 = vmul.f32 %v14247_v33, %v5405_v30  ;;  %v12539_v29 = vpop.f32.mrb[67].mxu1 }
0x14f2   :  { %v5410_v18 = vadd.f32 %v5409_v40, %v5250_v27  ;;  %v11529_v27 = vld [vmem:[%s15481_s19] ss:$0 sm:$0xff] }
0x14f3   :  { %v5565_v39 = vpop.f32.mrb[68].mxu1 }
0x14f4   :  { %v5569_v35 = vmul.f32 %v14253_v37, %v5565_v39  ;;  %v12549_v33 = vpop.f32.mrb[69].mxu1  ;;  %v14596_v37 = vadd.f32 %v11491_v43, %v3977_v51 }
0x14f6   :  { %v5570_v44 = vadd.f32 %v5569_v35, %v5410_v18  ;;  %v4019_v18 = vld [vmem:[%s15478_s16 + $0x58] sm:$0xff] }
0x14f7   :  { %v13168_v41 = vpack.c.bf16 %v4019_v18, %v4018_v34 }
0x14f8   :  { %12559 = vmatmul.mubr.msk.f32.vlgmr.msra.gmra.mrb[56].mxu0 %vm128_vm0, %v5570_v44 }
0x14f9   :  { %13159 = vmatpush3.bf16.msra.mxu0 %v13156_v63  ;;  %12580 = vmatprep.mubr.msk.f32.mxu0 %vm128_vm0, %v14591_v48 }
0x14fa   :  { %13161 = vmatprep.subr.bf16.mxu0 %v13160_v47 }
0x14fd   :  { %13163 = vmatpush3.bf16.msra.mxu0 %v13160_v47  ;;  %v11536_v47 = vld [vmem:[%s15479_s17 + $0x2] ss:$0 sm:$0xff] }
0x14fe   :  { %12594 = vmatprep.subr.mxu0 %v13577_v20 }
0x1500   :  { %12581 = vmatmul.mubr.msk.f32.vlgmr.msra.gmra.mrb[58].mxu0 %vm128_vm0, %v14596_v37 }
0x1501   :  { %12596 = vmatprep.mubr.msk.f32.mxu0 %vm13578_vm1, %v13577_v20 }
0x15cb   :  { %v12560_v53 = vpop.f32.mrb[56].mxu0 }
0x15cc   :  { %v5649_v54 = vpop.f32.mrb[57].mxu0  ;;  %v5655_v55 = vadd.f32 %v12560_v53, %v11525_v46 }
0x15cd   :  { %v5650_v56 = vadd.f32 %v11525_v46, %v5649_v54  ;;  %v14689_v54 = vld [vmem:[%s15522_s29 + $0x1] ss:$0 sm:$0xff] }
0x15ce   :  { %v5659_v60 = vadd.f32 %v5655_v55, %v14349_v58 }
0x15cf   :  { %v5658_v57 = vadd.f32 %v5650_v56, %v14326_v52 }
0x15d0   :  { %v5663_v21 = vsel %vm128_vm0, %v5659_v60, 0.0 }
0x15d1   :  { %v5660_v42 = vsel %vm128_vm0, %v5658_v57, 0.0 }
0x15d2   :  { %5661 = vadd.xlane.f32.xlu0 %v5660_v42  ;;  %v14704_v42 = vld [vmem:[%s15522_s29 + $0x2] ss:$0 sm:$0xff] }
0x15d3   :  { %v12582_v61 = vpop.f32.mrb[58].mxu0 }
0x15d4   :  { %v14612_v62 = vadd.f32 %v12582_v61, %v11533_v59  ;;  %v5869_v63 = vpop.f32.mrb[59].mxu0  ;;  %v14717_v61 = vld [vmem:[%s15522_s29 + $0x3] ss:$0 sm:$0xff] }
0x15d5   :  { %v14614_v49 = vadd.f32 %v11533_v59, %v5869_v63 }
0x15d6   :  { %5664 = vadd.xlane.f32.xlu0 %v5663_v21 }
0x15d7   :  { %12595 = vmatpush3.xpose.msk.msra.mxu0 %vm128_vm0, %v14614_v49 }
0x15d8   :  { %12604 = vmatprep.subr.mxu0 %v13577_v20 }
0x165f   :  { %v5662_v52 = vpop.xlane.xlu0 %5661 }
0x1660   :  { %v5666_v0 = vmul.f32 0.03125, %v5662_v52 }
0x1662   :  { %v5668_v1 = vsub.f32 %v5658_v57, %v5666_v0 }
0x1663   :  { %v5665_v2 = vpop.xlane.xlu0 %5664 }
0x1664   :  { %v5667_v58 = vmul.f32 0.03125, %v5665_v2  ;;  %v5670_v3 = vmul.f32 %v5668_v1, %v5668_v1 }
0x1666   :  { %v5669_v32 = vsub.f32 %v5659_v60, %v5667_v58  ;;  %v5672_v4 = vsel %vm128_vm0, %v5670_v3, 0.0 }
0x1667   :  { %5673 = vadd.xlane.f32.xlu0 %v5672_v4 }
0x1668   :  { %v5671_v5 = vmul.f32 %v5669_v32, %v5669_v32 }
0x166a   :  { %v5675_v9 = vsel %vm128_vm0, %v5671_v5, 0.0 }
0x166b   :  { %5676 = vadd.xlane.f32.xlu0 %v5675_v9 }
0x16f4   :  { %v5674_v36 = vpop.xlane.xlu0 %5673 }
0x16f5   :  { %v5678_v15 = vmul.f32 0.03125, %v5674_v36 }
0x16f7   :  { %v5680_v17 = vadd.f32 1e-05, %v5678_v15 }
0x16f8   :  { %v5677_v50 = vpop.xlane.xlu0 %5676 }
0x16f9   :  { %13417 = vrsqrt.f32 %v5680_v17  ;;  %v5679_v19 = vmul.f32 0.03125, %v5677_v50 }
0x16fb   :  { %v5681_v22 = vadd.f32 1e-05, %v5679_v19 }
0x16fd   :  { %13419 = vrsqrt.f32 %v5681_v22 }
0x1703   :  { %v13418_v23 = vpop.eup %13417 }
0x1704   :  { %v5684_v25 = vmul.f32 %v13418_v23, %v5668_v1  ;;  %v94_v1 = vld [vmem:[%s15530_s0] sm:$0xff] }
0x1706   :  { %v5692_v30 = vmul.f32 %v11528_v24, %v5684_v25 }
0x1707   :  { %v13420_v31 = vpop.eup %13419 }
0x1708   :  { %v5685_v40 = vmul.f32 %v13420_v31, %v5669_v32  ;;  %v14646_v29 = vadd.f32 %v11529_v27, %v5692_v30 }
0x170a   :  { %v5693_v11 = vmul.f32 %v11528_v24, %v5685_v40  ;;  %12569 = vmatprep.mubr.msk.f32.mxu1 %vm128_vm0, %v14646_v29 }
0x170c   :  { %v14656_v39 = vadd.f32 %v11529_v27, %v5693_v11 }
0x170e   :  { %12570 = vmatmul.mubr.msk.f32.vlgmr.msra.gmra.mrb[70].mxu1 %vm128_vm0, %v14656_v39 }
0x170f   :  { %13167 = vmatpush3.bf16.msra.mxu1 %v13164_v16  ;;  %12591 = vmatprep.mubr.msk.f32.mxu1 %vm128_vm0, %v14591_v48 }
0x1710   :  { %13169 = vmatprep.subr.bf16.mxu1 %v13168_v41 }
0x1713   :  { %13171 = vmatpush3.bf16.msra.mxu1 %v13168_v41 }
0x1714   :  { %12599 = vmatprep.subr.mxu1 %v13577_v20 }
0x1716   :  { %12592 = vmatmul.mubr.msk.f32.vlgmr.msra.gmra.mrb[72].mxu1 %vm128_vm0, %v14596_v37 }
0x1717   :  { %12601 = vmatprep.mubr.msk.f32.mxu1 %vm13578_vm1, %v13577_v20 }
0x17e1   :  { %v12571_v26 = vpop.f32.mrb[70].mxu1 }
0x17e2   :  { %v5780_v35 = vpop.f32.mrb[71].mxu1  ;;  %v5786_v57 = vadd.f32 %v12571_v26, %v11530_v8 }
0x17e3   :  { %v5781_v33 = vadd.f32 %v11530_v8, %v5780_v35 }
0x17e4   :  { %v5790_v60 = vmul.f32 0.35355338, %v5786_v57 }
0x17e5   :  { %v5789_v43 = vmul.f32 0.35355338, %v5781_v33 }
0x17e6   :  { %v6765_v21 = vmul.f32 %v14689_v54, %v5790_v60  ;;  %v6925_v52 = vmul.f32 %v14704_v42, %v5790_v60  ;;  %v7085_v0 = vmul.f32 %v14717_v61, %v5790_v60 }
0x17e7   :  { %v5959_v44 = vmul.f32 %v14673_v38, %v5789_v43  ;;  %v6122_v55 = vmul.f32 %v14689_v54, %v5789_v43  ;;  %v6282_v59 = vmul.f32 %v14704_v42, %v5789_v43  ;;  %v6442_v63 = vmul.f32 %v14717_v61, %v5789_v43 }
0x17e9   :  { %v12593_v51 = vpop.f32.mrb[72].mxu1  ;;  %12597 = vmatmul.mubr.msk.f32.vlgmr.msra.gmra.mrb[60].mxu0 %vm128_vm0, %v5959_v44 }
0x17ea   :  { %v14680_v46 = vadd.f32 %v12593_v51, %v11536_v47  ;;  %v5950_v53 = vpop.f32.mrb[73].mxu1  ;;  %12605 = vmatpush3.xpose.msk.msra.mxu0 %vm128_vm0, %v14614_v49  ;;  %12606 = vmatprep.mubr.msk.f32.mxu0 %vm13578_vm1, %v13577_v20 }
0x17eb   :  { %v14692_v56 = vadd.f32 %v11536_v47, %v5950_v53  ;;  %12614 = vmatprep.subr.mxu0 %v13577_v20 }
0x17ed   :  { %12600 = vmatpush3.msra.mxu1 %v14692_v56  ;;  %12607 = vmatmul.mubr.msk.f32.vlgmr.msra.gmra.mrb[62].mxu0 %vm128_vm0, %v6122_v55 }
0x17ee   :  { %12615 = vmatpush3.xpose.msk.msra.mxu0 %vm128_vm0, %v14614_v49  ;;  %12616 = vmatprep.mubr.msk.f32.mxu0 %vm13578_vm1, %v13577_v20 }
0x17ef   :  { %12624 = vmatprep.subr.mxu0 %v13577_v20  ;;  %12609 = vmatprep.subr.mxu1 %v13577_v20 }
0x17f1   :  { %12617 = vmatmul.mubr.msk.f32.vlgmr.msra.gmra.mrb[64].mxu0 %vm128_vm0, %v6282_v59 }
0x17f2   :  { %12625 = vmatpush3.xpose.msk.msra.mxu0 %vm128_vm0, %v14614_v49  ;;  %12626 = vmatprep.mubr.msk.f32.mxu0 %vm13578_vm1, %v13577_v20  ;;  %v6602_v49 = vmul.f32 %v14673_v38, %v5790_v60 }
0x17f3   :  { %12634 = vmatprep.subr.mxu0 %v13577_v20 }
0x17f5   :  { %12627 = vmatmul.mubr.msk.f32.vlgmr.msra.gmra.mrb[66].mxu0 %vm128_vm0, %v6442_v63 }
0x17f6   :  { %12635 = vmatpush3.xpose.msk.msra.mxu0 %vm128_vm0, %v14612_v62  ;;  %12636 = vmatprep.mubr.msk.f32.mxu0 %vm13578_vm1, %v13577_v20 }
0x17f7   :  { %12644 = vmatprep.subr.mxu0 %v13577_v20 }
0x17f9   :  { %12637 = vmatmul.mubr.msk.f32.vlgmr.msra.gmra.mrb[68].mxu0 %vm128_vm0, %v6602_v49 }
0x17fa   :  { %12645 = vmatpush3.xpose.msk.msra.mxu0 %vm128_vm0, %v14612_v62  ;;  %12646 = vmatprep.mubr.msk.f32.mxu0 %vm13578_vm1, %v13577_v20 }
0x17fb   :  { %12654 = vmatprep.subr.mxu0 %v13577_v20 }
0x17fd   :  { %12647 = vmatmul.mubr.msk.f32.vlgmr.msra.gmra.mrb[70].mxu0 %vm128_vm0, %v6765_v21 }
0x17fe   :  { %12655 = vmatpush3.xpose.msk.msra.mxu0 %vm128_vm0, %v14612_v62  ;;  %12656 = vmatprep.mubr.msk.f32.mxu0 %vm13578_vm1, %v13577_v20 }
0x17ff   :  { %12664 = vmatprep.subr.mxu0 %v13577_v20 }
0x1801   :  { %12657 = vmatmul.mubr.msk.f32.vlgmr.msra.gmra.mrb[72].mxu0 %vm128_vm0, %v6925_v52 }
0x1802   :  { %12665 = vmatpush3.xpose.msk.msra.mxu0 %vm128_vm0, %v14612_v62  ;;  %12666 = vmatprep.mubr.msk.f32.mxu0 %vm13578_vm1, %v13577_v20 }
0x1805   :  { %12667 = vmatmul.mubr.msk.f32.vlgmr.msra.gmra.mrb[74].mxu0 %vm128_vm0, %v7085_v0 }
0x18bc   :  { %v6032_v2 = vpop.f32.mrb[60].mxu0 }
0x18bd   :  { %v6033_v58 = vadd.f32 %v6032_v2, %v94_v1  ;;  %v12598_v3 = vpop.f32.mrb[61].mxu0 }
0x18bf   :  { %v6036_v32 = vsel %vm457_vm2, %v6033_v58, -inf }
0x18c0   :  { %6037 = vmax.xlane.f32.xlu0 %v6036_v32  ;;  %v6192_v4 = vpop.f32.mrb[62].mxu0 }
0x18c1   :  { %v6193_v5 = vadd.f32 %v6192_v4, %v94_v1  ;;  %v12608_v62 = vpop.f32.mrb[63].mxu0 }
0x18c3   :  { %v6196_v9 = vsel %vm457_vm2, %v6193_v5, -inf }
0x18c4   :  { %6197 = vmax.xlane.f32.xlu1 %v6196_v9  ;;  %v6352_v7 = vpop.f32.mrb[64].mxu0 }
0x18c5   :  { %v6353_v6 = vadd.f32 %v6352_v7, %v94_v1  ;;  %v12618_v10 = vpop.f32.mrb[65].mxu0 }
0x18c7   :  { %v6356_v45 = vsel %vm457_vm2, %v6353_v6, -inf }
0x18c8   :  { %6357 = vmax.xlane.f32.xlu0 %v6356_v45  ;;  %v6512_v12 = vpop.f32.mrb[66].mxu0 }
0x18c9   :  { %v6513_v13 = vadd.f32 %v6512_v12, %v94_v1  ;;  %v12628_v28 = vpop.f32.mrb[67].mxu0 }
0x18cb   :  { %v6516_v16 = vsel %vm457_vm2, %v6513_v13, -inf }
0x18cc   :  { %6517 = vmax.xlane.f32.xlu1 %v6516_v16  ;;  %v6675_v36 = vpop.f32.mrb[68].mxu0 }
0x18cd   :  { %v6676_v15 = vadd.f32 %v6675_v36, %v95_v14  ;;  %v12638_v17 = vpop.f32.mrb[69].mxu0 }
0x18cf   :  { %v6679_v50 = vsel %vm457_vm2, %v6676_v15, -inf }
0x18d0   :  { %6680 = vmax.xlane.f32.xlu0 %v6679_v50  ;;  %v6835_v19 = vpop.f32.mrb[70].mxu0 }
0x18d1   :  { %v6836_v22 = vadd.f32 %v6835_v19, %v95_v14  ;;  %v12648_v23 = vpop.f32.mrb[71].mxu0 }
0x18d3   :  { %v6839_v24 = vsel %vm457_vm2, %v6836_v22, -inf }
0x18d4   :  { %6840 = vmax.xlane.f32.xlu1 %v6839_v24  ;;  %v6995_v25 = vpop.f32.mrb[72].mxu0 }
0x18d5   :  { %v6996_v27 = vadd.f32 %v6995_v25, %v95_v14  ;;  %v12658_v30 = vpop.f32.mrb[73].mxu0 }
0x18d7   :  { %v6999_v31 = vsel %vm457_vm2, %v6996_v27, -inf }
0x18d8   :  { %7000 = vmax.xlane.f32.xlu0 %v6999_v31  ;;  %v7155_v40 = vpop.f32.mrb[74].mxu0 }
0x18d9   :  { %v7156_v34 = vadd.f32 %v7155_v40, %v95_v14  ;;  %v12668_v18 = vpop.f32.mrb[75].mxu0 }
0x18db   :  { %v7159_v11 = vsel %vm457_vm2, %v7156_v34, -inf }
0x18dc   :  { %7160 = vmax.xlane.f32.xlu1 %v7159_v11 }
0x194d   :  { %v6038_v41 = vpop.xlane.xlu0 %6037 }
0x194e   :  { %v6039_v8 = vsub.f32 %v6033_v58, %v6038_v41 }
0x1950   :  { %v6040_v26 = vmul.f32 1.442695, %v6039_v8 }
0x1951   :  { %v6198_v35 = vpop.xlane.xlu1 %6197 }
0x1952   :  { %13421 = vpow2.f32 %v6040_v26  ;;  %v6199_v33 = vsub.f32 %v6193_v5, %v6198_v35 }
0x1954   :  { %v6200_v43 = vmul.f32 1.442695, %v6199_v33 }
0x1955   :  { %v6358_v44 = vpop.xlane.xlu0 %6357 }
0x1956   :  { %13423 = vpow2.f32 %v6200_v43  ;;  %v6359_v47 = vsub.f32 %v6353_v6, %v6358_v44 }
0x1958   :  { %v6360_v51 = vmul.f32 1.442695, %v6359_v47 }
0x1959   :  { %v6518_v53 = vpop.xlane.xlu1 %6517 }
0x195a   :  { %13425 = vpow2.f32 %v6360_v51  ;;  %v6519_v55 = vsub.f32 %v6513_v13, %v6518_v53 }
0x195c   :  { %v13422_v57 = vpop.eup %13421  ;;  %v6520_v59 = vmul.f32 1.442695, %v6519_v55  ;;  %v4020_v55 = vld [vmem:[%s15478_s16 + $0x60] sm:$0xff] }
0x195d   :  { %v6681_v60 = vpop.xlane.xlu0 %6680  ;;  %v6042_v63 = vsel %vm457_vm2, %v13422_v57, 0.0 }
0x195e   :  { %13427 = vpow2.f32 %v6520_v59  ;;  %v6682_v49 = vsub.f32 %v6676_v15, %v6681_v60  ;;  %6043 = vadd.xlane.f32.xlu0 %v6042_v63  ;;  %v4023_v60 = vld [vmem:[%s15478_s16 + $0x78] sm:$0xff] }
0x1960   :  { %v13424_v21 = vpop.eup %13423  ;;  %v6683_v52 = vmul.f32 1.442695, %v6682_v49 }
0x1961   :  { %v6841_v0 = vpop.xlane.xlu1 %6840  ;;  %v6202_v1 = vsel %vm457_vm2, %v13424_v21, 0.0 }
0x1962   :  { %13429 = vpow2.f32 %v6683_v52  ;;  %v6842_v2 = vsub.f32 %v6836_v22, %v6841_v0  ;;  %6203 = vadd.xlane.f32.xlu1 %v6202_v1 }
0x1964   :  { %v13426_v58 = vpop.eup %13425  ;;  %v6843_v3 = vmul.f32 1.442695, %v6842_v2 }
0x1965   :  { %v7001_v32 = vpop.xlane.xlu0 %7000  ;;  %v6362_v4 = vsel %vm457_vm2, %v13426_v58, 0.0 }
0x1966   :  { %13431 = vpow2.f32 %v6843_v3  ;;  %v7002_v5 = vsub.f32 %v6996_v27, %v7001_v32  ;;  %6363 = vadd.xlane.f32.xlu0 %v6362_v4 }
0x1968   :  { %v13428_v62 = vpop.eup %13427  ;;  %v7003_v9 = vmul.f32 1.442695, %v7002_v5 }
0x1969   :  { %v7161_v7 = vpop.xlane.xlu1 %7160  ;;  %v6522_v6 = vsel %vm457_vm2, %v13428_v62, 0.0 }
0x196a   :  { %13433 = vpow2.f32 %v7003_v9  ;;  %v7162_v10 = vsub.f32 %v7156_v34, %v7161_v7  ;;  %6523 = vadd.xlane.f32.xlu1 %v6522_v6 }
0x196c   :  { %v13430_v45 = vpop.eup %13429  ;;  %v7163_v12 = vmul.f32 1.442695, %v7162_v10 }
0x196d   :  { %v6685_v13 = vsel %vm457_vm2, %v13430_v45, 0.0 }
0x196e   :  { %13435 = vpow2.f32 %v7163_v12  ;;  %6686 = vadd.xlane.f32.xlu0 %v6685_v13 }
0x1970   :  { %v13432_v28 = vpop.eup %13431 }
0x1971   :  { %v6845_v14 = vsel %vm457_vm2, %v13432_v28, 0.0 }
0x1972   :  { %6846 = vadd.xlane.f32.xlu1 %v6845_v14 }
0x1974   :  { %v13434_v16 = vpop.eup %13433 }
0x1975   :  { %v7005_v36 = vsel %vm457_vm2, %v13434_v16, 0.0 }
0x1976   :  { %7006 = vadd.xlane.f32.xlu0 %v7005_v36 }
0x1978   :  { %v13436_v15 = vpop.eup %13435 }
0x1979   :  { %v7165_v17 = vsel %vm457_vm2, %v13436_v15, 0.0 }
0x197a   :  { %7166 = vadd.xlane.f32.xlu1 %v7165_v17 }
0x19eb   :  { %v6044_v50 = vpop.xlane.xlu0 %6043 }
0x19ec   :  { %13437 = vrcp.f32 %v6044_v50 }
0x19ef   :  { %v6204_v19 = vpop.xlane.xlu1 %6203 }
0x19f0   :  { %13439 = vrcp.f32 %v6204_v19 }
0x19f3   :  { %v6364_v22 = vpop.xlane.xlu0 %6363 }
0x19f4   :  { %13441 = vrcp.f32 %v6364_v22 }
0x19f6   :  { %v13438_v23 = vpop.eup %13437 }
0x19f7   :  { %v6046_v24 = vmul.f32 %v13438_v23, %v13422_v57  ;;  %v6524_v25 = vpop.xlane.xlu1 %6523  ;;  %v4021_v57 = vld [vmem:[%s15478_s16 + $0x68] sm:$0xff] }
0x19f8   :  { %13443 = vrcp.f32 %v6524_v25  ;;  %v13172_v59 = vpack.c.bf16 %v4021_v57, %v4020_v55  ;;  %v11563_v25 = vld [vmem:[%s15479_s17 + $0x3] ss:$0 sm:$0xff]  ;;  %v7378_v57 = vld [vmem:[%s15482_s20 + $0x10] sm:$0xff] }
0x19f9   :  { %12602 = vmatmul.mubr.msk.f32.vlgmr.msra.gmra.mrb[74].mxu1 %vm457_vm2, %v6046_v24 }
0x19fa   :  { %v13440_v27 = vpop.eup %13439  ;;  %12610 = vmatpush3.msra.mxu1 %v14692_v56  ;;  %12611 = vmatprep.mubr.msk.f32.mxu1 %vm13578_vm1, %v13577_v20 }
0x19fb   :  { %v6206_v30 = vmul.f32 %v13440_v27, %v13424_v21  ;;  %v6687_v31 = vpop.xlane.xlu0 %6686  ;;  %12619 = vmatprep.subr.mxu1 %v13577_v20  ;;  %13173 = vmatprep.subr.bf16.mxu0 %v13172_v59 }
0x19fc   :  { %13445 = vrcp.f32 %v6687_v31  ;;  %13175 = vmatpush3.bf16.msra.mxu0 %v13172_v59  ;;  %v7379_v59 = vld [vmem:[%s15482_s20 + $0x18] sm:$0xff] }
0x19fd   :  { %12612 = vmatmul.mubr.msk.f32.vlgmr.msra.gmra.mrb[76].mxu1 %vm457_vm2, %v6206_v30 }
0x19fe   :  { %v13442_v40 = vpop.eup %13441  ;;  %12620 = vmatpush3.msra.mxu1 %v14692_v56  ;;  %12621 = vmatprep.mubr.msk.f32.mxu1 %vm13578_vm1, %v13577_v20 }
0x19ff   :  { %v6366_v34 = vmul.f32 %v13442_v40, %v13426_v58  ;;  %v6847_v18 = vpop.xlane.xlu1 %6846  ;;  %12629 = vmatprep.subr.mxu1 %v13577_v20 }
0x1a00   :  { %13447 = vrcp.f32 %v6847_v18 }
0x1a01   :  { %12622 = vmatmul.mubr.msk.f32.vlgmr.msra.gmra.mrb[78].mxu1 %vm457_vm2, %v6366_v34 }
0x1a02   :  { %v13444_v11 = vpop.eup %13443  ;;  %12630 = vmatpush3.msra.mxu1 %v14692_v56  ;;  %12631 = vmatprep.mubr.msk.f32.mxu1 %vm13578_vm1, %v13577_v20 }
0x1a03   :  { %v6526_v41 = vmul.f32 %v13444_v11, %v13428_v62  ;;  %v7007_v8 = vpop.xlane.xlu0 %7006  ;;  %12639 = vmatprep.subr.mxu1 %v13577_v20 }
0x1a04   :  { %13449 = vrcp.f32 %v7007_v8 }
0x1a05   :  { %12632 = vmatmul.mubr.msk.f32.vlgmr.msra.gmra.mrb[80].mxu1 %vm457_vm2, %v6526_v41 }
0x1a06   :  { %v13446_v26 = vpop.eup %13445  ;;  %12640 = vmatpush3.msra.mxu1 %v14680_v46  ;;  %12641 = vmatprep.mubr.msk.f32.mxu1 %vm13578_vm1, %v13577_v20 }
0x1a07   :  { %v6689_v35 = vmul.f32 %v13446_v26, %v13430_v45  ;;  %v7167_v33 = vpop.xlane.xlu1 %7166  ;;  %12649 = vmatprep.subr.mxu1 %v13577_v20 }
0x1a08   :  { %13451 = vrcp.f32 %v7167_v33 }
0x1a09   :  { %12642 = vmatmul.mubr.msk.f32.vlgmr.msra.gmra.mrb[82].mxu1 %vm457_vm2, %v6689_v35 }
0x1a0a   :  { %v13448_v56 = vpop.eup %13447  ;;  %12650 = vmatpush3.msra.mxu1 %v14680_v46  ;;  %12651 = vmatprep.mubr.msk.f32.mxu1 %vm13578_vm1, %v13577_v20 }
0x1a0b   :  { %v6849_v43 = vmul.f32 %v13448_v56, %v13432_v28  ;;  %12659 = vmatprep.subr.mxu1 %v13577_v20 }
0x1a0d   :  { %12652 = vmatmul.mubr.msk.f32.vlgmr.msra.gmra.mrb[84].mxu1 %vm457_vm2, %v6849_v43 }
0x1a0e   :  { %v13450_v44 = vpop.eup %13449  ;;  %12660 = vmatpush3.msra.mxu1 %v14680_v46  ;;  %12661 = vmatprep.mubr.msk.f32.mxu1 %vm13578_vm1, %v13577_v20 }
0x1a0f   :  { %v7009_v47 = vmul.f32 %v13450_v44, %v13434_v16  ;;  %12669 = vmatprep.subr.mxu1 %v13577_v20 }
0x1a11   :  { %12662 = vmatmul.mubr.msk.f32.vlgmr.msra.gmra.mrb[86].mxu1 %vm457_vm2, %v7009_v47 }
0x1a12   :  { %v13452_v51 = vpop.eup %13451  ;;  %12670 = vmatpush3.msra.mxu1 %v14680_v46  ;;  %12671 = vmatprep.mubr.msk.f32.mxu1 %vm13578_vm1, %v13577_v20  ;;  %v4022_v46 = vld [vmem:[%s15478_s16 + $0x70] sm:$0xff] }
0x1a13   :  { %v7169_v53 = vmul.f32 %v13452_v51, %v13436_v15  ;;  %v13176_v63 = vpack.c.bf16 %v4023_v60, %v4022_v46  ;;  %v13184_v46 = vpack.c.bf16 %v7379_v59, %v7378_v57  ;;  %v7470_v60 = vld [vmem:[%s15484_s22] sm:$0xff]  ;;  %v11577_v59 = vld [vmem:[%s15476_s14 + $0x88] sm:$0xff] }
0x1a14   :  { %v11576_v57 = vld [vmem:[%s15476_s14 + $0x80] sm:$0xff] }
0x1a15   :  { %12672 = vmatmul.mubr.msk.f32.vlgmr.msra.gmra.mrb[88].mxu1 %vm457_vm2, %v7169_v53  ;;  %13177 = vmatprep.subr.bf16.mxu0 %v13176_v63  ;;  %v7377_v53 = vld [vmem:[%s15482_s20 + $0x8] sm:$0xff] }
0x1a16   :  { %13179 = vmatpush3.bf16.msra.mxu0 %v13176_v63  ;;  %v7471_v63 = vld [vmem:[%s15484_s22 + $0x8] sm:$0xff] }
0x1acc   :  { %v6116_v49 = vpop.f32.mrb[74].mxu1 }
0x1acd   :  { %v12603_v21 = vpop.f32.mrb[75].mxu1  ;;  %v6120_v0 = vmul.f32 %v14673_v38, %v6116_v49  ;;  %v7472_v49 = vld [vmem:[%s15484_s22 + $0x10] sm:$0xff] }
0x1ace   :  { %v13188_v21 = vpack.c.bf16 %v7471_v63, %v7470_v60  ;;  %v11584_v60 = vld [vmem:[%s15476_s14 + $0xc0] sm:$0xff]  ;;  %v11585_v63 = vld [vmem:[%s15476_s14 + $0xc8] sm:$0xff] }
0x1ad0   :  { %v6276_v52 = vpop.f32.mrb[76].mxu1  ;;  %13189 = vmatprep.subr.bf16.mxu0 %v13188_v21 }
0x1ad1   :  { %v6280_v1 = vmul.f32 %v14689_v54, %v6276_v52  ;;  %v12613_v2 = vpop.f32.mrb[77].mxu1  ;;  %v7473_v52 = vld [vmem:[%s15484_s22 + $0x18] sm:$0xff] }
0x1ad2   :  { %v7475_v2 = vld [vmem:[%s15484_s22 + $0x28] sm:$0xff] }
0x1ad3   :  { %v6281_v58 = vadd.f32 %v6280_v1, %v6120_v0  ;;  %v13192_v0 = vpack.c.bf16 %v7473_v52, %v7472_v49  ;;  %v7474_v1 = vld [vmem:[%s15484_s22 + $0x20] sm:$0xff]  ;;  %v13220_v49 = vpack.c.bf16 %v11585_v63, %v11584_v60  ;;  %v11579_v52 = vld [vmem:[%s15476_s14 + $0x98] sm:$0xff] }
0x1ad4   :  { %v6436_v3 = vpop.f32.mrb[78].mxu1 }
0x1ad5   :  { %v6440_v32 = vmul.f32 %v14704_v42, %v6436_v3  ;;  %v12623_v4 = vpop.f32.mrb[79].mxu1 }
0x1ad7   :  { %v6441_v5 = vadd.f32 %v6440_v32, %v6281_v58  ;;  %v13196_v58 = vpack.c.bf16 %v7475_v2, %v7474_v1  ;;  %v11587_v2 = vld [vmem:[%s15476_s14 + $0xd8] sm:$0xff] }
0x1ad8   :  { %v6596_v62 = vpop.f32.mrb[80].mxu1 }
0x1ad9   :  { %v6600_v9 = vmul.f32 %v14717_v61, %v6596_v62  ;;  %v12633_v7 = vpop.f32.mrb[81].mxu1 }
0x1adb   :  { %v6601_v6 = vadd.f32 %v6600_v9, %v6441_v5 }
0x1adc   :  { %v6759_v10 = vpop.f32.mrb[82].mxu1 }
0x1add   :  { %v12643_v45 = vpop.f32.mrb[83].mxu1  ;;  %12682 = vmatprep.mubr.msk.f32.mxu0 %vm128_vm0, %v6601_v6  ;;  %v6763_v13 = vmul.f32 %v14673_v38, %v6759_v10  ;;  %v11566_v6 = vld [vmem:[%s15480_s18 + $0x1] ss:$0 sm:$0xff] }
0x1ae0   :  { %v6919_v12 = vpop.f32.mrb[84].mxu1 }
0x1ae1   :  { %v6923_v28 = vmul.f32 %v14689_v54, %v6919_v12  ;;  %v12653_v14 = vpop.f32.mrb[85].mxu1 }
0x1ae3   :  { %v6924_v16 = vadd.f32 %v6923_v28, %v6763_v13  ;;  %v11567_v13 = vld [vmem:[%s15481_s19 + $0x1] ss:$0 sm:$0xff] }
0x1ae4   :  { %v7079_v36 = vpop.f32.mrb[86].mxu1 }
0x1ae5   :  { %v7083_v15 = vmul.f32 %v14704_v42, %v7079_v36  ;;  %v12663_v17 = vpop.f32.mrb[87].mxu1 }
0x1ae6   :  { %v7477_v17 = vld [vmem:[%s15484_s22 + $0x38] sm:$0xff] }
0x1ae7   :  { %v7084_v50 = vadd.f32 %v7083_v15, %v6924_v16  ;;  %v7476_v15 = vld [vmem:[%s15484_s22 + $0x30] sm:$0xff] }
0x1ae8   :  { %v7239_v19 = vpop.f32.mrb[88].mxu1 }
0x1ae9   :  { %v7243_v22 = vmul.f32 %v14717_v61, %v7239_v19  ;;  %v12673_v23 = vpop.f32.mrb[89].mxu1  ;;  %v11568_v19 = vld [vmem:[%s15483_s21] ss:$0 sm:$0xff] }
0x1aeb   :  { %v7244_v24 = vadd.f32 %v7243_v22, %v7084_v50  ;;  %v13200_v50 = vpack.c.bf16 %v7477_v17, %v7476_v15  ;;  %v11582_v17 = vld [vmem:[%s15476_s14 + $0xb0] sm:$0xff] }
0x1aed   :  { %12683 = vmatmul.mubr.msk.f32.vlgmr.msra.gmra.mrb[76].mxu0 %vm128_vm0, %v7244_v24 }
0x1aee   :  { %13191 = vmatpush3.bf16.msra.mxu0 %v13188_v21  ;;  %v11578_v21 = vld [vmem:[%s15476_s14 + $0x90] sm:$0xff] }
0x1aef   :  { %13193 = vmatprep.subr.bf16.mxu0 %v13192_v0  ;;  %v13208_v1 = vpack.c.bf16 %v11579_v52, %v11578_v21 }
0x1af2   :  { %13195 = vmatpush3.bf16.msra.mxu0 %v13192_v0  ;;  %v11586_v0 = vld [vmem:[%s15476_s14 + $0xd0] sm:$0xff] }
0x1af3   :  { %13197 = vmatprep.subr.bf16.mxu0 %v13196_v58 }
0x1af6   :  { %13199 = vmatpush3.bf16.msra.mxu0 %v13196_v58  ;;  %v13224_v58 = vpack.c.bf16 %v11587_v2, %v11586_v0 }
0x1af7   :  { %13201 = vmatprep.subr.bf16.mxu0 %v13200_v50 }
0x1afa   :  { %13203 = vmatpush3.bf16.msra.mxu0 %v13200_v50  ;;  %v11583_v50 = vld [vmem:[%s15476_s14 + $0xb8] sm:$0xff] }
0x1afb   :  { %13221 = vmatprep.subr.bf16.mxu0 %v13220_v49 }
0x1bc0   :  { %v12684_v27 = vpop.f32.mrb[76].mxu0 }
0x1bc1   :  { %v7329_v30 = vadd.f32 %v12684_v27, %v11563_v25  ;;  %v7323_v31 = vpop.f32.mrb[77].mxu0 }
0x1bc2   :  { %v7324_v40 = vadd.f32 %v11563_v25, %v7323_v31  ;;  %v11571_v31 = vld [vmem:[%s15485_s23] ss:$0 sm:$0xff] }
0x1bc3   :  { %v7333_v34 = vadd.f32 %v7329_v30, %v14656_v39 }
0x1bc4   :  { %v7332_v18 = vadd.f32 %v7324_v40, %v14646_v29  ;;  %v7376_v29 = vld [vmem:[%s15482_s20] sm:$0xff] }
0x1bc5   :  { %v7337_v11 = vsel %vm128_vm0, %v7333_v34, 0.0  ;;  %v13180_v55 = vpack.c.bf16 %v7377_v53, %v7376_v29 }
0x1bc6   :  { %7338 = vadd.xlane.f32.xlu1 %v7337_v11  ;;  %v7334_v41 = vsel %vm128_vm0, %v7332_v18, 0.0 }
0x1bc7   :  { %7335 = vadd.xlane.f32.xlu0 %v7334_v41  ;;  %13181 = vmatprep.subr.bf16.mxu1 %v13180_v55 }
0x1bc8   :  { %13183 = vmatpush3.bf16.msra.mxu1 %v13180_v55 }
0x1bc9   :  { %13185 = vmatprep.subr.bf16.mxu1 %v13184_v46 }
0x1bcc   :  { %13187 = vmatpush3.bf16.msra.mxu1 %v13184_v46  ;;  %v13204_v46 = vpack.c.bf16 %v11577_v59, %v11576_v57 }
0x1bce   :  { %13205 = vmatprep.subr.bf16.mxu1 %v13204_v46 }
0x1c53   :  { %v7339_v8 = vpop.xlane.xlu1 %7338 }
0x1c54   :  { %v7341_v26 = vmul.f32 0.03125, %v7339_v8  ;;  %v7336_v35 = vpop.xlane.xlu0 %7335 }
0x1c55   :  { %v7340_v33 = vmul.f32 0.03125, %v7336_v35 }
0x1c56   :  { %v7343_v56 = vsub.f32 %v7333_v34, %v7341_v26 }
0x1c57   :  { %v7342_v43 = vsub.f32 %v7332_v18, %v7340_v33 }
0x1c58   :  { %v7345_v44 = vmul.f32 %v7343_v56, %v7343_v56 }
0x1c59   :  { %v7344_v47 = vmul.f32 %v7342_v43, %v7342_v43 }
0x1c5a   :  { %v7349_v51 = vsel %vm128_vm0, %v7345_v44, 0.0 }
0x1c5b   :  { %7350 = vadd.xlane.f32.xlu1 %v7349_v51  ;;  %v7346_v39 = vsel %vm128_vm0, %v7344_v47, 0.0 }
0x1c5c   :  { %7347 = vadd.xlane.f32.xlu0 %v7346_v39 }
0x1ce8   :  { %v7351_v3 = vpop.xlane.xlu1 %7350 }
0x1ce9   :  { %v7353_v32 = vmul.f32 0.03125, %v7351_v3  ;;  %v7348_v4 = vpop.xlane.xlu0 %7347  ;;  %v11580_v3 = vld [vmem:[%s15476_s14 + $0xa0] sm:$0xff] }
0x1cea   :  { %v7352_v5 = vmul.f32 0.03125, %v7348_v4 }
0x1ceb   :  { %v7355_v62 = vadd.f32 1e-05, %v7353_v32  ;;  %v11581_v32 = vld [vmem:[%s15476_s14 + $0xa8] sm:$0xff] }
0x1cec   :  { %v7354_v9 = vadd.f32 1e-05, %v7352_v5  ;;  %v13212_v4 = vpack.c.bf16 %v11581_v32, %v11580_v3 }
0x1ced   :  { %13453 = vrsqrt.f32 %v7355_v62 }
0x1cee   :  { %13455 = vrsqrt.f32 %v7354_v9 }
0x1cf7   :  { %v13454_v7 = vpop.eup %13453 }
0x1cf8   :  { %v13456_v10 = vpop.eup %13455  ;;  %v7359_v45 = vmul.f32 %v13454_v7, %v7343_v56 }
0x1cf9   :  { %v7358_v12 = vmul.f32 %v13456_v10, %v7342_v43 }
0x1cfa   :  { %v7367_v28 = vmul.f32 %v11566_v6, %v7359_v45 }
0x1cfb   :  { %v7366_v14 = vmul.f32 %v11566_v6, %v7358_v12  ;;  %v11574_v12 = vld [vmem:[%s15480_s18 + $0x2] ss:$0 sm:$0xff] }
0x1cfc   :  { %v7375_v36 = vadd.f32 %v11567_v13, %v7367_v28 }
0x1cfd   :  { %v7374_v16 = vadd.f32 %v11567_v13, %v7366_v14 }
0x1cff   :  { %12693 = vmatprep.mubr.msk.f32.mxu1 %vm128_vm0, %v7374_v16 }
0x1d00   :  { %12694 = vmatmul.mubr.msk.f32.vlgmr.msra.gmra.mrb[90].mxu1 %vm128_vm0, %v7375_v36 }
0x1d01   :  { %13207 = vmatpush3.bf16.msra.mxu1 %v13204_v46  ;;  %v13545_v46 = vld [vmem:[%s15529_s30] sm:$0xff] }
0x1d02   :  { %13209 = vmatprep.subr.bf16.mxu1 %v13208_v1 }
0x1d05   :  { %13211 = vmatpush3.bf16.msra.mxu1 %v13208_v1 }
0x1d06   :  { %13213 = vmatprep.subr.bf16.mxu1 %v13212_v4 }
0x1dd3   :  { %v12695_v22 = vpop.f32.mrb[90].mxu1 }
0x1dd4   :  { %v7465_v23 = vadd.f32 %v12695_v22, %v11568_v19  ;;  %v7459_v24 = vpop.f32.mrb[91].mxu1 }
0x1dd5   :  { %v7460_v25 = vadd.f32 %v11568_v19, %v7459_v24  ;;  %v11628_v24 = vld [vmem:[%s15477_s15 + $0x6] ss:$0 sm:$0xff] }
0x1dd6   :  { %v7469_v30 = vmax.f32 %v7465_v23, 0.0  ;;  %v13216_v23 = vpack.c.bf16 %v11583_v50, %v11582_v17 }
0x1dd7   :  { %v7468_v27 = vmax.f32 %v7460_v25, 0.0 }
0x1dd9   :  { %12712 = vmatprep.mubr.msk.f32.mxu0 %vm1926_vm3, %v7468_v27 }
0x1dda   :  { %12713 = vmatmul.mubr.msk.f32.vlgmr.msra.gmra.mrb[78].mxu0 %vm1926_vm3, %v7469_v30 }
0x1ddb   :  { %13223 = vmatpush3.bf16.msra.mxu0 %v13220_v49 }
0x1ddc   :  { %13225 = vmatprep.subr.bf16.mxu0 %v13224_v58 }
0x1ddf   :  { %13227 = vmatpush3.bf16.msra.mxu0 %v13224_v58 }
0x1de0   :  { %12758 = vmatprep.subr.mxu0 %v13577_v20 }
0x1ead   :  { %v12714_v40 = vpop.f32.mrb[78].mxu0 }
0x1eae   :  { %v7563_v34 = vadd.f32 %v12714_v40, %v11571_v31  ;;  %v7557_v18 = vpop.f32.mrb[79].mxu0 }
0x1eaf   :  { %v7558_v11 = vadd.f32 %v11571_v31, %v7557_v18 }
0x1eb0   :  { %v7567_v41 = vadd.f32 %v7563_v34, %v7375_v36  ;;  %v11622_v34 = vld [vmem:[%s15477_s15 + $0x4] ss:$0 sm:$0xff] }
0x1eb1   :  { %v7566_v8 = vadd.f32 %v7558_v11, %v7374_v16  ;;  %v11575_v16 = vld [vmem:[%s15481_s19 + $0x2] ss:$0 sm:$0xff]  ;;  %v11625_v11 = vld [vmem:[%s15477_s15 + $0x5] ss:$0 sm:$0xff] }
0x1eb2   :  { %v7571_v26 = vsel %vm128_vm0, %v7567_v41, 0.0 }
0x1eb3   :  { %7572 = vadd.xlane.f32.xlu1 %v7571_v26  ;;  %v7568_v35 = vsel %vm128_vm0, %v7566_v8, 0.0 }
0x1eb4   :  { %7569 = vadd.xlane.f32.xlu0 %v7568_v35 }
0x1f40   :  { %v7573_v33 = vpop.xlane.xlu1 %7572 }
0x1f41   :  { %v7575_v56 = vmul.f32 0.03125, %v7573_v33  ;;  %v7570_v43 = vpop.xlane.xlu0 %7569 }
0x1f42   :  { %v7574_v44 = vmul.f32 0.03125, %v7570_v43 }
0x1f43   :  { %v7577_v47 = vsub.f32 %v7567_v41, %v7575_v56 }
0x1f44   :  { %v7576_v51 = vsub.f32 %v7566_v8, %v7574_v44 }
0x1f45   :  { %v7579_v39 = vmul.f32 %v7577_v47, %v7577_v47 }
0x1f46   :  { %v7578_v29 = vmul.f32 %v7576_v51, %v7576_v51 }
0x1f47   :  { %v7583_v53 = vsel %vm128_vm0, %v7579_v39, 0.0 }
0x1f48   :  { %7584 = vadd.xlane.f32.xlu1 %v7583_v53  ;;  %v7580_v55 = vsel %vm128_vm0, %v7578_v29, 0.0 }
0x1f49   :  { %7581 = vadd.xlane.f32.xlu0 %v7580_v55 }
0x1fd5   :  { %v7585_v5 = vpop.xlane.xlu1 %7584 }
0x1fd6   :  { %v7587_v62 = vmul.f32 0.03125, %v7585_v5  ;;  %v7582_v9 = vpop.xlane.xlu0 %7581 }
0x1fd7   :  { %v7586_v7 = vmul.f32 0.03125, %v7582_v9 }
0x1fd8   :  { %v7589_v6 = vadd.f32 1e-05, %v7587_v62  ;;  %v13546_v62 = vld [vmem:[%s15529_s30 + $0x8] sm:$0xff] }
0x1fd9   :  { %v7588_v10 = vadd.f32 1e-05, %v7586_v7 }
0x1fda   :  { %13457 = vrsqrt.f32 %v7589_v6 }
0x1fdb   :  { %13459 = vrsqrt.f32 %v7588_v10 }
0x1fe4   :  { %v13458_v45 = vpop.eup %13457 }
0x1fe5   :  { %v13460_v13 = vpop.eup %13459  ;;  %v7593_v28 = vmul.f32 %v13458_v45, %v7577_v47 }
0x1fe6   :  { %v7592_v14 = vmul.f32 %v13460_v13, %v7576_v51 }
0x1fe7   :  { %v7601_v36 = vmul.f32 %v11574_v12, %v7593_v28 }
0x1fe8   :  { %v7600_v15 = vmul.f32 %v11574_v12, %v7592_v14 }
0x1fe9   :  { %v14938_v22 = vadd.f32 %v11575_v16, %v7601_v36 }
0x1fea   :  { %v14936_v19 = vadd.f32 %v11575_v16, %v7600_v15 }
0x1fec   :  { %12723 = vmatprep.mubr.msk.f32.mxu1 %vm128_vm0, %v14936_v19  ;;  %12745 = vmatprep.mubr.msk.f32.mxu0 %vm128_vm0, %v14936_v19 }
0x1fed   :  { %12724 = vmatmul.mubr.msk.f32.vlgmr.msra.gmra.mrb[92].mxu1 %vm128_vm0, %v14938_v22  ;;  %12746 = vmatmul.mubr.msk.f32.vlgmr.msra.gmra.mrb[80].mxu0 %vm128_vm0, %v14938_v22 }
0x1fee   :  { %13215 = vmatpush3.bf16.msra.mxu1 %v13212_v4  ;;  %12734 = vmatprep.mubr.msk.f32.mxu1 %vm128_vm0, %v14936_v19 }
0x1fef   :  { %13217 = vmatprep.subr.bf16.mxu1 %v13216_v23  ;;  %12760 = vmatprep.mubr.msk.f32.mxu0 %vm13578_vm1, %v13577_v20 }
0x1ff2   :  { %13219 = vmatpush3.bf16.msra.mxu1 %v13216_v23 }
0x1ff3   :  { %12748 = vmatprep.subr.mxu1 %v13577_v20 }
0x1ff5   :  { %12735 = vmatmul.mubr.msk.f32.vlgmr.msra.gmra.mrb[94].mxu1 %vm128_vm0, %v14938_v22 }
0x1ff6   :  { %12750 = vmatprep.mubr.msk.f32.mxu1 %vm13578_vm1, %v13577_v20 }
0x20c0   :  { %v12725_v25 = vpop.f32.mrb[92].mxu1  ;;  %v12747_v27 = vpop.f32.mrb[80].mxu0 }
0x20c1   :  { %v14960_v30 = vadd.f32 %v12747_v27, %v11628_v24  ;;  %v7740_v31 = vpop.f32.mrb[93].mxu1  ;;  %v7904_v40 = vpop.f32.mrb[81].mxu0  ;;  %v7746_v44 = vadd.f32 %v12725_v25, %v11622_v34 }
0x20c2   :  { %v7741_v18 = vadd.f32 %v11622_v34, %v7740_v31  ;;  %v14974_v43 = vadd.f32 %v11628_v24, %v7904_v40 }
0x20c3   :  { %v7750_v51 = vmul.f32 0.35355338, %v7746_v44 }
0x20c4   :  { %v7749_v8 = vmul.f32 0.35355338, %v7741_v18 }
0x20c5   :  { %v8556_v53 = vmul.f32 %v14673_v38, %v7750_v51  ;;  %v8719_v55 = vmul.f32 %v14689_v54, %v7750_v51 }
0x20c6   :  { %v7913_v33 = vmul.f32 %v14673_v38, %v7749_v8  ;;  %v8076_v56 = vmul.f32 %v14689_v54, %v7749_v8  ;;  %v8236_v47 = vmul.f32 %v14704_v42, %v7749_v8  ;;  %v8396_v39 = vmul.f32 %v14717_v61, %v7749_v8 }
0x20c7   :  { %v8879_v38 = vmul.f32 %v14704_v42, %v7750_v51  ;;  %v9039_v54 = vmul.f32 %v14717_v61, %v7750_v51 }
0x20c8   :  { %v12736_v41 = vpop.f32.mrb[94].mxu1 }
0x20c9   :  { %v7823_v26 = vpop.f32.mrb[95].mxu1  ;;  %v7829_v29 = vadd.f32 %v12736_v41, %v11625_v11 }
0x20ca   :  { %v7824_v35 = vadd.f32 %v11625_v11, %v7823_v26 }
0x20cc   :  { %12749 = vmatpush3.xpose.msk.msra.mxu1 %vm128_vm0, %v7824_v35  ;;  %12759 = vmatpush3.xpose.msk.msra.mxu0 %vm128_vm0, %v7824_v35 }
0x20cd   :  { %12753 = vmatprep.subr.mxu1 %v13577_v20  ;;  %12768 = vmatprep.subr.mxu0 %v13577_v20 }
0x20cf   :  { %12751 = vmatmul.mubr.msk.f32.vlgmr.msra.gmra.mrb[96].mxu1 %vm128_vm0, %v7913_v33  ;;  %12761 = vmatmul.mubr.msk.f32.vlgmr.msra.gmra.mrb[82].mxu0 %vm128_vm0, %v8076_v56 }
0x20d0   :  { %12754 = vmatpush3.msra.mxu1 %v14974_v43  ;;  %12769 = vmatpush3.xpose.msk.msra.mxu0 %vm128_vm0, %v7824_v35 }
0x20d1   :  { %12770 = vmatprep.mubr.msk.f32.mxu0 %vm13578_vm1, %v13577_v20  ;;  %12778 = vmatprep.subr.mxu0 %v13577_v20 }
0x20d2   :  { %12755 = vmatprep.mubr.msk.f32.mxu1 %vm13578_vm1, %v13577_v20  ;;  %12763 = vmatprep.subr.mxu1 %v13577_v20 }
0x20d3   :  { %12771 = vmatmul.mubr.msk.f32.vlgmr.msra.gmra.mrb[84].mxu0 %vm128_vm0, %v8236_v47 }
0x20d4   :  { %12779 = vmatpush3.xpose.msk.msra.mxu0 %vm128_vm0, %v7824_v35  ;;  %12780 = vmatprep.mubr.msk.f32.mxu0 %vm13578_vm1, %v13577_v20 }
0x20d5   :  { %12788 = vmatprep.subr.mxu0 %v13577_v20 }
0x20d7   :  { %12781 = vmatmul.mubr.msk.f32.vlgmr.msra.gmra.mrb[86].mxu0 %vm128_vm0, %v8396_v39 }
0x20d8   :  { %12789 = vmatpush3.xpose.msk.msra.mxu0 %vm128_vm0, %v7829_v29  ;;  %12790 = vmatprep.mubr.msk.f32.mxu0 %vm13578_vm1, %v13577_v20 }
0x20d9   :  { %12798 = vmatprep.subr.mxu0 %v13577_v20 }
0x20db   :  { %12791 = vmatmul.mubr.msk.f32.vlgmr.msra.gmra.mrb[88].mxu0 %vm128_vm0, %v8556_v53 }
0x20dc   :  { %12799 = vmatpush3.xpose.msk.msra.mxu0 %vm128_vm0, %v7829_v29  ;;  %12800 = vmatprep.mubr.msk.f32.mxu0 %vm13578_vm1, %v13577_v20 }
0x20dd   :  { %12808 = vmatprep.subr.mxu0 %v13577_v20 }
0x20df   :  { %12801 = vmatmul.mubr.msk.f32.vlgmr.msra.gmra.mrb[90].mxu0 %vm128_vm0, %v8719_v55 }
0x20e0   :  { %12809 = vmatpush3.xpose.msk.msra.mxu0 %vm128_vm0, %v7829_v29  ;;  %12810 = vmatprep.mubr.msk.f32.mxu0 %vm13578_vm1, %v13577_v20 }
0x20e1   :  { %12818 = vmatprep.subr.mxu0 %v13577_v20 }
0x20e3   :  { %12811 = vmatmul.mubr.msk.f32.vlgmr.msra.gmra.mrb[92].mxu0 %vm128_vm0, %v8879_v38 }
0x20e4   :  { %12819 = vmatpush3.xpose.msk.msra.mxu0 %vm128_vm0, %v7829_v29  ;;  %12820 = vmatprep.mubr.msk.f32.mxu0 %vm13578_vm1, %v13577_v20 }
0x20e7   :  { %12821 = vmatmul.mubr.msk.f32.vlgmr.msra.gmra.mrb[94].mxu0 %vm128_vm0, %v9039_v54 }
0x21a2   :  { %v7986_v57 = vpop.f32.mrb[96].mxu1  ;;  %v8146_v59 = vpop.f32.mrb[82].mxu0 }
0x21a3   :  { %v7987_v42 = vadd.f32 %v13545_v46, %v7986_v57  ;;  %v8147_v60 = vadd.f32 %v13545_v46, %v8146_v59  ;;  %v12752_v63 = vpop.f32.mrb[97].mxu1  ;;  %v12762_v49 = vpop.f32.mrb[83].mxu0 }
0x21a5   :  { %v8150_v21 = vsel %vm457_vm2, %v8147_v60, -inf  ;;  %v7990_v52 = vsel %vm457_vm2, %v7987_v42, -inf }
0x21a6   :  { %8151 = vmax.xlane.f32.xlu1 %v8150_v21  ;;  %v8306_v0 = vpop.f32.mrb[84].mxu0  ;;  %7991 = vmax.xlane.f32.xlu0 %v7990_v52 }
0x21a7   :  { %v8307_v61 = vadd.f32 %v13545_v46, %v8306_v0  ;;  %v12772_v1 = vpop.f32.mrb[85].mxu0 }
0x21a9   :  { %v8310_v2 = vsel %vm457_vm2, %v8307_v61, -inf }
0x21aa   :  { %v8466_v58 = vpop.f32.mrb[86].mxu0  ;;  %8311 = vmax.xlane.f32.xlu0 %v8310_v2 }
0x21ab   :  { %v8467_v3 = vadd.f32 %v13545_v46, %v8466_v58  ;;  %v12782_v32 = vpop.f32.mrb[87].mxu0 }
0x21ad   :  { %v8470_v4 = vsel %vm457_vm2, %v8467_v3, -inf }
0x21ae   :  { %8471 = vmax.xlane.f32.xlu1 %v8470_v4  ;;  %v8629_v5 = vpop.f32.mrb[88].mxu0 }
0x21af   :  { %v8630_v9 = vadd.f32 %v13546_v62, %v8629_v5  ;;  %v12792_v7 = vpop.f32.mrb[89].mxu0 }
0x21b1   :  { %v8633_v6 = vsel %vm457_vm2, %v8630_v9, -inf }
0x21b2   :  { %v8789_v10 = vpop.f32.mrb[90].mxu0  ;;  %8634 = vmax.xlane.f32.xlu0 %v8633_v6 }
0x21b3   :  { %v8790_v45 = vadd.f32 %v13546_v62, %v8789_v10  ;;  %v12802_v12 = vpop.f32.mrb[91].mxu0 }
0x21b5   :  { %v8793_v13 = vsel %vm457_vm2, %v8790_v45, -inf }
0x21b6   :  { %8794 = vmax.xlane.f32.xlu1 %v8793_v13  ;;  %v8949_v28 = vpop.f32.mrb[92].mxu0 }
0x21b7   :  { %v8950_v14 = vadd.f32 %v13546_v62, %v8949_v28  ;;  %v12812_v16 = vpop.f32.mrb[93].mxu0 }
0x21b9   :  { %v8953_v36 = vsel %vm457_vm2, %v8950_v14, -inf }
0x21ba   :  { %v9109_v15 = vpop.f32.mrb[94].mxu0  ;;  %8954 = vmax.xlane.f32.xlu0 %v8953_v36 }
0x21bb   :  { %v9110_v17 = vadd.f32 %v13546_v62, %v9109_v15  ;;  %v12822_v50 = vpop.f32.mrb[95].mxu0 }
0x21bd   :  { %v9113_v23 = vsel %vm457_vm2, %v9110_v17, -inf }
0x21be   :  { %9114 = vmax.xlane.f32.xlu1 %v9113_v23 }
0x2233   :  { %v8152_v24 = vpop.xlane.xlu1 %8151  ;;  %v7992_v25 = vpop.xlane.xlu0 %7991 }
0x2234   :  { %v8153_v27 = vsub.f32 %v8147_v60, %v8152_v24  ;;  %v7993_v31 = vsub.f32 %v7987_v42, %v7992_v25 }
0x2236   :  { %v8154_v40 = vmul.f32 1.442695, %v8153_v27  ;;  %v7994_v34 = vmul.f32 1.442695, %v7993_v31 }
0x2237   :  { %v8312_v18 = vpop.xlane.xlu0 %8311 }
0x2238   :  { %13461 = vpow2.f32 %v8154_v40  ;;  %v8313_v11 = vsub.f32 %v8307_v61, %v8312_v18  ;;  %v11588_v18 = vld [vmem:[%s15476_s14 + $0xe0] sm:$0xff] }
0x2239   :  { %13463 = vpow2.f32 %v7994_v34 }
0x223a   :  { %v8314_v41 = vmul.f32 1.442695, %v8313_v11  ;;  %v11589_v11 = vld [vmem:[%s15476_s14 + $0xe8] sm:$0xff] }
0x223b   :  { %v8472_v8 = vpop.xlane.xlu1 %8471 }
0x223c   :  { %13465 = vpow2.f32 %v8314_v41  ;;  %v8473_v26 = vsub.f32 %v8467_v3, %v8472_v8  ;;  %v13228_v41 = vpack.c.bf16 %v11589_v11, %v11588_v18  ;;  %v11591_v8 = vld [vmem:[%s15476_s14 + $0xf8] sm:$0xff] }
0x223e   :  { %v8474_v35 = vmul.f32 1.442695, %v8473_v26  ;;  %13229 = vmatprep.subr.bf16.mxu0 %v13228_v41 }
0x223f   :  { %v8635_v33 = vpop.xlane.xlu0 %8634  ;;  %13231 = vmatpush3.bf16.msra.mxu0 %v13228_v41 }
0x2240   :  { %13467 = vpow2.f32 %v8474_v35  ;;  %v8636_v56 = vsub.f32 %v8630_v9, %v8635_v33  ;;  %v11600_v35 = vld [vmem:[%s15478_s16 + $0xa0] sm:$0xff]  ;;  %v11601_v33 = vld [vmem:[%s15478_s16 + $0xa8] sm:$0xff] }
0x2242   :  { %v13462_v44 = vpop.eup %13461  ;;  %v8637_v47 = vmul.f32 1.442695, %v8636_v56  ;;  %v13244_v56 = vpack.c.bf16 %v11601_v33, %v11600_v35 }
0x2243   :  { %v13464_v51 = vpop.eup %13463  ;;  %v8795_v39 = vpop.xlane.xlu1 %8794  ;;  %v8156_v29 = vsel %vm457_vm2, %v13462_v44, 0.0 }
0x2244   :  { %13469 = vpow2.f32 %v8637_v47  ;;  %v8796_v53 = vsub.f32 %v8790_v45, %v8795_v39  ;;  %8157 = vadd.xlane.f32.xlu1 %v8156_v29  ;;  %v7996_v55 = vsel %vm457_vm2, %v13464_v51, 0.0  ;;  %v15095_v39 = vld [vmem:[%s15522_s29] ss:$0 sm:$0xff] }
0x2245   :  { %7997 = vadd.xlane.f32.xlu0 %v7996_v55 }
0x2246   :  { %v13466_v38 = vpop.eup %13465  ;;  %v8797_v54 = vmul.f32 1.442695, %v8796_v53  ;;  %v15101_v53 = vld [vmem:[%s15522_s29 + $0x1] ss:$0 sm:$0xff] }
0x2247   :  { %v8955_v57 = vpop.xlane.xlu0 %8954  ;;  %v8316_v59 = vsel %vm457_vm2, %v13466_v38, 0.0 }
0x2248   :  { %13471 = vpow2.f32 %v8797_v54  ;;  %v8956_v46 = vsub.f32 %v8950_v14, %v8955_v57 }
0x2249   :  { %8317 = vadd.xlane.f32.xlu0 %v8316_v59  ;;  %v15107_v59 = vld [vmem:[%s15522_s29 + $0x2] ss:$0 sm:$0xff] }
0x224a   :  { %v13468_v42 = vpop.eup %13467  ;;  %v8957_v60 = vmul.f32 1.442695, %v8956_v46 }
0x224b   :  { %v9115_v63 = vpop.xlane.xlu1 %9114  ;;  %v8476_v49 = vsel %vm457_vm2, %v13468_v42, 0.0 }
0x224c   :  { %13473 = vpow2.f32 %v8957_v60  ;;  %v9116_v21 = vsub.f32 %v9110_v17, %v9115_v63  ;;  %8477 = vadd.xlane.f32.xlu1 %v8476_v49  ;;  %v15113_v49 = vld [vmem:[%s15522_s29 + $0x3] ss:$0 sm:$0xff] }
0x224e   :  { %v13470_v52 = vpop.eup %13469  ;;  %v9117_v0 = vmul.f32 1.442695, %v9116_v21 }
0x224f   :  { %v8639_v61 = vsel %vm457_vm2, %v13470_v52, 0.0 }
0x2250   :  { %13475 = vpow2.f32 %v9117_v0  ;;  %8640 = vadd.xlane.f32.xlu0 %v8639_v61 }
0x2252   :  { %v13472_v1 = vpop.eup %13471 }
0x2253   :  { %v8799_v2 = vsel %vm457_vm2, %v13472_v1, 0.0 }
0x2254   :  { %8800 = vadd.xlane.f32.xlu1 %v8799_v2 }
0x2256   :  { %v13474_v58 = vpop.eup %13473 }
0x2257   :  { %v8959_v3 = vsel %vm457_vm2, %v13474_v58, 0.0 }
0x2258   :  { %8960 = vadd.xlane.f32.xlu0 %v8959_v3 }
0x225a   :  { %v13476_v32 = vpop.eup %13475 }
0x225b   :  { %v9119_v4 = vsel %vm457_vm2, %v13476_v32, 0.0 }
0x225c   :  { %9120 = vadd.xlane.f32.xlu1 %v9119_v4 }
0x22d1   :  { %v8158_v5 = vpop.xlane.xlu1 %8157 }
0x22d2   :  { %v7998_v62 = vpop.xlane.xlu0 %7997 }
0x22d3   :  { %13477 = vrcp.f32 %v7998_v62 }
0x22d4   :  { %13479 = vrcp.f32 %v8158_v5 }
0x22d6   :  { %v8318_v9 = vpop.xlane.xlu0 %8317 }
0x22d7   :  { %13481 = vrcp.f32 %v8318_v9 }
0x22d9   :  { %v8478_v7 = vpop.xlane.xlu1 %8477 }
0x22da   :  { %13483 = vrcp.f32 %v8478_v7 }
0x22dd   :  { %v13478_v6 = vpop.eup %13477  ;;  %v8641_v45 = vpop.xlane.xlu0 %8640 }
0x22de   :  { %v8000_v10 = vmul.f32 %v13478_v6, %v13464_v51  ;;  %v13480_v12 = vpop.eup %13479  ;;  %13485 = vrcp.f32 %v8641_v45  ;;  %v11603_v45 = vld [vmem:[%s15478_s16 + $0xb8] sm:$0xff] }
0x22df   :  { %v8160_v13 = vmul.f32 %v13480_v12, %v13462_v44 }
0x22e0   :  { %12756 = vmatmul.mubr.msk.f32.vlgmr.msra.gmra.mrb[98].mxu1 %vm457_vm2, %v8000_v10  ;;  %v11602_v10 = vld [vmem:[%s15478_s16 + $0xb0] sm:$0xff] }
0x22e1   :  { %12764 = vmatpush3.msra.mxu1 %v14974_v43  ;;  %12765 = vmatprep.mubr.msk.f32.mxu1 %vm13578_vm1, %v13577_v20  ;;  %v8801_v28 = vpop.xlane.xlu1 %8800  ;;  %v13482_v14 = vpop.eup %13481 }
0x22e2   :  { %12773 = vmatprep.subr.mxu1 %v13577_v20  ;;  %13487 = vrcp.f32 %v8801_v28  ;;  %v8320_v16 = vmul.f32 %v13482_v14, %v13466_v38  ;;  %v13248_v14 = vpack.c.bf16 %v11603_v45, %v11602_v10  ;;  %v11660_v45 = vld [vmem:[%s15479_s17 + $0x4] ss:$0 sm:$0xff] }
0x22e4   :  { %12766 = vmatmul.mubr.msk.f32.vlgmr.msra.gmra.mrb[100].mxu1 %vm457_vm2, %v8160_v13  ;;  %v13484_v15 = vpop.eup %13483 }
0x22e5   :  { %12774 = vmatpush3.msra.mxu1 %v14974_v43  ;;  %12775 = vmatprep.mubr.msk.f32.mxu1 %vm13578_vm1, %v13577_v20  ;;  %v8961_v36 = vpop.xlane.xlu0 %8960  ;;  %v8480_v17 = vmul.f32 %v13484_v15, %v13468_v42 }
0x22e6   :  { %12783 = vmatprep.subr.mxu1 %v13577_v20  ;;  %13489 = vrcp.f32 %v8961_v36 }
0x22e8   :  { %12776 = vmatmul.mubr.msk.f32.vlgmr.msra.gmra.mrb[102].mxu1 %vm457_vm2, %v8320_v16  ;;  %v13486_v23 = vpop.eup %13485  ;;  %v11655_v16 = vld [vmem:[%s15477_s15 + $0x7] ss:$0 sm:$0xff] }
0x22e9   :  { %12784 = vmatpush3.msra.mxu1 %v14974_v43  ;;  %12785 = vmatprep.mubr.msk.f32.mxu1 %vm13578_vm1, %v13577_v20  ;;  %v9121_v50 = vpop.xlane.xlu1 %9120  ;;  %v8643_v24 = vmul.f32 %v13486_v23, %v13470_v52 }
0x22ea   :  { %12793 = vmatprep.subr.mxu1 %v13577_v20  ;;  %13491 = vrcp.f32 %v9121_v50 }
0x22ec   :  { %12786 = vmatmul.mubr.msk.f32.vlgmr.msra.gmra.mrb[104].mxu1 %vm457_vm2, %v8480_v17  ;;  %v13488_v43 = vpop.eup %13487 }
0x22ed   :  { %12794 = vmatpush3.msra.mxu1 %v14960_v30  ;;  %12795 = vmatprep.mubr.msk.f32.mxu1 %vm13578_vm1, %v13577_v20  ;;  %v8803_v25 = vmul.f32 %v13488_v43, %v13472_v1 }
0x22ee   :  { %12803 = vmatprep.subr.mxu1 %v13577_v20 }
0x22f0   :  { %12796 = vmatmul.mubr.msk.f32.vlgmr.msra.gmra.mrb[106].mxu1 %vm457_vm2, %v8643_v24  ;;  %v13490_v27 = vpop.eup %13489 }
0x22f1   :  { %12804 = vmatpush3.msra.mxu1 %v14960_v30  ;;  %12805 = vmatprep.mubr.msk.f32.mxu1 %vm13578_vm1, %v13577_v20  ;;  %v8963_v31 = vmul.f32 %v13490_v27, %v13474_v58 }
0x22f2   :  { %12813 = vmatprep.subr.mxu1 %v13577_v20 }
0x22f4   :  { %12806 = vmatmul.mubr.msk.f32.vlgmr.msra.gmra.mrb[108].mxu1 %vm457_vm2, %v8803_v25  ;;  %v13492_v40 = vpop.eup %13491  ;;  %v11663_v25 = vld [vmem:[%s15479_s17 + $0x5] ss:$0 sm:$0xff] }
0x22f5   :  { %12814 = vmatpush3.msra.mxu1 %v14960_v30  ;;  %12815 = vmatprep.mubr.msk.f32.mxu1 %vm13578_vm1, %v13577_v20  ;;  %v9123_v34 = vmul.f32 %v13492_v40, %v13476_v32 }
0x22f6   :  { %12823 = vmatprep.subr.mxu1 %v13577_v20 }
0x22f8   :  { %12816 = vmatmul.mubr.msk.f32.vlgmr.msra.gmra.mrb[110].mxu1 %vm457_vm2, %v8963_v31 }
0x22f9   :  { %12824 = vmatpush3.msra.mxu1 %v14960_v30  ;;  %12825 = vmatprep.mubr.msk.f32.mxu1 %vm13578_vm1, %v13577_v20  ;;  %v11590_v30 = vld [vmem:[%s15476_s14 + $0xf0] sm:$0xff] }
0x22fa   :  { %v13232_v26 = vpack.c.bf16 %v11591_v8, %v11590_v30 }
0x22fc   :  { %12826 = vmatmul.mubr.msk.f32.vlgmr.msra.gmra.mrb[112].mxu1 %vm457_vm2, %v9123_v34  ;;  %13233 = vmatprep.subr.bf16.mxu0 %v13232_v26 }
0x22fd   :  { %13235 = vmatpush3.bf16.msra.mxu0 %v13232_v26 }
0x22fe   :  { %13245 = vmatprep.subr.bf16.mxu0 %v13244_v56 }
0x23b3   :  { %v8070_v44 = vpop.f32.mrb[98].mxu1 }
0x23b4   :  { %v12757_v47 = vpop.f32.mrb[99].mxu1  ;;  %v8074_v29 = vmul.f32 %v15095_v39, %v8070_v44  ;;  %v11596_v44 = vld [vmem:[%s15478_s16 + $0x80] sm:$0xff] }
0x23b5   :  { %v11597_v47 = vld [vmem:[%s15478_s16 + $0x88] sm:$0xff] }
0x23b7   :  { %v8230_v51 = vpop.f32.mrb[100].mxu1 }
0x23b8   :  { %v8234_v55 = vmul.f32 %v15101_v53, %v8230_v51  ;;  %v12767_v38 = vpop.f32.mrb[101].mxu1  ;;  %v13236_v51 = vpack.c.bf16 %v11597_v47, %v11596_v44 }
0x23ba   :  { %v8235_v54 = vadd.f32 %v8234_v55, %v8074_v29  ;;  %13237 = vmatprep.subr.bf16.mxu1 %v13236_v51  ;;  %v11598_v29 = vld [vmem:[%s15478_s16 + $0x90] sm:$0xff]  ;;  %v11599_v55 = vld [vmem:[%s15478_s16 + $0x98] sm:$0xff] }
0x23bb   :  { %v8390_v57 = vpop.f32.mrb[102].mxu1  ;;  %13239 = vmatpush3.bf16.msra.mxu1 %v13236_v51  ;;  %v13240_v38 = vpack.c.bf16 %v11599_v55, %v11598_v29 }
0x23bc   :  { %v8394_v46 = vmul.f32 %v15107_v59, %v8390_v57  ;;  %v12777_v42 = vpop.f32.mrb[103].mxu1  ;;  %v11605_v57 = vld [vmem:[%s15478_s16 + $0xc8] sm:$0xff] }
0x23bd   :  { %13241 = vmatprep.subr.bf16.mxu1 %v13240_v38 }
0x23be   :  { %v8395_v60 = vadd.f32 %v8394_v46, %v8235_v54  ;;  %v11604_v54 = vld [vmem:[%s15478_s16 + $0xc0] sm:$0xff] }
0x23bf   :  { %v8550_v63 = vpop.f32.mrb[104].mxu1  ;;  %13243 = vmatpush3.bf16.msra.mxu1 %v13240_v38  ;;  %v13252_v46 = vpack.c.bf16 %v11605_v57, %v11604_v54  ;;  %v13552_v57 = vld [vmem:[%s15530_s0 + $0x8] sm:$0xff] }
0x23c0   :  { %v8554_v21 = vmul.f32 %v15113_v49, %v8550_v63  ;;  %v12787_v52 = vpop.f32.mrb[105].mxu1 }
0x23c1   :  { %13253 = vmatprep.subr.bf16.mxu1 %v13252_v46 }
0x23c2   :  { %v8555_v0 = vadd.f32 %v8554_v21, %v8395_v60 }
0x23c3   :  { %v8713_v61 = vpop.f32.mrb[106].mxu1 }
0x23c4   :  { %v12797_v1 = vpop.f32.mrb[107].mxu1  ;;  %12836 = vmatprep.mubr.msk.f32.mxu0 %vm128_vm0, %v8555_v0  ;;  %v8717_v58 = vmul.f32 %v15095_v39, %v8713_v61 }
0x23c5   :  { %v11658_v1 = vld [vmem:[%s15480_s18 + $0x3] ss:$0 sm:$0xff] }
0x23c7   :  { %v8873_v2 = vpop.f32.mrb[108].mxu1 }
0x23c8   :  { %v8877_v3 = vmul.f32 %v15101_v53, %v8873_v2  ;;  %v12807_v32 = vpop.f32.mrb[109].mxu1 }
0x23c9   :  { %v11659_v32 = vld [vmem:[%s15481_s19 + $0x3] ss:$0 sm:$0xff] }
0x23ca   :  { %v8878_v4 = vadd.f32 %v8877_v3, %v8717_v58 }
0x23cb   :  { %v9033_v5 = vpop.f32.mrb[110].mxu1 }
0x23cc   :  { %v9037_v62 = vmul.f32 %v15107_v59, %v9033_v5  ;;  %v12817_v9 = vpop.f32.mrb[111].mxu1 }
0x23cd   :  { %v11607_v9 = vld [vmem:[%s15478_s16 + $0xd8] sm:$0xff] }
0x23ce   :  { %v9038_v7 = vadd.f32 %v9037_v62, %v8878_v4  ;;  %v11606_v62 = vld [vmem:[%s15478_s16 + $0xd0] sm:$0xff] }
0x23cf   :  { %v9193_v6 = vpop.f32.mrb[112].mxu1  ;;  %v13256_v10 = vpack.c.bf16 %v11607_v9, %v11606_v62 }
0x23d0   :  { %v9197_v12 = vmul.f32 %v15113_v49, %v9193_v6  ;;  %v12827_v13 = vpop.f32.mrb[113].mxu1 }
0x23d2   :  { %v9198_v28 = vadd.f32 %v9197_v12, %v9038_v7 }
0x23d4   :  { %12837 = vmatmul.mubr.msk.f32.vlgmr.msra.gmra.mrb[96].mxu0 %vm128_vm0, %v9198_v28 }
0x23d5   :  { %13247 = vmatpush3.bf16.msra.mxu0 %v13244_v56  ;;  %12858 = vmatprep.mubr.msk.f32.mxu0 %vm128_vm0, %v14591_v48 }
0x23d6   :  { %13249 = vmatprep.subr.bf16.mxu0 %v13248_v14 }
0x23d9   :  { %13251 = vmatpush3.bf16.msra.mxu0 %v13248_v14 }
0x23da   :  { %12872 = vmatprep.subr.mxu0 %v13577_v20 }
0x23dc   :  { %12859 = vmatmul.mubr.msk.f32.vlgmr.msra.gmra.mrb[98].mxu0 %vm128_vm0, %v14596_v37 }
0x23dd   :  { %12874 = vmatprep.mubr.msk.f32.mxu0 %vm13578_vm1, %v13577_v20 }
0x24a7   :  { %v12838_v36 = vpop.f32.mrb[96].mxu0 }
0x24a8   :  { %v9283_v15 = vadd.f32 %v12838_v36, %v11655_v16  ;;  %v9277_v17 = vpop.f32.mrb[97].mxu0 }
0x24a9   :  { %v9278_v50 = vadd.f32 %v11655_v16, %v9277_v17  ;;  %v11666_v16 = vld [vmem:[%s15479_s17 + $0x6] ss:$0 sm:$0xff] }
0x24aa   :  { %v9287_v23 = vadd.f32 %v9283_v15, %v14938_v22 }
0x24ab   :  { %v9286_v24 = vadd.f32 %v9278_v50, %v14936_v19 }
0x24ac   :  { %v9291_v43 = vsel %vm128_vm0, %v9287_v23, 0.0 }
0x24ad   :  { %9292 = vadd.xlane.f32.xlu1 %v9291_v43  ;;  %v9288_v27 = vsel %vm128_vm0, %v9286_v24, 0.0 }
0x24ae   :  { %9289 = vadd.xlane.f32.xlu0 %v9288_v27 }
0x24af   :  { %v12860_v31 = vpop.f32.mrb[98].mxu0 }
0x24b0   :  { %v15145_v40 = vadd.f32 %v12860_v31, %v11663_v25  ;;  %v9491_v34 = vpop.f32.mrb[99].mxu0 }
0x24b1   :  { %v15147_v18 = vadd.f32 %v11663_v25, %v9491_v34 }
0x24b3   :  { %12873 = vmatpush3.xpose.msk.msra.mxu0 %vm128_vm0, %v15147_v18 }
0x24b4   :  { %12882 = vmatprep.subr.mxu0 %v13577_v20 }
0x253a   :  { %v9293_v19 = vpop.xlane.xlu1 %9292 }
0x253b   :  { %v9295_v22 = vmul.f32 0.03125, %v9293_v19  ;;  %v9290_v11 = vpop.xlane.xlu0 %9289 }
0x253c   :  { %v9294_v41 = vmul.f32 0.03125, %v9290_v11 }
0x253d   :  { %v9297_v30 = vsub.f32 %v9287_v23, %v9295_v22  ;;  %v13551_v22 = vld [vmem:[%s15530_s0] sm:$0xff] }
0x253e   :  { %v9296_v8 = vsub.f32 %v9286_v24, %v9294_v41 }
0x253f   :  { %v9299_v26 = vmul.f32 %v9297_v30, %v9297_v30 }
0x2540   :  { %v9298_v35 = vmul.f32 %v9296_v8, %v9296_v8 }
0x2541   :  { %v9303_v33 = vsel %vm128_vm0, %v9299_v26, 0.0 }
0x2542   :  { %9304 = vadd.xlane.f32.xlu1 %v9303_v33  ;;  %v9300_v56 = vsel %vm128_vm0, %v9298_v35, 0.0 }
0x2543   :  { %9301 = vadd.xlane.f32.xlu0 %v9300_v56 }
0x25cf   :  { %v9305_v42 = vpop.xlane.xlu1 %9304 }
0x25d0   :  { %v9307_v60 = vmul.f32 0.03125, %v9305_v42  ;;  %v9302_v63 = vpop.xlane.xlu0 %9301 }
0x25d1   :  { %v9306_v21 = vmul.f32 0.03125, %v9302_v63 }
0x25d2   :  { %v9309_v52 = vadd.f32 1e-05, %v9307_v60 }
0x25d3   :  { %v9308_v0 = vadd.f32 1e-05, %v9306_v21 }
0x25d4   :  { %13493 = vrsqrt.f32 %v9309_v52 }
0x25d5   :  { %13495 = vrsqrt.f32 %v9308_v0 }
0x25de   :  { %v13494_v61 = vpop.eup %13493 }
0x25df   :  { %v13496_v2 = vpop.eup %13495  ;;  %v9313_v58 = vmul.f32 %v13494_v61, %v9297_v30 }
0x25e0   :  { %v9312_v3 = vmul.f32 %v13496_v2, %v9296_v8 }
0x25e1   :  { %v9321_v4 = vmul.f32 %v11658_v1, %v9313_v58 }
0x25e2   :  { %v9320_v5 = vmul.f32 %v11658_v1, %v9312_v3 }
0x25e3   :  { %v15186_v6 = vadd.f32 %v11659_v32, %v9321_v4 }
0x25e4   :  { %v15184_v7 = vadd.f32 %v11659_v32, %v9320_v5 }
0x25e6   :  { %12847 = vmatprep.mubr.msk.f32.mxu1 %vm128_vm0, %v15184_v7 }
0x25e7   :  { %12848 = vmatmul.mubr.msk.f32.vlgmr.msra.gmra.mrb[114].mxu1 %vm128_vm0, %v15186_v6 }
0x25e8   :  { %13255 = vmatpush3.bf16.msra.mxu1 %v13252_v46  ;;  %12869 = vmatprep.mubr.msk.f32.mxu1 %vm128_vm0, %v14591_v48 }
0x25e9   :  { %13257 = vmatprep.subr.bf16.mxu1 %v13256_v10 }
0x25ec   :  { %13259 = vmatpush3.bf16.msra.mxu1 %v13256_v10 }
0x25ed   :  { %12877 = vmatprep.subr.mxu1 %v13577_v20 }
0x25ef   :  { %12870 = vmatmul.mubr.msk.f32.vlgmr.msra.gmra.mrb[116].mxu1 %vm128_vm0, %v14596_v37 }
0x25f0   :  { %12879 = vmatprep.mubr.msk.f32.mxu1 %vm13578_vm1, %v13577_v20 }
0x26ba   :  { %v12849_v12 = vpop.f32.mrb[114].mxu1 }
0x26bb   :  { %v9408_v13 = vpop.f32.mrb[115].mxu1  ;;  %v9414_v23 = vadd.f32 %v12849_v12, %v11660_v45 }
0x26bc   :  { %v9409_v28 = vadd.f32 %v11660_v45, %v9408_v13 }
0x26bd   :  { %v9418_v43 = vmul.f32 0.35355338, %v9414_v23 }
0x26be   :  { %v9417_v14 = vmul.f32 0.35355338, %v9409_v28 }
0x26bf   :  { %v10228_v27 = vmul.f32 %v15095_v39, %v9418_v43  ;;  %v10392_v31 = vmul.f32 %v15101_v53, %v9418_v43  ;;  %v10553_v34 = vmul.f32 %v15107_v59, %v9418_v43 }
0x26c0   :  { %v9581_v48 = vmul.f32 %v15095_v39, %v9417_v14  ;;  %v9745_v17 = vmul.f32 %v15101_v53, %v9417_v14  ;;  %v9906_v24 = vmul.f32 %v15107_v59, %v9417_v14  ;;  %v10067_v25 = vmul.f32 %v15113_v49, %v9417_v14 }
0x26c2   :  { %v12871_v36 = vpop.f32.mrb[116].mxu1  ;;  %12875 = vmatmul.mubr.msk.f32.vlgmr.msra.gmra.mrb[100].mxu0 %vm128_vm0, %v9581_v48 }
0x26c3   :  { %v15207_v37 = vadd.f32 %v12871_v36, %v11666_v16  ;;  %v9572_v15 = vpop.f32.mrb[117].mxu1  ;;  %12883 = vmatpush3.xpose.msk.msra.mxu0 %vm128_vm0, %v15147_v18  ;;  %12884 = vmatprep.mubr.msk.f32.mxu0 %vm13578_vm1, %v13577_v20 }
0x26c4   :  { %v15214_v50 = vadd.f32 %v11666_v16, %v9572_v15  ;;  %12892 = vmatprep.subr.mxu0 %v13577_v20 }
0x26c6   :  { %12878 = vmatpush3.msra.mxu1 %v15214_v50  ;;  %12885 = vmatmul.mubr.msk.f32.vlgmr.msra.gmra.mrb[102].mxu0 %vm128_vm0, %v9745_v17 }
0x26c7   :  { %12893 = vmatpush3.xpose.msk.msra.mxu0 %vm128_vm0, %v15147_v18  ;;  %12894 = vmatprep.mubr.msk.f32.mxu0 %vm13578_vm1, %v13577_v20 }
0x26c8   :  { %12902 = vmatprep.subr.mxu0 %v13577_v20  ;;  %12887 = vmatprep.subr.mxu1 %v13577_v20 }
0x26ca   :  { %12895 = vmatmul.mubr.msk.f32.vlgmr.msra.gmra.mrb[104].mxu0 %vm128_vm0, %v9906_v24 }
0x26cb   :  { %12903 = vmatpush3.xpose.msk.msra.mxu0 %vm128_vm0, %v15147_v18  ;;  %12904 = vmatprep.mubr.msk.f32.mxu0 %vm13578_vm1, %v13577_v20  ;;  %v10714_v18 = vmul.f32 %v15113_v49, %v9418_v43 }
0x26cc   :  { %12912 = vmatprep.subr.mxu0 %v13577_v20 }
0x26ce   :  { %12905 = vmatmul.mubr.msk.f32.vlgmr.msra.gmra.mrb[106].mxu0 %vm128_vm0, %v10067_v25 }
0x26cf   :  { %12913 = vmatpush3.xpose.msk.msra.mxu0 %vm128_vm0, %v15145_v40  ;;  %12914 = vmatprep.mubr.msk.f32.mxu0 %vm13578_vm1, %v13577_v20 }
0x26d0   :  { %12922 = vmatprep.subr.mxu0 %v13577_v20 }
0x26d2   :  { %12915 = vmatmul.mubr.msk.f32.vlgmr.msra.gmra.mrb[108].mxu0 %vm128_vm0, %v10228_v27 }
0x26d3   :  { %12923 = vmatpush3.xpose.msk.msra.mxu0 %vm128_vm0, %v15145_v40  ;;  %12924 = vmatprep.mubr.msk.f32.mxu0 %vm13578_vm1, %v13577_v20 }
0x26d4   :  { %12932 = vmatprep.subr.mxu0 %v13577_v20 }
0x26d6   :  { %12925 = vmatmul.mubr.msk.f32.vlgmr.msra.gmra.mrb[110].mxu0 %vm128_vm0, %v10392_v31 }
0x26d7   :  { %12933 = vmatpush3.xpose.msk.msra.mxu0 %vm128_vm0, %v15145_v40  ;;  %12934 = vmatprep.mubr.msk.f32.mxu0 %vm13578_vm1, %v13577_v20 }
0x26d8   :  { %12942 = vmatprep.subr.mxu0 %v13577_v20 }
0x26da   :  { %12935 = vmatmul.mubr.msk.f32.vlgmr.msra.gmra.mrb[112].mxu0 %vm128_vm0, %v10553_v34 }
0x26db   :  { %12943 = vmatpush3.xpose.msk.msra.mxu0 %vm128_vm0, %v15145_v40  ;;  %12944 = vmatprep.mubr.msk.f32.mxu0 %vm13578_vm1, %v13577_v20 }
0x26de   :  { %12945 = vmatmul.mubr.msk.f32.vlgmr.msra.gmra.mrb[114].mxu0 %vm128_vm0, %v10714_v18 }
0x2795   :  { %v9654_v19 = vpop.f32.mrb[100].mxu0 }
0x2796   :  { %v9655_v11 = vadd.f32 %v13551_v22, %v9654_v19  ;;  %v12876_v41 = vpop.f32.mrb[101].mxu0 }
0x2798   :  { %v9658_v30 = vsel %vm457_vm2, %v9655_v11, -inf }
0x2799   :  { %9659 = vmax.xlane.f32.xlu0 %v9658_v30  ;;  %v9815_v8 = vpop.f32.mrb[102].mxu0 }
0x279a   :  { %v9816_v26 = vadd.f32 %v13551_v22, %v9815_v8  ;;  %v12886_v40 = vpop.f32.mrb[103].mxu0 }
0x279c   :  { %v9819_v35 = vsel %vm457_vm2, %v9816_v26, -inf }
0x279d   :  { %9820 = vmax.xlane.f32.xlu1 %v9819_v35  ;;  %v9976_v33 = vpop.f32.mrb[104].mxu0 }
0x279e   :  { %v9977_v56 = vadd.f32 %v13551_v22, %v9976_v33  ;;  %v12896_v44 = vpop.f32.mrb[105].mxu0 }
0x27a0   :  { %v9980_v47 = vsel %vm457_vm2, %v9977_v56, -inf }
0x27a1   :  { %9981 = vmax.xlane.f32.xlu0 %v9980_v47  ;;  %v10137_v51 = vpop.f32.mrb[106].mxu0 }
0x27a2   :  { %v10138_v29 = vadd.f32 %v13551_v22, %v10137_v51  ;;  %v12906_v55 = vpop.f32.mrb[107].mxu0 }
0x27a4   :  { %v10141_v38 = vsel %vm457_vm2, %v10138_v29, -inf }
0x27a5   :  { %10142 = vmax.xlane.f32.xlu1 %v10141_v38  ;;  %v10301_v54 = vpop.f32.mrb[108].mxu0 }
0x27a6   :  { %v10302_v46 = vadd.f32 %v13552_v57, %v10301_v54  ;;  %v12916_v42 = vpop.f32.mrb[109].mxu0 }
0x27a8   :  { %v10305_v60 = vsel %vm457_vm2, %v10302_v46, -inf }
0x27a9   :  { %10306 = vmax.xlane.f32.xlu0 %v10305_v60  ;;  %v10462_v63 = vpop.f32.mrb[110].mxu0 }
0x27aa   :  { %v10463_v21 = vadd.f32 %v13552_v57, %v10462_v63  ;;  %v12926_v52 = vpop.f32.mrb[111].mxu0 }
0x27ac   :  { %v10466_v0 = vsel %vm457_vm2, %v10463_v21, -inf }
0x27ad   :  { %10467 = vmax.xlane.f32.xlu1 %v10466_v0  ;;  %v10623_v61 = vpop.f32.mrb[112].mxu0 }
0x27ae   :  { %v10624_v1 = vadd.f32 %v13552_v57, %v10623_v61  ;;  %v12936_v2 = vpop.f32.mrb[113].mxu0 }
0x27b0   :  { %v10627_v58 = vsel %vm457_vm2, %v10624_v1, -inf }
0x27b1   :  { %10628 = vmax.xlane.f32.xlu0 %v10627_v58  ;;  %v10784_v3 = vpop.f32.mrb[114].mxu0 }
0x27b2   :  { %v10785_v32 = vadd.f32 %v13552_v57, %v10784_v3  ;;  %v12946_v4 = vpop.f32.mrb[115].mxu0 }
0x27b4   :  { %v10788_v5 = vsel %vm457_vm2, %v10785_v32, -inf }
0x27b5   :  { %10789 = vmax.xlane.f32.xlu1 %v10788_v5 }
0x2826   :  { %v9660_v62 = vpop.xlane.xlu0 %9659 }
0x2827   :  { %v9661_v9 = vsub.f32 %v9655_v11, %v9660_v62 }
0x2829   :  { %v9662_v10 = vmul.f32 1.442695, %v9661_v9 }
0x282a   :  { %v9821_v45 = vpop.xlane.xlu1 %9820 }
0x282b   :  { %13497 = vpow2.f32 %v9662_v10  ;;  %v9822_v12 = vsub.f32 %v9816_v26, %v9821_v45 }
0x282d   :  { %v9823_v13 = vmul.f32 1.442695, %v9822_v12 }
0x282e   :  { %v9982_v28 = vpop.xlane.xlu0 %9981 }
0x282f   :  { %13499 = vpow2.f32 %v9823_v13  ;;  %v9983_v14 = vsub.f32 %v9977_v56, %v9982_v28 }
0x2831   :  { %v9984_v48 = vmul.f32 1.442695, %v9983_v14 }
0x2832   :  { %v10143_v16 = vpop.xlane.xlu1 %10142 }
0x2833   :  { %13501 = vpow2.f32 %v9984_v48  ;;  %v10144_v36 = vsub.f32 %v10138_v29, %v10143_v16  ;;  %v11608_v48 = vld [vmem:[%s15478_s16 + $0xe0] sm:$0xff]  ;;  %v11609_v16 = vld [vmem:[%s15478_s16 + $0xe8] sm:$0xff] }
0x2835   :  { %v13498_v15 = vpop.eup %13497  ;;  %v10145_v17 = vmul.f32 1.442695, %v10144_v36  ;;  %v13260_v36 = vpack.c.bf16 %v11609_v16, %v11608_v48  ;;  %v11709_v16 = vld [vmem:[%s15484_s22 + $0x58] sm:$0xff] }
0x2836   :  { %v10307_v23 = vpop.xlane.xlu0 %10306  ;;  %v9664_v24 = vsel %vm457_vm2, %v13498_v15, 0.0 }
0x2837   :  { %13503 = vpow2.f32 %v10145_v17  ;;  %v10308_v43 = vsub.f32 %v10302_v46, %v10307_v23  ;;  %9665 = vadd.xlane.f32.xlu0 %v9664_v24  ;;  %13261 = vmatprep.subr.bf16.mxu0 %v13260_v36 }
0x2838   :  { %13263 = vmatpush3.bf16.msra.mxu0 %v13260_v36 }
0x2839   :  { %v13500_v25 = vpop.eup %13499  ;;  %v10309_v27 = vmul.f32 1.442695, %v10308_v43 }
0x283a   :  { %v10468_v31 = vpop.xlane.xlu1 %10467  ;;  %v9825_v34 = vsel %vm457_vm2, %v13500_v25, 0.0 }
0x283b   :  { %13505 = vpow2.f32 %v10309_v27  ;;  %v10469_v18 = vsub.f32 %v10463_v21, %v10468_v31  ;;  %9826 = vadd.xlane.f32.xlu1 %v9825_v34 }
0x283d   :  { %v13502_v19 = vpop.eup %13501  ;;  %v10470_v22 = vmul.f32 1.442695, %v10469_v18 }
0x283e   :  { %v10629_v11 = vpop.xlane.xlu0 %10628  ;;  %v9986_v41 = vsel %vm457_vm2, %v13502_v19, 0.0 }
0x283f   :  { %13507 = vpow2.f32 %v10470_v22  ;;  %v10630_v30 = vsub.f32 %v10624_v1, %v10629_v11  ;;  %9987 = vadd.xlane.f32.xlu0 %v9986_v41 }
0x2841   :  { %v13504_v8 = vpop.eup %13503  ;;  %v10631_v26 = vmul.f32 1.442695, %v10630_v30 }
0x2842   :  { %v10790_v40 = vpop.xlane.xlu1 %10789  ;;  %v10147_v35 = vsel %vm457_vm2, %v13504_v8, 0.0 }
0x2843   :  { %13509 = vpow2.f32 %v10631_v26  ;;  %v10791_v33 = vsub.f32 %v10785_v32, %v10790_v40  ;;  %10148 = vadd.xlane.f32.xlu1 %v10147_v35 }
0x2845   :  { %v13506_v56 = vpop.eup %13505  ;;  %v10792_v44 = vmul.f32 1.442695, %v10791_v33 }
0x2846   :  { %v10311_v47 = vsel %vm457_vm2, %v13506_v56, 0.0 }
0x2847   :  { %13511 = vpow2.f32 %v10792_v44  ;;  %10312 = vadd.xlane.f32.xlu0 %v10311_v47 }
0x2849   :  { %v13508_v51 = vpop.eup %13507 }
0x284a   :  { %v10472_v29 = vsel %vm457_vm2, %v13508_v51, 0.0 }
0x284b   :  { %10473 = vadd.xlane.f32.xlu1 %v10472_v29 }
0x284d   :  { %v15281_v55 = vpop.eup %13509 }
0x284e   :  { %v10633_v38 = vsel %vm457_vm2, %v15281_v55, 0.0 }
0x284f   :  { %10634 = vadd.xlane.f32.xlu0 %v10633_v38 }
0x2851   :  { %v15285_v54 = vpop.eup %13511 }
0x2852   :  { %v10794_v57 = vsel %vm457_vm2, %v15285_v54, 0.0 }
0x2853   :  { %10795 = vadd.xlane.f32.xlu1 %v10794_v57 }
0x28c4   :  { %v9666_v46 = vpop.xlane.xlu0 %9665 }
0x28c5   :  { %13513 = vrcp.f32 %v9666_v46 }
0x28c8   :  { %v9827_v42 = vpop.xlane.xlu1 %9826 }
0x28c9   :  { %13515 = vrcp.f32 %v9827_v42 }
0x28cc   :  { %v9988_v60 = vpop.xlane.xlu0 %9987 }
0x28cd   :  { %13517 = vrcp.f32 %v9988_v60 }
0x28cf   :  { %v13514_v63 = vpop.eup %13513 }
0x28d0   :  { %v9668_v21 = vmul.f32 %v13514_v63, %v13498_v15  ;;  %v10149_v52 = vpop.xlane.xlu1 %10148 }
0x28d1   :  { %13519 = vrcp.f32 %v10149_v52 }
0x28d2   :  { %9669 = vst.msk [vmem:[#allocation2] sm:$0xff] %vm457_vm2, %v9668_v21  ;;  %12880 = vmatmul.mubr.msk.f32.vlgmr.msra.gmra.mrb[118].mxu1 %vm457_vm2, %v9668_v21 }
0x28d3   :  { %v13516_v0 = vpop.eup %13515  ;;  %12888 = vmatpush3.msra.mxu1 %v15214_v50  ;;  %12889 = vmatprep.mubr.msk.f32.mxu1 %vm13578_vm1, %v13577_v20 }
0x28d4   :  { %v9829_v61 = vmul.f32 %v13516_v0, %v13500_v25  ;;  %v10313_v1 = vpop.xlane.xlu0 %10312  ;;  %12897 = vmatprep.subr.mxu1 %v13577_v20 }
0x28d5   :  { %13521 = vrcp.f32 %v10313_v1 }
0x28d6   :  { %9830 = vst.msk [vmem:[#allocation2 + $0x8] sm:$0xff] %vm457_vm2, %v9829_v61  ;;  %12890 = vmatmul.mubr.msk.f32.vlgmr.msra.gmra.mrb[120].mxu1 %vm457_vm2, %v9829_v61 }
0x28d7   :  { %v13518_v2 = vpop.eup %13517  ;;  %12898 = vmatpush3.msra.mxu1 %v15214_v50  ;;  %12899 = vmatprep.mubr.msk.f32.mxu1 %vm13578_vm1, %v13577_v20 }
0x28d8   :  { %v9990_v58 = vmul.f32 %v13518_v2, %v13502_v19  ;;  %v10474_v3 = vpop.xlane.xlu1 %10473  ;;  %12907 = vmatprep.subr.mxu1 %v13577_v20 }
0x28d9   :  { %13523 = vrcp.f32 %v10474_v3 }
0x28da   :  { %9991 = vst.msk [vmem:[#allocation2 + $0x10] sm:$0xff] %vm457_vm2, %v9990_v58  ;;  %12900 = vmatmul.mubr.msk.f32.vlgmr.msra.gmra.mrb[122].mxu1 %vm457_vm2, %v9990_v58 }
0x28db   :  { %v13520_v32 = vpop.eup %13519  ;;  %12908 = vmatpush3.msra.mxu1 %v15214_v50  ;;  %12909 = vmatprep.mubr.msk.f32.mxu1 %vm13578_vm1, %v13577_v20 }
0x28dc   :  { %v10151_v4 = vmul.f32 %v13520_v32, %v13504_v8  ;;  %v10635_v5 = vpop.xlane.xlu0 %10634  ;;  %12917 = vmatprep.subr.mxu1 %v13577_v20 }
0x28dd   :  { %13525 = vrcp.f32 %v10635_v5 }
0x28de   :  { %10152 = vst.msk [vmem:[#allocation2 + $0x18] sm:$0xff] %vm457_vm2, %v10151_v4  ;;  %12910 = vmatmul.mubr.msk.f32.vlgmr.msra.gmra.mrb[124].mxu1 %vm457_vm2, %v10151_v4 }
0x28df   :  { %v13522_v62 = vpop.eup %13521  ;;  %12918 = vmatpush3.msra.mxu1 %v15207_v37  ;;  %12919 = vmatprep.mubr.msk.f32.mxu1 %vm13578_vm1, %v13577_v20 }
0x28e0   :  { %v10315_v9 = vmul.f32 %v13522_v62, %v13506_v56  ;;  %v10796_v50 = vpop.xlane.xlu1 %10795  ;;  %12927 = vmatprep.subr.mxu1 %v13577_v20 }
0x28e1   :  { %13527 = vrcp.f32 %v10796_v50 }
0x28e2   :  { %10316 = vst.msk [vmem:[#allocation2 + $0x20] sm:$0xff] %vm457_vm2, %v10315_v9  ;;  %12920 = vmatmul.mubr.msk.f32.vlgmr.msra.gmra.mrb[126].mxu1 %vm457_vm2, %v10315_v9  ;;  %v11699_v9 = vld [vmem:[%s15482_s20 + $0x28] sm:$0xff] }
0x28e3   :  { %v13524_v10 = vpop.eup %13523  ;;  %12928 = vmatpush3.msra.mxu1 %v15207_v37  ;;  %12929 = vmatprep.mubr.msk.f32.mxu1 %vm13578_vm1, %v13577_v20 }
0x28e4   :  { %v10476_v45 = vmul.f32 %v13524_v10, %v13508_v51  ;;  %12937 = vmatprep.subr.mxu1 %v13577_v20  ;;  %v11700_v10 = vld [vmem:[%s15482_s20 + $0x30] sm:$0xff] }
0x28e6   :  { %10477 = vst.msk [vmem:[#allocation2 + $0x28] sm:$0xff] %vm457_vm2, %v10476_v45  ;;  %12930 = vmatmul.mubr.msk.f32.vlgmr.msra.gmra.mrb[128].mxu1 %vm457_vm2, %v10476_v45  ;;  %v11701_v45 = vld [vmem:[%s15482_s20 + $0x38] sm:$0xff] }
0x28e7   :  { %v13526_v12 = vpop.eup %13525  ;;  %12938 = vmatpush3.msra.mxu1 %v15207_v37  ;;  %12939 = vmatprep.mubr.msk.f32.mxu1 %vm13578_vm1, %v13577_v20 }
0x28e8   :  { %v10637_v13 = vmul.f32 %v13526_v12, %v15281_v55  ;;  %12947 = vmatprep.subr.mxu1 %v13577_v20  ;;  %v13272_v12 = vpack.c.bf16 %v11701_v45, %v11700_v10 }
0x28ea   :  { %10638 = vst.msk [vmem:[#allocation2 + $0x30] sm:$0xff] %vm457_vm2, %v10637_v13  ;;  %12940 = vmatmul.mubr.msk.f32.vlgmr.msra.gmra.mrb[130].mxu1 %vm457_vm2, %v10637_v13  ;;  %v11706_v13 = vld [vmem:[%s15484_s22 + $0x40] sm:$0xff] }
0x28eb   :  { %v13528_v28 = vpop.eup %13527  ;;  %12948 = vmatpush3.msra.mxu1 %v15207_v37  ;;  %12949 = vmatprep.mubr.msk.f32.mxu1 %vm13578_vm1, %v13577_v20  ;;  %v11610_v20 = vld [vmem:[%s15478_s16 + $0xf0] sm:$0xff]  ;;  %v11611_v37 = vld [vmem:[%s15478_s16 + $0xf8] sm:$0xff] }
0x28ec   :  { %v10798_v14 = vmul.f32 %v13528_v28, %v15285_v54  ;;  %v13264_v15 = vpack.c.bf16 %v11611_v37, %v11610_v20  ;;  %v11707_v28 = vld [vmem:[%s15484_s22 + $0x48] sm:$0xff]  ;;  %v11710_v20 = vld [vmem:[%s15484_s22 + $0x60] sm:$0xff] }
0x28ed   :  { %v13276_v48 = vpack.c.bf16 %v11707_v28, %v11706_v13  ;;  %v11711_v37 = vld [vmem:[%s15484_s22 + $0x68] sm:$0xff] }
0x28ee   :  { %10799 = vst.msk [vmem:[#allocation2 + $0x38] sm:$0xff] %vm457_vm2, %v10798_v14  ;;  %12950 = vmatmul.mubr.msk.f32.vlgmr.msra.gmra.mrb[132].mxu1 %vm457_vm2, %v10798_v14  ;;  %13265 = vmatprep.subr.bf16.mxu0 %v13264_v15  ;;  %v11708_v14 = vld [vmem:[%s15484_s22 + $0x50] sm:$0xff] }
0x28ef   :  { %13267 = vmatpush3.bf16.msra.mxu0 %v13264_v15  ;;  %v13280_v36 = vpack.c.bf16 %v11709_v16, %v11708_v14  ;;  %v13284_v15 = vpack.c.bf16 %v11711_v37, %v11710_v20  ;;  %v11719_v37 = vld [vmem:[%s15481_s19 + $0x5] ss:$0 sm:$0xff] }
0x28f0   :  { %13277 = vmatprep.subr.bf16.mxu0 %v13276_v48 }
0x29a5   :  { %v9739_v17 = vpop.f32.mrb[118].mxu1 }
0x29a6   :  { %v12881_v23 = vpop.f32.mrb[119].mxu1  ;;  %v9743_v43 = vmul.f32 %v15095_v39, %v9739_v17 }
0x29a9   :  { %v9900_v24 = vpop.f32.mrb[120].mxu1 }
0x29aa   :  { %v9904_v25 = vmul.f32 %v15101_v53, %v9900_v24  ;;  %v12891_v27 = vpop.f32.mrb[121].mxu1 }
0x29ac   :  { %v9905_v31 = vadd.f32 %v9904_v25, %v9743_v43 }
0x29ad   :  { %v10061_v34 = vpop.f32.mrb[122].mxu1 }
0x29ae   :  { %v10065_v18 = vmul.f32 %v15107_v59, %v10061_v34  ;;  %v12901_v19 = vpop.f32.mrb[123].mxu1  ;;  %v11696_v34 = vld [vmem:[%s15480_s18 + $0x4] ss:$0 sm:$0xff] }
0x29b0   :  { %v10066_v22 = vadd.f32 %v10065_v18, %v9905_v31 }
0x29b1   :  { %v10222_v11 = vpop.f32.mrb[124].mxu1 }
0x29b2   :  { %v10226_v41 = vmul.f32 %v15113_v49, %v10222_v11  ;;  %v12911_v30 = vpop.f32.mrb[125].mxu1  ;;  %v11697_v11 = vld [vmem:[%s15481_s19 + $0x4] ss:$0 sm:$0xff] }
0x29b4   :  { %v10227_v8 = vadd.f32 %v10226_v41, %v10066_v22 }
0x29b5   :  { %v10386_v26 = vpop.f32.mrb[126].mxu1 }
0x29b6   :  { %v12921_v40 = vpop.f32.mrb[127].mxu1  ;;  %12960 = vmatprep.mubr.msk.f32.mxu0 %vm128_vm0, %v10227_v8  ;;  %v10390_v33 = vmul.f32 %v15095_v39, %v10386_v26  ;;  %v11693_v39 = vld [vmem:[%s15479_s17 + $0x7] ss:$0 sm:$0xff] }
0x29b7   :  { %v11712_v40 = vld [vmem:[%s15484_s22 + $0x70] sm:$0xff] }
0x29b9   :  { %v10547_v35 = vpop.f32.mrb[128].mxu1 }
0x29ba   :  { %v10551_v56 = vmul.f32 %v15101_v53, %v10547_v35  ;;  %v12931_v44 = vpop.f32.mrb[129].mxu1  ;;  %v11713_v35 = vld [vmem:[%s15484_s22 + $0x78] sm:$0xff] }
0x29bc   :  { %v10552_v47 = vadd.f32 %v10551_v56, %v10390_v33  ;;  %v13288_v33 = vpack.c.bf16 %v11713_v35, %v11712_v40  ;;  %v11703_v56 = vld [vmem:[%s15483_s21 + $0x1] ss:$0 sm:$0xff] }
0x29bd   :  { %v10708_v51 = vpop.f32.mrb[130].mxu1 }
0x29be   :  { %v10712_v29 = vmul.f32 %v15107_v59, %v10708_v51  ;;  %v12941_v55 = vpop.f32.mrb[131].mxu1 }
0x29c0   :  { %v10713_v38 = vadd.f32 %v10712_v29, %v10552_v47 }
0x29c1   :  { %v10869_v54 = vpop.f32.mrb[132].mxu1 }
0x29c2   :  { %v10873_v57 = vmul.f32 %v15113_v49, %v10869_v54  ;;  %v12951_v46 = vpop.f32.mrb[133].mxu1  ;;  %v11715_v54 = vld [vmem:[%s15485_s23 + $0x1] ss:$0 sm:$0xff] }
0x29c4   :  { %v10874_v42 = vadd.f32 %v10873_v57, %v10713_v38 }
0x29c6   :  { %12961 = vmatmul.mubr.msk.f32.vlgmr.msra.gmra.mrb[116].mxu0 %vm128_vm0, %v10874_v42 }
0x29c7   :  { %13279 = vmatpush3.bf16.msra.mxu0 %v13276_v48  ;;  %v11718_v48 = vld [vmem:[%s15480_s18 + $0x5] ss:$0 sm:$0xff] }
0x29c8   :  { %13281 = vmatprep.subr.bf16.mxu0 %v13280_v36 }
0x29cb   :  { %13283 = vmatpush3.bf16.msra.mxu0 %v13280_v36 }
0x29cc   :  { %13285 = vmatprep.subr.bf16.mxu0 %v13284_v15 }
0x29cf   :  { %13287 = vmatpush3.bf16.msra.mxu0 %v13284_v15 }
0x29d0   :  { %13289 = vmatprep.subr.bf16.mxu0 %v13288_v33 }
0x29d3   :  { %13291 = vmatpush3.bf16.msra.mxu0 %v13288_v33 }
0x2a99   :  { %v12962_v60 = vpop.f32.mrb[116].mxu0 }
0x2a9a   :  { %v10959_v53 = vadd.f32 %v12962_v60, %v11693_v39  ;;  %v10953_v63 = vpop.f32.mrb[117].mxu0 }
0x2a9b   :  { %v10954_v21 = vadd.f32 %v11693_v39, %v10953_v63 }
0x2a9c   :  { %v10963_v52 = vadd.f32 %v10959_v53, %v15186_v6 }
0x2a9d   :  { %v10962_v59 = vadd.f32 %v10954_v21, %v15184_v7  ;;  %v11698_v7 = vld [vmem:[%s15482_s20 + $0x20] sm:$0xff]  ;;  %s13579_s20 = smov [#allocation2]  }
0x2a9e   :  { %v10967_v0 = vsel %vm128_vm0, %v10963_v52, 0.0  ;;  %v13268_v50 = vpack.c.bf16 %v11699_v9, %v11698_v7  ;;  %v11247_v7 = vld [vmem:[%s15486_s24 + $0x18] sm:$0xff]  ;;  %s11345_s14 = sshll.u32 %s13579_s20, 4  ;;  %s11346_s14 = int_to_ptr.vmem [resolvable:$true] %s11345_s14 }
0x2a9f   :  { %10968 = vadd.xlane.f32.xlu1 %v10967_v0  ;;  %v10964_v49 = vsel %vm128_vm0, %v10962_v59, 0.0  ;;  %s13553_s12 = scalar_lea.vmem %s11346_s14, 1024  ;;  %p13558_p1 = scmp.lt.s32.totalorder %s11346_s14, %s11346_s14 }
0x2aa0   :  { %10965 = vadd.xlane.f32.xlu0 %v10964_v49  ;;  %13269 = vmatprep.subr.bf16.mxu1 %v13268_v50  ;;  %p13554_p0 = scmp.ne.s32.totalorder %s11346_s14, %s13553_s12  ;;  %p13559_p2 = scmp.lt.s32.totalorder %s13553_s12, %s13553_s12 }
0x2aa1   :  { %13271 = vmatpush3.bf16.msra.mxu1 %v13268_v50 }
0x2aa2   :  { %13273 = vmatprep.subr.bf16.mxu1 %v13272_v12  ;;  %p13560_p3 = por %p13559_p2, %p13558_p1 }
0x2aa4   :  { %p13561_p4 = pnand %p13560_p3, %p13554_p0 }
0x2aa5   :  { %13275 = vmatpush3.bf16.msra.mxu1 %v13272_v12 }
0x2b2c   :  { %v10969_v61 = vpop.xlane.xlu1 %10968 }
0x2b2d   :  { %v10971_v1 = vmul.f32 0.03125, %v10969_v61  ;;  %v10966_v2 = vpop.xlane.xlu0 %10965 }
0x2b2e   :  { %v10970_v58 = vmul.f32 0.03125, %v10966_v2 }
0x2b2f   :  { %v10973_v3 = vsub.f32 %v10963_v52, %v10971_v1 }
0x2b30   :  { %v10972_v32 = vsub.f32 %v10962_v59, %v10970_v58 }
0x2b31   :  { %v10975_v4 = vmul.f32 %v10973_v3, %v10973_v3 }
0x2b32   :  { %v10974_v5 = vmul.f32 %v10972_v32, %v10972_v32 }
0x2b33   :  { %v10979_v62 = vsel %vm128_vm0, %v10975_v4, 0.0  ;;  %v11244_v4 = vld [vmem:[%s15486_s24] sm:$0xff] }
0x2b34   :  { %10980 = vadd.xlane.f32.xlu1 %v10979_v62  ;;  %v10976_v6 = vsel %vm128_vm0, %v10974_v5, 0.0  ;;  %v11245_v5 = vld [vmem:[%s15486_s24 + $0x8] sm:$0xff] }
0x2b35   :  { %10977 = vadd.xlane.f32.xlu0 %v10976_v6  ;;  %v13292_v62 = vpack.c.bf16 %v11245_v5, %v11244_v4  ;;  %v11246_v6 = vld [vmem:[%s15486_s24 + $0x10] sm:$0xff] }
0x2b36   :  { %v13296_v9 = vpack.c.bf16 %v11247_v7, %v11246_v6 }
0x2b37   :  { %13293 = vmatprep.subr.bf16.mxu1 %v13292_v62 }
0x2bc1   :  { %v10981_v17 = vpop.xlane.xlu1 %10980 }
0x2bc2   :  { %v10983_v23 = vmul.f32 0.03125, %v10981_v17  ;;  %v10978_v24 = vpop.xlane.xlu0 %10977 }
0x2bc3   :  { %v10982_v43 = vmul.f32 0.03125, %v10978_v24 }
0x2bc4   :  { %v10985_v25 = vadd.f32 1e-05, %v10983_v23 }
0x2bc5   :  { %v10984_v27 = vadd.f32 1e-05, %v10982_v43 }
0x2bc6   :  { %13529 = vrsqrt.f32 %v10985_v25 }
0x2bc7   :  { %13531 = vrsqrt.f32 %v10984_v27 }
0x2bd0   :  { %v13530_v31 = vpop.eup %13529 }
0x2bd1   :  { %v13532_v18 = vpop.eup %13531  ;;  %v10989_v19 = vmul.f32 %v13530_v31, %v10973_v3 }
0x2bd2   :  { %v10988_v22 = vmul.f32 %v13532_v18, %v10972_v32 }
0x2bd3   :  { %v10997_v41 = vmul.f32 %v11696_v34, %v10989_v19 }
0x2bd4   :  { %v10996_v30 = vmul.f32 %v11696_v34, %v10988_v22 }
0x2bd5   :  { %v11005_v26 = vadd.f32 %v11697_v11, %v10997_v41 }
0x2bd6   :  { %v11004_v8 = vadd.f32 %v11697_v11, %v10996_v30 }
0x2bd8   :  { %12971 = vmatprep.mubr.msk.f32.mxu1 %vm128_vm0, %v11004_v8 }
0x2bd9   :  { %12972 = vmatmul.mubr.msk.f32.vlgmr.msra.gmra.mrb[134].mxu1 %vm128_vm0, %v11005_v26 }
0x2bda   :  { %13295 = vmatpush3.bf16.msra.mxu1 %v13292_v62 }
0x2bdb   :  { %13297 = vmatprep.subr.bf16.mxu1 %v13296_v9 }
0x2bde   :  { %13299 = vmatpush3.bf16.msra.mxu1 %v13296_v9 }
0x2cac   :  { %v12973_v44 = vpop.f32.mrb[134].mxu1 }
0x2cad   :  { %v11097_v47 = vadd.f32 %v12973_v44, %v11703_v56  ;;  %v11091_v51 = vpop.f32.mrb[135].mxu1 }
0x2cae   :  { %v11092_v29 = vadd.f32 %v11703_v56, %v11091_v51 }
0x2caf   :  { %v11101_v38 = vmax.f32 %v11097_v47, 0.0 }
0x2cb0   :  { %v11100_v55 = vmax.f32 %v11092_v29, 0.0 }
0x2cb2   :  { %12990 = vmatprep.mubr.msk.f32.mxu0 %vm1926_vm3, %v11100_v55 }
0x2cb3   :  { %12991 = vmatmul.mubr.msk.f32.vlgmr.msra.gmra.mrb[118].mxu0 %vm1926_vm3, %v11101_v38 }
0x2d86   :  { %v12992_v57 = vpop.f32.mrb[118].mxu0 }
0x2d87   :  { %v11197_v46 = vadd.f32 %v12992_v57, %v11715_v54  ;;  %v11191_v42 = vpop.f32.mrb[119].mxu0 }
0x2d88   :  { %v11192_v39 = vadd.f32 %v11715_v54, %v11191_v42 }
0x2d89   :  { %v11201_v60 = vadd.f32 %v11197_v46, %v11005_v26 }
0x2d8a   :  { %v11200_v53 = vadd.f32 %v11192_v39, %v11004_v8 }
0x2d8b   :  { %v11205_v63 = vsel %vm128_vm0, %v11201_v60, 0.0 }
0x2d8c   :  { %11206 = vadd.xlane.f32.xlu1 %v11205_v63  ;;  %v11202_v21 = vsel %vm128_vm0, %v11200_v53, 0.0 }
0x2d8d   :  { %11203 = vadd.xlane.f32.xlu0 %v11202_v21 }
0x2e19   :  { %v11207_v52 = vpop.xlane.xlu1 %11206 }
0x2e1a   :  { %v11209_v59 = vmul.f32 0.03125, %v11207_v52  ;;  %v11204_v0 = vpop.xlane.xlu0 %11203 }
0x2e1b   :  { %v11208_v49 = vmul.f32 0.03125, %v11204_v0 }
0x2e1c   :  { %v11211_v61 = vsub.f32 %v11201_v60, %v11209_v59 }
0x2e1d   :  { %v11210_v1 = vsub.f32 %v11200_v53, %v11208_v49 }
0x2e1e   :  { %v11213_v2 = vmul.f32 %v11211_v61, %v11211_v61 }
0x2e1f   :  { %v11212_v58 = vmul.f32 %v11210_v1, %v11210_v1 }
0x2e20   :  { %v11217_v3 = vsel %vm128_vm0, %v11213_v2, 0.0 }
0x2e21   :  { %11218 = vadd.xlane.f32.xlu1 %v11217_v3  ;;  %v11214_v32 = vsel %vm128_vm0, %v11212_v58, 0.0 }
0x2e22   :  { %11215 = vadd.xlane.f32.xlu0 %v11214_v32 }
0x2eae   :  { %v11219_v50 = vpop.xlane.xlu1 %11218 }
0x2eaf   :  { %v11221_v10 = vmul.f32 0.03125, %v11219_v50  ;;  %v11216_v45 = vpop.xlane.xlu0 %11215 }
0x2eb0   :  { %v11220_v12 = vmul.f32 0.03125, %v11216_v45 }
0x2eb1   :  { %v11223_v13 = vadd.f32 1e-05, %v11221_v10 }
0x2eb2   :  { %v11222_v28 = vadd.f32 1e-05, %v11220_v12 }
0x2eb3   :  { %13533 = vrsqrt.f32 %v11223_v13 }
0x2eb4   :  { %13535 = vrsqrt.f32 %v11222_v28 }
0x2ebd   :  { %v13534_v14 = vpop.eup %13533 }
0x2ebe   :  { %v13536_v16 = vpop.eup %13535  ;;  %v11227_v36 = vmul.f32 %v13534_v14, %v11211_v61 }
0x2ebf   :  { %v11226_v20 = vmul.f32 %v13536_v16, %v11210_v1 }
0x2ec0   :  { %v11235_v15 = vmul.f32 %v11718_v48, %v11227_v36 }
0x2ec1   :  { %v11234_v17 = vmul.f32 %v11718_v48, %v11226_v20 }
0x2ec2   :  { %v11243_v24 = vadd.f32 %v11719_v37, %v11235_v15 }
0x2ec3   :  { %v11242_v23 = vadd.f32 %v11719_v37, %v11234_v17 }
0x2ec5   :  { %13001 = vmatprep.mubr.msk.f32.mxu1 %vm128_vm0, %v11242_v23 }
0x2ec6   :  { %13002 = vmatmul.mubr.msk.f32.vlgmr.msra.gmra.mrb[136].mxu1 %vm128_vm0, %v11243_v24 }
0x2ec7   :  { %13564 = shalt.err (!%p13561_p4)
}
0x2ec8   :  { %s15531_s13 = sld [smem:[#allocation19_spill]] }
0x2ece   :  { %s13565_s9 = scalar_lea.hbm %s15531_s13, 1024 }
0x2ecf   :  { %p13566_p5 = scmp.ne.s32.totalorder %s15531_s13, %s13565_s9  ;;  %p13569_p6 = scmp.lt.u32.totalorder %s13565_s9, %s15531_s13 }
0x2ed1   :  { %p13571_p7 = pnand %p13569_p6, %p13566_p5 }
0x2ed3   :  { %13574 = shalt.err (!%p13571_p7)
}
0x2ed4   :  { %s13580_s6 = smov 128   ;;  %s13581_s17 = smov 8  }
0x2ed5   :  { %11351 = dma.vmem_to_hbm [thread:$0]  %s11346_s14, 1024, %s15531_s13, [#allocation3], %s13580_s6, %s13580_s6, %s13581_s17  }
0x2ed6   :  { %s15532_s11 = sld [smem:[#allocation17_spill]]  ;;  %s15533_s22 = sld [smem:[#allocation18_spill]] }
0x2edc   :  { %v11720_v43 = vld [vmem:[%s15532_s11] ss:$0 sm:$0xff] }
0x2f99   :  { %v13003_v25 = vpop.f32.mrb[136].mxu1 }
0x2f9a   :  { %v11333_v27 = vadd.f32 %v13003_v25, %v11720_v43  ;;  %v11327_v31 = vpop.f32.mrb[137].mxu1 }
0x2f9b   :  { %v11328_v34 = vadd.f32 %v11720_v43, %v11327_v31 }
0x2f9c   :  { %11337 = vst [vmem:[%s15533_s22 + $0x8] sm:$0xff] %v11333_v27 }
0x2f9d   :  { %11336 = vst [vmem:[%s15533_s22] sm:$0xff] %v11328_v34 }
0x2f9e   :  { %13575 = dma.done.wait [#allocation3], 1024  }
0x2f9f   :  { %13576 = vsyncadd [#allocation3], 4294966272 }
0x2fa0   :  { %11357 = vsyncpa [#allocation3], 1 }

</bundles_post_ra>
